<compile_context>
chip_gen: v7x
topology: tpu7x:2x2x1
jax: 0.10.0
libtpu: 0.0.40
codegen_flags: <defaults>
</compile_context>

<pallas_src>
import functools

import jax
import jax.numpy as jnp
from jax.experimental import pallas as pl
from jax.experimental.pallas import tpu as pltpu


# ----------------------------------------------------------------------------
# Pallas GEMM kernels: out = act(x @ w + b) [+ residual]
# ----------------------------------------------------------------------------
def _apply_act(acc, act):
    if act == "relu":
        return jnp.maximum(acc, 0.0)
    if act == "tanh":
        return jnp.tanh(acc)
    return acc


def _gemm_kernel(x_ref, w_ref, b_ref, o_ref, *, act):
    acc = jnp.dot(x_ref[...], w_ref[...], preferred_element_type=jnp.float32)
    acc = acc + b_ref[...]
    acc = _apply_act(acc, act)
    o_ref[...] = acc.astype(o_ref.dtype)


def _gemm_res_kernel(x_ref, w_ref, b_ref, r_ref, o_ref, *, act):
    acc = jnp.dot(x_ref[...], w_ref[...], preferred_element_type=jnp.float32)
    acc = acc + b_ref[...]
    acc = _apply_act(acc, act)
    acc = acc + r_ref[...].astype(jnp.float32)        # fused residual add
    o_ref[...] = acc.astype(o_ref.dtype)


def gemm_bias_act(x, w, b, *, act="none", residual=None, tm=256,
                  out_dtype=jnp.bfloat16):
    """x:(M,K) @ w:(K,N) + b:(N,) -> (M,N) with fused activation / residual."""
    M, K = x.shape
    N = w.shape[1]

    # Lane-dense output for tiny Cout (final conv, Cout=3): pad N -> 128.
    Np = N
    if N < 64:
        Np = 128
        w = jnp.pad(w, ((0, 0), (0, Np - N)))
        b = jnp.pad(b, (0, Np - N))
    assert residual is None or Np == N

    # Pick an M tile that divides M (avoids pad + slice HBM round trips).
    tm_eff = min(tm, M)
    Mp = M
    if M % tm_eff != 0:  # ragged fallback (not hit for the shapes in this net)
        Mp = ((M + tm_eff - 1) // tm_eff) * tm_eff
        x = jnp.pad(x, ((0, Mp - M), (0, 0)))
        if residual is not None:
            residual = jnp.pad(residual, ((0, Mp - M), (0, 0)))

    x = x.astype(jnp.bfloat16)
    w = w.astype(jnp.bfloat16)
    b2 = b.astype(jnp.float32).reshape(1, Np)

    in_specs = [
        pl.BlockSpec((tm_eff, K), lambda i: (i, 0)),
        pl.BlockSpec((K, Np), lambda i: (0, 0)),      # weight stays VMEM-resident
        pl.BlockSpec((1, Np), lambda i: (0, 0)),
    ]
    args = [x, w, b2]
    if residual is not None:
        in_specs.append(pl.BlockSpec((tm_eff, Np), lambda i: (i, 0)))
        args.append(residual.astype(jnp.bfloat16))
        kern = functools.partial(_gemm_res_kernel, act=act)
    else:
        kern = functools.partial(_gemm_kernel, act=act)

    out = pl.pallas_call(
        kern,
        out_shape=jax.ShapeDtypeStruct((Mp, Np), out_dtype),
        grid=(Mp // tm_eff,),
        in_specs=in_specs,
        out_specs=pl.BlockSpec((tm_eff, Np), lambda i: (i, 0)),
        compiler_params=pltpu.CompilerParams(dimension_semantics=("parallel",)),
    )(*args)

    if Mp != M:
        out = out[:M]
    if Np != N:
        out = out[:, :N]
    return out


# ----------------------------------------------------------------------------
# Plain-JAX glue: patch extraction (im2col) feeding the Pallas GEMM.
# ----------------------------------------------------------------------------
def _im2col(x, k, stride, pad, pad_mode):
    B, H, W, C = x.shape
    if pad > 0:
        mode = "reflect" if pad_mode == "reflect" else "constant"
        xp = jnp.pad(x, ((0, 0), (pad, pad), (pad, pad), (0, 0)), mode=mode)
    else:
        xp = x
    Ho = (H + 2 * pad - k) // stride + 1
    Wo = (W + 2 * pad - k) // stride + 1
    taps = [xp[:, dy:dy + stride * (Ho - 1) + 1:stride,
                dx:dx + stride * (Wo - 1) + 1:stride, :]
            for dy in range(k) for dx in range(k)]
    patches = jnp.concatenate(taps, axis=-1)          # (B, Ho, Wo, k*k*C)
    return patches.reshape(B * Ho * Wo, k * k * C), Ho, Wo


def conv_layer(x, w2, b2, *, k, stride, pad, pad_mode, act,
               out_dtype=jnp.bfloat16):
    """Conv2d (+folded BN) + activation.  x: NHWC, w2: packed (k*k*Cin, Cout)."""
    B = x.shape[0]
    patches, Ho, Wo = _im2col(x, k, stride, pad, pad_mode)
    y = gemm_bias_act(patches, w2, b2, act=act, out_dtype=out_dtype)
    return y.reshape(B, Ho, Wo, y.shape[-1])


def resnet_block(x, w2, b2):
    """out = x + BN(Conv3x3(ReflectionPad1(x)))  (no ReLU, use_dropout=False)."""
    B, H, W, C = x.shape
    patches, _, _ = _im2col(x, 3, 1, 1, "reflect")
    res = x.reshape(B * H * W, C)
    y = gemm_bias_act(patches, w2, b2, act="none", residual=res)
    return y.reshape(B, H, W, C)


def deconv_layer(x, wc, bc):
    """ConvTranspose2d(k=3,s=2,p=1,output_padding=1) + BN + ReLU via sub-pixel
    (phase) decomposition: one GEMM at the input resolution + pixel shuffle."""
    B, H, W, Cin = x.shape
    cout = wc.shape[1] // 4
    xp = jnp.pad(x, ((0, 0), (0, 1), (0, 1), (0, 0)))   # zero pad bottom/right
    taps = [xp[:, dy:dy + H, dx:dx + W, :] for dy in (0, 1) for dx in (0, 1)]
    patches = jnp.concatenate(taps, axis=-1).reshape(B * H * W, 4 * Cin)
    y = gemm_bias_act(patches, wc, bc, act="relu")       # (M, 4*Cout)
    y = y.reshape(B, H, W, 2, 2, cout)
    y = jnp.transpose(y, (0, 1, 3, 2, 4, 5)).reshape(B, 2 * H, 2 * W, cout)
    return y


# ----------------------------------------------------------------------------
# Parameters: synthetic init (PyTorch layouts) + one-time packing / BN folding.
# ----------------------------------------------------------------------------
_BN_EPS = 1e-5


def _conv_init(k_, cout, cin, ksz):
    kw, kb = jax.random.split(k_)
    s = (cin * ksz * ksz) ** -0.5
    w = jax.random.normal(kw, (cout, cin, ksz, ksz), jnp.float32) * s
    b = jax.random.normal(kb, (cout,), jnp.float32) * 0.01
    return w, b


def _deconv_init(k_, cin, cout, ksz):
    kw, kb = jax.random.split(k_)
    s = (cin * ksz * ksz) ** -0.5
    w = jax.random.normal(kw, (cin, cout, ksz, ksz), jnp.float32) * s
    b = jax.random.normal(kb, (cout,), jnp.float32) * 0.01
    return w, b


def _bn_init(k_, c):
    k1, k2, k3, k4 = jax.random.split(k_, 4)
    gamma = 1.0 + 0.1 * jax.random.normal(k1, (c,), jnp.float32)
    beta = 0.05 * jax.random.normal(k2, (c,), jnp.float32)
    mean = 0.05 * jax.random.normal(k3, (c,), jnp.float32)
    var = 1.0 + 0.1 * jax.random.uniform(k4, (c,), jnp.float32)
    return gamma, beta, mean, var


def init_params(key, input_nc, output_nc, ngf=64, n_blocks=9):
    keys = iter(jax.random.split(key, 11 + 2 * n_blocks))
    p = {}
    p["stem_conv"] = _conv_init(next(keys), ngf, input_nc, 7)
    p["stem_bn"] = _bn_init(next(keys), ngf)
    p["down1_conv"] = _conv_init(next(keys), 2 * ngf, ngf, 3)
    p["down1_bn"] = _bn_init(next(keys), 2 * ngf)
    p["down2_conv"] = _conv_init(next(keys), 4 * ngf, 2 * ngf, 3)
    p["down2_bn"] = _bn_init(next(keys), 4 * ngf)
    p["blocks"] = [( _conv_init(next(keys), 4 * ngf, 4 * ngf, 3),
                     _bn_init(next(keys), 4 * ngf)) for _ in range(n_blocks)]
    p["up1_deconv"] = _deconv_init(next(keys), 4 * ngf, 2 * ngf, 3)
    p["up1_bn"] = _bn_init(next(keys), 2 * ngf)
    p["up2_deconv"] = _deconv_init(next(keys), 2 * ngf, ngf, 3)
    p["up2_bn"] = _bn_init(next(keys), ngf)
    p["out_conv"] = _conv_init(next(keys), output_nc, ngf, 7)
    return p


def _pack_conv(w_oihw, b, bn=None):
    """PyTorch (Cout,Cin,kh,kw) -> GEMM (k*k*Cin, Cout) bf16 with BN folded."""
    cout, cin, k, _ = w_oihw.shape
    w2 = jnp.transpose(w_oihw, (2, 3, 1, 0)).reshape(k * k * cin, cout)
    b2 = b
    if bn is not None:
        gamma, beta, mean, var = bn
        s = gamma * jax.lax.rsqrt(var + _BN_EPS)
        w2 = w2 * s[None, :]
        b2 = b * s + (beta - mean * s)
    return w2.astype(jnp.bfloat16), b2.astype(jnp.float32)


def _pack_deconv(w_iohw, b, bn=None):
    """ConvTranspose2d(k=3,s=2,p=1,op=1) weight (Cin,Cout,3,3) -> combined
    sub-pixel GEMM weight (4*Cin, 4*Cout) bf16 with BN folded."""
    cin, cout = w_iohw.shape[0], w_iohw.shape[1]
    wc = jnp.zeros((4, cin, 4, cout), jnp.float32)
    # (tap, phase) -> (ky, kx) of the transposed-conv kernel that contributes.
    # taps: 0=(m,n) 1=(m,n+1) 2=(m+1,n) 3=(m+1,n+1); phases: p=a*2+b of o[2m+a,2n+b]
    contrib = {
        (0, 0): (1, 1),
        (0, 1): (1, 2), (1, 1): (1, 0),
        (0, 2): (2, 1), (2, 2): (0, 1),
        (0, 3): (2, 2), (1, 3): (2, 0), (2, 3): (0, 2), (3, 3): (0, 0),
    }
    for (tap, phase), (ky, kx) in contrib.items():
        wc = wc.at[tap, :, phase, :].set(w_iohw[:, :, ky, kx])
    wc = wc.reshape(4 * cin, 4 * cout)
    bc = jnp.tile(b, 4)
    if bn is not None:
        gamma, beta, mean, var = bn
        s = gamma * jax.lax.rsqrt(var + _BN_EPS)
        t = beta - mean * s
        wc = wc * jnp.tile(s, 4)[None, :]
        bc = bc * jnp.tile(s, 4) + jnp.tile(t, 4)
    return wc.astype(jnp.bfloat16), bc.astype(jnp.float32)


def pack_params(p):
    """One-time weight packing / BN folding (kept out of the per-call hot path)."""
    return {
        "stem": _pack_conv(*p["stem_conv"], bn=p["stem_bn"]),
        "down1": _pack_conv(*p["down1_conv"], bn=p["down1_bn"]),
        "down2": _pack_conv(*p["down2_conv"], bn=p["down2_bn"]),
        "blocks": [_pack_conv(*cw, bn=cb) for cw, cb in p["blocks"]],
        "up1": _pack_deconv(*p["up1_deconv"], bn=p["up1_bn"]),
        "up2": _pack_deconv(*p["up2_deconv"], bn=p["up2_bn"]),
        "out": _pack_conv(*p["out_conv"], bn=None),
    }


# ----------------------------------------------------------------------------
# ResnetGenerator.forward  (learn_residual defaults to False, as in the module)
# BatchNorm is implemented in inference mode (running statistics).
# ----------------------------------------------------------------------------
def resnet_generator_forward(packed, x_nchw, learn_residual=False):
    x = jnp.transpose(x_nchw, (0, 2, 3, 1)).astype(jnp.bfloat16)   # NCHW -> NHWC

    # ReflectionPad(3) + Conv7x7 + BN + ReLU
    h = conv_layer(x, *packed["stem"], k=7, stride=1, pad=3,
                   pad_mode="reflect", act="relu")
    # two stride-2 downsampling convs + BN + ReLU
    h = conv_layer(h, *packed["down1"], k=3, stride=2, pad=1,
                   pad_mode="zero", act="relu")
    h = conv_layer(h, *packed["down2"], k=3, stride=2, pad=1,
                   pad_mode="zero", act="relu")
    # 9 ResnetBlocks: x + BN(Conv3x3(ReflectPad1(x)))  (residual fused in-kernel)
    for w2, b2 in packed["blocks"]:
        h = resnet_block(h, w2, b2)
    # two ConvTranspose2d(k=3,s=2,p=1,op=1) + BN + ReLU (sub-pixel GEMMs)
    h = deconv_layer(h, *packed["up1"])
    h = deconv_layer(h, *packed["up2"])
    # ReflectionPad(3) + Conv7x7 + Tanh  (f32, lane-dense padded output)
    out = conv_layer(h, *packed["out"], k=7, stride=1, pad=3,
                     pad_mode="reflect", act="tanh", out_dtype=jnp.float32)

    out = jnp.transpose(out, (0, 3, 1, 2))                          # NHWC -> NCHW
    if learn_residual:
        out = jnp.clip(x_nchw.astype(out.dtype) + out, -1.0, 1.0)
    return out


if __name__ == "__main__":
    key = jax.random.PRNGKey(0)
    kp, kx = jax.random.split(key)

    B, input_nc, output_nc, H, W = 2, 4, 3, 16, 16
    params = init_params(kp, input_nc, output_nc, ngf=64, n_blocks=9)
    packed = pack_params(params)            # one-time BN fold / weight pack

    x = jax.random.normal(kx, (B, input_nc, H, W), jnp.float32)

    fwd = jax.jit(resnet_generator_forward)
    out = fwd(packed, x)
    jax.block_until_ready(out)

    assert out.shape == (B, output_nc, H, W), out.shape
    assert bool(jnp.all(jnp.isfinite(out)))
    print("KERNEL_OK")
</pallas_src>

<mosaic_0001>
module attributes {stable_mosaic.version = 11 : i64} {
  func.func @_gemm_kernel(%arg0: i32, %arg1: memref<256x196xbf16, #tpu.memory_space<vmem>>, %arg2: memref<196x64xbf16, #tpu.memory_space<vmem>>, %arg3: memref<1x64xf32, #tpu.memory_space<vmem>>, %arg4: memref<256x64xbf16, #tpu.memory_space<vmem>>) attributes {dimension_semantics = [#tpu.dimension_semantics<parallel>], iteration_bounds = array<i64: 2>, scalar_prefetch = 0 : i64, scratch_operands = 0 : i64, tpu.core_type = #tpu.core_type<tc>, window_params = [{transform_indices = @transform_0, window_bounds = array<i64: 256, 196>}, {pipeline_mode = #tpu.pipeline_mode<synchronous>, transform_indices = @transform_1, window_bounds = array<i64: 196, 64>}, {pipeline_mode = #tpu.pipeline_mode<synchronous>, transform_indices = @transform_2, window_bounds = array<i64: 1, 64>}, {transform_indices = @transform_3, window_bounds = array<i64: 256, 64>}]} {
    %c0 = arith.constant 0 : index
    %c0_0 = arith.constant 0 : index
    %0 = vector.load %arg1[%c0, %c0_0] : memref<256x196xbf16, #tpu.memory_space<vmem>>, vector<256x196xbf16>
    %c0_1 = arith.constant 0 : index
    %c0_2 = arith.constant 0 : index
    %1 = vector.load %arg2[%c0_1, %c0_2] : memref<196x64xbf16, #tpu.memory_space<vmem>>, vector<196x64xbf16>
    %cst = arith.constant dense<0.000000e+00> : vector<256x64xf32>
    %2 = tpu.matmul %0, %1, %cst {dimension_numbers = #tpu.dot_dimension_numbers<[1], [0], [0], [1], [0, 0, 1, 1], [], []>} : vector<256x196xbf16>, vector<196x64xbf16>, vector<256x64xf32> -> vector<256x64xf32>
    %c0_3 = arith.constant 0 : index
    %c0_4 = arith.constant 0 : index
    %3 = vector.load %arg3[%c0_3, %c0_4] : memref<1x64xf32, #tpu.memory_space<vmem>>, vector<1x64xf32>
    %4 = vector.broadcast %3 : vector<1x64xf32> to vector<256x64xf32>
    %5 = arith.addf %2, %4 : vector<256x64xf32>
    %cst_5 = arith.constant 0.000000e+00 : f32
    %6 = vector.broadcast %cst_5 : f32 to vector<256x64xf32>
    %7 = arith.maximumf %5, %6 : vector<256x64xf32>
    %8 = arith.truncf %7 : vector<256x64xf32> to vector<256x64xbf16>
    %c0_6 = arith.constant 0 : index
    %c0_7 = arith.constant 0 : index
    %9 = vector.load %arg4[%c0_6, %c0_7] : memref<256x64xbf16, #tpu.memory_space<vmem>>, vector<256x64xbf16>
    tpu.vector_store %arg4[%c0_6, %c0_7], %8 {strides = array<i32>} : memref<256x64xbf16, #tpu.memory_space<vmem>>, vector<256x64xbf16>,
    return
  }
  func.func @transform_0(%arg0: i32) -> (i32, i32) {
    %c0_i32 = arith.constant 0 : i32
    %c0_i32_0 = arith.constant 0 : i32
    return %arg0, %c0_i32 : i32, i32
  }
  func.func @transform_1(%arg0: i32) -> (i32, i32) {
    %c0_i32 = arith.constant 0 : i32
    %c0_i32_0 = arith.constant 0 : i32
    %c0_i32_1 = arith.constant 0 : i32
    return %c0_i32, %c0_i32_0 : i32, i32
  }
  func.func @transform_2(%arg0: i32) -> (i32, i32) {
    %c0_i32 = arith.constant 0 : i32
    %c0_i32_0 = arith.constant 0 : i32
    %c0_i32_1 = arith.constant 0 : i32
    return %c0_i32, %c0_i32_0 : i32, i32
  }
  func.func @transform_3(%arg0: i32) -> (i32, i32) {
    %c0_i32 = arith.constant 0 : i32
    %c0_i32_0 = arith.constant 0 : i32
    return %arg0, %c0_i32 : i32, i32
  }
}

module attributes {stable_mosaic.version = 11 : i64} {
  func.func @_gemm_kernel(%arg0: i32, %arg1: memref<128x576xbf16, #tpu.memory_space<vmem>>, %arg2: memref<576x128xbf16, #tpu.memory_space<vmem>>, %arg3: memref<1x128xf32, #tpu.memory_space<vmem>>, %arg4: memref<128x128xbf16, #tpu.memory_space<vmem>>) attributes {dimension_semantics = [#tpu.dimension_semantics<parallel>], iteration_bounds = array<i64: 1>, scalar_prefetch = 0 : i64, scratch_operands = 0 : i64, tpu.core_type = #tpu.core_type<tc>, window_params = [{transform_indices = @transform_0, window_bounds = array<i64: 128, 576>}, {pipeline_mode = #tpu.pipeline_mode<synchronous>, transform_indices = @transform_1, window_bounds = array<i64: 576, 128>}, {pipeline_mode = #tpu.pipeline_mode<synchronous>, transform_indices = @transform_2, window_bounds = array<i64: 1, 128>}, {transform_indices = @transform_3, window_bounds = array<i64: 128, 128>}]} {
    %c0 = arith.constant 0 : index
    %c0_0 = arith.constant 0 : index
    %0 = vector.load %arg1[%c0, %c0_0] : memref<128x576xbf16, #tpu.memory_space<vmem>>, vector<128x576xbf16>
    %c0_1 = arith.constant 0 : index
    %c0_2 = arith.constant 0 : index
    %1 = vector.load %arg2[%c0_1, %c0_2] : memref<576x128xbf16, #tpu.memory_space<vmem>>, vector<576x128xbf16>
    %cst = arith.constant dense<0.000000e+00> : vector<128x128xf32>
    %2 = tpu.matmul %0, %1, %cst {dimension_numbers = #tpu.dot_dimension_numbers<[1], [0], [0], [1], [0, 0, 1, 1], [], []>} : vector<128x576xbf16>, vector<576x128xbf16>, vector<128x128xf32> -> vector<128x128xf32>
    %c0_3 = arith.constant 0 : index
    %c0_4 = arith.constant 0 : index
    %3 = vector.load %arg3[%c0_3, %c0_4] : memref<1x128xf32, #tpu.memory_space<vmem>>, vector<1x128xf32>
    %4 = vector.broadcast %3 : vector<1x128xf32> to vector<128x128xf32>
    %5 = arith.addf %2, %4 : vector<128x128xf32>
    %cst_5 = arith.constant 0.000000e+00 : f32
    %6 = vector.broadcast %cst_5 : f32 to vector<128x128xf32>
    %7 = arith.maximumf %5, %6 : vector<128x128xf32>
    %8 = arith.truncf %7 : vector<128x128xf32> to vector<128x128xbf16>
    %c0_6 = arith.constant 0 : index
    %c0_7 = arith.constant 0 : index
    %9 = vector.load %arg4[%c0_6, %c0_7] : memref<128x128xbf16, #tpu.memory_space<vmem>>, vector<128x128xbf16>
    tpu.vector_store %arg4[%c0_6, %c0_7], %8 {strides = array<i32>} : memref<128x128xbf16, #tpu.memory_space<vmem>>, vector<128x128xbf16>,
    return
  }
  func.func @transform_0(%arg0: i32) -> (i32, i32) {
    %c0_i32 = arith.constant 0 : i32
    %c0_i32_0 = arith.constant 0 : i32
    return %arg0, %c0_i32 : i32, i32
  }
  func.func @transform_1(%arg0: i32) -> (i32, i32) {
    %c0_i32 = arith.constant 0 : i32
    %c0_i32_0 = arith.constant 0 : i32
    %c0_i32_1 = arith.constant 0 : i32
    return %c0_i32, %c0_i32_0 : i32, i32
  }
  func.func @transform_2(%arg0: i32) -> (i32, i32) {
    %c0_i32 = arith.constant 0 : i32
    %c0_i32_0 = arith.constant 0 : i32
    %c0_i32_1 = arith.constant 0 : i32
    return %c0_i32, %c0_i32_0 : i32, i32
  }
  func.func @transform_3(%arg0: i32) -> (i32, i32) {
    %c0_i32 = arith.constant 0 : i32
    %c0_i32_0 = arith.constant 0 : i32
    return %arg0, %c0_i32 : i32, i32
  }
}

module attributes {stable_mosaic.version = 11 : i64} {
  func.func @_gemm_kernel(%arg0: i32, %arg1: memref<32x1152xbf16, #tpu.memory_space<vmem>>, %arg2: memref<1152x256xbf16, #tpu.memory_space<vmem>>, %arg3: memref<1x256xf32, #tpu.memory_space<vmem>>, %arg4: memref<32x256xbf16, #tpu.memory_space<vmem>>) attributes {dimension_semantics = [#tpu.dimension_semantics<parallel>], iteration_bounds = array<i64: 1>, scalar_prefetch = 0 : i64, scratch_operands = 0 : i64, tpu.core_type = #tpu.core_type<tc>, window_params = [{transform_indices = @transform_0, window_bounds = array<i64: 32, 1152>}, {pipeline_mode = #tpu.pipeline_mode<synchronous>, transform_indices = @transform_1, window_bounds = array<i64: 1152, 256>}, {pipeline_mode = #tpu.pipeline_mode<synchronous>, transform_indices = @transform_2, window_bounds = array<i64: 1, 256>}, {transform_indices = @transform_3, window_bounds = array<i64: 32, 256>}]} {
    %c0 = arith.constant 0 : index
    %c0_0 = arith.constant 0 : index
    %0 = vector.load %arg1[%c0, %c0_0] : memref<32x1152xbf16, #tpu.memory_space<vmem>>, vector<32x1152xbf16>
    %c0_1 = arith.constant 0 : index
    %c0_2 = arith.constant 0 : index
    %1 = vector.load %arg2[%c0_1, %c0_2] : memref<1152x256xbf16, #tpu.memory_space<vmem>>, vector<1152x256xbf16>
    %cst = arith.constant dense<0.000000e+00> : vector<32x256xf32>
    %2 = tpu.matmul %0, %1, %cst {dimension_numbers = #tpu.dot_dimension_numbers<[1], [0], [0], [1], [0, 0, 1, 1], [], []>} : vector<32x1152xbf16>, vector<1152x256xbf16>, vector<32x256xf32> -> vector<32x256xf32>
    %c0_3 = arith.constant 0 : index
    %c0_4 = arith.constant 0 : index
    %3 = vector.load %arg3[%c0_3, %c0_4] : memref<1x256xf32, #tpu.memory_space<vmem>>, vector<1x256xf32>
    %4 = vector.broadcast %3 : vector<1x256xf32> to vector<32x256xf32>
    %5 = arith.addf %2, %4 : vector<32x256xf32>
    %cst_5 = arith.constant 0.000000e+00 : f32
    %6 = vector.broadcast %cst_5 : f32 to vector<32x256xf32>
    %7 = arith.maximumf %5, %6 : vector<32x256xf32>
    %8 = arith.truncf %7 : vector<32x256xf32> to vector<32x256xbf16>
    %c0_6 = arith.constant 0 : index
    %c0_7 = arith.constant 0 : index
    %9 = vector.load %arg4[%c0_6, %c0_7] : memref<32x256xbf16, #tpu.memory_space<vmem>>, vector<32x256xbf16>
    tpu.vector_store %arg4[%c0_6, %c0_7], %8 {strides = array<i32>} : memref<32x256xbf16, #tpu.memory_space<vmem>>, vector<32x256xbf16>,
    return
  }
  func.func @transform_0(%arg0: i32) -> (i32, i32) {
    %c0_i32 = arith.constant 0 : i32
    %c0_i32_0 = arith.constant 0 : i32
    return %arg0, %c0_i32 : i32, i32
  }
  func.func @transform_1(%arg0: i32) -> (i32, i32) {
    %c0_i32 = arith.constant 0 : i32
    %c0_i32_0 = arith.constant 0 : i32
    %c0_i32_1 = arith.constant 0 : i32
    return %c0_i32, %c0_i32_0 : i32, i32
  }
  func.func @transform_2(%arg0: i32) -> (i32, i32) {
    %c0_i32 = arith.constant 0 : i32
    %c0_i32_0 = arith.constant 0 : i32
    %c0_i32_1 = arith.constant 0 : i32
    return %c0_i32, %c0_i32_0 : i32, i32
  }
  func.func @transform_3(%arg0: i32) -> (i32, i32) {
    %c0_i32 = arith.constant 0 : i32
    %c0_i32_0 = arith.constant 0 : i32
    return %arg0, %c0_i32 : i32, i32
  }
}

module attributes {stable_mosaic.version = 11 : i64} {
  func.func @_gemm_res_kernel(%arg0: i32, %arg1: memref<32x2304xbf16, #tpu.memory_space<vmem>>, %arg2: memref<2304x256xbf16, #tpu.memory_space<vmem>>, %arg3: memref<1x256xf32, #tpu.memory_space<vmem>>, %arg4: memref<32x256xbf16, #tpu.memory_space<vmem>>, %arg5: memref<32x256xbf16, #tpu.memory_space<vmem>>) attributes {dimension_semantics = [#tpu.dimension_semantics<parallel>], iteration_bounds = array<i64: 1>, scalar_prefetch = 0 : i64, scratch_operands = 0 : i64, tpu.core_type = #tpu.core_type<tc>, window_params = [{transform_indices = @transform_0, window_bounds = array<i64: 32, 2304>}, {pipeline_mode = #tpu.pipeline_mode<synchronous>, transform_indices = @transform_1, window_bounds = array<i64: 2304, 256>}, {pipeline_mode = #tpu.pipeline_mode<synchronous>, transform_indices = @transform_2, window_bounds = array<i64: 1, 256>}, {transform_indices = @transform_3, window_bounds = array<i64: 32, 256>}, {transform_indices = @transform_4, window_bounds = array<i64: 32, 256>}]} {
    %c0 = arith.constant 0 : index
    %c0_0 = arith.constant 0 : index
    %0 = vector.load %arg1[%c0, %c0_0] : memref<32x2304xbf16, #tpu.memory_space<vmem>>, vector<32x2304xbf16>
    %c0_1 = arith.constant 0 : index
    %c0_2 = arith.constant 0 : index
    %1 = vector.load %arg2[%c0_1, %c0_2] : memref<2304x256xbf16, #tpu.memory_space<vmem>>, vector<2304x256xbf16>
    %cst = arith.constant dense<0.000000e+00> : vector<32x256xf32>
    %2 = tpu.matmul %0, %1, %cst {dimension_numbers = #tpu.dot_dimension_numbers<[1], [0], [0], [1], [0, 0, 1, 1], [], []>} : vector<32x2304xbf16>, vector<2304x256xbf16>, vector<32x256xf32> -> vector<32x256xf32>
    %c0_3 = arith.constant 0 : index
    %c0_4 = arith.constant 0 : index
    %3 = vector.load %arg3[%c0_3, %c0_4] : memref<1x256xf32, #tpu.memory_space<vmem>>, vector<1x256xf32>
    %4 = vector.broadcast %3 : vector<1x256xf32> to vector<32x256xf32>
    %5 = arith.addf %2, %4 : vector<32x256xf32>
    %c0_5 = arith.constant 0 : index
    %c0_6 = arith.constant 0 : index
    %6 = vector.load %arg4[%c0_5, %c0_6] : memref<32x256xbf16, #tpu.memory_space<vmem>>, vector<32x256xbf16>
    %7 = arith.extf %6 : vector<32x256xbf16> to vector<32x256xf32>
    %8 = arith.addf %5, %7 : vector<32x256xf32>
    %9 = arith.truncf %8 : vector<32x256xf32> to vector<32x256xbf16>
    %c0_7 = arith.constant 0 : index
    %c0_8 = arith.constant 0 : index
    %10 = vector.load %arg5[%c0_7, %c0_8] : memref<32x256xbf16, #tpu.memory_space<vmem>>, vector<32x256xbf16>
    tpu.vector_store %arg5[%c0_7, %c0_8], %9 {strides = array<i32>} : memref<32x256xbf16, #tpu.memory_space<vmem>>, vector<32x256xbf16>,
    return
  }
  func.func @transform_0(%arg0: i32) -> (i32, i32) {
    %c0_i32 = arith.constant 0 : i32
    %c0_i32_0 = arith.constant 0 : i32
    return %arg0, %c0_i32 : i32, i32
  }
  func.func @transform_1(%arg0: i32) -> (i32, i32) {
    %c0_i32 = arith.constant 0 : i32
    %c0_i32_0 = arith.constant 0 : i32
    %c0_i32_1 = arith.constant 0 : i32
    return %c0_i32, %c0_i32_0 : i32, i32
  }
  func.func @transform_2(%arg0: i32) -> (i32, i32) {
    %c0_i32 = arith.constant 0 : i32
    %c0_i32_0 = arith.constant 0 : i32
    %c0_i32_1 = arith.constant 0 : i32
    return %c0_i32, %c0_i32_0 : i32, i32
  }
  func.func @transform_3(%arg0: i32) -> (i32, i32) {
    %c0_i32 = arith.constant 0 : i32
    %c0_i32_0 = arith.constant 0 : i32
    return %arg0, %c0_i32 : i32, i32
  }
  func.func @transform_4(%arg0: i32) -> (i32, i32) {
    %c0_i32 = arith.constant 0 : i32
    %c0_i32_0 = arith.constant 0 : i32
    return %arg0, %c0_i32 : i32, i32
  }
}

module attributes {stable_mosaic.version = 11 : i64} {
  func.func @_gemm_res_kernel(%arg0: i32, %arg1: memref<32x2304xbf16, #tpu.memory_space<vmem>>, %arg2: memref<2304x256xbf16, #tpu.memory_space<vmem>>, %arg3: memref<1x256xf32, #tpu.memory_space<vmem>>, %arg4: memref<32x256xbf16, #tpu.memory_space<vmem>>, %arg5: memref<32x256xbf16, #tpu.memory_space<vmem>>) attributes {dimension_semantics = [#tpu.dimension_semantics<parallel>], iteration_bounds = array<i64: 1>, scalar_prefetch = 0 : i64, scratch_operands = 0 : i64, tpu.core_type = #tpu.core_type<tc>, window_params = [{transform_indices = @transform_0, window_bounds = array<i64: 32, 2304>}, {pipeline_mode = #tpu.pipeline_mode<synchronous>, transform_indices = @transform_1, window_bounds = array<i64: 2304, 256>}, {pipeline_mode = #tpu.pipeline_mode<synchronous>, transform_indices = @transform_2, window_bounds = array<i64: 1, 256>}, {transform_indices = @transform_3, window_bounds = array<i64: 32, 256>}, {transform_indices = @transform_4, window_bounds = array<i64: 32, 256>}]} {
    %c0 = arith.constant 0 : index
    %c0_0 = arith.constant 0 : index
    %0 = vector.load %arg1[%c0, %c0_0] : memref<32x2304xbf16, #tpu.memory_space<vmem>>, vector<32x2304xbf16>
    %c0_1 = arith.constant 0 : index
    %c0_2 = arith.constant 0 : index
    %1 = vector.load %arg2[%c0_1, %c0_2] : memref<2304x256xbf16, #tpu.memory_space<vmem>>, vector<2304x256xbf16>
    %cst = arith.constant dense<0.000000e+00> : vector<32x256xf32>
    %2 = tpu.matmul %0, %1, %cst {dimension_numbers = #tpu.dot_dimension_numbers<[1], [0], [0], [1], [0, 0, 1, 1], [], []>} : vector<32x2304xbf16>, vector<2304x256xbf16>, vector<32x256xf32> -> vector<32x256xf32>
    %c0_3 = arith.constant 0 : index
    %c0_4 = arith.constant 0 : index
    %3 = vector.load %arg3[%c0_3, %c0_4] : memref<1x256xf32, #tpu.memory_space<vmem>>, vector<1x256xf32>
    %4 = vector.broadcast %3 : vector<1x256xf32> to vector<32x256xf32>
    %5 = arith.addf %2, %4 : vector<32x256xf32>
    %c0_5 = arith.constant 0 : index
    %c0_6 = arith.constant 0 : index
    %6 = vector.load %arg4[%c0_5, %c0_6] : memref<32x256xbf16, #tpu.memory_space<vmem>>, vector<32x256xbf16>
    %7 = arith.extf %6 : vector<32x256xbf16> to vector<32x256xf32>
    %8 = arith.addf %5, %7 : vector<32x256xf32>
    %9 = arith.truncf %8 : vector<32x256xf32> to vector<32x256xbf16>
    %c0_7 = arith.constant 0 : index
    %c0_8 = arith.constant 0 : index
    %10 = vector.load %arg5[%c0_7, %c0_8] : memref<32x256xbf16, #tpu.memory_space<vmem>>, vector<32x256xbf16>
    tpu.vector_store %arg5[%c0_7, %c0_8], %9 {strides = array<i32>} : memref<32x256xbf16, #tpu.memory_space<vmem>>, vector<32x256xbf16>,
    return
  }
  func.func @transform_0(%arg0: i32) -> (i32, i32) {
    %c0_i32 = arith.constant 0 : i32
    %c0_i32_0 = arith.constant 0 : i32
    return %arg0, %c0_i32 : i32, i32
  }
  func.func @transform_1(%arg0: i32) -> (i32, i32) {
    %c0_i32 = arith.constant 0 : i32
    %c0_i32_0 = arith.constant 0 : i32
    %c0_i32_1 = arith.constant 0 : i32
    return %c0_i32, %c0_i32_0 : i32, i32
  }
  func.func @transform_2(%arg0: i32) -> (i32, i32) {
    %c0_i32 = arith.constant 0 : i32
    %c0_i32_0 = arith.constant 0 : i32
    %c0_i32_1 = arith.constant 0 : i32
    return %c0_i32, %c0_i32_0 : i32, i32
  }
  func.func @transform_3(%arg0: i32) -> (i32, i32) {
    %c0_i32 = arith.constant 0 : i32
    %c0_i32_0 = arith.constant 0 : i32
    return %arg0, %c0_i32 : i32, i32
  }
  func.func @transform_4(%arg0: i32) -> (i32, i32) {
    %c0_i32 = arith.constant 0 : i32
    %c0_i32_0 = arith.constant 0 : i32
    return %arg0, %c0_i32 : i32, i32
  }
}

module attributes {stable_mosaic.version = 11 : i64} {
  func.func @_gemm_kernel(%arg0: i32, %arg1: memref<32x1024xbf16, #tpu.memory_space<vmem>>, %arg2: memref<1024x512xbf16, #tpu.memory_space<vmem>>, %arg3: memref<1x512xf32, #tpu.memory_space<vmem>>, %arg4: memref<32x512xbf16, #tpu.memory_space<vmem>>) attributes {dimension_semantics = [#tpu.dimension_semantics<parallel>], iteration_bounds = array<i64: 1>, scalar_prefetch = 0 : i64, scratch_operands = 0 : i64, tpu.core_type = #tpu.core_type<tc>, window_params = [{transform_indices = @transform_0, window_bounds = array<i64: 32, 1024>}, {pipeline_mode = #tpu.pipeline_mode<synchronous>, transform_indices = @transform_1, window_bounds = array<i64: 1024, 512>}, {pipeline_mode = #tpu.pipeline_mode<synchronous>, transform_indices = @transform_2, window_bounds = array<i64: 1, 512>}, {transform_indices = @transform_3, window_bounds = array<i64: 32, 512>}]} {
    %c0 = arith.constant 0 : index
    %c0_0 = arith.constant 0 : index
    %0 = vector.load %arg1[%c0, %c0_0] : memref<32x1024xbf16, #tpu.memory_space<vmem>>, vector<32x1024xbf16>
    %c0_1 = arith.constant 0 : index
    %c0_2 = arith.constant 0 : index
    %1 = vector.load %arg2[%c0_1, %c0_2] : memref<1024x512xbf16, #tpu.memory_space<vmem>>, vector<1024x512xbf16>
    %cst = arith.constant dense<0.000000e+00> : vector<32x512xf32>
    %2 = tpu.matmul %0, %1, %cst {dimension_numbers = #tpu.dot_dimension_numbers<[1], [0], [0], [1], [0, 0, 1, 1], [], []>} : vector<32x1024xbf16>, vector<1024x512xbf16>, vector<32x512xf32> -> vector<32x512xf32>
    %c0_3 = arith.constant 0 : index
    %c0_4 = arith.constant 0 : index
    %3 = vector.load %arg3[%c0_3, %c0_4] : memref<1x512xf32, #tpu.memory_space<vmem>>, vector<1x512xf32>
    %4 = vector.broadcast %3 : vector<1x512xf32> to vector<32x512xf32>
    %5 = arith.addf %2, %4 : vector<32x512xf32>
    %cst_5 = arith.constant 0.000000e+00 : f32
    %6 = vector.broadcast %cst_5 : f32 to vector<32x512xf32>
    %7 = arith.maximumf %5, %6 : vector<32x512xf32>
    %8 = arith.truncf %7 : vector<32x512xf32> to vector<32x512xbf16>
    %c0_6 = arith.constant 0 : index
    %c0_7 = arith.constant 0 : index
    %9 = vector.load %arg4[%c0_6, %c0_7] : memref<32x512xbf16, #tpu.memory_space<vmem>>, vector<32x512xbf16>
    tpu.vector_store %arg4[%c0_6, %c0_7], %8 {strides = array<i32>} : memref<32x512xbf16, #tpu.memory_space<vmem>>, vector<32x512xbf16>,
    return
  }
  func.func @transform_0(%arg0: i32) -> (i32, i32) {
    %c0_i32 = arith.constant 0 : i32
    %c0_i32_0 = arith.constant 0 : i32
    return %arg0, %c0_i32 : i32, i32
  }
  func.func @transform_1(%arg0: i32) -> (i32, i32) {
    %c0_i32 = arith.constant 0 : i32
    %c0_i32_0 = arith.constant 0 : i32
    %c0_i32_1 = arith.constant 0 : i32
    return %c0_i32, %c0_i32_0 : i32, i32
  }
  func.func @transform_2(%arg0: i32) -> (i32, i32) {
    %c0_i32 = arith.constant 0 : i32
    %c0_i32_0 = arith.constant 0 : i32
    %c0_i32_1 = arith.constant 0 : i32
    return %c0_i32, %c0_i32_0 : i32, i32
  }
  func.func @transform_3(%arg0: i32) -> (i32, i32) {
    %c0_i32 = arith.constant 0 : i32
    %c0_i32_0 = arith.constant 0 : i32
    return %arg0, %c0_i32 : i32, i32
  }
}

module attributes {stable_mosaic.version = 11 : i64} {
  func.func @_gemm_kernel(%arg0: i32, %arg1: memref<128x512xbf16, #tpu.memory_space<vmem>>, %arg2: memref<512x256xbf16, #tpu.memory_space<vmem>>, %arg3: memref<1x256xf32, #tpu.memory_space<vmem>>, %arg4: memref<128x256xbf16, #tpu.memory_space<vmem>>) attributes {dimension_semantics = [#tpu.dimension_semantics<parallel>], iteration_bounds = array<i64: 1>, scalar_prefetch = 0 : i64, scratch_operands = 0 : i64, tpu.core_type = #tpu.core_type<tc>, window_params = [{transform_indices = @transform_0, window_bounds = array<i64: 128, 512>}, {pipeline_mode = #tpu.pipeline_mode<synchronous>, transform_indices = @transform_1, window_bounds = array<i64: 512, 256>}, {pipeline_mode = #tpu.pipeline_mode<synchronous>, transform_indices = @transform_2, window_bounds = array<i64: 1, 256>}, {transform_indices = @transform_3, window_bounds = array<i64: 128, 256>}]} {
    %c0 = arith.constant 0 : index
    %c0_0 = arith.constant 0 : index
    %0 = vector.load %arg1[%c0, %c0_0] : memref<128x512xbf16, #tpu.memory_space<vmem>>, vector<128x512xbf16>
    %c0_1 = arith.constant 0 : index
    %c0_2 = arith.constant 0 : index
    %1 = vector.load %arg2[%c0_1, %c0_2] : memref<512x256xbf16, #tpu.memory_space<vmem>>, vector<512x256xbf16>
    %cst = arith.constant dense<0.000000e+00> : vector<128x256xf32>
    %2 = tpu.matmul %0, %1, %cst {dimension_numbers = #tpu.dot_dimension_numbers<[1], [0], [0], [1], [0, 0, 1, 1], [], []>} : vector<128x512xbf16>, vector<512x256xbf16>, vector<128x256xf32> -> vector<128x256xf32>
    %c0_3 = arith.constant 0 : index
    %c0_4 = arith.constant 0 : index
    %3 = vector.load %arg3[%c0_3, %c0_4] : memref<1x256xf32, #tpu.memory_space<vmem>>, vector<1x256xf32>
    %4 = vector.broadcast %3 : vector<1x256xf32> to vector<128x256xf32>
    %5 = arith.addf %2, %4 : vector<128x256xf32>
    %cst_5 = arith.constant 0.000000e+00 : f32
    %6 = vector.broadcast %cst_5 : f32 to vector<128x256xf32>
    %7 = arith.maximumf %5, %6 : vector<128x256xf32>
    %8 = arith.truncf %7 : vector<128x256xf32> to vector<128x256xbf16>
    %c0_6 = arith.constant 0 : index
    %c0_7 = arith.constant 0 : index
    %9 = vector.load %arg4[%c0_6, %c0_7] : memref<128x256xbf16, #tpu.memory_space<vmem>>, vector<128x256xbf16>
    tpu.vector_store %arg4[%c0_6, %c0_7], %8 {strides = array<i32>} : memref<128x256xbf16, #tpu.memory_space<vmem>>, vector<128x256xbf16>,
    return
  }
  func.func @transform_0(%arg0: i32) -> (i32, i32) {
    %c0_i32 = arith.constant 0 : i32
    %c0_i32_0 = arith.constant 0 : i32
    return %arg0, %c0_i32 : i32, i32
  }
  func.func @transform_1(%arg0: i32) -> (i32, i32) {
    %c0_i32 = arith.constant 0 : i32
    %c0_i32_0 = arith.constant 0 : i32
    %c0_i32_1 = arith.constant 0 : i32
    return %c0_i32, %c0_i32_0 : i32, i32
  }
  func.func @transform_2(%arg0: i32) -> (i32, i32) {
    %c0_i32 = arith.constant 0 : i32
    %c0_i32_0 = arith.constant 0 : i32
    %c0_i32_1 = arith.constant 0 : i32
    return %c0_i32, %c0_i32_0 : i32, i32
  }
  func.func @transform_3(%arg0: i32) -> (i32, i32) {
    %c0_i32 = arith.constant 0 : i32
    %c0_i32_0 = arith.constant 0 : i32
    return %arg0, %c0_i32 : i32, i32
  }
}

module attributes {stable_mosaic.version = 11 : i64} {
  func.func @_gemm_kernel(%arg0: i32, %arg1: memref<256x3136xbf16, #tpu.memory_space<vmem>>, %arg2: memref<3136x128xbf16, #tpu.memory_space<vmem>>, %arg3: memref<1x128xf32, #tpu.memory_space<vmem>>, %arg4: memref<256x128xf32, #tpu.memory_space<vmem>>) attributes {dimension_semantics = [#tpu.dimension_semantics<parallel>], iteration_bounds = array<i64: 2>, scalar_prefetch = 0 : i64, scratch_operands = 0 : i64, tpu.core_type = #tpu.core_type<tc>, window_params = [{transform_indices = @transform_0, window_bounds = array<i64: 256, 3136>}, {pipeline_mode = #tpu.pipeline_mode<synchronous>, transform_indices = @transform_1, window_bounds = array<i64: 3136, 128>}, {pipeline_mode = #tpu.pipeline_mode<synchronous>, transform_indices = @transform_2, window_bounds = array<i64: 1, 128>}, {transform_indices = @transform_3, window_bounds = array<i64: 256, 128>}]} {
    %c0 = arith.constant 0 : index
    %c0_0 = arith.constant 0 : index
    %0 = vector.load %arg1[%c0, %c0_0] : memref<256x3136xbf16, #tpu.memory_space<vmem>>, vector<256x3136xbf16>
    %c0_1 = arith.constant 0 : index
    %c0_2 = arith.constant 0 : index
    %1 = vector.load %arg2[%c0_1, %c0_2] : memref<3136x128xbf16, #tpu.memory_space<vmem>>, vector<3136x128xbf16>
    %cst = arith.constant dense<0.000000e+00> : vector<256x128xf32>
    %2 = tpu.matmul %0, %1, %cst {dimension_numbers = #tpu.dot_dimension_numbers<[1], [0], [0], [1], [0, 0, 1, 1], [], []>} : vector<256x3136xbf16>, vector<3136x128xbf16>, vector<256x128xf32> -> vector<256x128xf32>
    %c0_3 = arith.constant 0 : index
    %c0_4 = arith.constant 0 : index
    %3 = vector.load %arg3[%c0_3, %c0_4] : memref<1x128xf32, #tpu.memory_space<vmem>>, vector<1x128xf32>
    %4 = vector.broadcast %3 : vector<1x128xf32> to vector<256x128xf32>
    %5 = arith.addf %2, %4 : vector<256x128xf32>
    %6 = math.tanh %5 : vector<256x128xf32>
    %c0_5 = arith.constant 0 : index
    %c0_6 = arith.constant 0 : index
    %7 = vector.load %arg4[%c0_5, %c0_6] : memref<256x128xf32, #tpu.memory_space<vmem>>, vector<256x128xf32>
    tpu.vector_store %arg4[%c0_5, %c0_6], %6 {strides = array<i32>} : memref<256x128xf32, #tpu.memory_space<vmem>>, vector<256x128xf32>,
    return
  }
  func.func @transform_0(%arg0: i32) -> (i32, i32) {
    %c0_i32 = arith.constant 0 : i32
    %c0_i32_0 = arith.constant 0 : i32
    return %arg0, %c0_i32 : i32, i32
  }
  func.func @transform_1(%arg0: i32) -> (i32, i32) {
    %c0_i32 = arith.constant 0 : i32
    %c0_i32_0 = arith.constant 0 : i32
    %c0_i32_1 = arith.constant 0 : i32
    return %c0_i32, %c0_i32_0 : i32, i32
  }
  func.func @transform_2(%arg0: i32) -> (i32, i32) {
    %c0_i32 = arith.constant 0 : i32
    %c0_i32_0 = arith.constant 0 : i32
    %c0_i32_1 = arith.constant 0 : i32
    return %c0_i32, %c0_i32_0 : i32, i32
  }
  func.func @transform_3(%arg0: i32) -> (i32, i32) {
    %c0_i32 = arith.constant 0 : i32
    %c0_i32_0 = arith.constant 0 : i32
    return %arg0, %c0_i32 : i32, i32
  }
}

</mosaic_0001>

<bundles_post_ra>
// kernel: resnet_generator_forward.15
= control target key start
LH: loop header
LB: loop body
LE: loop exit
PB: predicated region body
PF: predicated region fallthrough
CT: control target
= control target key end

     0   :  { %s1188_s12 = smov 0   ;;  %s1427_s0 = inlined_call_operand.vmem [shape: bf16[512,196], index: 0, kind: input, shape index: {}]   ;;  %s1428_s1 = inlined_call_operand.vmem [shape: bf16[196,64], index: 1, kind: input, shape index: {}]   ;;  %s1429_s2 = inlined_call_operand.vmem [shape: f32[1,64], index: 2, kind: input, shape index: {}]   ;;  %s1430_s3 = inlined_call_operand.vmem [shape: bf16[512,64], index: 3, kind: output, shape index: {}]  }
   0x1 LB: > { %s924_s13 = sadd.s32 4294967295, %s1165_s12   ;;  %p928_p0 = scmp.ge.s32.totalorder %s1165_s12, 1  ;;  %s1165_s12 = sphi %s1188_s12, %s13_s12  }
   0x2   : > { %p139_p1 = scmp.lt.s32.totalorder %s1165_s12, 3 }
   0x4   : > { %p140_p2 = pnand %p928_p0, %p139_p1 }
   0x5   : > { %v1098_v0 = vld [vmem:[%s1428_s1] sm:$0xff] (!%p140_p2)   ;;  %v1167_v1 = vmov (!%p140_p2), 0   ;;  %v1099_v2 = vld [vmem:[%s1428_s1 + $0x8] sm:$0xff] (!%p140_p2)   ;;  %s929_s18 = sshll.u32 (!%p140_p2), %s924_s13, 5  ;;  %v1100_v3 = vld [vmem:[%s1428_s1 + $0x10] sm:$0xff] (!%p140_p2)   ;;  %vm461_vm0 = vcmask (!%p140_p2), 556032  }
   0x6   : > { %143 = sbr.rel (%p140_p2) target bundleno = 335 (0x14f), region = 32  ;;  %514 = vmatprep.subr.bf16.mxu0 (!%p140_p2), %v1167_v1  ;;  %1063 = vmatprep.subr.bf16.mxu1 (!%p140_p2), %v1167_v1  ;;  %p165_p3 = scmp.lt.s32.totalorder (!%p140_p2), %s929_s18, 63  ;;  %v1101_v4 = vld [vmem:[%s1428_s1 + $0x18] sm:$0xff] (!%p140_p2)   ;;  %v1102_v6 = vld [vmem:[%s1428_s1 + $0x20] sm:$0xff] (!%p140_p2)   ;;  %v1103_v8 = vld [vmem:[%s1428_s1 + $0x28] sm:$0xff] (!%p140_p2)   ;;  %vm510_vm1 = vcmask (!%p140_p2), 1041408  }
   0x7   : > { %515 = vmatpush1.bf16.msra.mxu0 (!%p140_p2), %v1098_v0  ;;  %1076 = vmatpush1.bf16.msra.mxu1 (!%p140_p2), %v1098_v0  ;;  %v1104_v9 = vld [vmem:[%s1428_s1 + $0x30] sm:$0xff] (!%p140_p2)   ;;  %v1105_v10 = vld [vmem:[%s1428_s1 + $0x38] sm:$0xff] (!%p140_p2)   ;;  %v1106_v11 = vld [vmem:[%s1428_s1 + $0x40] sm:$0xff] (!%p140_p2)   ;;  %vm835_vm2 = vcmask (!%p140_p2), 519168  }
   0x8   : > { %516 = vmatprep.subr.bf16.mxu0 (!%p140_p2), %v1167_v1  ;;  %1064 = vmatprep.subr.bf16.mxu1 (!%p140_p2), %v1167_v1  ;;  %v1107_v12 = vld [vmem:[%s1428_s1 + $0x48] sm:$0xff] (!%p140_p2)   ;;  %v1108_v13 = vld [vmem:[%s1428_s1 + $0x50] sm:$0xff] (!%p140_p2)   ;;  %v1109_v14 = vld [vmem:[%s1428_s1 + $0x58] sm:$0xff] (!%p140_p2)  }
   0x9   : > { %v1110_v15 = vld [vmem:[%s1428_s1 + $0x60] ss:$0 sps:$4 sm:$0x33] (!%p140_p2)  }
   0xa   : > { %v512_v16 = vsel (!%p140_p2), %vm510_vm1, %v1110_v15, 0  ;;  %v1320_v47 = vld [vmem:[%s1429_s2] ss:$0 sm:$0xff] (!%p140_p2) }
   0xb   : > { %517 = vmatpush1.bf16.msra.mxu0 (!%p140_p2), %v1099_v2  ;;  %1077 = vmatpush1.bf16.msra.mxu1 (!%p140_p2), %v1099_v2 }
   0xc   : > { %518 = vmatprep.subr.bf16.mxu0 (!%p140_p2), %v1167_v1  ;;  %1065 = vmatprep.subr.bf16.mxu1 (!%p140_p2), %v1167_v1 }
   0xd   : > { %s1432_s18 = smov (!%p165_p3, %s929_s18), 63 }
   0xe   : > { %s1030_s21 = sshll.u32 %s1432_s18, 3  ;;  %s933_s22 = sshll.u32 %s1432_s18, 2 }
   0xf   : > { %519 = vmatpush1.bf16.msra.mxu0 %v1100_v3  ;;  %1078 = vmatpush1.bf16.msra.mxu1 %v1100_v3  ;;  %s1220_s26 = scalar_lea.vmem %s1427_s0, %s1030_s21  ;;  %s1330_s18 = scalar_lea.vmem %s1430_s3, %s933_s22 }
  0x10   : > { %520 = vmatprep.subr.bf16.mxu0 %v1167_v1  ;;  %1066 = vmatprep.subr.bf16.mxu1 %v1167_v1  ;;  %v1113_v5 = vld [vmem:[%s1220_s26 + $0x4] ss:$8 sps:$4 sm:$0xff]   ;;  %v1111_v17 = vld [vmem:[%s1220_s26] ss:$8 sps:$4 sm:$0xff]   ;;  %v1117_v19 = vld [vmem:[%s1220_s26 + $0x14] ss:$8 sps:$4 sm:$0xff]  }
  0x11   : > { %v1116_v7 = vld [vmem:[%s1220_s26 + $0x84] ss:$8 sps:$4 sm:$0xff]   ;;  %980 = vmatprep.mubr.msk.bf16.mxu0 %vm461_vm0, %v1113_v5  ;;  %v1114_v18 = vld [vmem:[%s1220_s26 + $0x80] ss:$8 sps:$4 sm:$0xff]   ;;  %v1119_v20 = vld [vmem:[%s1220_s26 + $0x94] ss:$8 sps:$4 sm:$0xff]  }
  0x12   : > { %988 = vmatprep.mubr.msk.bf16.mxu1 %vm461_vm0, %v1116_v7  ;;  %v1121_v21 = vld [vmem:[%s1220_s26 + $0x10] ss:$8 sps:$4 sm:$0xff]   ;;  %v1123_v23 = vld [vmem:[%s1220_s26 + $0x24] ss:$8 sps:$4 sm:$0xff]   ;;  %v1127_v25 = vld [vmem:[%s1220_s26 + $0x20] ss:$8 sps:$4 sm:$0xff]  }
  0x13   : > { %521 = vmatpush1.bf16.msra.mxu0 %v1101_v4  ;;  %1079 = vmatpush1.bf16.msra.mxu1 %v1101_v4  ;;  %v1122_v22 = vld [vmem:[%s1220_s26 + $0x90] ss:$8 sps:$4 sm:$0xff]   ;;  %v1125_v24 = vld [vmem:[%s1220_s26 + $0xa4] ss:$8 sps:$4 sm:$0xff]   ;;  %v1128_v26 = vld [vmem:[%s1220_s26 + $0xa0] ss:$8 sps:$4 sm:$0xff]  }
  0x14   : > { %522 = vmatprep.subr.bf16.mxu0 %v1167_v1  ;;  %1067 = vmatprep.subr.bf16.mxu1 %v1167_v1  ;;  %v1129_v27 = vld [vmem:[%s1220_s26 + $0x34] ss:$8 sps:$4 sm:$0xff]   ;;  %v1133_v29 = vld [vmem:[%s1220_s26 + $0x30] ss:$8 sps:$4 sm:$0xff]   ;;  %v1135_v31 = vld [vmem:[%s1220_s26 + $0x44] ss:$8 sps:$4 sm:$0xff]  }
  0x15   : > { %v1131_v28 = vld [vmem:[%s1220_s26 + $0xb4] ss:$8 sps:$4 sm:$0xff]   ;;  %v1134_v30 = vld [vmem:[%s1220_s26 + $0xb0] ss:$8 sps:$4 sm:$0xff]   ;;  %v1137_v32 = vld [vmem:[%s1220_s26 + $0xc4] ss:$8 sps:$4 sm:$0xff]  }
  0x16   : > { %v1139_v33 = vld [vmem:[%s1220_s26 + $0x40] ss:$8 sps:$4 sm:$0xff]   ;;  %v1141_v35 = vld [vmem:[%s1220_s26 + $0x54] ss:$8 sps:$4 sm:$0xff]   ;;  %v1145_v37 = vld [vmem:[%s1220_s26 + $0x50] ss:$8 sps:$4 sm:$0xff]  }
  0x17   : > { %523 = vmatpush1.bf16.msra.mxu0 %v1102_v6  ;;  %1080 = vmatpush1.bf16.msra.mxu1 %v1102_v6  ;;  %v1140_v34 = vld [vmem:[%s1220_s26 + $0xc0] ss:$8 sps:$4 sm:$0xff]   ;;  %v1143_v36 = vld [vmem:[%s1220_s26 + $0xd4] ss:$8 sps:$4 sm:$0xff]   ;;  %v1146_v38 = vld [vmem:[%s1220_s26 + $0xd0] ss:$8 sps:$4 sm:$0xff]  }
  0x18   : > { %524 = vmatprep.subr.bf16.mxu0 %v1167_v1  ;;  %1068 = vmatprep.subr.bf16.mxu1 %v1167_v1  ;;  %v1147_v39 = vld [vmem:[%s1220_s26 + $0x64] ss:$8 sps:$4 sm:$0xff]   ;;  %v1151_v41 = vld [vmem:[%s1220_s26 + $0x60] ss:$8 sps:$4 sm:$0xff]   ;;  %v1153_v43 = vld [vmem:[%s1220_s26 + $0x74] ss:$8 sps:$4 sm:$0xff]  }
  0x19   : > { %v1149_v40 = vld [vmem:[%s1220_s26 + $0xe4] ss:$8 sps:$4 sm:$0xff]   ;;  %v1152_v42 = vld [vmem:[%s1220_s26 + $0xe0] ss:$8 sps:$4 sm:$0xff]   ;;  %v1155_v44 = vld [vmem:[%s1220_s26 + $0xf4] ss:$8 sps:$4 sm:$0xff]  }
  0x1a   : > { %v1157_v45 = vld [vmem:[%s1220_s26 + $0x70] ss:$8 sps:$4 sm:$0xff]  }
  0x1b   : > { %525 = vmatpush1.bf16.msra.mxu0 %v1103_v8  ;;  %1081 = vmatpush1.bf16.msra.mxu1 %v1103_v8  ;;  %v1158_v46 = vld [vmem:[%s1220_s26 + $0xf0] ss:$8 sps:$4 sm:$0xff]  }
  0x1c   : > { %526 = vmatprep.subr.bf16.mxu0 %v1167_v1  ;;  %1069 = vmatprep.subr.bf16.mxu1 %v1167_v1 }
  0x1f   : > { %527 = vmatpush1.bf16.msra.mxu0 %v1104_v9  ;;  %1082 = vmatpush1.bf16.msra.mxu1 %v1104_v9 }
  0x20   : > { %528 = vmatprep.subr.bf16.mxu0 %v1167_v1  ;;  %1070 = vmatprep.subr.bf16.mxu1 %v1167_v1 }
  0x23   : > { %529 = vmatpush1.bf16.msra.mxu0 %v1105_v10  ;;  %1083 = vmatpush1.bf16.msra.mxu1 %v1105_v10 }
  0x24   : > { %530 = vmatprep.subr.bf16.mxu0 %v1167_v1  ;;  %1071 = vmatprep.subr.bf16.mxu1 %v1167_v1 }
  0x27   : > { %531 = vmatpush1.bf16.msra.mxu0 %v1106_v11  ;;  %1084 = vmatpush1.bf16.msra.mxu1 %v1106_v11 }
  0x28   : > { %532 = vmatprep.subr.bf16.mxu0 %v1167_v1  ;;  %1072 = vmatprep.subr.bf16.mxu1 %v1167_v1 }
  0x2b   : > { %533 = vmatpush1.bf16.msra.mxu0 %v1107_v12  ;;  %1085 = vmatpush1.bf16.msra.mxu1 %v1107_v12 }
  0x2c   : > { %534 = vmatprep.subr.bf16.mxu0 %v1167_v1  ;;  %1073 = vmatprep.subr.bf16.mxu1 %v1167_v1 }
  0x2f   : > { %535 = vmatpush1.bf16.msra.mxu0 %v1108_v13  ;;  %1086 = vmatpush1.bf16.msra.mxu1 %v1108_v13 }
  0x30   : > { %536 = vmatprep.subr.bf16.mxu0 %v1167_v1  ;;  %1074 = vmatprep.subr.bf16.mxu1 %v1167_v1 }
  0x33   : > { %537 = vmatpush1.bf16.msra.mxu0 %v1109_v14  ;;  %1087 = vmatpush1.bf16.msra.mxu1 %v1109_v14 }
  0x34   : > { %538 = vmatprep.subr.bf16.mxu0 %v1167_v1  ;;  %1075 = vmatprep.subr.bf16.mxu1 %v1167_v1 }
  0x37   : > { %539 = vmatpush1.bf16.msra.mxu0 %v512_v16  ;;  %1088 = vmatpush1.bf16.msra.mxu1 %v512_v16 }
  0x3a   : > { %547 = vmatmul.mubr.bf16.vlgmr.msra.gmra.mrb[0].mxu0 %v1111_v17  ;;  %611 = vmatmul.mubr.bf16.vlgmr.msra.gmra.mrb[0].mxu1 %v1114_v18 }
  0x3b   : > { %981 = vmatprep.mubr.msk.bf16.mxu0 %vm461_vm0, %v1117_v19  ;;  %989 = vmatprep.mubr.msk.bf16.mxu1 %vm461_vm0, %v1119_v20 }
  0x42   : > { %555 = vmatmul.mubr.bf16.gmra.mrb[4].mxu0 %v1121_v21  ;;  %619 = vmatmul.mubr.bf16.gmra.mrb[4].mxu1 %v1122_v22 }
  0x43   : > { %982 = vmatprep.mubr.msk.bf16.mxu0 %vm461_vm0, %v1123_v23  ;;  %990 = vmatprep.mubr.msk.bf16.mxu1 %vm461_vm0, %v1125_v24 }
  0x4a   : > { %563 = vmatmul.mubr.bf16.gmra.mrb[8].mxu0 %v1127_v25  ;;  %627 = vmatmul.mubr.bf16.gmra.mrb[8].mxu1 %v1128_v26 }
  0x4b   : > { %983 = vmatprep.mubr.msk.bf16.mxu0 %vm461_vm0, %v1129_v27  ;;  %991 = vmatprep.mubr.msk.bf16.mxu1 %vm461_vm0, %v1131_v28 }
  0x52   : > { %571 = vmatmul.mubr.bf16.gmra.mrb[12].mxu0 %v1133_v29  ;;  %635 = vmatmul.mubr.bf16.gmra.mrb[12].mxu1 %v1134_v30 }
  0x53   : > { %984 = vmatprep.mubr.msk.bf16.mxu0 %vm461_vm0, %v1135_v31  ;;  %992 = vmatprep.mubr.msk.bf16.mxu1 %vm461_vm0, %v1137_v32 }
  0x5a   : > { %579 = vmatmul.mubr.bf16.gmra.mrb[16].mxu0 %v1139_v33  ;;  %643 = vmatmul.mubr.bf16.gmra.mrb[16].mxu1 %v1140_v34 }
  0x5b   : > { %985 = vmatprep.mubr.msk.bf16.mxu0 %vm461_vm0, %v1141_v35  ;;  %993 = vmatprep.mubr.msk.bf16.mxu1 %vm461_vm0, %v1143_v36 }
  0x62   : > { %587 = vmatmul.mubr.bf16.gmra.mrb[20].mxu0 %v1145_v37  ;;  %651 = vmatmul.mubr.bf16.gmra.mrb[20].mxu1 %v1146_v38 }
  0x63   : > { %986 = vmatprep.mubr.msk.bf16.mxu0 %vm461_vm0, %v1147_v39  ;;  %994 = vmatprep.mubr.msk.bf16.mxu1 %vm461_vm0, %v1149_v40 }
  0x6a   : > { %595 = vmatmul.mubr.bf16.gmra.mrb[24].mxu0 %v1151_v41  ;;  %659 = vmatmul.mubr.bf16.gmra.mrb[24].mxu1 %v1152_v42 }
  0x6b   : > { %987 = vmatprep.mubr.msk.bf16.mxu0 %vm461_vm0, %v1153_v43  ;;  %995 = vmatprep.mubr.msk.bf16.mxu1 %vm461_vm0, %v1155_v44 }
  0x72   : > { %603 = vmatmul.mubr.bf16.gmra.mrb[28].mxu0 %v1157_v45  ;;  %667 = vmatmul.mubr.bf16.gmra.mrb[28].mxu1 %v1158_v46 }
 0x10d   : > { %v548_v48 = vpop.f32.mrb[0].mxu0  ;;  %v612_v49 = vpop.f32.mrb[0].mxu1 }
 0x10e   : > { %v549_v50 = vadd.f32 %v1320_v47, %v548_v48  ;;  %v613_v51 = vadd.f32 %v1320_v47, %v612_v49  ;;  %v550_v52 = vpop.f32.mrb[1].mxu0  ;;  %v614_v53 = vpop.f32.mrb[1].mxu1 }
 0x10f   : > { %v551_v54 = vpop.f32.mrb[2].mxu0  ;;  %v615_v55 = vpop.f32.mrb[2].mxu1 }
 0x110   : > { %v675_v56 = vmax.f32 %v549_v50, 0.0  ;;  %v691_v57 = vmax.f32 %v613_v51, 0.0  ;;  %v552_v58 = vadd.f32 %v1320_v47, %v551_v54  ;;  %v616_v59 = vadd.f32 %v1320_v47, %v615_v55  ;;  %v553_v60 = vpop.f32.mrb[3].mxu0  ;;  %v617_v61 = vpop.f32.mrb[3].mxu1 }
 0x112   : > { %v1031_v62 = vpack.c.bf16 %v675_v56, %v675_v56  ;;  %v1047_v63 = vpack.c.bf16 %v691_v57, %v691_v57  ;;  %v676_v0 = vmax.f32 %v552_v58, 0.0  ;;  %v692_v1 = vmax.f32 %v616_v59, 0.0 }
 0x114   : > { %836 = vst.msk [vmem:[%s1330_s18] sm:$0xf] %vm835_vm2, %v1031_v62  ;;  %852 = vst.msk [vmem:[%s1330_s18 + $0x40] sm:$0xf] %vm835_vm2, %v1047_v63  ;;  %v1032_v2 = vpack.c.bf16 %v676_v0, %v676_v0  ;;  %v1048_v3 = vpack.c.bf16 %v692_v1, %v692_v1 }
 0x115   : > { %v556_v4 = vpop.f32.mrb[4].mxu0  ;;  %v620_v5 = vpop.f32.mrb[4].mxu1 }
 0x116   : > { %837 = vst.msk [vmem:[%s1330_s18 + $0x4] sm:$0xf] %vm835_vm2, %v1032_v2  ;;  %853 = vst.msk [vmem:[%s1330_s18 + $0x44] sm:$0xf] %vm835_vm2, %v1048_v3  ;;  %v557_v6 = vadd.f32 %v1320_v47, %v556_v4  ;;  %v621_v7 = vadd.f32 %v1320_v47, %v620_v5  ;;  %v558_v8 = vpop.f32.mrb[5].mxu0  ;;  %v622_v9 = vpop.f32.mrb[5].mxu1 }
 0x117   : > { %v559_v10 = vpop.f32.mrb[6].mxu0  ;;  %v623_v11 = vpop.f32.mrb[6].mxu1 }
 0x118   : > { %v677_v12 = vmax.f32 %v557_v6, 0.0  ;;  %v693_v13 = vmax.f32 %v621_v7, 0.0  ;;  %v560_v14 = vadd.f32 %v1320_v47, %v559_v10  ;;  %v624_v15 = vadd.f32 %v1320_v47, %v623_v11  ;;  %v561_v16 = vpop.f32.mrb[7].mxu0  ;;  %v625_v17 = vpop.f32.mrb[7].mxu1 }
 0x11a   : > { %v1033_v18 = vpack.c.bf16 %v677_v12, %v677_v12  ;;  %v1049_v19 = vpack.c.bf16 %v693_v13, %v693_v13  ;;  %v678_v20 = vmax.f32 %v560_v14, 0.0  ;;  %v694_v21 = vmax.f32 %v624_v15, 0.0 }
 0x11c   : > { %838 = vst.msk [vmem:[%s1330_s18 + $0x8] sm:$0xf] %vm835_vm2, %v1033_v18  ;;  %854 = vst.msk [vmem:[%s1330_s18 + $0x48] sm:$0xf] %vm835_vm2, %v1049_v19  ;;  %v1034_v22 = vpack.c.bf16 %v678_v20, %v678_v20  ;;  %v1050_v23 = vpack.c.bf16 %v694_v21, %v694_v21 }
 0x11d   : > { %v564_v24 = vpop.f32.mrb[8].mxu0  ;;  %v628_v25 = vpop.f32.mrb[8].mxu1 }
 0x11e   : > { %839 = vst.msk [vmem:[%s1330_s18 + $0xc] sm:$0xf] %vm835_vm2, %v1034_v22  ;;  %855 = vst.msk [vmem:[%s1330_s18 + $0x4c] sm:$0xf] %vm835_vm2, %v1050_v23  ;;  %v565_v26 = vadd.f32 %v1320_v47, %v564_v24  ;;  %v629_v27 = vadd.f32 %v1320_v47, %v628_v25  ;;  %v566_v28 = vpop.f32.mrb[9].mxu0  ;;  %v630_v29 = vpop.f32.mrb[9].mxu1 }
 0x11f   : > { %v567_v30 = vpop.f32.mrb[10].mxu0  ;;  %v631_v31 = vpop.f32.mrb[10].mxu1 }
 0x120   : > { %v679_v32 = vmax.f32 %v565_v26, 0.0  ;;  %v695_v33 = vmax.f32 %v629_v27, 0.0  ;;  %v568_v34 = vadd.f32 %v1320_v47, %v567_v30  ;;  %v632_v35 = vadd.f32 %v1320_v47, %v631_v31  ;;  %v569_v36 = vpop.f32.mrb[11].mxu0  ;;  %v633_v37 = vpop.f32.mrb[11].mxu1 }
 0x122   : > { %v1035_v38 = vpack.c.bf16 %v679_v32, %v679_v32  ;;  %v1051_v39 = vpack.c.bf16 %v695_v33, %v695_v33  ;;  %v680_v40 = vmax.f32 %v568_v34, 0.0  ;;  %v696_v41 = vmax.f32 %v632_v35, 0.0 }
 0x124   : > { %840 = vst.msk [vmem:[%s1330_s18 + $0x10] sm:$0xf] %vm835_vm2, %v1035_v38  ;;  %856 = vst.msk [vmem:[%s1330_s18 + $0x50] sm:$0xf] %vm835_vm2, %v1051_v39  ;;  %v1036_v42 = vpack.c.bf16 %v680_v40, %v680_v40  ;;  %v1052_v43 = vpack.c.bf16 %v696_v41, %v696_v41 }
 0x125   : > { %v572_v44 = vpop.f32.mrb[12].mxu0  ;;  %v636_v45 = vpop.f32.mrb[12].mxu1 }
 0x126   : > { %841 = vst.msk [vmem:[%s1330_s18 + $0x14] sm:$0xf] %vm835_vm2, %v1036_v42  ;;  %857 = vst.msk [vmem:[%s1330_s18 + $0x54] sm:$0xf] %vm835_vm2, %v1052_v43  ;;  %v573_v46 = vadd.f32 %v1320_v47, %v572_v44  ;;  %v637_v48 = vadd.f32 %v1320_v47, %v636_v45  ;;  %v574_v49 = vpop.f32.mrb[13].mxu0  ;;  %v638_v50 = vpop.f32.mrb[13].mxu1 }
 0x127   : > { %v575_v51 = vpop.f32.mrb[14].mxu0  ;;  %v639_v52 = vpop.f32.mrb[14].mxu1 }
 0x128   : > { %v681_v53 = vmax.f32 %v573_v46, 0.0  ;;  %v697_v54 = vmax.f32 %v637_v48, 0.0  ;;  %v576_v55 = vadd.f32 %v1320_v47, %v575_v51  ;;  %v640_v56 = vadd.f32 %v1320_v47, %v639_v52  ;;  %v577_v57 = vpop.f32.mrb[15].mxu0  ;;  %v641_v58 = vpop.f32.mrb[15].mxu1 }
 0x12a   : > { %v1037_v59 = vpack.c.bf16 %v681_v53, %v681_v53  ;;  %v1053_v60 = vpack.c.bf16 %v697_v54, %v697_v54  ;;  %v682_v61 = vmax.f32 %v576_v55, 0.0  ;;  %v698_v62 = vmax.f32 %v640_v56, 0.0 }
 0x12c   : > { %842 = vst.msk [vmem:[%s1330_s18 + $0x18] sm:$0xf] %vm835_vm2, %v1037_v59  ;;  %858 = vst.msk [vmem:[%s1330_s18 + $0x58] sm:$0xf] %vm835_vm2, %v1053_v60  ;;  %v1038_v63 = vpack.c.bf16 %v682_v61, %v682_v61  ;;  %v1054_v0 = vpack.c.bf16 %v698_v62, %v698_v62 }
 0x12d   : > { %v580_v1 = vpop.f32.mrb[16].mxu0  ;;  %v644_v2 = vpop.f32.mrb[16].mxu1 }
 0x12e   : > { %843 = vst.msk [vmem:[%s1330_s18 + $0x1c] sm:$0xf] %vm835_vm2, %v1038_v63  ;;  %859 = vst.msk [vmem:[%s1330_s18 + $0x5c] sm:$0xf] %vm835_vm2, %v1054_v0  ;;  %v581_v3 = vadd.f32 %v1320_v47, %v580_v1  ;;  %v645_v4 = vadd.f32 %v1320_v47, %v644_v2  ;;  %v582_v5 = vpop.f32.mrb[17].mxu0  ;;  %v646_v6 = vpop.f32.mrb[17].mxu1 }
 0x12f   : > { %v583_v7 = vpop.f32.mrb[18].mxu0  ;;  %v647_v8 = vpop.f32.mrb[18].mxu1 }
 0x130   : > { %v683_v9 = vmax.f32 %v581_v3, 0.0  ;;  %v699_v10 = vmax.f32 %v645_v4, 0.0  ;;  %v584_v11 = vadd.f32 %v1320_v47, %v583_v7  ;;  %v648_v12 = vadd.f32 %v1320_v47, %v647_v8  ;;  %v585_v13 = vpop.f32.mrb[19].mxu0  ;;  %v649_v14 = vpop.f32.mrb[19].mxu1 }
 0x132   : > { %v1039_v15 = vpack.c.bf16 %v683_v9, %v683_v9  ;;  %v1055_v16 = vpack.c.bf16 %v699_v10, %v699_v10  ;;  %v684_v17 = vmax.f32 %v584_v11, 0.0  ;;  %v700_v18 = vmax.f32 %v648_v12, 0.0 }
 0x134   : > { %844 = vst.msk [vmem:[%s1330_s18 + $0x20] sm:$0xf] %vm835_vm2, %v1039_v15  ;;  %860 = vst.msk [vmem:[%s1330_s18 + $0x60] sm:$0xf] %vm835_vm2, %v1055_v16  ;;  %v1040_v19 = vpack.c.bf16 %v684_v17, %v684_v17  ;;  %v1056_v20 = vpack.c.bf16 %v700_v18, %v700_v18 }
 0x135   : > { %v588_v21 = vpop.f32.mrb[20].mxu0  ;;  %v652_v22 = vpop.f32.mrb[20].mxu1 }
 0x136   : > { %845 = vst.msk [vmem:[%s1330_s18 + $0x24] sm:$0xf] %vm835_vm2, %v1040_v19  ;;  %861 = vst.msk [vmem:[%s1330_s18 + $0x64] sm:$0xf] %vm835_vm2, %v1056_v20  ;;  %v589_v23 = vadd.f32 %v1320_v47, %v588_v21  ;;  %v653_v24 = vadd.f32 %v1320_v47, %v652_v22  ;;  %v590_v25 = vpop.f32.mrb[21].mxu0  ;;  %v654_v26 = vpop.f32.mrb[21].mxu1 }
 0x137   : > { %v591_v27 = vpop.f32.mrb[22].mxu0  ;;  %v655_v28 = vpop.f32.mrb[22].mxu1 }
 0x138   : > { %v685_v29 = vmax.f32 %v589_v23, 0.0  ;;  %v701_v30 = vmax.f32 %v653_v24, 0.0  ;;  %v592_v31 = vadd.f32 %v1320_v47, %v591_v27  ;;  %v656_v32 = vadd.f32 %v1320_v47, %v655_v28  ;;  %v593_v33 = vpop.f32.mrb[23].mxu0  ;;  %v657_v34 = vpop.f32.mrb[23].mxu1 }
 0x13a   : > { %v1041_v35 = vpack.c.bf16 %v685_v29, %v685_v29  ;;  %v1057_v36 = vpack.c.bf16 %v701_v30, %v701_v30  ;;  %v686_v37 = vmax.f32 %v592_v31, 0.0  ;;  %v702_v38 = vmax.f32 %v656_v32, 0.0 }
 0x13c   : > { %846 = vst.msk [vmem:[%s1330_s18 + $0x28] sm:$0xf] %vm835_vm2, %v1041_v35  ;;  %862 = vst.msk [vmem:[%s1330_s18 + $0x68] sm:$0xf] %vm835_vm2, %v1057_v36  ;;  %v1042_v39 = vpack.c.bf16 %v686_v37, %v686_v37  ;;  %v1058_v40 = vpack.c.bf16 %v702_v38, %v702_v38 }
 0x13d   : > { %v596_v41 = vpop.f32.mrb[24].mxu0  ;;  %v660_v42 = vpop.f32.mrb[24].mxu1 }
 0x13e   : > { %847 = vst.msk [vmem:[%s1330_s18 + $0x2c] sm:$0xf] %vm835_vm2, %v1042_v39  ;;  %863 = vst.msk [vmem:[%s1330_s18 + $0x6c] sm:$0xf] %vm835_vm2, %v1058_v40  ;;  %v597_v43 = vadd.f32 %v1320_v47, %v596_v41  ;;  %v661_v44 = vadd.f32 %v1320_v47, %v660_v42  ;;  %v598_v45 = vpop.f32.mrb[25].mxu0  ;;  %v662_v46 = vpop.f32.mrb[25].mxu1 }
 0x13f   : > { %v599_v48 = vpop.f32.mrb[26].mxu0  ;;  %v663_v49 = vpop.f32.mrb[26].mxu1 }
 0x140   : > { %v687_v50 = vmax.f32 %v597_v43, 0.0  ;;  %v703_v51 = vmax.f32 %v661_v44, 0.0  ;;  %v600_v52 = vadd.f32 %v1320_v47, %v599_v48  ;;  %v664_v53 = vadd.f32 %v1320_v47, %v663_v49  ;;  %v601_v54 = vpop.f32.mrb[27].mxu0  ;;  %v665_v55 = vpop.f32.mrb[27].mxu1 }
 0x142   : > { %v1043_v56 = vpack.c.bf16 %v687_v50, %v687_v50  ;;  %v1059_v57 = vpack.c.bf16 %v703_v51, %v703_v51  ;;  %v688_v58 = vmax.f32 %v600_v52, 0.0  ;;  %v704_v59 = vmax.f32 %v664_v53, 0.0 }
 0x144   : > { %848 = vst.msk [vmem:[%s1330_s18 + $0x30] sm:$0xf] %vm835_vm2, %v1043_v56  ;;  %864 = vst.msk [vmem:[%s1330_s18 + $0x70] sm:$0xf] %vm835_vm2, %v1059_v57  ;;  %v1044_v60 = vpack.c.bf16 %v688_v58, %v688_v58  ;;  %v1060_v61 = vpack.c.bf16 %v704_v59, %v704_v59 }
 0x145   : > { %v604_v62 = vpop.f32.mrb[28].mxu0  ;;  %v668_v63 = vpop.f32.mrb[28].mxu1 }
 0x146   : > { %849 = vst.msk [vmem:[%s1330_s18 + $0x34] sm:$0xf] %vm835_vm2, %v1044_v60  ;;  %865 = vst.msk [vmem:[%s1330_s18 + $0x74] sm:$0xf] %vm835_vm2, %v1060_v61  ;;  %v605_v0 = vadd.f32 %v1320_v47, %v604_v62  ;;  %v669_v1 = vadd.f32 %v1320_v47, %v668_v63  ;;  %v606_v2 = vpop.f32.mrb[29].mxu0  ;;  %v670_v3 = vpop.f32.mrb[29].mxu1 }
 0x147   : > { %v607_v4 = vpop.f32.mrb[30].mxu0  ;;  %v671_v5 = vpop.f32.mrb[30].mxu1 }
 0x148   : > { %v689_v6 = vmax.f32 %v605_v0, 0.0  ;;  %v705_v7 = vmax.f32 %v669_v1, 0.0  ;;  %v608_v8 = vadd.f32 %v1320_v47, %v607_v4  ;;  %v672_v9 = vadd.f32 %v1320_v47, %v671_v5  ;;  %v609_v10 = vpop.f32.mrb[31].mxu0  ;;  %v673_v11 = vpop.f32.mrb[31].mxu1 }
 0x14a   : > { %v1045_v12 = vpack.c.bf16 %v689_v6, %v689_v6  ;;  %v1061_v13 = vpack.c.bf16 %v705_v7, %v705_v7  ;;  %v690_v14 = vmax.f32 %v608_v8, 0.0  ;;  %v706_v15 = vmax.f32 %v672_v9, 0.0 }
 0x14c   : > { %850 = vst.msk [vmem:[%s1330_s18 + $0x38] sm:$0xf] %vm835_vm2, %v1045_v12  ;;  %866 = vst.msk [vmem:[%s1330_s18 + $0x78] sm:$0xf] %vm835_vm2, %v1061_v13  ;;  %v1046_v16 = vpack.c.bf16 %v690_v14, %v690_v14  ;;  %v1062_v17 = vpack.c.bf16 %v706_v15, %v706_v15 }
 0x14e   : > { %851 = vst.msk [vmem:[%s1330_s18 + $0x3c] sm:$0xf] %vm835_vm2, %v1046_v16  ;;  %867 = vst.msk [vmem:[%s1330_s18 + $0x7c] sm:$0xf] %vm835_vm2, %v1062_v17 }
 0x14f PF: > { %s13_s12 = sadd.s32 1, %s1165_s12  }
 0x150   : > { %p10_p4 = scmp.ge.s32.totalorder %s13_s12, 4  }
 0x152   :  { %12 = sbr.rel (!%p10_p4) target bundleno = 1 (0x1), region = 62 }

// kernel: resnet_generator_forward.16
= control target key start
LH: loop header
LB: loop body
LE: loop exit
PB: predicated region body
PF: predicated region fallthrough
CT: control target
= control target key end

     0   :  { %vm558_vm0 = vcmask 523264   ;;  %s1733_s1 = inlined_call_operand.vmem [shape: bf16[576,128], index: 1, kind: input, shape index: {}]   ;;  %s1734_s0 = inlined_call_operand.vmem [shape: bf16[128,576], index: 0, kind: input, shape index: {}]   ;;  %s1735_s2 = inlined_call_operand.vmem [shape: f32[1,128], index: 2, kind: input, shape index: {}]   ;;  %s1736_s3 = inlined_call_operand.vmem [shape: bf16[128,128], index: 3, kind: output, shape index: {}]  }
   0x1   :  { %v1310_v0 = vld [vmem:[%s1733_s1 + $0x40] sm:$0xff]   ;;  %v1314_v4 = vld [vmem:[%s1733_s1 + $0x48] sm:$0xff]   ;;  %v1318_v8 = vld [vmem:[%s1733_s1 + $0x50] sm:$0xff]  }
   0x2   :  { %v1311_v1 = vld [vmem:[%s1733_s1 + $0xc0] sm:$0xff]   ;;  %1138 = vmatprep.subr.bf16.mxu0 %v1310_v0  ;;  %v1315_v5 = vld [vmem:[%s1733_s1 + $0xc8] sm:$0xff]   ;;  %v1319_v9 = vld [vmem:[%s1733_s1 + $0xd0] sm:$0xff]  }
   0x3   :  { %v1312_v2 = vld [vmem:[%s1733_s1] sm:$0xff]   ;;  %1202 = vmatprep.subr.bf16.mxu1 %v1311_v1  ;;  %v1316_v6 = vld [vmem:[%s1733_s1 + $0x8] sm:$0xff]   ;;  %v1320_v10 = vld [vmem:[%s1733_s1 + $0x10] sm:$0xff]  }
   0x4   :  { %v1313_v3 = vld [vmem:[%s1733_s1 + $0x80] sm:$0xff]   ;;  %1139 = vmatpush3.bf16.msra.mxu0 %v1312_v2  ;;  %v1317_v7 = vld [vmem:[%s1733_s1 + $0x88] sm:$0xff]   ;;  %v1321_v11 = vld [vmem:[%s1733_s1 + $0x90] sm:$0xff]  }
   0x5   :  { %1203 = vmatpush3.bf16.msra.mxu1 %v1313_v3  ;;  %1140 = vmatprep.subr.bf16.mxu0 %v1314_v4  ;;  %v1322_v12 = vld [vmem:[%s1733_s1 + $0x58] sm:$0xff]   ;;  %v1326_v16 = vld [vmem:[%s1733_s1 + $0x60] sm:$0xff]   ;;  %v1330_v20 = vld [vmem:[%s1733_s1 + $0x68] sm:$0xff]  }
   0x6   :  { %1204 = vmatprep.subr.bf16.mxu1 %v1315_v5  ;;  %v1323_v13 = vld [vmem:[%s1733_s1 + $0xd8] sm:$0xff]   ;;  %v1327_v17 = vld [vmem:[%s1733_s1 + $0xe0] sm:$0xff]   ;;  %v1331_v21 = vld [vmem:[%s1733_s1 + $0xe8] sm:$0xff]  }
   0x7   :  { %v1324_v14 = vld [vmem:[%s1733_s1 + $0x18] sm:$0xff]   ;;  %v1328_v18 = vld [vmem:[%s1733_s1 + $0x20] sm:$0xff]   ;;  %v1332_v22 = vld [vmem:[%s1733_s1 + $0x28] sm:$0xff]  }
   0x8   :  { %1141 = vmatpush3.bf16.msra.mxu0 %v1316_v6  ;;  %v1325_v15 = vld [vmem:[%s1733_s1 + $0x98] sm:$0xff]   ;;  %v1329_v19 = vld [vmem:[%s1733_s1 + $0xa0] sm:$0xff]   ;;  %v1333_v23 = vld [vmem:[%s1733_s1 + $0xa8] sm:$0xff]  }
   0x9   :  { %1205 = vmatpush3.bf16.msra.mxu1 %v1317_v7  ;;  %1142 = vmatprep.subr.bf16.mxu0 %v1318_v8  ;;  %v1334_v24 = vld [vmem:[%s1733_s1 + $0x70] sm:$0xff]   ;;  %v1338_v28 = vld [vmem:[%s1733_s1 + $0x78] sm:$0xff]   ;;  %v1347_v35 = vld [vmem:[%s1734_s0 + $0xc] ss:$20 sps:$4 sm:$0xff]  }
   0xa   :  { %1206 = vmatprep.subr.bf16.mxu1 %v1319_v9  ;;  %v1335_v25 = vld [vmem:[%s1733_s1 + $0xf0] sm:$0xff]   ;;  %v1339_v29 = vld [vmem:[%s1733_s1 + $0xf8] sm:$0xff]   ;;  %v1348_v36 = vld [vmem:[%s1733_s1 + $0x100] sm:$0xff]   ;;  %712 = vmatprep.mubr.bf16.mxu1 %v1347_v35 }
   0xb   :  { %v1336_v26 = vld [vmem:[%s1733_s1 + $0x30] sm:$0xff]   ;;  %v1340_v30 = vld [vmem:[%s1733_s1 + $0x38] sm:$0xff]   ;;  %v1349_v37 = vld [vmem:[%s1734_s0 + $0x2c] ss:$20 sps:$4 sm:$0xff]  }
   0xc   :  { %1143 = vmatpush3.bf16.msra.mxu0 %v1320_v10  ;;  %v1337_v27 = vld [vmem:[%s1733_s1 + $0xb0] sm:$0xff]   ;;  %v1341_v31 = vld [vmem:[%s1733_s1 + $0xb8] sm:$0xff]   ;;  %v1361_v42 = vld [vmem:[%s1733_s1 + $0x108] sm:$0xff]  }
   0xd   :  { %1207 = vmatpush3.bf16.msra.mxu1 %v1321_v11  ;;  %1144 = vmatprep.subr.bf16.mxu0 %v1322_v12  ;;  %v1342_v32 = vld [vmem:[%s1734_s0] ss:$20 sps:$4 sm:$0xff]   ;;  %v1344_v33 = vld [vmem:[%s1734_s0 + $0x4] ss:$20 sps:$4 sm:$0xff]   ;;  %v1345_v34 = vld [vmem:[%s1734_s0 + $0x8] ss:$20 sps:$4 sm:$0xff]  }
   0xe   :  { %1208 = vmatprep.subr.bf16.mxu1 %v1323_v13  ;;  %615 = vmatprep.mubr.bf16.mxu0 %v1344_v33  ;;  %v1351_v38 = vld [vmem:[%s1734_s0 + $0x34] ss:$20 sps:$4 sm:$0xff]   ;;  %v1354_v40 = vld [vmem:[%s1734_s0 + $0x30] ss:$20 sps:$4 sm:$0xff]   ;;  %v1360_v45 = vld [vmem:[%s1734_s0 + $0x58] ss:$20 sps:$4 sm:$0xff]  }
   0xf   :  { %v1353_v39 = vld [vmem:[%s1734_s0 + $0x28] ss:$20 sps:$4 sm:$0xff]   ;;  %v1359_v44 = vld [vmem:[%s1734_s0 + $0x50] ss:$20 sps:$4 sm:$0xff]   ;;  %v1366_v50 = vld [vmem:[%s1734_s0 + $0x78] ss:$20 sps:$4 sm:$0xff]  }
  0x10   :  { %1145 = vmatpush3.bf16.msra.mxu0 %v1324_v14  ;;  %v1355_v41 = vld [vmem:[%s1734_s0 + $0x54] ss:$20 sps:$4 sm:$0xff]   ;;  %v1357_v43 = vld [vmem:[%s1734_s0 + $0x5c] ss:$20 sps:$4 sm:$0xff]   ;;  %v1364_v48 = vld [vmem:[%s1734_s0 + $0x84] ss:$20 sps:$4 sm:$0xff]  }
  0x11   :  { %1209 = vmatpush3.bf16.msra.mxu1 %v1325_v15  ;;  %1146 = vmatprep.subr.bf16.mxu0 %v1326_v16  ;;  %v1374_v46 = vld [vmem:[%s1733_s1 + $0x110] sm:$0xff]   ;;  %v1387_v49 = vld [vmem:[%s1733_s1 + $0x118] sm:$0xff]   ;;  %v1370_v53 = vld [vmem:[%s1734_s0 + $0xac] ss:$20 sps:$4 sm:$0xff]  }
  0x12   :  { %1210 = vmatprep.subr.bf16.mxu1 %v1327_v17  ;;  %v1362_v47 = vld [vmem:[%s1734_s0 + $0x7c] ss:$20 sps:$4 sm:$0xff]   ;;  %v1367_v51 = vld [vmem:[%s1734_s0 + $0x80] ss:$20 sps:$4 sm:$0xff]   ;;  %v1368_v52 = vld [vmem:[%s1734_s0 + $0xa4] ss:$20 sps:$4 sm:$0xff]  }
  0x13   :  { %v1372_v54 = vld [vmem:[%s1734_s0 + $0xa0] ss:$20 sps:$4 sm:$0xff]   ;;  %v1373_v55 = vld [vmem:[%s1734_s0 + $0xa8] ss:$20 sps:$4 sm:$0xff]   ;;  %v1380_v59 = vld [vmem:[%s1734_s0 + $0xd0] ss:$20 sps:$4 sm:$0xff]  }
  0x14   :  { %1147 = vmatpush3.bf16.msra.mxu0 %v1328_v18  ;;  %v1375_v56 = vld [vmem:[%s1734_s0 + $0xcc] ss:$20 sps:$4 sm:$0xff]   ;;  %v1377_v57 = vld [vmem:[%s1734_s0 + $0xd4] ss:$20 sps:$4 sm:$0xff]   ;;  %v1383_v61 = vld [vmem:[%s1734_s0 + $0xfc] ss:$20 sps:$4 sm:$0xff]  }
  0x15   :  { %1211 = vmatpush3.bf16.msra.mxu1 %v1329_v19  ;;  %1148 = vmatprep.subr.bf16.mxu0 %v1330_v20  ;;  %v1379_v58 = vld [vmem:[%s1734_s0 + $0xc8] ss:$20 sps:$4 sm:$0xff]   ;;  %v1385_v62 = vld [vmem:[%s1734_s0 + $0xf0] ss:$20 sps:$4 sm:$0xff]   ;;  %v1386_v63 = vld [vmem:[%s1734_s0 + $0xf8] ss:$20 sps:$4 sm:$0xff]  }
  0x16   :  { %1212 = vmatprep.subr.bf16.mxu1 %v1331_v21  ;;  %v1381_v60 = vld [vmem:[%s1734_s0 + $0xf4] ss:$20 sps:$4 sm:$0xff]   ;;  %v1388_v0 = vld [vmem:[%s1734_s0 + $0x11c] ss:$20 sps:$4 sm:$0xff]   ;;  %v1390_v1 = vld [vmem:[%s1734_s0 + $0x124] ss:$20 sps:$4 sm:$0xff]  }
  0x17   :  { %v1392_v2 = vld [vmem:[%s1734_s0 + $0x118] ss:$20 sps:$4 sm:$0xff]   ;;  %v1393_v3 = vld [vmem:[%s1734_s0 + $0x120] ss:$20 sps:$4 sm:$0xff]   ;;  %v1394_v4 = vld [vmem:[%s1734_s0 + $0x10] ss:$20 sps:$4 sm:$0xff]  }
  0x18   :  { %1149 = vmatpush3.bf16.msra.mxu0 %v1332_v22  ;;  %v1395_v5 = vld [vmem:[%s1734_s0 + $0xb0] ss:$20 sps:$4 sm:$0xff]   ;;  %v1396_v6 = vld [vmem:[%s1734_s0 + $0x38] ss:$20 sps:$4 sm:$0xff]   ;;  %v1398_v8 = vld [vmem:[%s1734_s0 + $0x60] ss:$20 sps:$4 sm:$0xff]  }
  0x19   :  { %1213 = vmatpush3.bf16.msra.mxu1 %v1333_v23  ;;  %1150 = vmatprep.subr.bf16.mxu0 %v1334_v24  ;;  %v1397_v7 = vld [vmem:[%s1734_s0 + $0xd8] ss:$20 sps:$4 sm:$0xff]   ;;  %v1399_v9 = vld [vmem:[%s1734_s0 + $0x100] ss:$20 sps:$4 sm:$0xff]   ;;  %v1400_v10 = vld [vmem:[%s1734_s0 + $0x88] ss:$20 sps:$4 sm:$0xff]  }
  0x1a   :  { %1214 = vmatprep.subr.bf16.mxu1 %v1335_v25  ;;  %v1401_v11 = vld [vmem:[%s1734_s0 + $0x128] ss:$20 sps:$4 sm:$0xff]   ;;  %v1661_v14 = vld [vmem:[%s1735_s2] ss:$0 sm:$0xff] }
  0x1c   :  { %1151 = vmatpush3.bf16.msra.mxu0 %v1336_v26 }
  0x1d   :  { %1215 = vmatpush3.bf16.msra.mxu1 %v1337_v27  ;;  %1152 = vmatprep.subr.bf16.mxu0 %v1338_v28 }
  0x1e   :  { %1216 = vmatprep.subr.bf16.mxu1 %v1339_v29 }
  0x20   :  { %1153 = vmatpush3.bf16.msra.mxu0 %v1340_v30 }
  0x21   :  { %1217 = vmatpush3.bf16.msra.mxu1 %v1341_v31  ;;  %1278 = vmatprep.subr.bf16.mxu0 %v1348_v36 }
  0x22   :  { %1302 = vmatprep.subr.bf16.mxu1 %v1348_v36 }
  0x23   :  { %616 = vmatmul.mubr.bf16.vlgmr.msra.gmra.mrb[0].mxu0 %v1342_v32 }
  0x24   :  { %713 = vmatmul.mubr.bf16.vlgmr.msra.gmra.mrb[0].mxu1 %v1345_v34  ;;  %1279 = vmatpush3.bf16.msra.mxu0 %v1348_v36 }
  0x25   :  { %1306 = vmatpush3.bf16.msra.mxu1 %v1348_v36  ;;  %623 = vmatprep.mubr.bf16.mxu0 %v1349_v37 }
  0x26   :  { %720 = vmatprep.mubr.bf16.mxu1 %v1351_v38  ;;  %1280 = vmatprep.subr.bf16.mxu0 %v1361_v42 }
  0x27   :  { %1303 = vmatprep.subr.bf16.mxu1 %v1361_v42 }
  0x28   :  { %1281 = vmatpush3.bf16.msra.mxu0 %v1361_v42 }
  0x29   :  { %1307 = vmatpush3.bf16.msra.mxu1 %v1361_v42  ;;  %1282 = vmatprep.subr.bf16.mxu0 %v1374_v46 }
  0x2a   :  { %1304 = vmatprep.subr.bf16.mxu1 %v1374_v46 }
  0x2b   :  { %624 = vmatmul.mubr.bf16.gmra.mrb[4].mxu0 %v1353_v39 }
  0x2c   :  { %721 = vmatmul.mubr.bf16.gmra.mrb[4].mxu1 %v1354_v40  ;;  %631 = vmatprep.mubr.bf16.mxu0 %v1355_v41 }
  0x2d   :  { %728 = vmatprep.mubr.bf16.mxu1 %v1357_v43  ;;  %1283 = vmatpush3.bf16.msra.mxu0 %v1374_v46 }
  0x2e   :  { %1308 = vmatpush3.bf16.msra.mxu1 %v1374_v46  ;;  %1284 = vmatprep.subr.bf16.mxu0 %v1387_v49 }
  0x2f   :  { %1305 = vmatprep.subr.bf16.mxu1 %v1387_v49 }
  0x31   :  { %1285 = vmatpush3.bf16.msra.mxu0 %v1387_v49 }
  0x32   :  { %1309 = vmatpush3.bf16.msra.mxu1 %v1387_v49 }
  0x33   :  { %632 = vmatmul.mubr.bf16.gmra.mrb[8].mxu0 %v1359_v44 }
  0x34   :  { %729 = vmatmul.mubr.bf16.gmra.mrb[8].mxu1 %v1360_v45  ;;  %639 = vmatprep.mubr.bf16.mxu0 %v1362_v47 }
  0x35   :  { %736 = vmatprep.mubr.bf16.mxu1 %v1364_v48 }
  0x3b   :  { %640 = vmatmul.mubr.bf16.gmra.mrb[12].mxu0 %v1366_v50 }
  0x3c   :  { %737 = vmatmul.mubr.bf16.gmra.mrb[12].mxu1 %v1367_v51  ;;  %647 = vmatprep.mubr.bf16.mxu0 %v1368_v52 }
  0x3d   :  { %744 = vmatprep.mubr.bf16.mxu1 %v1370_v53 }
  0x43   :  { %648 = vmatmul.mubr.bf16.gmra.mrb[16].mxu0 %v1372_v54 }
  0x44   :  { %745 = vmatmul.mubr.bf16.gmra.mrb[16].mxu1 %v1373_v55  ;;  %655 = vmatprep.mubr.bf16.mxu0 %v1375_v56 }
  0x45   :  { %752 = vmatprep.mubr.bf16.mxu1 %v1377_v57 }
  0x4b   :  { %656 = vmatmul.mubr.bf16.gmra.mrb[20].mxu0 %v1379_v58 }
  0x4c   :  { %753 = vmatmul.mubr.bf16.gmra.mrb[20].mxu1 %v1380_v59  ;;  %663 = vmatprep.mubr.bf16.mxu0 %v1381_v60 }
  0x4d   :  { %760 = vmatprep.mubr.bf16.mxu1 %v1383_v61 }
  0x53   :  { %664 = vmatmul.mubr.bf16.gmra.mrb[24].mxu0 %v1385_v62 }
  0x54   :  { %761 = vmatmul.mubr.bf16.gmra.mrb[24].mxu1 %v1386_v63  ;;  %671 = vmatprep.mubr.bf16.mxu0 %v1388_v0 }
  0x55   :  { %768 = vmatprep.mubr.bf16.mxu1 %v1390_v1 }
  0x5b   :  { %672 = vmatmul.mubr.bf16.gmra.mrb[28].mxu0 %v1392_v2 }
  0x5c   :  { %769 = vmatmul.mubr.bf16.gmra.mrb[28].mxu1 %v1393_v3  ;;  %1286 = vmatprep.mubr.msk.bf16.mxu0 %vm558_vm0, %v1394_v4 }
  0x5d   :  { %1294 = vmatprep.mubr.msk.bf16.mxu1 %vm558_vm0, %v1395_v5 }
  0x63   :  { %1287 = vmatmul.mubr.msk.bf16.vlgmr.msra.gmra.mrb[32].mxu0 %vm558_vm0, %v1396_v6 }
  0x64   :  { %1295 = vmatmul.mubr.msk.bf16.vlgmr.msra.gmra.mrb[32].mxu1 %vm558_vm0, %v1397_v7  ;;  %1290 = vmatprep.mubr.msk.bf16.mxu0 %vm558_vm0, %v1398_v8 }
  0x65   :  { %1298 = vmatprep.mubr.msk.bf16.mxu1 %vm558_vm0, %v1399_v9 }
  0x6b   :  { %1291 = vmatmul.mubr.msk.bf16.gmra.mrb[36].mxu0 %vm558_vm0, %v1400_v10 }
  0x6c   :  { %1299 = vmatmul.mubr.msk.bf16.gmra.mrb[36].mxu1 %vm558_vm0, %v1401_v11 }
  0xf6   :  { %v1154_v12 = vpop.f32.mrb[0].mxu0 }
  0xf7   :  { %v1218_v13 = vpop.f32.mrb[0].mxu1  ;;  %v1155_v15 = vpop.f32.mrb[1].mxu0 }
  0xf8   :  { %v1156_v16 = vadd.f32 %v1155_v15, %v1154_v12  ;;  %v1219_v17 = vpop.f32.mrb[1].mxu1  ;;  %v1157_v18 = vpop.f32.mrb[2].mxu0 }
  0xf9   :  { %v1220_v19 = vadd.f32 %v1219_v17, %v1218_v13  ;;  %v1221_v20 = vpop.f32.mrb[2].mxu1  ;;  %v1158_v21 = vpop.f32.mrb[3].mxu0 }
  0xfa   :  { %v618_v22 = vadd.f32 %v1156_v16, %v1661_v14  ;;  %v1159_v23 = vadd.f32 %v1158_v21, %v1157_v18  ;;  %v1222_v24 = vpop.f32.mrb[3].mxu1 }
  0xfb   :  { %v1223_v25 = vadd.f32 %v1222_v24, %v1221_v20 }
  0xfc   :  { %v621_v26 = vadd.f32 %v1159_v23, %v1661_v14  ;;  %v1665_v27 = vadd.f32 %v1220_v19, %v618_v22 }
  0xfe   :  { %v1160_v28 = vpop.f32.mrb[4].mxu0  ;;  %v1667_v29 = vadd.f32 %v1223_v25, %v621_v26 }
  0xff   :  { %v1224_v30 = vpop.f32.mrb[4].mxu1  ;;  %v1161_v31 = vpop.f32.mrb[5].mxu0 }
 0x100   :  { %v1162_v32 = vadd.f32 %v1161_v31, %v1160_v28  ;;  %v1225_v33 = vpop.f32.mrb[5].mxu1  ;;  %v1163_v34 = vpop.f32.mrb[6].mxu0 }
 0x101   :  { %v1226_v35 = vadd.f32 %v1225_v33, %v1224_v30  ;;  %v1227_v36 = vpop.f32.mrb[6].mxu1  ;;  %v1164_v37 = vpop.f32.mrb[7].mxu0 }
 0x102   :  { %v626_v38 = vadd.f32 %v1162_v32, %v1661_v14  ;;  %v1165_v39 = vadd.f32 %v1164_v37, %v1163_v34  ;;  %v1228_v40 = vpop.f32.mrb[7].mxu1 }
 0x103   :  { %v1229_v41 = vadd.f32 %v1228_v40, %v1227_v36 }
 0x104   :  { %v629_v42 = vadd.f32 %v1165_v39, %v1661_v14  ;;  %v1671_v43 = vadd.f32 %v1226_v35, %v626_v38 }
 0x106   :  { %v1166_v44 = vpop.f32.mrb[8].mxu0  ;;  %v1673_v45 = vadd.f32 %v1229_v41, %v629_v42 }
 0x107   :  { %v1230_v46 = vpop.f32.mrb[8].mxu1  ;;  %v1167_v47 = vpop.f32.mrb[9].mxu0 }
 0x108   :  { %v1168_v48 = vadd.f32 %v1167_v47, %v1166_v44  ;;  %v1231_v49 = vpop.f32.mrb[9].mxu1  ;;  %v1169_v50 = vpop.f32.mrb[10].mxu0 }
 0x109   :  { %v1232_v51 = vadd.f32 %v1231_v49, %v1230_v46  ;;  %v1233_v52 = vpop.f32.mrb[10].mxu1  ;;  %v1170_v53 = vpop.f32.mrb[11].mxu0 }
 0x10a   :  { %v634_v54 = vadd.f32 %v1168_v48, %v1661_v14  ;;  %v1171_v55 = vadd.f32 %v1170_v53, %v1169_v50  ;;  %v1234_v56 = vpop.f32.mrb[11].mxu1 }
 0x10b   :  { %v1235_v57 = vadd.f32 %v1234_v56, %v1233_v52 }
 0x10c   :  { %v637_v58 = vadd.f32 %v1171_v55, %v1661_v14  ;;  %v1677_v59 = vadd.f32 %v1232_v51, %v634_v54 }
 0x10e   :  { %v1172_v60 = vpop.f32.mrb[12].mxu0  ;;  %v1679_v61 = vadd.f32 %v1235_v57, %v637_v58 }
 0x10f   :  { %v1236_v62 = vpop.f32.mrb[12].mxu1  ;;  %v1173_v63 = vpop.f32.mrb[13].mxu0 }
 0x110   :  { %v1174_v0 = vadd.f32 %v1173_v63, %v1172_v60  ;;  %v1237_v1 = vpop.f32.mrb[13].mxu1  ;;  %v1175_v2 = vpop.f32.mrb[14].mxu0 }
 0x111   :  { %v1238_v3 = vadd.f32 %v1237_v1, %v1236_v62  ;;  %v1239_v4 = vpop.f32.mrb[14].mxu1  ;;  %v1176_v5 = vpop.f32.mrb[15].mxu0 }
 0x112   :  { %v642_v6 = vadd.f32 %v1174_v0, %v1661_v14  ;;  %v1177_v7 = vadd.f32 %v1176_v5, %v1175_v2  ;;  %v1240_v8 = vpop.f32.mrb[15].mxu1 }
 0x113   :  { %v1241_v9 = vadd.f32 %v1240_v8, %v1239_v4 }
 0x114   :  { %v645_v10 = vadd.f32 %v1177_v7, %v1661_v14  ;;  %v1683_v11 = vadd.f32 %v1238_v3, %v642_v6 }
 0x116   :  { %v1178_v12 = vpop.f32.mrb[16].mxu0  ;;  %v1685_v13 = vadd.f32 %v1241_v9, %v645_v10 }
 0x117   :  { %v1242_v15 = vpop.f32.mrb[16].mxu1  ;;  %v1179_v16 = vpop.f32.mrb[17].mxu0 }
 0x118   :  { %v1180_v17 = vadd.f32 %v1179_v16, %v1178_v12  ;;  %v1243_v18 = vpop.f32.mrb[17].mxu1  ;;  %v1181_v19 = vpop.f32.mrb[18].mxu0 }
 0x119   :  { %v1244_v20 = vadd.f32 %v1243_v18, %v1242_v15  ;;  %v1245_v21 = vpop.f32.mrb[18].mxu1  ;;  %v1182_v22 = vpop.f32.mrb[19].mxu0 }
 0x11a   :  { %v650_v23 = vadd.f32 %v1180_v17, %v1661_v14  ;;  %v1183_v24 = vadd.f32 %v1182_v22, %v1181_v19  ;;  %v1246_v25 = vpop.f32.mrb[19].mxu1 }
 0x11b   :  { %v1247_v26 = vadd.f32 %v1246_v25, %v1245_v21 }
 0x11c   :  { %v653_v28 = vadd.f32 %v1183_v24, %v1661_v14  ;;  %v747_v30 = vadd.f32 %v1244_v20, %v650_v23 }
 0x11e   :  { %v1184_v31 = vpop.f32.mrb[20].mxu0  ;;  %v1689_v32 = vadd.f32 %v1247_v26, %v653_v28 }
 0x11f   :  { %v1248_v33 = vpop.f32.mrb[20].mxu1  ;;  %v1185_v34 = vpop.f32.mrb[21].mxu0 }
 0x120   :  { %v1186_v35 = vadd.f32 %v1185_v34, %v1184_v31  ;;  %v1249_v36 = vpop.f32.mrb[21].mxu1  ;;  %v1187_v37 = vpop.f32.mrb[22].mxu0 }
 0x121   :  { %v1250_v38 = vadd.f32 %v1249_v36, %v1248_v33  ;;  %v1251_v39 = vpop.f32.mrb[22].mxu1  ;;  %v1188_v40 = vpop.f32.mrb[23].mxu0 }
 0x122   :  { %v658_v41 = vadd.f32 %v1186_v35, %v1661_v14  ;;  %v1189_v42 = vadd.f32 %v1188_v40, %v1187_v37  ;;  %v1252_v44 = vpop.f32.mrb[23].mxu1 }
 0x123   :  { %v1253_v46 = vadd.f32 %v1252_v44, %v1251_v39 }
 0x124   :  { %v661_v47 = vadd.f32 %v1189_v42, %v1661_v14  ;;  %v755_v48 = vadd.f32 %v1250_v38, %v658_v41 }
 0x126   :  { %v1190_v49 = vpop.f32.mrb[24].mxu0  ;;  %v758_v50 = vadd.f32 %v1253_v46, %v661_v47 }
 0x127   :  { %v1254_v51 = vpop.f32.mrb[24].mxu1  ;;  %v1191_v52 = vpop.f32.mrb[25].mxu0 }
 0x128   :  { %v1192_v53 = vadd.f32 %v1191_v52, %v1190_v49  ;;  %v1255_v54 = vpop.f32.mrb[25].mxu1  ;;  %v1193_v55 = vpop.f32.mrb[26].mxu0 }
 0x129   :  { %v1256_v56 = vadd.f32 %v1255_v54, %v1254_v51  ;;  %v1257_v57 = vpop.f32.mrb[26].mxu1  ;;  %v1194_v58 = vpop.f32.mrb[27].mxu0 }
 0x12a   :  { %v666_v60 = vadd.f32 %v1192_v53, %v1661_v14  ;;  %v1195_v62 = vadd.f32 %v1194_v58, %v1193_v55  ;;  %v1258_v63 = vpop.f32.mrb[27].mxu1 }
 0x12b   :  { %v1259_v0 = vadd.f32 %v1258_v63, %v1257_v57 }
 0x12c   :  { %v669_v1 = vadd.f32 %v1195_v62, %v1661_v14  ;;  %v763_v2 = vadd.f32 %v1256_v56, %v666_v60 }
 0x12e   :  { %v1196_v3 = vpop.f32.mrb[28].mxu0  ;;  %v1695_v4 = vadd.f32 %v1259_v0, %v669_v1 }
 0x12f   :  { %v1260_v5 = vpop.f32.mrb[28].mxu1  ;;  %v1197_v6 = vpop.f32.mrb[29].mxu0 }
 0x130   :  { %v1198_v7 = vadd.f32 %v1197_v6, %v1196_v3  ;;  %v1261_v8 = vpop.f32.mrb[29].mxu1  ;;  %v1199_v9 = vpop.f32.mrb[30].mxu0 }
 0x131   :  { %v1262_v10 = vadd.f32 %v1261_v8, %v1260_v5  ;;  %v1263_v12 = vpop.f32.mrb[30].mxu1  ;;  %v1200_v15 = vpop.f32.mrb[31].mxu0 }
 0x132   :  { %v674_v16 = vadd.f32 %v1198_v7, %v1661_v14  ;;  %v1201_v17 = vadd.f32 %v1200_v15, %v1199_v9  ;;  %v1264_v18 = vpop.f32.mrb[31].mxu1 }
 0x133   :  { %v1265_v19 = vadd.f32 %v1264_v18, %v1263_v12 }
 0x134   :  { %v677_v20 = vadd.f32 %v1201_v17, %v1661_v14  ;;  %v771_v21 = vadd.f32 %v1262_v10, %v674_v16 }
 0x136   :  { %v1288_v22 = vpop.f32.mrb[32].mxu0  ;;  %v774_v23 = vadd.f32 %v1265_v19, %v677_v20 }
 0x137   :  { %v820_v24 = vadd.f32 %v1288_v22, %v1671_v43  ;;  %v1296_v25 = vpop.f32.mrb[32].mxu1  ;;  %v811_v26 = vpop.f32.mrb[33].mxu0 }
 0x138   :  { %v852_v28 = vadd.f32 %v1296_v25, %v755_v48  ;;  %v812_v31 = vadd.f32 %v811_v26, %v1665_v27  ;;  %v843_v33 = vpop.f32.mrb[33].mxu1  ;;  %v1289_v34 = vpop.f32.mrb[34].mxu0 }
 0x139   :  { %v844_v35 = vadd.f32 %v843_v33, %v747_v30  ;;  %v823_v36 = vadd.f32 %v1289_v34, %v1673_v45  ;;  %v1297_v37 = vpop.f32.mrb[34].mxu1  ;;  %v814_v38 = vpop.f32.mrb[35].mxu0  ;;  %v876_v41 = vmax.f32 %v820_v24, 0.0 }
 0x13a   :  { %v855_v39 = vadd.f32 %v1297_v37, %v758_v50  ;;  %v815_v14 = vadd.f32 %v814_v38, %v1667_v29  ;;  %v846_v40 = vpop.f32.mrb[35].mxu1  ;;  %v884_v44 = vmax.f32 %v852_v28, 0.0  ;;  %v874_v46 = vmax.f32 %v812_v31, 0.0 }
 0x13b   :  { %v877_v42 = vmax.f32 %v823_v36, 0.0  ;;  %v847_v43 = vadd.f32 %v846_v40, %v1689_v32  ;;  %v882_v27 = vmax.f32 %v844_v35, 0.0 }
 0x13c   :  { %v885_v47 = vmax.f32 %v855_v39, 0.0  ;;  %v875_v48 = vmax.f32 %v815_v14, 0.0 }
 0x13d   :  { %v1099_v49 = vpack.c.bf16 %v877_v42, %v876_v41  ;;  %v883_v51 = vmax.f32 %v847_v43, 0.0 }
 0x13e   :  { %v1119_v30 = vpack.c.bf16 %v885_v47, %v884_v44  ;;  %v1094_v52 = vpack.c.bf16 %v875_v48, %v874_v46  ;;  %v1292_v45 = vpop.f32.mrb[36].mxu0 }
 0x13f   :  { %1131 = vst [vmem:[%s1736_s3 + $0x8] sm:$0xff] %v1099_v49   ;;  %v1114_v29 = vpack.c.bf16 %v883_v51, %v882_v27  ;;  %v836_v50 = vadd.f32 %v1292_v45, %v1683_v11  ;;  %v1300_v53 = vpop.f32.mrb[36].mxu1  ;;  %v827_v54 = vpop.f32.mrb[37].mxu0 }
 0x140   :  { %1135 = vst [vmem:[%s1736_s3 + $0x28] sm:$0xff] %v1119_v30   ;;  %1095 = vst [vmem:[%s1736_s3] sm:$0xff] %v1094_v52   ;;  %v868_v32 = vadd.f32 %v1300_v53, %v771_v21  ;;  %v828_v55 = vadd.f32 %v827_v54, %v1677_v59  ;;  %v859_v56 = vpop.f32.mrb[37].mxu1  ;;  %v1293_v57 = vpop.f32.mrb[38].mxu0 }
 0x141   :  { %1134 = vst [vmem:[%s1736_s3 + $0x20] sm:$0xff] %v1114_v29   ;;  %v860_v11 = vadd.f32 %v859_v56, %v763_v2  ;;  %v839_v58 = vadd.f32 %v1293_v57, %v1685_v13  ;;  %v1301_v60 = vpop.f32.mrb[38].mxu1  ;;  %v830_v62 = vpop.f32.mrb[39].mxu0  ;;  %v880_v3 = vmax.f32 %v836_v50, 0.0 }
 0x142   :  { %v871_v63 = vadd.f32 %v1301_v60, %v774_v23  ;;  %v831_v0 = vadd.f32 %v830_v62, %v1679_v61  ;;  %v862_v1 = vpop.f32.mrb[39].mxu1  ;;  %v888_v59 = vmax.f32 %v868_v32, 0.0  ;;  %v878_v7 = vmax.f32 %v828_v55, 0.0 }
 0x143   :  { %v881_v5 = vmax.f32 %v839_v58, 0.0  ;;  %v863_v6 = vadd.f32 %v862_v1, %v1695_v4  ;;  %v886_v10 = vmax.f32 %v860_v11, 0.0 }
 0x144   :  { %v889_v8 = vmax.f32 %v871_v63, 0.0  ;;  %v879_v9 = vmax.f32 %v831_v0, 0.0 }
 0x145   :  { %v1109_v12 = vpack.c.bf16 %v881_v5, %v880_v3  ;;  %v887_v15 = vmax.f32 %v863_v6, 0.0 }
 0x146   :  { %v1129_v2 = vpack.c.bf16 %v889_v8, %v888_v59  ;;  %v1104_v16 = vpack.c.bf16 %v879_v9, %v878_v7 }
 0x147   :  { %1133 = vst [vmem:[%s1736_s3 + $0x18] sm:$0xff] %v1109_v12   ;;  %v1124_v13 = vpack.c.bf16 %v887_v15, %v886_v10 }
 0x148   :  { %1137 = vst [vmem:[%s1736_s3 + $0x38] sm:$0xff] %v1129_v2   ;;  %1132 = vst [vmem:[%s1736_s3 + $0x10] sm:$0xff] %v1104_v16  }
 0x149   :  { %1136 = vst [vmem:[%s1736_s3 + $0x30] sm:$0xff] %v1124_v13  }

// kernel: resnet_generator_forward.17
= control target key start
LH: loop header
LB: loop body
LE: loop exit
PB: predicated region body
PF: predicated region fallthrough
CT: control target
= control target key end

     0   :  { %s2299_s1 = inlined_call_operand.vmem [shape: bf16[1152,256], index: 1, kind: input, shape index: {}]   ;;  %s2300_s0 = inlined_call_operand.vmem [shape: bf16[32,1152], index: 0, kind: input, shape index: {}]   ;;  %s2301_s2 = inlined_call_operand.vmem [shape: f32[1,256], index: 2, kind: input, shape index: {}]   ;;  %s2302_s3 = inlined_call_operand.vmem [shape: bf16[32,256], index: 3, kind: output, shape index: {}]  }
   0x1   :  { %v1535_v0 = vld [vmem:[%s2299_s1 + $0x4] ss:$8 sps:$4 sm:$0xff]   ;;  %v1539_v2 = vld [vmem:[%s2299_s1] ss:$8 sps:$4 sm:$0xff]   ;;  %v1541_v4 = vld [vmem:[%s2299_s1 + $0x14] ss:$8 sps:$4 sm:$0xff]  }
   0x2   :  { %v1537_v1 = vld [vmem:[%s2299_s1 + $0x204] ss:$8 sps:$4 sm:$0xff]   ;;  %1003 = vmatprep.subr.bf16.mxu1 %v1535_v0  ;;  %v1540_v3 = vld [vmem:[%s2299_s1 + $0x200] ss:$8 sps:$4 sm:$0xff]   ;;  %v1543_v5 = vld [vmem:[%s2299_s1 + $0x214] ss:$8 sps:$4 sm:$0xff]  }
   0x3   :  { %1109 = vmatprep.subr.bf16.mxu0 %v1537_v1  ;;  %1004 = vmatpush1.bf16.msra.mxu1 %v1539_v2  ;;  %v1545_v6 = vld [vmem:[%s2299_s1 + $0x10] ss:$8 sps:$4 sm:$0xff]   ;;  %v1547_v8 = vld [vmem:[%s2299_s1 + $0x24] ss:$8 sps:$4 sm:$0xff]   ;;  %v1551_v10 = vld [vmem:[%s2299_s1 + $0x20] ss:$8 sps:$4 sm:$0xff]  }
   0x4   :  { %1110 = vmatpush1.bf16.msra.mxu0 %v1540_v3  ;;  %1005 = vmatprep.subr.bf16.mxu1 %v1541_v4  ;;  %v1546_v7 = vld [vmem:[%s2299_s1 + $0x210] ss:$8 sps:$4 sm:$0xff]   ;;  %v1549_v9 = vld [vmem:[%s2299_s1 + $0x224] ss:$8 sps:$4 sm:$0xff]   ;;  %v1552_v11 = vld [vmem:[%s2299_s1 + $0x220] ss:$8 sps:$4 sm:$0xff]  }
   0x5   :  { %1111 = vmatprep.subr.bf16.mxu0 %v1543_v5  ;;  %v1553_v12 = vld [vmem:[%s2299_s1 + $0x34] ss:$8 sps:$4 sm:$0xff]   ;;  %v1557_v14 = vld [vmem:[%s2299_s1 + $0x30] ss:$8 sps:$4 sm:$0xff]   ;;  %v1559_v16 = vld [vmem:[%s2299_s1 + $0x44] ss:$8 sps:$4 sm:$0xff]  }
   0x6   :  { %v1555_v13 = vld [vmem:[%s2299_s1 + $0x234] ss:$8 sps:$4 sm:$0xff]   ;;  %v1558_v15 = vld [vmem:[%s2299_s1 + $0x230] ss:$8 sps:$4 sm:$0xff]   ;;  %v1561_v17 = vld [vmem:[%s2299_s1 + $0x244] ss:$8 sps:$4 sm:$0xff]  }
   0x7   :  { %1006 = vmatpush1.bf16.msra.mxu1 %v1545_v6  ;;  %v1563_v18 = vld [vmem:[%s2299_s1 + $0x40] ss:$8 sps:$4 sm:$0xff]   ;;  %v1565_v20 = vld [vmem:[%s2299_s1 + $0x54] ss:$8 sps:$4 sm:$0xff]   ;;  %v1569_v22 = vld [vmem:[%s2299_s1 + $0x50] ss:$8 sps:$4 sm:$0xff]  }
   0x8   :  { %1112 = vmatpush1.bf16.msra.mxu0 %v1546_v7  ;;  %1007 = vmatprep.subr.bf16.mxu1 %v1547_v8  ;;  %v1564_v19 = vld [vmem:[%s2299_s1 + $0x240] ss:$8 sps:$4 sm:$0xff]   ;;  %v1567_v21 = vld [vmem:[%s2299_s1 + $0x254] ss:$8 sps:$4 sm:$0xff]   ;;  %v1570_v23 = vld [vmem:[%s2299_s1 + $0x250] ss:$8 sps:$4 sm:$0xff]  }
   0x9   :  { %1113 = vmatprep.subr.bf16.mxu0 %v1549_v9  ;;  %v1571_v24 = vld [vmem:[%s2299_s1 + $0x64] ss:$8 sps:$4 sm:$0xff]   ;;  %v1575_v26 = vld [vmem:[%s2299_s1 + $0x60] ss:$8 sps:$4 sm:$0xff]   ;;  %v1577_v28 = vld [vmem:[%s2299_s1 + $0x74] ss:$8 sps:$4 sm:$0xff]  }
   0xa   :  { %v1573_v25 = vld [vmem:[%s2299_s1 + $0x264] ss:$8 sps:$4 sm:$0xff]   ;;  %v1576_v27 = vld [vmem:[%s2299_s1 + $0x260] ss:$8 sps:$4 sm:$0xff]   ;;  %v1579_v29 = vld [vmem:[%s2299_s1 + $0x274] ss:$8 sps:$4 sm:$0xff]  }
   0xb   :  { %1008 = vmatpush1.bf16.msra.mxu1 %v1551_v10  ;;  %v1581_v30 = vld [vmem:[%s2299_s1 + $0x70] ss:$8 sps:$4 sm:$0xff]   ;;  %v1583_v32 = vld [vmem:[%s2299_s1 + $0x84] ss:$8 sps:$4 sm:$0xff]   ;;  %v1587_v34 = vld [vmem:[%s2299_s1 + $0x80] ss:$8 sps:$4 sm:$0xff]  }
   0xc   :  { %1114 = vmatpush1.bf16.msra.mxu0 %v1552_v11  ;;  %1009 = vmatprep.subr.bf16.mxu1 %v1553_v12  ;;  %v1582_v31 = vld [vmem:[%s2299_s1 + $0x270] ss:$8 sps:$4 sm:$0xff]   ;;  %v1585_v33 = vld [vmem:[%s2299_s1 + $0x284] ss:$8 sps:$4 sm:$0xff]   ;;  %v1588_v35 = vld [vmem:[%s2299_s1 + $0x280] ss:$8 sps:$4 sm:$0xff]  }
   0xd   :  { %1115 = vmatprep.subr.bf16.mxu0 %v1555_v13  ;;  %v1589_v36 = vld [vmem:[%s2299_s1 + $0x94] ss:$8 sps:$4 sm:$0xff]   ;;  %v1593_v38 = vld [vmem:[%s2299_s1 + $0x90] ss:$8 sps:$4 sm:$0xff]   ;;  %v1595_v40 = vld [vmem:[%s2299_s1 + $0xa4] ss:$8 sps:$4 sm:$0xff]  }
   0xe   :  { %v1591_v37 = vld [vmem:[%s2299_s1 + $0x294] ss:$8 sps:$4 sm:$0xff]   ;;  %v1594_v39 = vld [vmem:[%s2299_s1 + $0x290] ss:$8 sps:$4 sm:$0xff]   ;;  %v1597_v41 = vld [vmem:[%s2299_s1 + $0x2a4] ss:$8 sps:$4 sm:$0xff]  }
   0xf   :  { %1010 = vmatpush1.bf16.msra.mxu1 %v1557_v14  ;;  %v1599_v42 = vld [vmem:[%s2299_s1 + $0xa0] ss:$8 sps:$4 sm:$0xff]   ;;  %v1601_v44 = vld [vmem:[%s2299_s1 + $0xb4] ss:$8 sps:$4 sm:$0xff]   ;;  %v1605_v46 = vld [vmem:[%s2299_s1 + $0xb0] ss:$8 sps:$4 sm:$0xff]  }
  0x10   :  { %1116 = vmatpush1.bf16.msra.mxu0 %v1558_v15  ;;  %1011 = vmatprep.subr.bf16.mxu1 %v1559_v16  ;;  %v1600_v43 = vld [vmem:[%s2299_s1 + $0x2a0] ss:$8 sps:$4 sm:$0xff]   ;;  %v1603_v45 = vld [vmem:[%s2299_s1 + $0x2b4] ss:$8 sps:$4 sm:$0xff]   ;;  %v1606_v47 = vld [vmem:[%s2299_s1 + $0x2b0] ss:$8 sps:$4 sm:$0xff]  }
  0x11   :  { %1117 = vmatprep.subr.bf16.mxu0 %v1561_v17  ;;  %v1633_v48 = vld [vmem:[%s2300_s0 + $0x4] ss:$36 sps:$4 sm:$0xff]   ;;  %v1639_v51 = vld [vmem:[%s2300_s0 + $0x14] ss:$36 sps:$4 sm:$0xff]  }
  0x12   :  { %v1607_v49 = vld [vmem:[%s2299_s1 + $0xc4] ss:$8 sps:$4 sm:$0xff]   ;;  %1035 = vmatprep.mubr.bf16.mxu1 %v1633_v48  ;;  %v1611_v52 = vld [vmem:[%s2299_s1 + $0xc0] ss:$8 sps:$4 sm:$0xff]   ;;  %v1613_v54 = vld [vmem:[%s2299_s1 + $0xd4] ss:$8 sps:$4 sm:$0xff]   ;;  %1141 = vmatprep.mubr.bf16.mxu0 %v1639_v51 }
  0x13   :  { %1012 = vmatpush1.bf16.msra.mxu1 %v1563_v18  ;;  %v1609_v50 = vld [vmem:[%s2299_s1 + $0x2c4] ss:$8 sps:$4 sm:$0xff]   ;;  %v1612_v53 = vld [vmem:[%s2299_s1 + $0x2c0] ss:$8 sps:$4 sm:$0xff]   ;;  %v1615_v55 = vld [vmem:[%s2299_s1 + $0x2d4] ss:$8 sps:$4 sm:$0xff]  }
  0x14   :  { %1118 = vmatpush1.bf16.msra.mxu0 %v1564_v19  ;;  %1013 = vmatprep.subr.bf16.mxu1 %v1565_v20  ;;  %v1617_v56 = vld [vmem:[%s2299_s1 + $0xd0] ss:$8 sps:$4 sm:$0xff]   ;;  %v1619_v58 = vld [vmem:[%s2299_s1 + $0xe4] ss:$8 sps:$4 sm:$0xff]   ;;  %v1623_v60 = vld [vmem:[%s2299_s1 + $0xe0] ss:$8 sps:$4 sm:$0xff]  }
  0x15   :  { %1119 = vmatprep.subr.bf16.mxu0 %v1567_v21  ;;  %v1618_v57 = vld [vmem:[%s2299_s1 + $0x2d0] ss:$8 sps:$4 sm:$0xff]   ;;  %v1621_v59 = vld [vmem:[%s2299_s1 + $0x2e4] ss:$8 sps:$4 sm:$0xff]   ;;  %v1624_v61 = vld [vmem:[%s2299_s1 + $0x2e0] ss:$8 sps:$4 sm:$0xff]  }
  0x16   :  { %v1625_v62 = vld [vmem:[%s2299_s1 + $0xf4] ss:$8 sps:$4 sm:$0xff]   ;;  %v1629_v0 = vld [vmem:[%s2299_s1 + $0xf0] ss:$8 sps:$4 sm:$0xff]   ;;  %v1636_v2 = vld [vmem:[%s2299_s1 + $0x104] ss:$8 sps:$4 sm:$0xff]  }
  0x17   :  { %1014 = vmatpush1.bf16.msra.mxu1 %v1569_v22  ;;  %v1627_v63 = vld [vmem:[%s2299_s1 + $0x2f4] ss:$8 sps:$4 sm:$0xff]   ;;  %v1630_v1 = vld [vmem:[%s2299_s1 + $0x2f0] ss:$8 sps:$4 sm:$0xff]   ;;  %v1642_v3 = vld [vmem:[%s2299_s1 + $0x304] ss:$8 sps:$4 sm:$0xff]  }
  0x18   :  { %1120 = vmatpush1.bf16.msra.mxu0 %v1570_v23  ;;  %1015 = vmatprep.subr.bf16.mxu1 %v1571_v24  ;;  %v1631_v4 = vld [vmem:[%s2300_s0] ss:$36 sps:$4 sm:$0xff]   ;;  %v1637_v6 = vld [vmem:[%s2300_s0 + $0x10] ss:$36 sps:$4 sm:$0xff]  }
  0x19   :  { %1121 = vmatprep.subr.bf16.mxu0 %v1573_v25  ;;  %v1634_v5 = vld [vmem:[%s2299_s1 + $0x100] ss:$8 sps:$4 sm:$0xff]   ;;  %v1645_v8 = vld [vmem:[%s2299_s1 + $0x114] ss:$8 sps:$4 sm:$0xff]   ;;  %v1643_v10 = vld [vmem:[%s2299_s1 + $0x110] ss:$8 sps:$4 sm:$0xff]  }
  0x1a   :  { %v1640_v7 = vld [vmem:[%s2299_s1 + $0x300] ss:$8 sps:$4 sm:$0xff]   ;;  %v1648_v9 = vld [vmem:[%s2299_s1 + $0x314] ss:$8 sps:$4 sm:$0xff]   ;;  %v1646_v11 = vld [vmem:[%s2299_s1 + $0x310] ss:$8 sps:$4 sm:$0xff]  }
  0x1b   :  { %1016 = vmatpush1.bf16.msra.mxu1 %v1575_v26  ;;  %v1651_v12 = vld [vmem:[%s2299_s1 + $0x124] ss:$8 sps:$4 sm:$0xff]   ;;  %v1649_v14 = vld [vmem:[%s2299_s1 + $0x120] ss:$8 sps:$4 sm:$0xff]   ;;  %v1657_v16 = vld [vmem:[%s2299_s1 + $0x134] ss:$8 sps:$4 sm:$0xff]  }
  0x1c   :  { %1122 = vmatpush1.bf16.msra.mxu0 %v1576_v27  ;;  %1017 = vmatprep.subr.bf16.mxu1 %v1577_v28  ;;  %v1654_v13 = vld [vmem:[%s2299_s1 + $0x324] ss:$8 sps:$4 sm:$0xff]   ;;  %v1652_v15 = vld [vmem:[%s2299_s1 + $0x320] ss:$8 sps:$4 sm:$0xff]   ;;  %v1660_v17 = vld [vmem:[%s2299_s1 + $0x334] ss:$8 sps:$4 sm:$0xff]  }
  0x1d   :  { %1123 = vmatprep.subr.bf16.mxu0 %v1579_v29  ;;  %v1655_v18 = vld [vmem:[%s2299_s1 + $0x130] ss:$8 sps:$4 sm:$0xff]   ;;  %v1663_v20 = vld [vmem:[%s2299_s1 + $0x144] ss:$8 sps:$4 sm:$0xff]   ;;  %v1661_v22 = vld [vmem:[%s2299_s1 + $0x140] ss:$8 sps:$4 sm:$0xff]  }
  0x1e   :  { %v1658_v19 = vld [vmem:[%s2299_s1 + $0x330] ss:$8 sps:$4 sm:$0xff]   ;;  %v1666_v21 = vld [vmem:[%s2299_s1 + $0x344] ss:$8 sps:$4 sm:$0xff]   ;;  %v1664_v23 = vld [vmem:[%s2299_s1 + $0x340] ss:$8 sps:$4 sm:$0xff]  }
  0x1f   :  { %1018 = vmatpush1.bf16.msra.mxu1 %v1581_v30  ;;  %v1669_v24 = vld [vmem:[%s2299_s1 + $0x154] ss:$8 sps:$4 sm:$0xff]   ;;  %v1667_v26 = vld [vmem:[%s2299_s1 + $0x150] ss:$8 sps:$4 sm:$0xff]   ;;  %v1675_v28 = vld [vmem:[%s2299_s1 + $0x164] ss:$8 sps:$4 sm:$0xff]  }
  0x20   :  { %1124 = vmatpush1.bf16.msra.mxu0 %v1582_v31  ;;  %1019 = vmatprep.subr.bf16.mxu1 %v1583_v32  ;;  %v1672_v25 = vld [vmem:[%s2299_s1 + $0x354] ss:$8 sps:$4 sm:$0xff]   ;;  %v1670_v27 = vld [vmem:[%s2299_s1 + $0x350] ss:$8 sps:$4 sm:$0xff]   ;;  %v1725_v31 = vld [vmem:[%s2300_s0 + $0x48] ss:$36 sps:$4 sm:$0xff]  }
  0x21   :  { %1125 = vmatprep.subr.bf16.mxu0 %v1585_v33  ;;  %v1721_v29 = vld [vmem:[%s2300_s0 + $0x4c] ss:$36 sps:$4 sm:$0xff]   ;;  %v1723_v30 = vld [vmem:[%s2300_s0 + $0x5c] ss:$36 sps:$4 sm:$0xff]  }
  0x22   :  { %v1678_v32 = vld [vmem:[%s2299_s1 + $0x364] ss:$8 sps:$4 sm:$0xff]   ;;  %v1729_v33 = vld [vmem:[%s2300_s0 + $0x58] ss:$36 sps:$4 sm:$0xff]  }
  0x23   :  { %1020 = vmatpush1.bf16.msra.mxu1 %v1587_v34  ;;  %v1673_v34 = vld [vmem:[%s2299_s1 + $0x160] ss:$8 sps:$4 sm:$0xff]   ;;  %v1691_v48 = vld [vmem:[%s2299_s1 + $0x190] ss:$8 sps:$4 sm:$0xff]   ;;  %v1702_v51 = vld [vmem:[%s2299_s1 + $0x3a4] ss:$8 sps:$4 sm:$0xff]  }
  0x24   :  { %1126 = vmatpush1.bf16.msra.mxu0 %v1588_v35  ;;  %1021 = vmatprep.subr.bf16.mxu1 %v1589_v36  ;;  %v1676_v35 = vld [vmem:[%s2299_s1 + $0x360] ss:$8 sps:$4 sm:$0xff]   ;;  %v1681_v36 = vld [vmem:[%s2299_s1 + $0x174] ss:$8 sps:$4 sm:$0xff]  }
  0x25   :  { %1127 = vmatprep.subr.bf16.mxu0 %v1591_v37  ;;  %v1684_v37 = vld [vmem:[%s2299_s1 + $0x374] ss:$8 sps:$4 sm:$0xff]  }
  0x27   :  { %1022 = vmatpush1.bf16.msra.mxu1 %v1593_v38  ;;  %v1679_v38 = vld [vmem:[%s2299_s1 + $0x170] ss:$8 sps:$4 sm:$0xff]  }
  0x28   :  { %1128 = vmatpush1.bf16.msra.mxu0 %v1594_v39  ;;  %1023 = vmatprep.subr.bf16.mxu1 %v1595_v40  ;;  %v1682_v39 = vld [vmem:[%s2299_s1 + $0x370] ss:$8 sps:$4 sm:$0xff]   ;;  %v1687_v40 = vld [vmem:[%s2299_s1 + $0x184] ss:$8 sps:$4 sm:$0xff]  }
  0x29   :  { %1129 = vmatprep.subr.bf16.mxu0 %v1597_v41  ;;  %v1741_v41 = vld [vmem:[%s2300_s0 + $0xc] ss:$36 sps:$4 sm:$0xff]  }
  0x2b   :  { %1024 = vmatpush1.bf16.msra.mxu1 %v1599_v42  ;;  %v1690_v42 = vld [vmem:[%s2299_s1 + $0x384] ss:$8 sps:$4 sm:$0xff]  }
  0x2c   :  { %1130 = vmatpush1.bf16.msra.mxu0 %v1600_v43  ;;  %1025 = vmatprep.subr.bf16.mxu1 %v1601_v44  ;;  %v1744_v43 = vld [vmem:[%s2300_s0 + $0x1c] ss:$36 sps:$4 sm:$0xff]  }
  0x2d   :  { %1131 = vmatprep.subr.bf16.mxu0 %v1603_v45  ;;  %v1685_v44 = vld [vmem:[%s2299_s1 + $0x180] ss:$8 sps:$4 sm:$0xff]  }
  0x2e   :  { %v1688_v45 = vld [vmem:[%s2299_s1 + $0x380] ss:$8 sps:$4 sm:$0xff]  }
  0x2f   :  { %1026 = vmatpush1.bf16.msra.mxu1 %v1605_v46  ;;  %v1693_v46 = vld [vmem:[%s2299_s1 + $0x194] ss:$8 sps:$4 sm:$0xff]  }
  0x30   :  { %1132 = vmatpush1.bf16.msra.mxu0 %v1606_v47  ;;  %1027 = vmatprep.subr.bf16.mxu1 %v1607_v49  ;;  %v1696_v47 = vld [vmem:[%s2299_s1 + $0x394] ss:$8 sps:$4 sm:$0xff]   ;;  %v1694_v49 = vld [vmem:[%s2299_s1 + $0x390] ss:$8 sps:$4 sm:$0xff]  }
  0x31   :  { %1133 = vmatprep.subr.bf16.mxu0 %v1609_v50  ;;  %v1699_v50 = vld [vmem:[%s2299_s1 + $0x1a4] ss:$8 sps:$4 sm:$0xff]  }
  0x33   :  { %1028 = vmatpush1.bf16.msra.mxu1 %v1611_v52  ;;  %v1697_v52 = vld [vmem:[%s2299_s1 + $0x1a0] ss:$8 sps:$4 sm:$0xff]  }
  0x34   :  { %1134 = vmatpush1.bf16.msra.mxu0 %v1612_v53  ;;  %1029 = vmatprep.subr.bf16.mxu1 %v1613_v54  ;;  %v1700_v53 = vld [vmem:[%s2299_s1 + $0x3a0] ss:$8 sps:$4 sm:$0xff]   ;;  %v1705_v54 = vld [vmem:[%s2299_s1 + $0x1b4] ss:$8 sps:$4 sm:$0xff]  }
  0x35   :  { %1135 = vmatprep.subr.bf16.mxu0 %v1615_v55  ;;  %v1708_v55 = vld [vmem:[%s2299_s1 + $0x3b4] ss:$8 sps:$4 sm:$0xff]  }
  0x37   :  { %1030 = vmatpush1.bf16.msra.mxu1 %v1617_v56  ;;  %v1703_v56 = vld [vmem:[%s2299_s1 + $0x1b0] ss:$8 sps:$4 sm:$0xff]  }
  0x38   :  { %1136 = vmatpush1.bf16.msra.mxu0 %v1618_v57  ;;  %1031 = vmatprep.subr.bf16.mxu1 %v1619_v58  ;;  %v1706_v57 = vld [vmem:[%s2299_s1 + $0x3b0] ss:$8 sps:$4 sm:$0xff]   ;;  %v1711_v58 = vld [vmem:[%s2299_s1 + $0x1c4] ss:$8 sps:$4 sm:$0xff]  }
  0x39   :  { %1137 = vmatprep.subr.bf16.mxu0 %v1621_v59  ;;  %v1714_v59 = vld [vmem:[%s2299_s1 + $0x3c4] ss:$8 sps:$4 sm:$0xff]  }
  0x3b   :  { %1032 = vmatpush1.bf16.msra.mxu1 %v1623_v60  ;;  %v1709_v60 = vld [vmem:[%s2299_s1 + $0x1c0] ss:$8 sps:$4 sm:$0xff]  }
  0x3c   :  { %1138 = vmatpush1.bf16.msra.mxu0 %v1624_v61  ;;  %1033 = vmatprep.subr.bf16.mxu1 %v1625_v62  ;;  %v1712_v61 = vld [vmem:[%s2299_s1 + $0x3c0] ss:$8 sps:$4 sm:$0xff]   ;;  %v1717_v62 = vld [vmem:[%s2299_s1 + $0x1d4] ss:$8 sps:$4 sm:$0xff]  }
  0x3d   :  { %1139 = vmatprep.subr.bf16.mxu0 %v1627_v63  ;;  %v1720_v63 = vld [vmem:[%s2299_s1 + $0x3d4] ss:$8 sps:$4 sm:$0xff]  }
  0x3f   :  { %1034 = vmatpush1.bf16.msra.mxu1 %v1629_v0  ;;  %v1715_v0 = vld [vmem:[%s2299_s1 + $0x1d0] ss:$8 sps:$4 sm:$0xff]  }
  0x40   :  { %1140 = vmatpush1.bf16.msra.mxu0 %v1630_v1  ;;  %1056 = vmatprep.subr.bf16.mxu1 %v1636_v2  ;;  %v1718_v1 = vld [vmem:[%s2299_s1 + $0x3d0] ss:$8 sps:$4 sm:$0xff]   ;;  %v1728_v2 = vld [vmem:[%s2299_s1 + $0x1e4] ss:$8 sps:$4 sm:$0xff]  }
  0x41   :  { %1162 = vmatprep.subr.bf16.mxu0 %v1642_v3  ;;  %v1732_v3 = vld [vmem:[%s2299_s1 + $0x3e4] ss:$8 sps:$4 sm:$0xff]  }
  0x42   :  { %1036 = vmatmul.mubr.bf16.vlgmr.msra.gmra.mrb[0].mxu1 %v1631_v4  ;;  %v1726_v4 = vld [vmem:[%s2299_s1 + $0x1e0] ss:$8 sps:$4 sm:$0xff]  }
  0x43   :  { %1142 = vmatmul.mubr.bf16.vlgmr.msra.gmra.mrb[0].mxu0 %v1637_v6  ;;  %1057 = vmatpush1.bf16.msra.mxu1 %v1634_v5  ;;  %v1730_v5 = vld [vmem:[%s2299_s1 + $0x3e0] ss:$8 sps:$4 sm:$0xff]   ;;  %v1735_v6 = vld [vmem:[%s2299_s1 + $0x1f4] ss:$8 sps:$4 sm:$0xff]  }
  0x44   :  { %1163 = vmatpush1.bf16.msra.mxu0 %v1640_v7  ;;  %1058 = vmatprep.subr.bf16.mxu1 %v1645_v8  ;;  %v1738_v7 = vld [vmem:[%s2299_s1 + $0x3f4] ss:$8 sps:$4 sm:$0xff]   ;;  %v1733_v8 = vld [vmem:[%s2299_s1 + $0x1f0] ss:$8 sps:$4 sm:$0xff]  }
  0x45   :  { %1164 = vmatprep.subr.bf16.mxu0 %v1648_v9  ;;  %1045 = vmatprep.mubr.bf16.mxu1 %v1721_v29  ;;  %v1736_v9 = vld [vmem:[%s2299_s1 + $0x3f0] ss:$8 sps:$4 sm:$0xff]   ;;  %v1771_v29 = vld [vmem:[%s2299_s1 + $0x464] ss:$8 sps:$4 sm:$0xff]  }
  0x46   :  { %1151 = vmatprep.mubr.bf16.mxu0 %v1723_v30  ;;  %v1769_v30 = vld [vmem:[%s2299_s1 + $0x460] ss:$8 sps:$4 sm:$0xff]  }
  0x47   :  { %1059 = vmatpush1.bf16.msra.mxu1 %v1643_v10  ;;  %v1747_v10 = vld [vmem:[%s2299_s1 + $0x404] ss:$8 sps:$4 sm:$0xff]  }
  0x48   :  { %1165 = vmatpush1.bf16.msra.mxu0 %v1646_v11  ;;  %1060 = vmatprep.subr.bf16.mxu1 %v1651_v12  ;;  %v1739_v11 = vld [vmem:[%s2300_s0 + $0x8] ss:$36 sps:$4 sm:$0xff]   ;;  %v1742_v12 = vld [vmem:[%s2300_s0 + $0x18] ss:$36 sps:$4 sm:$0xff]  }
  0x49   :  { %1166 = vmatprep.subr.bf16.mxu0 %v1654_v13  ;;  %v1745_v13 = vld [vmem:[%s2299_s1 + $0x400] ss:$8 sps:$4 sm:$0xff]  }
  0x4a   :  { %1046 = vmatmul.mubr.bf16.gmra.mrb[4].mxu1 %v1725_v31  ;;  %v1774_v31 = vld [vmem:[%s2299_s1 + $0x474] ss:$8 sps:$4 sm:$0xff]  }
  0x4b   :  { %1061 = vmatpush1.bf16.msra.mxu1 %v1649_v14  ;;  %1152 = vmatmul.mubr.bf16.gmra.mrb[4].mxu0 %v1729_v33  ;;  %v1750_v14 = vld [vmem:[%s2299_s1 + $0x414] ss:$8 sps:$4 sm:$0xff]   ;;  %v1775_v33 = vld [vmem:[%s2300_s0 + $0x20] ss:$36 sps:$4 sm:$0xff]  }
  0x4c   :  { %1167 = vmatpush1.bf16.msra.mxu0 %v1652_v15  ;;  %1062 = vmatprep.subr.bf16.mxu1 %v1657_v16  ;;  %v1751_v15 = vld [vmem:[%s2300_s0 + $0x54] ss:$36 sps:$4 sm:$0xff]   ;;  %v1753_v16 = vld [vmem:[%s2300_s0 + $0x64] ss:$36 sps:$4 sm:$0xff]  }
  0x4d   :  { %1168 = vmatprep.subr.bf16.mxu0 %v1660_v17  ;;  %1088 = vmatprep.mubr.bf16.mxu1 %v1741_v41  ;;  %v1748_v17 = vld [vmem:[%s2299_s1 + $0x410] ss:$8 sps:$4 sm:$0xff]  }
  0x4e   :  { %1194 = vmatprep.mubr.bf16.mxu0 %v1744_v43 }
  0x4f   :  { %1063 = vmatpush1.bf16.msra.mxu1 %v1655_v18  ;;  %v1759_v18 = vld [vmem:[%s2299_s1 + $0x424] ss:$8 sps:$4 sm:$0xff]  }
  0x50   :  { %1169 = vmatpush1.bf16.msra.mxu0 %v1658_v19  ;;  %1064 = vmatprep.subr.bf16.mxu1 %v1663_v20  ;;  %v1755_v19 = vld [vmem:[%s2300_s0 + $0x50] ss:$36 sps:$4 sm:$0xff]   ;;  %v1756_v20 = vld [vmem:[%s2300_s0 + $0x60] ss:$36 sps:$4 sm:$0xff]  }
  0x51   :  { %1170 = vmatprep.subr.bf16.mxu0 %v1666_v21  ;;  %v1757_v21 = vld [vmem:[%s2299_s1 + $0x420] ss:$8 sps:$4 sm:$0xff]  }
  0x53   :  { %1065 = vmatpush1.bf16.msra.mxu1 %v1661_v22  ;;  %v1762_v22 = vld [vmem:[%s2299_s1 + $0x434] ss:$8 sps:$4 sm:$0xff]  }
  0x54   :  { %1171 = vmatpush1.bf16.msra.mxu0 %v1664_v23  ;;  %1066 = vmatprep.subr.bf16.mxu1 %v1669_v24  ;;  %v1760_v23 = vld [vmem:[%s2299_s1 + $0x430] ss:$8 sps:$4 sm:$0xff]   ;;  %v1765_v24 = vld [vmem:[%s2299_s1 + $0x444] ss:$8 sps:$4 sm:$0xff]  }
  0x55   :  { %1172 = vmatprep.subr.bf16.mxu0 %v1672_v25  ;;  %v1777_v25 = vmov 0  }
  0x57   :  { %1067 = vmatpush1.bf16.msra.mxu1 %v1667_v26  ;;  %v1763_v26 = vld [vmem:[%s2299_s1 + $0x440] ss:$8 sps:$4 sm:$0xff]  }
  0x58   :  { %1173 = vmatpush1.bf16.msra.mxu0 %v1670_v27  ;;  %1068 = vmatprep.subr.bf16.mxu1 %v1675_v28  ;;  %v1768_v27 = vld [vmem:[%s2299_s1 + $0x454] ss:$8 sps:$4 sm:$0xff]   ;;  %v1766_v28 = vld [vmem:[%s2299_s1 + $0x450] ss:$8 sps:$4 sm:$0xff]  }
  0x59   :  { %1174 = vmatprep.subr.bf16.mxu0 %v1678_v32  ;;  %v1772_v32 = vld [vmem:[%s2299_s1 + $0x470] ss:$8 sps:$4 sm:$0xff]  }
  0x5b   :  { %1069 = vmatpush1.bf16.msra.mxu1 %v1673_v34  ;;  %v1776_v34 = vld [vmem:[%s2300_s0 + $0x68] ss:$36 sps:$4 sm:$0xff]  }
  0x5c   :  { %1175 = vmatpush1.bf16.msra.mxu0 %v1676_v35  ;;  %1070 = vmatprep.subr.bf16.mxu1 %v1681_v36  ;;  %v181_v35 = vlaneseq }
  0x5d   :  { %1176 = vmatprep.subr.bf16.mxu0 %v1684_v37 }
  0x5e   :  { %v182_v36 = vshrl.u32 %v181_v35, 7 }
  0x5f   :  { %1071 = vmatpush1.bf16.msra.mxu1 %v1679_v38 }
  0x60   :  { %1177 = vmatpush1.bf16.msra.mxu0 %v1682_v39  ;;  %1072 = vmatprep.subr.bf16.mxu1 %v1687_v40  ;;  %v183_v40 = vsub.s32 0, %v182_v36  ;;  %v187_v43 = vsub.s32 1, %v182_v36 }
  0x61   :  { %1178 = vmatprep.subr.bf16.mxu0 %v1690_v42  ;;  %v179_v42 = vld [vmem:[%s2301_s2] sm:$0x3] }
  0x63   :  { %1073 = vmatpush1.bf16.msra.mxu1 %v1685_v44  ;;  %v184_v44 = vrot.slane %v179_v42, %v183_v40 }
  0x64   :  { %1179 = vmatpush1.bf16.msra.mxu0 %v1688_v45  ;;  %1074 = vmatprep.subr.bf16.mxu1 %v1693_v46  ;;  %v188_v45 = vrot.slane %v179_v42, %v187_v43 }
  0x65   :  { %1180 = vmatprep.subr.bf16.mxu0 %v1696_v47 }
  0x67   :  { %1075 = vmatpush1.bf16.msra.mxu1 %v1691_v48 }
  0x68   :  { %1181 = vmatpush1.bf16.msra.mxu0 %v1694_v49  ;;  %1076 = vmatprep.subr.bf16.mxu1 %v1699_v50 }
  0x69   :  { %1182 = vmatprep.subr.bf16.mxu0 %v1702_v51 }
  0x6b   :  { %1077 = vmatpush1.bf16.msra.mxu1 %v1697_v52 }
  0x6c   :  { %1183 = vmatpush1.bf16.msra.mxu0 %v1700_v53  ;;  %1078 = vmatprep.subr.bf16.mxu1 %v1705_v54 }
  0x6d   :  { %1184 = vmatprep.subr.bf16.mxu0 %v1708_v55 }
  0x6f   :  { %1079 = vmatpush1.bf16.msra.mxu1 %v1703_v56 }
  0x70   :  { %1185 = vmatpush1.bf16.msra.mxu0 %v1706_v57  ;;  %1080 = vmatprep.subr.bf16.mxu1 %v1711_v58 }
  0x71   :  { %1186 = vmatprep.subr.bf16.mxu0 %v1714_v59 }
  0x73   :  { %1081 = vmatpush1.bf16.msra.mxu1 %v1709_v60 }
  0x74   :  { %1187 = vmatpush1.bf16.msra.mxu0 %v1712_v61  ;;  %1082 = vmatprep.subr.bf16.mxu1 %v1717_v62 }
  0x75   :  { %1188 = vmatprep.subr.bf16.mxu0 %v1720_v63 }
  0x77   :  { %1083 = vmatpush1.bf16.msra.mxu1 %v1715_v0 }
  0x78   :  { %1189 = vmatpush1.bf16.msra.mxu0 %v1718_v1  ;;  %1084 = vmatprep.subr.bf16.mxu1 %v1728_v2 }
  0x79   :  { %1190 = vmatprep.subr.bf16.mxu0 %v1732_v3 }
  0x7b   :  { %1085 = vmatpush1.bf16.msra.mxu1 %v1726_v4 }
  0x7c   :  { %1191 = vmatpush1.bf16.msra.mxu0 %v1730_v5  ;;  %1086 = vmatprep.subr.bf16.mxu1 %v1735_v6 }
  0x7d   :  { %1192 = vmatprep.subr.bf16.mxu0 %v1738_v7 }
  0x7f   :  { %1087 = vmatpush1.bf16.msra.mxu1 %v1733_v8 }
  0x80   :  { %1193 = vmatpush1.bf16.msra.mxu0 %v1736_v9  ;;  %1478 = vmatprep.subr.bf16.mxu1 %v1747_v10 }
  0x81   :  { %1215 = vmatprep.subr.bf16.mxu0 %v1747_v10 }
  0x82   :  { %1089 = vmatmul.mubr.bf16.vlgmr.msra.gmra.mrb[0].mxu1 %v1739_v11 }
  0x83   :  { %1195 = vmatmul.mubr.bf16.vlgmr.msra.gmra.mrb[0].mxu0 %v1742_v12  ;;  %1486 = vmatpush1.bf16.msra.mxu1 %v1745_v13 }
  0x84   :  { %1216 = vmatpush1.bf16.msra.mxu0 %v1745_v13  ;;  %1479 = vmatprep.subr.bf16.mxu1 %v1750_v14 }
  0x85   :  { %1217 = vmatprep.subr.bf16.mxu0 %v1750_v14  ;;  %1098 = vmatprep.mubr.bf16.mxu1 %v1751_v15 }
  0x86   :  { %1204 = vmatprep.mubr.bf16.mxu0 %v1753_v16 }
  0x87   :  { %1487 = vmatpush1.bf16.msra.mxu1 %v1748_v17 }
  0x88   :  { %1218 = vmatpush1.bf16.msra.mxu0 %v1748_v17  ;;  %1480 = vmatprep.subr.bf16.mxu1 %v1759_v18 }
  0x89   :  { %1219 = vmatprep.subr.bf16.mxu0 %v1759_v18 }
  0x8a   :  { %1099 = vmatmul.mubr.bf16.gmra.mrb[4].mxu1 %v1755_v19 }
  0x8b   :  { %1205 = vmatmul.mubr.bf16.gmra.mrb[4].mxu0 %v1756_v20  ;;  %1488 = vmatpush1.bf16.msra.mxu1 %v1757_v21 }
  0x8c   :  { %1220 = vmatpush1.bf16.msra.mxu0 %v1757_v21  ;;  %1481 = vmatprep.subr.bf16.mxu1 %v1762_v22 }
  0x8d   :  { %1221 = vmatprep.subr.bf16.mxu0 %v1762_v22  ;;  %1247 = vmatprep.mubr.bf16.mxu0 %v1777_v25 }
  0x8e   :  { %1257 = vmatprep.mubr.bf16.mxu1 %v1777_v25 }
  0x8f   :  { %1489 = vmatpush1.bf16.msra.mxu1 %v1760_v23 }
  0x90   :  { %1222 = vmatpush1.bf16.msra.mxu0 %v1760_v23  ;;  %1482 = vmatprep.subr.bf16.mxu1 %v1765_v24 }
  0x91   :  { %1223 = vmatprep.subr.bf16.mxu0 %v1765_v24 }
  0x93   :  { %1490 = vmatpush1.bf16.msra.mxu1 %v1763_v26 }
  0x94   :  { %1224 = vmatpush1.bf16.msra.mxu0 %v1763_v26  ;;  %1483 = vmatprep.subr.bf16.mxu1 %v1768_v27 }
  0x95   :  { %1225 = vmatprep.subr.bf16.mxu0 %v1768_v27 }
  0x97   :  { %1491 = vmatpush1.bf16.msra.mxu1 %v1766_v28 }
  0x98   :  { %1226 = vmatpush1.bf16.msra.mxu0 %v1766_v28  ;;  %1484 = vmatprep.subr.bf16.mxu1 %v1771_v29 }
  0x99   :  { %1227 = vmatprep.subr.bf16.mxu0 %v1771_v29 }
  0x9b   :  { %1492 = vmatpush1.bf16.msra.mxu1 %v1769_v30 }
  0x9c   :  { %1228 = vmatpush1.bf16.msra.mxu0 %v1769_v30  ;;  %1485 = vmatprep.subr.bf16.mxu1 %v1774_v31 }
  0x9d   :  { %1229 = vmatprep.subr.bf16.mxu0 %v1774_v31 }
  0x9f   :  { %1493 = vmatpush1.bf16.msra.mxu1 %v1772_v32 }
  0xa0   :  { %1230 = vmatpush1.bf16.msra.mxu0 %v1772_v32 }
  0xa2   :  { %1258 = vmatmul.mubr.bf16.vlgmr.msra.gmra.mrb[8].mxu1 %v1776_v34 }
  0xa3   :  { %1248 = vmatmul.mubr.bf16.vlgmr.msra.gmra.mrb[0].mxu0 %v1775_v33 }
 0x155   :  { %v1090_v37 = vpop.f32.mrb[0].mxu1 }
 0x156   :  { %v1092_v38 = vpop.f32.mrb[1].mxu1  ;;  %v1494_v62 = vadd.f32 %v1090_v37, %v184_v44 }
 0x157   :  { %v1094_v39 = vpop.f32.mrb[2].mxu1  ;;  %v1496_v63 = vadd.f32 %v1092_v38, %v188_v45 }
 0x158   :  { %v1096_v41 = vpop.f32.mrb[3].mxu1  ;;  %v1498_v2 = vadd.f32 %v1094_v39, %v184_v44 }
 0x159   :  { %v1500_v7 = vadd.f32 %v1096_v41, %v188_v45 }
 0x15d   :  { %v1100_v46 = vpop.f32.mrb[4].mxu1 }
 0x15e   :  { %v1206_v47 = vpop.f32.mrb[4].mxu0  ;;  %v1502_v48 = vadd.f32 %v1100_v46, %v184_v44  ;;  %v1102_v49 = vpop.f32.mrb[5].mxu1 }
 0x15f   :  { %v1208_v50 = vpop.f32.mrb[5].mxu0  ;;  %v1505_v51 = vadd.f32 %v1102_v49, %v188_v45  ;;  %v1104_v52 = vpop.f32.mrb[6].mxu1 }
 0x160   :  { %v1210_v53 = vpop.f32.mrb[6].mxu0  ;;  %v1503_v54 = vadd.f32 %v1502_v48, %v1206_v47  ;;  %v1508_v55 = vadd.f32 %v1104_v52, %v184_v44  ;;  %v1106_v56 = vpop.f32.mrb[7].mxu1 }
 0x161   :  { %v1212_v57 = vpop.f32.mrb[7].mxu0  ;;  %v1506_v58 = vadd.f32 %v1505_v51, %v1208_v50  ;;  %v1511_v59 = vadd.f32 %v1106_v56, %v188_v45 }
 0x162   :  { %v1509_v60 = vadd.f32 %v1508_v55, %v1210_v53 }
 0x163   :  { %v1512_v61 = vadd.f32 %v1511_v59, %v1212_v57 }
 0x175   :  { %v1259_v1 = vpop.f32.mrb[8].mxu1 }
 0x176   :  { %v1249_v0 = vpop.f32.mrb[0].mxu0  ;;  %v1504_v4 = vadd.f32 %v1503_v54, %v1259_v1  ;;  %v1261_v6 = vpop.f32.mrb[9].mxu1 }
 0x177   :  { %v1495_v3 = vadd.f32 %v1494_v62, %v1249_v0  ;;  %v1251_v5 = vpop.f32.mrb[1].mxu0  ;;  %v1507_v9 = vadd.f32 %v1506_v58, %v1261_v6  ;;  %v1263_v11 = vpop.f32.mrb[10].mxu1 }
 0x178   :  { %v1497_v8 = vadd.f32 %v1496_v63, %v1251_v5  ;;  %v1253_v10 = vpop.f32.mrb[2].mxu0  ;;  %v1272_v13 = vmax.f32 %v1504_v4, 0.0  ;;  %v1510_v15 = vadd.f32 %v1509_v60, %v1263_v11  ;;  %v1265_v17 = vpop.f32.mrb[11].mxu1 }
 0x179   :  { %v1268_v12 = vmax.f32 %v1495_v3, 0.0  ;;  %v1499_v14 = vadd.f32 %v1498_v2, %v1253_v10  ;;  %v1255_v16 = vpop.f32.mrb[3].mxu0  ;;  %v1273_v19 = vmax.f32 %v1507_v9, 0.0  ;;  %v1513_v21 = vadd.f32 %v1512_v61, %v1265_v17 }
 0x17a   :  { %v1269_v18 = vmax.f32 %v1497_v8, 0.0  ;;  %v1501_v20 = vadd.f32 %v1500_v7, %v1255_v16  ;;  %v1274_v23 = vmax.f32 %v1510_v15, 0.0 }
 0x17b   :  { %v1270_v22 = vmax.f32 %v1499_v14, 0.0  ;;  %v1476_v25 = vpack.c.bf16 %v1273_v19, %v1272_v13  ;;  %v1275_v27 = vmax.f32 %v1513_v21, 0.0 }
 0x17c   :  { %v1474_v24 = vpack.c.bf16 %v1269_v18, %v1268_v12  ;;  %v1271_v26 = vmax.f32 %v1501_v20, 0.0 }
 0x17d   :  { %1302 = vst [vmem:[%s2302_s3 + $0x10] sm:$0xff] %v1476_v25  ;;  %v1477_v29 = vpack.c.bf16 %v1275_v27, %v1274_v23 }
 0x17e   :  { %1300 = vst [vmem:[%s2302_s3] sm:$0xff] %v1474_v24  ;;  %v1475_v28 = vpack.c.bf16 %v1271_v26, %v1270_v22 }
 0x17f   :  { %1303 = vst [vmem:[%s2302_s3 + $0x18] sm:$0xff] %v1477_v29 }
 0x180   :  { %1301 = vst [vmem:[%s2302_s3 + $0x8] sm:$0xff] %v1475_v28 }

// kernel: resnet_generator_forward.19
= control target key start
LH: loop header
LB: loop body
LE: loop exit
PB: predicated region body
PF: predicated region fallthrough
CT: control target
= control target key end

     0   :  { %9 = vsyncpa [#allocation3], 0  ;;  %s3466_s15 = smov [#allocation2]   ;;  %s4397_s0 = inlined_call_operand.hbm [shape: bf16[32,2304], index: 0, kind: input, shape index: {}]   ;;  %s4398_s1 = inlined_call_operand.vmem [shape: bf16[2304,256], index: 1, kind: input, shape index: {}]   ;;  %s4399_s2 = inlined_call_operand.vmem [shape: f32[1,256], index: 2, kind: input, shape index: {}]   ;;  %s4400_s3 = inlined_call_operand.vmem [shape: bf16[32,256], index: 3, kind: input, shape index: {}]   ;;  %s4401_s4 = inlined_call_operand.vmem [shape: bf16[32,256], index: 4, kind: output, shape index: {}]  }
   0x1   :  { %s15_s16 = sshll.u32 %s3466_s15, 4  ;;  %s3442_s19 = scalar_lea.hbm %s4397_s0, 4608  ;;  %s16_s16 = int_to_ptr.vmem [resolvable:$true] %s15_s16 }
   0x2   :  { %p3443_p0 = scmp.ne.s32.totalorder %s4397_s0, %s3442_s19  ;;  %p3446_p1 = scmp.lt.u32.totalorder %s3442_s19, %s4397_s0 }
   0x4   :  { %p3448_p2 = pnand %p3446_p1, %p3443_p0 }
   0x6   :  { %3451 = shalt.err (!%p3448_p2)
}
   0x7   :  { %s3452_s24 = scalar_lea.vmem %s16_s16, 4608  ;;  %p3457_p4 = scmp.lt.s32.totalorder %s16_s16, %s16_s16 }
   0x8   :  { %p3453_p3 = scmp.ne.s32.totalorder %s16_s16, %s3452_s24  ;;  %p3458_p5 = scmp.lt.s32.totalorder %s3452_s24, %s3452_s24 }
   0xa   :  { %p3459_p6 = por %p3458_p5, %p3457_p4 }
   0xc   :  { %p3460_p7 = pnand %p3459_p6, %p3453_p3 }
   0xe   :  { %3463 = shalt.err (!%p3460_p7)
}
   0xf   :  { %s3467_s25 = smov 1152   ;;  %s3468_s26 = smov 72  }
  0x10   :  { %21 = dma.hbm_to_vmem [thread:$0]  %s4397_s0, 4608, %s16_s16, [#allocation3], %s3467_s25, %s3467_s25, %s3468_s26  }
  0x11   :  { %3464 = dma.done.wait [#allocation3], 4608  }
  0x12   :  { %3465 = vsyncadd [#allocation3], 4294962688  ;;  %v2956_v0 = vld [vmem:[%s4398_s1 + $0x4] ss:$8 sps:$4 sm:$0xff]   ;;  %v2960_v2 = vld [vmem:[%s4398_s1] ss:$8 sps:$4 sm:$0xff]  }
  0x13   :  { %v2958_v1 = vld [vmem:[%s4398_s1 + $0x404] ss:$8 sps:$4 sm:$0xff]   ;;  %1987 = vmatprep.subr.bf16.mxu1 %v2956_v0  ;;  %v2961_v3 = vld [vmem:[%s4398_s1 + $0x400] ss:$8 sps:$4 sm:$0xff]   ;;  %v2962_v4 = vld [vmem:[%s4398_s1 + $0x14] ss:$8 sps:$4 sm:$0xff]  }
  0x14   :  { %2199 = vmatprep.subr.bf16.mxu0 %v2958_v1  ;;  %1988 = vmatpush1.bf16.msra.mxu1 %v2960_v2  ;;  %v2964_v5 = vld [vmem:[%s4398_s1 + $0x414] ss:$8 sps:$4 sm:$0xff]   ;;  %v2966_v6 = vld [vmem:[%s4398_s1 + $0x10] ss:$8 sps:$4 sm:$0xff]   ;;  %v2968_v8 = vld [vmem:[%s4398_s1 + $0x24] ss:$8 sps:$4 sm:$0xff]  }
  0x15   :  { %2200 = vmatpush1.bf16.msra.mxu0 %v2961_v3  ;;  %1989 = vmatprep.subr.bf16.mxu1 %v2962_v4  ;;  %v2967_v7 = vld [vmem:[%s4398_s1 + $0x410] ss:$8 sps:$4 sm:$0xff]   ;;  %v2970_v9 = vld [vmem:[%s4398_s1 + $0x424] ss:$8 sps:$4 sm:$0xff]   ;;  %v2972_v10 = vld [vmem:[%s4398_s1 + $0x20] ss:$8 sps:$4 sm:$0xff]  }
  0x16   :  { %2201 = vmatprep.subr.bf16.mxu0 %v2964_v5  ;;  %v2973_v11 = vld [vmem:[%s4398_s1 + $0x420] ss:$8 sps:$4 sm:$0xff]   ;;  %v2974_v12 = vld [vmem:[%s4398_s1 + $0x34] ss:$8 sps:$4 sm:$0xff]   ;;  %v2978_v14 = vld [vmem:[%s4398_s1 + $0x30] ss:$8 sps:$4 sm:$0xff]  }
  0x17   :  { %v2976_v13 = vld [vmem:[%s4398_s1 + $0x434] ss:$8 sps:$4 sm:$0xff]   ;;  %v2979_v15 = vld [vmem:[%s4398_s1 + $0x430] ss:$8 sps:$4 sm:$0xff]   ;;  %v2980_v16 = vld [vmem:[%s4398_s1 + $0x44] ss:$8 sps:$4 sm:$0xff]  }
  0x18   :  { %1990 = vmatpush1.bf16.msra.mxu1 %v2966_v6  ;;  %v2982_v17 = vld [vmem:[%s4398_s1 + $0x444] ss:$8 sps:$4 sm:$0xff]   ;;  %v2984_v18 = vld [vmem:[%s4398_s1 + $0x40] ss:$8 sps:$4 sm:$0xff]   ;;  %v2986_v20 = vld [vmem:[%s4398_s1 + $0x54] ss:$8 sps:$4 sm:$0xff]  }
  0x19   :  { %2202 = vmatpush1.bf16.msra.mxu0 %v2967_v7  ;;  %1991 = vmatprep.subr.bf16.mxu1 %v2968_v8  ;;  %v2985_v19 = vld [vmem:[%s4398_s1 + $0x440] ss:$8 sps:$4 sm:$0xff]   ;;  %v2988_v21 = vld [vmem:[%s4398_s1 + $0x454] ss:$8 sps:$4 sm:$0xff]   ;;  %v2990_v22 = vld [vmem:[%s4398_s1 + $0x50] ss:$8 sps:$4 sm:$0xff]  }
  0x1a   :  { %2203 = vmatprep.subr.bf16.mxu0 %v2970_v9  ;;  %v2991_v23 = vld [vmem:[%s4398_s1 + $0x450] ss:$8 sps:$4 sm:$0xff]   ;;  %v2992_v24 = vld [vmem:[%s4398_s1 + $0x64] ss:$8 sps:$4 sm:$0xff]   ;;  %v2996_v26 = vld [vmem:[%s4398_s1 + $0x60] ss:$8 sps:$4 sm:$0xff]  }
  0x1b   :  { %v2994_v25 = vld [vmem:[%s4398_s1 + $0x464] ss:$8 sps:$4 sm:$0xff]   ;;  %v2997_v27 = vld [vmem:[%s4398_s1 + $0x460] ss:$8 sps:$4 sm:$0xff]   ;;  %v2998_v28 = vld [vmem:[%s4398_s1 + $0x74] ss:$8 sps:$4 sm:$0xff]  }
  0x1c   :  { %1992 = vmatpush1.bf16.msra.mxu1 %v2972_v10  ;;  %v3000_v29 = vld [vmem:[%s4398_s1 + $0x474] ss:$8 sps:$4 sm:$0xff]   ;;  %v3002_v30 = vld [vmem:[%s4398_s1 + $0x70] ss:$8 sps:$4 sm:$0xff]   ;;  %v3004_v32 = vld [vmem:[%s4398_s1 + $0x84] ss:$8 sps:$4 sm:$0xff]  }
  0x1d   :  { %2204 = vmatpush1.bf16.msra.mxu0 %v2973_v11  ;;  %1993 = vmatprep.subr.bf16.mxu1 %v2974_v12  ;;  %v3003_v31 = vld [vmem:[%s4398_s1 + $0x470] ss:$8 sps:$4 sm:$0xff]   ;;  %v3006_v33 = vld [vmem:[%s4398_s1 + $0x484] ss:$8 sps:$4 sm:$0xff]   ;;  %v3008_v34 = vld [vmem:[%s4398_s1 + $0x80] ss:$8 sps:$4 sm:$0xff]  }
  0x1e   :  { %2205 = vmatprep.subr.bf16.mxu0 %v2976_v13  ;;  %v3009_v35 = vld [vmem:[%s4398_s1 + $0x480] ss:$8 sps:$4 sm:$0xff]   ;;  %v3010_v36 = vld [vmem:[%s4398_s1 + $0x94] ss:$8 sps:$4 sm:$0xff]   ;;  %v3014_v38 = vld [vmem:[%s4398_s1 + $0x90] ss:$8 sps:$4 sm:$0xff]  }
  0x1f   :  { %v3012_v37 = vld [vmem:[%s4398_s1 + $0x494] ss:$8 sps:$4 sm:$0xff]   ;;  %v3015_v39 = vld [vmem:[%s4398_s1 + $0x490] ss:$8 sps:$4 sm:$0xff]   ;;  %v3016_v40 = vld [vmem:[%s4398_s1 + $0xa4] ss:$8 sps:$4 sm:$0xff]  }
  0x20   :  { %1994 = vmatpush1.bf16.msra.mxu1 %v2978_v14  ;;  %v3018_v41 = vld [vmem:[%s4398_s1 + $0x4a4] ss:$8 sps:$4 sm:$0xff]   ;;  %v3020_v42 = vld [vmem:[%s4398_s1 + $0xa0] ss:$8 sps:$4 sm:$0xff]   ;;  %v3022_v44 = vld [vmem:[%s4398_s1 + $0xb4] ss:$8 sps:$4 sm:$0xff]  }
  0x21   :  { %2206 = vmatpush1.bf16.msra.mxu0 %v2979_v15  ;;  %1995 = vmatprep.subr.bf16.mxu1 %v2980_v16  ;;  %v3021_v43 = vld [vmem:[%s4398_s1 + $0x4a0] ss:$8 sps:$4 sm:$0xff]   ;;  %v3024_v45 = vld [vmem:[%s4398_s1 + $0x4b4] ss:$8 sps:$4 sm:$0xff]   ;;  %v3026_v46 = vld [vmem:[%s4398_s1 + $0xb0] ss:$8 sps:$4 sm:$0xff]  }
  0x22   :  { %2207 = vmatprep.subr.bf16.mxu0 %v2982_v17  ;;  %v3027_v47 = vld [vmem:[%s4398_s1 + $0x4b0] ss:$8 sps:$4 sm:$0xff]   ;;  %v3054_v48 = vld [vmem:[#allocation2 + $0x4] ss:$72 sps:$4 sm:$0xff]   ;;  %v3032_v52 = vld [vmem:[%s4398_s1 + $0xc0] ss:$8 sps:$4 sm:$0xff]  }
  0x23   :  { %v3028_v49 = vld [vmem:[%s4398_s1 + $0xc4] ss:$8 sps:$4 sm:$0xff]   ;;  %2019 = vmatprep.mubr.bf16.mxu1 %v3054_v48  ;;  %v3033_v53 = vld [vmem:[%s4398_s1 + $0x4c0] ss:$8 sps:$4 sm:$0xff]   ;;  %v3034_v54 = vld [vmem:[%s4398_s1 + $0xd4] ss:$8 sps:$4 sm:$0xff]  }
  0x24   :  { %1996 = vmatpush1.bf16.msra.mxu1 %v2984_v18  ;;  %v3030_v50 = vld [vmem:[%s4398_s1 + $0x4c4] ss:$8 sps:$4 sm:$0xff]   ;;  %v3036_v55 = vld [vmem:[%s4398_s1 + $0x4d4] ss:$8 sps:$4 sm:$0xff]   ;;  %v3038_v56 = vld [vmem:[%s4398_s1 + $0xd0] ss:$8 sps:$4 sm:$0xff]  }
  0x25   :  { %2208 = vmatpush1.bf16.msra.mxu0 %v2985_v19  ;;  %1997 = vmatprep.subr.bf16.mxu1 %v2986_v20  ;;  %v3060_v51 = vld [vmem:[#allocation2 + $0x24] ss:$72 sps:$4 sm:$0xff]   ;;  %v3039_v57 = vld [vmem:[%s4398_s1 + $0x4d0] ss:$8 sps:$4 sm:$0xff]   ;;  %v3044_v60 = vld [vmem:[%s4398_s1 + $0xe0] ss:$8 sps:$4 sm:$0xff]  }
  0x26   :  { %2209 = vmatprep.subr.bf16.mxu0 %v2988_v21  ;;  %2231 = vmatprep.mubr.bf16.mxu0 %v3060_v51  ;;  %v3040_v58 = vld [vmem:[%s4398_s1 + $0xe4] ss:$8 sps:$4 sm:$0xff]   ;;  %v3045_v61 = vld [vmem:[%s4398_s1 + $0x4e0] ss:$8 sps:$4 sm:$0xff]   ;;  %v3046_v62 = vld [vmem:[%s4398_s1 + $0xf4] ss:$8 sps:$4 sm:$0xff]  }
  0x27   :  { %v3042_v59 = vld [vmem:[%s4398_s1 + $0x4e4] ss:$8 sps:$4 sm:$0xff]   ;;  %v3048_v63 = vld [vmem:[%s4398_s1 + $0x4f4] ss:$8 sps:$4 sm:$0xff]   ;;  %v3050_v0 = vld [vmem:[%s4398_s1 + $0xf0] ss:$8 sps:$4 sm:$0xff]  }
  0x28   :  { %1998 = vmatpush1.bf16.msra.mxu1 %v2990_v22  ;;  %v3051_v1 = vld [vmem:[%s4398_s1 + $0x4f0] ss:$8 sps:$4 sm:$0xff]   ;;  %v3057_v2 = vld [vmem:[%s4398_s1 + $0x104] ss:$8 sps:$4 sm:$0xff]   ;;  %v3052_v4 = vld [vmem:[#allocation2] ss:$72 sps:$4 sm:$0xff]  }
  0x29   :  { %2210 = vmatpush1.bf16.msra.mxu0 %v2991_v23  ;;  %1999 = vmatprep.subr.bf16.mxu1 %v2992_v24  ;;  %v3063_v3 = vld [vmem:[%s4398_s1 + $0x504] ss:$8 sps:$4 sm:$0xff]   ;;  %v3055_v5 = vld [vmem:[%s4398_s1 + $0x100] ss:$8 sps:$4 sm:$0xff]   ;;  %v3066_v8 = vld [vmem:[%s4398_s1 + $0x114] ss:$8 sps:$4 sm:$0xff]  }
  0x2a   :  { %2211 = vmatprep.subr.bf16.mxu0 %v2994_v25  ;;  %v3058_v6 = vld [vmem:[#allocation2 + $0x20] ss:$72 sps:$4 sm:$0xff]   ;;  %v3069_v9 = vld [vmem:[%s4398_s1 + $0x514] ss:$8 sps:$4 sm:$0xff]   ;;  %v3064_v10 = vld [vmem:[%s4398_s1 + $0x110] ss:$8 sps:$4 sm:$0xff]  }
  0x2b   :  { %v3061_v7 = vld [vmem:[%s4398_s1 + $0x500] ss:$8 sps:$4 sm:$0xff]   ;;  %v3067_v11 = vld [vmem:[%s4398_s1 + $0x510] ss:$8 sps:$4 sm:$0xff]   ;;  %v3072_v12 = vld [vmem:[%s4398_s1 + $0x124] ss:$8 sps:$4 sm:$0xff]  }
  0x2c   :  { %2000 = vmatpush1.bf16.msra.mxu1 %v2996_v26  ;;  %v3075_v13 = vld [vmem:[%s4398_s1 + $0x524] ss:$8 sps:$4 sm:$0xff]   ;;  %v3070_v14 = vld [vmem:[%s4398_s1 + $0x120] ss:$8 sps:$4 sm:$0xff]   ;;  %v3078_v16 = vld [vmem:[%s4398_s1 + $0x134] ss:$8 sps:$4 sm:$0xff]  }
  0x2d   :  { %2212 = vmatpush1.bf16.msra.mxu0 %v2997_v27  ;;  %2001 = vmatprep.subr.bf16.mxu1 %v2998_v28  ;;  %v3073_v15 = vld [vmem:[%s4398_s1 + $0x520] ss:$8 sps:$4 sm:$0xff]   ;;  %v3081_v17 = vld [vmem:[%s4398_s1 + $0x534] ss:$8 sps:$4 sm:$0xff]   ;;  %v3076_v18 = vld [vmem:[%s4398_s1 + $0x130] ss:$8 sps:$4 sm:$0xff]  }
  0x2e   :  { %2213 = vmatprep.subr.bf16.mxu0 %v3000_v29  ;;  %v3079_v19 = vld [vmem:[%s4398_s1 + $0x530] ss:$8 sps:$4 sm:$0xff]   ;;  %v3084_v20 = vld [vmem:[%s4398_s1 + $0x144] ss:$8 sps:$4 sm:$0xff]   ;;  %v3082_v22 = vld [vmem:[%s4398_s1 + $0x140] ss:$8 sps:$4 sm:$0xff]  }
  0x2f   :  { %v3087_v21 = vld [vmem:[%s4398_s1 + $0x544] ss:$8 sps:$4 sm:$0xff]   ;;  %v3085_v23 = vld [vmem:[%s4398_s1 + $0x540] ss:$8 sps:$4 sm:$0xff]   ;;  %v3090_v24 = vld [vmem:[%s4398_s1 + $0x154] ss:$8 sps:$4 sm:$0xff]  }
  0x30   :  { %2002 = vmatpush1.bf16.msra.mxu1 %v3002_v30  ;;  %v3093_v25 = vld [vmem:[%s4398_s1 + $0x554] ss:$8 sps:$4 sm:$0xff]   ;;  %v3088_v26 = vld [vmem:[%s4398_s1 + $0x150] ss:$8 sps:$4 sm:$0xff]   ;;  %v3096_v29 = vld [vmem:[%s4398_s1 + $0x164] ss:$8 sps:$4 sm:$0xff]  }
  0x31   :  { %2214 = vmatpush1.bf16.msra.mxu0 %v3003_v31  ;;  %2003 = vmatprep.subr.bf16.mxu1 %v3004_v32  ;;  %v3091_v27 = vld [vmem:[%s4398_s1 + $0x550] ss:$8 sps:$4 sm:$0xff]   ;;  %v3142_v28 = vld [vmem:[#allocation2 + $0x94] ss:$72 sps:$4 sm:$0xff]   ;;  %v3099_v30 = vld [vmem:[%s4398_s1 + $0x564] ss:$8 sps:$4 sm:$0xff]  }
  0x32   :  { %2215 = vmatprep.subr.bf16.mxu0 %v3006_v33  ;;  %v3147_v31 = vld [vmem:[#allocation2 + $0xb4] ss:$72 sps:$4 sm:$0xff]   ;;  %v3094_v32 = vld [vmem:[%s4398_s1 + $0x160] ss:$8 sps:$4 sm:$0xff]   ;;  %v3112_v48 = vld [vmem:[%s4398_s1 + $0x190] ss:$8 sps:$4 sm:$0xff]  }
  0x33   :  { %v3097_v33 = vld [vmem:[%s4398_s1 + $0x560] ss:$8 sps:$4 sm:$0xff]   ;;  %v3123_v51 = vld [vmem:[%s4398_s1 + $0x5a4] ss:$8 sps:$4 sm:$0xff]  }
  0x34   :  { %2004 = vmatpush1.bf16.msra.mxu1 %v3008_v34  ;;  %v3152_v34 = vld [vmem:[#allocation2 + $0x90] ss:$72 sps:$4 sm:$0xff]  }
  0x35   :  { %2216 = vmatpush1.bf16.msra.mxu0 %v3009_v35  ;;  %2005 = vmatprep.subr.bf16.mxu1 %v3010_v36  ;;  %v3153_v35 = vld [vmem:[#allocation2 + $0xb0] ss:$72 sps:$4 sm:$0xff]   ;;  %v3102_v36 = vld [vmem:[%s4398_s1 + $0x174] ss:$8 sps:$4 sm:$0xff]  }
  0x36   :  { %2217 = vmatprep.subr.bf16.mxu0 %v3012_v37  ;;  %v3105_v37 = vld [vmem:[%s4398_s1 + $0x574] ss:$8 sps:$4 sm:$0xff]  }
  0x38   :  { %2006 = vmatpush1.bf16.msra.mxu1 %v3014_v38  ;;  %v3100_v38 = vld [vmem:[%s4398_s1 + $0x170] ss:$8 sps:$4 sm:$0xff]  }
  0x39   :  { %2218 = vmatpush1.bf16.msra.mxu0 %v3015_v39  ;;  %2007 = vmatprep.subr.bf16.mxu1 %v3016_v40  ;;  %v3103_v39 = vld [vmem:[%s4398_s1 + $0x570] ss:$8 sps:$4 sm:$0xff]   ;;  %v3162_v40 = vld [vmem:[#allocation2 + $0xc] ss:$72 sps:$4 sm:$0xff]  }
  0x3a   :  { %2219 = vmatprep.subr.bf16.mxu0 %v3018_v41  ;;  %v3108_v41 = vld [vmem:[%s4398_s1 + $0x184] ss:$8 sps:$4 sm:$0xff]  }
  0x3c   :  { %2008 = vmatpush1.bf16.msra.mxu1 %v3020_v42  ;;  %v3111_v42 = vld [vmem:[%s4398_s1 + $0x584] ss:$8 sps:$4 sm:$0xff]  }
  0x3d   :  { %2220 = vmatpush1.bf16.msra.mxu0 %v3021_v43  ;;  %2009 = vmatprep.subr.bf16.mxu1 %v3022_v44  ;;  %v3168_v43 = vld [vmem:[#allocation2 + $0x2c] ss:$72 sps:$4 sm:$0xff]   ;;  %v3106_v44 = vld [vmem:[%s4398_s1 + $0x180] ss:$8 sps:$4 sm:$0xff]  }
  0x3e   :  { %2221 = vmatprep.subr.bf16.mxu0 %v3024_v45  ;;  %v3109_v45 = vld [vmem:[%s4398_s1 + $0x580] ss:$8 sps:$4 sm:$0xff]  }
  0x40   :  { %2010 = vmatpush1.bf16.msra.mxu1 %v3026_v46  ;;  %v3114_v46 = vld [vmem:[%s4398_s1 + $0x194] ss:$8 sps:$4 sm:$0xff]  }
  0x41   :  { %2222 = vmatpush1.bf16.msra.mxu0 %v3027_v47  ;;  %2011 = vmatprep.subr.bf16.mxu1 %v3028_v49  ;;  %v3117_v47 = vld [vmem:[%s4398_s1 + $0x594] ss:$8 sps:$4 sm:$0xff]   ;;  %v3115_v49 = vld [vmem:[%s4398_s1 + $0x590] ss:$8 sps:$4 sm:$0xff]  }
  0x42   :  { %2223 = vmatprep.subr.bf16.mxu0 %v3030_v50  ;;  %v3120_v50 = vld [vmem:[%s4398_s1 + $0x1a4] ss:$8 sps:$4 sm:$0xff]  }
  0x44   :  { %2012 = vmatpush1.bf16.msra.mxu1 %v3032_v52  ;;  %v3118_v52 = vld [vmem:[%s4398_s1 + $0x1a0] ss:$8 sps:$4 sm:$0xff]  }
  0x45   :  { %2224 = vmatpush1.bf16.msra.mxu0 %v3033_v53  ;;  %2013 = vmatprep.subr.bf16.mxu1 %v3034_v54  ;;  %v3121_v53 = vld [vmem:[%s4398_s1 + $0x5a0] ss:$8 sps:$4 sm:$0xff]   ;;  %v3126_v54 = vld [vmem:[%s4398_s1 + $0x1b4] ss:$8 sps:$4 sm:$0xff]  }
  0x46   :  { %2225 = vmatprep.subr.bf16.mxu0 %v3036_v55  ;;  %v3129_v55 = vld [vmem:[%s4398_s1 + $0x5b4] ss:$8 sps:$4 sm:$0xff]  }
  0x48   :  { %2014 = vmatpush1.bf16.msra.mxu1 %v3038_v56  ;;  %v3124_v56 = vld [vmem:[%s4398_s1 + $0x1b0] ss:$8 sps:$4 sm:$0xff]  }
  0x49   :  { %2226 = vmatpush1.bf16.msra.mxu0 %v3039_v57  ;;  %2015 = vmatprep.subr.bf16.mxu1 %v3040_v58  ;;  %v3127_v57 = vld [vmem:[%s4398_s1 + $0x5b0] ss:$8 sps:$4 sm:$0xff]   ;;  %v3132_v58 = vld [vmem:[%s4398_s1 + $0x1c4] ss:$8 sps:$4 sm:$0xff]  }
  0x4a   :  { %2227 = vmatprep.subr.bf16.mxu0 %v3042_v59  ;;  %v3135_v59 = vld [vmem:[%s4398_s1 + $0x5c4] ss:$8 sps:$4 sm:$0xff]  }
  0x4c   :  { %2016 = vmatpush1.bf16.msra.mxu1 %v3044_v60  ;;  %v3130_v60 = vld [vmem:[%s4398_s1 + $0x1c0] ss:$8 sps:$4 sm:$0xff]  }
  0x4d   :  { %2228 = vmatpush1.bf16.msra.mxu0 %v3045_v61  ;;  %2017 = vmatprep.subr.bf16.mxu1 %v3046_v62  ;;  %v3133_v61 = vld [vmem:[%s4398_s1 + $0x5c0] ss:$8 sps:$4 sm:$0xff]   ;;  %v3138_v62 = vld [vmem:[%s4398_s1 + $0x1d4] ss:$8 sps:$4 sm:$0xff]  }
  0x4e   :  { %2229 = vmatprep.subr.bf16.mxu0 %v3048_v63  ;;  %v3141_v63 = vld [vmem:[%s4398_s1 + $0x5d4] ss:$8 sps:$4 sm:$0xff]  }
  0x50   :  { %2018 = vmatpush1.bf16.msra.mxu1 %v3050_v0  ;;  %v3136_v0 = vld [vmem:[%s4398_s1 + $0x1d0] ss:$8 sps:$4 sm:$0xff]  }
  0x51   :  { %2230 = vmatpush1.bf16.msra.mxu0 %v3051_v1  ;;  %2040 = vmatprep.subr.bf16.mxu1 %v3057_v2  ;;  %v3139_v1 = vld [vmem:[%s4398_s1 + $0x5d0] ss:$8 sps:$4 sm:$0xff]   ;;  %v3146_v2 = vld [vmem:[%s4398_s1 + $0x1e4] ss:$8 sps:$4 sm:$0xff]  }
  0x52   :  { %2252 = vmatprep.subr.bf16.mxu0 %v3063_v3  ;;  %v3151_v3 = vld [vmem:[%s4398_s1 + $0x5e4] ss:$8 sps:$4 sm:$0xff]  }
  0x53   :  { %2020 = vmatmul.mubr.bf16.vlgmr.msra.gmra.mrb[0].mxu1 %v3052_v4  ;;  %v3144_v4 = vld [vmem:[%s4398_s1 + $0x1e0] ss:$8 sps:$4 sm:$0xff]  }
  0x54   :  { %2232 = vmatmul.mubr.bf16.vlgmr.msra.gmra.mrb[0].mxu0 %v3058_v6  ;;  %2041 = vmatpush1.bf16.msra.mxu1 %v3055_v5  ;;  %v3149_v5 = vld [vmem:[%s4398_s1 + $0x5e0] ss:$8 sps:$4 sm:$0xff]   ;;  %v3156_v6 = vld [vmem:[%s4398_s1 + $0x1f4] ss:$8 sps:$4 sm:$0xff]  }
  0x55   :  { %2253 = vmatpush1.bf16.msra.mxu0 %v3061_v7  ;;  %2042 = vmatprep.subr.bf16.mxu1 %v3066_v8  ;;  %v3159_v7 = vld [vmem:[%s4398_s1 + $0x5f4] ss:$8 sps:$4 sm:$0xff]   ;;  %v3154_v8 = vld [vmem:[%s4398_s1 + $0x1f0] ss:$8 sps:$4 sm:$0xff]  }
  0x56   :  { %2254 = vmatprep.subr.bf16.mxu0 %v3069_v9  ;;  %2029 = vmatprep.mubr.bf16.mxu1 %v3142_v28  ;;  %v3157_v9 = vld [vmem:[%s4398_s1 + $0x5f0] ss:$8 sps:$4 sm:$0xff]   ;;  %v3186_v28 = vld [vmem:[%s4398_s1 + $0x234] ss:$8 sps:$4 sm:$0xff]  }
  0x57   :  { %2241 = vmatprep.mubr.bf16.mxu0 %v3147_v31  ;;  %v3187_v31 = vld [vmem:[%s4398_s1 + $0x630] ss:$8 sps:$4 sm:$0xff]  }
  0x58   :  { %2043 = vmatpush1.bf16.msra.mxu1 %v3064_v10  ;;  %v3165_v10 = vld [vmem:[%s4398_s1 + $0x204] ss:$8 sps:$4 sm:$0xff]  }
  0x59   :  { %2255 = vmatpush1.bf16.msra.mxu0 %v3067_v11  ;;  %2044 = vmatprep.subr.bf16.mxu1 %v3072_v12  ;;  %v3171_v11 = vld [vmem:[%s4398_s1 + $0x604] ss:$8 sps:$4 sm:$0xff]   ;;  %v3160_v12 = vld [vmem:[#allocation2 + $0x8] ss:$72 sps:$4 sm:$0xff]  }
  0x5a   :  { %2256 = vmatprep.subr.bf16.mxu0 %v3075_v13  ;;  %v3163_v13 = vld [vmem:[%s4398_s1 + $0x200] ss:$8 sps:$4 sm:$0xff]  }
  0x5b   :  { %2030 = vmatmul.mubr.bf16.gmra.mrb[4].mxu1 %v3152_v34  ;;  %v3195_v34 = vld [vmem:[%s4398_s1 + $0x644] ss:$8 sps:$4 sm:$0xff]  }
  0x5c   :  { %2045 = vmatpush1.bf16.msra.mxu1 %v3070_v14  ;;  %2242 = vmatmul.mubr.bf16.gmra.mrb[4].mxu0 %v3153_v35  ;;  %v3166_v14 = vld [vmem:[#allocation2 + $0x28] ss:$72 sps:$4 sm:$0xff]   ;;  %v3276_v35 = vld [vmem:[#allocation2 + $0x34] ss:$72 sps:$4 sm:$0xff]  }
  0x5d   :  { %2257 = vmatpush1.bf16.msra.mxu0 %v3073_v15  ;;  %2046 = vmatprep.subr.bf16.mxu1 %v3078_v16  ;;  %v3169_v15 = vld [vmem:[%s4398_s1 + $0x600] ss:$8 sps:$4 sm:$0xff]   ;;  %v3174_v16 = vld [vmem:[%s4398_s1 + $0x214] ss:$8 sps:$4 sm:$0xff]  }
  0x5e   :  { %2258 = vmatprep.subr.bf16.mxu0 %v3081_v17  ;;  %2072 = vmatprep.mubr.bf16.mxu1 %v3162_v40  ;;  %v3177_v17 = vld [vmem:[%s4398_s1 + $0x614] ss:$8 sps:$4 sm:$0xff]   ;;  %v3196_v40 = vld [vmem:[%s4398_s1 + $0x250] ss:$8 sps:$4 sm:$0xff]  }
  0x5f   :  { %2284 = vmatprep.mubr.bf16.mxu0 %v3168_v43  ;;  %v3207_v43 = vld [vmem:[%s4398_s1 + $0x664] ss:$8 sps:$4 sm:$0xff]  }
  0x60   :  { %2047 = vmatpush1.bf16.msra.mxu1 %v3076_v18  ;;  %v3172_v18 = vld [vmem:[%s4398_s1 + $0x210] ss:$8 sps:$4 sm:$0xff]  }
  0x61   :  { %2259 = vmatpush1.bf16.msra.mxu0 %v3079_v19  ;;  %2048 = vmatprep.subr.bf16.mxu1 %v3084_v20  ;;  %v3175_v19 = vld [vmem:[%s4398_s1 + $0x610] ss:$8 sps:$4 sm:$0xff]   ;;  %v3250_v20 = vld [vmem:[#allocation2 + $0x9c] ss:$72 sps:$4 sm:$0xff]  }
  0x62   :  { %2260 = vmatprep.subr.bf16.mxu0 %v3087_v21  ;;  %v3180_v21 = vld [vmem:[%s4398_s1 + $0x224] ss:$8 sps:$4 sm:$0xff]  }
  0x64   :  { %2049 = vmatpush1.bf16.msra.mxu1 %v3082_v22  ;;  %v3183_v22 = vld [vmem:[%s4398_s1 + $0x624] ss:$8 sps:$4 sm:$0xff]  }
  0x65   :  { %2261 = vmatpush1.bf16.msra.mxu0 %v3085_v23  ;;  %2050 = vmatprep.subr.bf16.mxu1 %v3090_v24  ;;  %v3255_v23 = vld [vmem:[#allocation2 + $0xbc] ss:$72 sps:$4 sm:$0xff]   ;;  %v3178_v24 = vld [vmem:[%s4398_s1 + $0x220] ss:$8 sps:$4 sm:$0xff]  }
  0x66   :  { %2262 = vmatprep.subr.bf16.mxu0 %v3093_v25  ;;  %v3181_v25 = vld [vmem:[%s4398_s1 + $0x620] ss:$8 sps:$4 sm:$0xff]  }
  0x68   :  { %2051 = vmatpush1.bf16.msra.mxu1 %v3088_v26  ;;  %v3260_v26 = vld [vmem:[#allocation2 + $0x98] ss:$72 sps:$4 sm:$0xff]  }
  0x69   :  { %2263 = vmatpush1.bf16.msra.mxu0 %v3091_v27  ;;  %2052 = vmatprep.subr.bf16.mxu1 %v3096_v29  ;;  %v3261_v27 = vld [vmem:[#allocation2 + $0xb8] ss:$72 sps:$4 sm:$0xff]   ;;  %v3189_v29 = vld [vmem:[%s4398_s1 + $0x634] ss:$8 sps:$4 sm:$0xff]  }
  0x6a   :  { %2264 = vmatprep.subr.bf16.mxu0 %v3099_v30  ;;  %v3184_v30 = vld [vmem:[%s4398_s1 + $0x230] ss:$8 sps:$4 sm:$0xff]  }
  0x6c   :  { %2053 = vmatpush1.bf16.msra.mxu1 %v3094_v32  ;;  %v3270_v32 = vld [vmem:[#allocation2 + $0x14] ss:$72 sps:$4 sm:$0xff]  }
  0x6d   :  { %2265 = vmatpush1.bf16.msra.mxu0 %v3097_v33  ;;  %2054 = vmatprep.subr.bf16.mxu1 %v3102_v36  ;;  %v3192_v33 = vld [vmem:[%s4398_s1 + $0x244] ss:$8 sps:$4 sm:$0xff]   ;;  %v3190_v36 = vld [vmem:[%s4398_s1 + $0x240] ss:$8 sps:$4 sm:$0xff]  }
  0x6e   :  { %2266 = vmatprep.subr.bf16.mxu0 %v3105_v37  ;;  %v3193_v37 = vld [vmem:[%s4398_s1 + $0x640] ss:$8 sps:$4 sm:$0xff]  }
  0x70   :  { %2055 = vmatpush1.bf16.msra.mxu1 %v3100_v38  ;;  %v3198_v38 = vld [vmem:[%s4398_s1 + $0x254] ss:$8 sps:$4 sm:$0xff]  }
  0x71   :  { %2267 = vmatpush1.bf16.msra.mxu0 %v3103_v39  ;;  %2056 = vmatprep.subr.bf16.mxu1 %v3108_v41  ;;  %v3201_v39 = vld [vmem:[%s4398_s1 + $0x654] ss:$8 sps:$4 sm:$0xff]   ;;  %v3199_v41 = vld [vmem:[%s4398_s1 + $0x650] ss:$8 sps:$4 sm:$0xff]  }
  0x72   :  { %2268 = vmatprep.subr.bf16.mxu0 %v3111_v42  ;;  %v3204_v42 = vld [vmem:[%s4398_s1 + $0x264] ss:$8 sps:$4 sm:$0xff]  }
  0x74   :  { %2057 = vmatpush1.bf16.msra.mxu1 %v3106_v44  ;;  %v3202_v44 = vld [vmem:[%s4398_s1 + $0x260] ss:$8 sps:$4 sm:$0xff]  }
  0x75   :  { %2269 = vmatpush1.bf16.msra.mxu0 %v3109_v45  ;;  %2058 = vmatprep.subr.bf16.mxu1 %v3114_v46  ;;  %v3205_v45 = vld [vmem:[%s4398_s1 + $0x660] ss:$8 sps:$4 sm:$0xff]   ;;  %v3210_v46 = vld [vmem:[%s4398_s1 + $0x274] ss:$8 sps:$4 sm:$0xff]  }
  0x76   :  { %2270 = vmatprep.subr.bf16.mxu0 %v3117_v47  ;;  %v3213_v47 = vld [vmem:[%s4398_s1 + $0x674] ss:$8 sps:$4 sm:$0xff]  }
  0x78   :  { %2059 = vmatpush1.bf16.msra.mxu1 %v3112_v48  ;;  %v3208_v48 = vld [vmem:[%s4398_s1 + $0x270] ss:$8 sps:$4 sm:$0xff]  }
  0x79   :  { %2271 = vmatpush1.bf16.msra.mxu0 %v3115_v49  ;;  %2060 = vmatprep.subr.bf16.mxu1 %v3120_v50  ;;  %v3211_v49 = vld [vmem:[%s4398_s1 + $0x670] ss:$8 sps:$4 sm:$0xff]   ;;  %v3216_v50 = vld [vmem:[%s4398_s1 + $0x284] ss:$8 sps:$4 sm:$0xff]  }
  0x7a   :  { %2272 = vmatprep.subr.bf16.mxu0 %v3123_v51  ;;  %v3219_v51 = vld [vmem:[%s4398_s1 + $0x684] ss:$8 sps:$4 sm:$0xff]  }
  0x7c   :  { %2061 = vmatpush1.bf16.msra.mxu1 %v3118_v52  ;;  %v3214_v52 = vld [vmem:[%s4398_s1 + $0x280] ss:$8 sps:$4 sm:$0xff]  }
  0x7d   :  { %2273 = vmatpush1.bf16.msra.mxu0 %v3121_v53  ;;  %2062 = vmatprep.subr.bf16.mxu1 %v3126_v54  ;;  %v3217_v53 = vld [vmem:[%s4398_s1 + $0x680] ss:$8 sps:$4 sm:$0xff]   ;;  %v3222_v54 = vld [vmem:[%s4398_s1 + $0x294] ss:$8 sps:$4 sm:$0xff]  }
  0x7e   :  { %2274 = vmatprep.subr.bf16.mxu0 %v3129_v55  ;;  %v3225_v55 = vld [vmem:[%s4398_s1 + $0x694] ss:$8 sps:$4 sm:$0xff]  }
  0x80   :  { %2063 = vmatpush1.bf16.msra.mxu1 %v3124_v56  ;;  %v3220_v56 = vld [vmem:[%s4398_s1 + $0x290] ss:$8 sps:$4 sm:$0xff]  }
  0x81   :  { %2275 = vmatpush1.bf16.msra.mxu0 %v3127_v57  ;;  %2064 = vmatprep.subr.bf16.mxu1 %v3132_v58  ;;  %v3223_v57 = vld [vmem:[%s4398_s1 + $0x690] ss:$8 sps:$4 sm:$0xff]   ;;  %v3228_v58 = vld [vmem:[%s4398_s1 + $0x2a4] ss:$8 sps:$4 sm:$0xff]  }
  0x82   :  { %2276 = vmatprep.subr.bf16.mxu0 %v3135_v59  ;;  %v3231_v59 = vld [vmem:[%s4398_s1 + $0x6a4] ss:$8 sps:$4 sm:$0xff]  }
  0x84   :  { %2065 = vmatpush1.bf16.msra.mxu1 %v3130_v60  ;;  %v3226_v60 = vld [vmem:[%s4398_s1 + $0x2a0] ss:$8 sps:$4 sm:$0xff]  }
  0x85   :  { %2277 = vmatpush1.bf16.msra.mxu0 %v3133_v61  ;;  %2066 = vmatprep.subr.bf16.mxu1 %v3138_v62  ;;  %v3229_v61 = vld [vmem:[%s4398_s1 + $0x6a0] ss:$8 sps:$4 sm:$0xff]   ;;  %v3234_v62 = vld [vmem:[%s4398_s1 + $0x2b4] ss:$8 sps:$4 sm:$0xff]  }
  0x86   :  { %2278 = vmatprep.subr.bf16.mxu0 %v3141_v63  ;;  %v3237_v63 = vld [vmem:[%s4398_s1 + $0x6b4] ss:$8 sps:$4 sm:$0xff]  }
  0x88   :  { %2067 = vmatpush1.bf16.msra.mxu1 %v3136_v0  ;;  %v3232_v0 = vld [vmem:[%s4398_s1 + $0x2b0] ss:$8 sps:$4 sm:$0xff]  }
  0x89   :  { %2279 = vmatpush1.bf16.msra.mxu0 %v3139_v1  ;;  %2068 = vmatprep.subr.bf16.mxu1 %v3146_v2  ;;  %v3235_v1 = vld [vmem:[%s4398_s1 + $0x6b0] ss:$8 sps:$4 sm:$0xff]   ;;  %v3240_v2 = vld [vmem:[%s4398_s1 + $0x2c4] ss:$8 sps:$4 sm:$0xff]  }
  0x8a   :  { %2280 = vmatprep.subr.bf16.mxu0 %v3151_v3  ;;  %v3243_v3 = vld [vmem:[%s4398_s1 + $0x6c4] ss:$8 sps:$4 sm:$0xff]  }
  0x8c   :  { %2069 = vmatpush1.bf16.msra.mxu1 %v3144_v4  ;;  %v3238_v4 = vld [vmem:[%s4398_s1 + $0x2c0] ss:$8 sps:$4 sm:$0xff]  }
  0x8d   :  { %2281 = vmatpush1.bf16.msra.mxu0 %v3149_v5  ;;  %2070 = vmatprep.subr.bf16.mxu1 %v3156_v6  ;;  %v3241_v5 = vld [vmem:[%s4398_s1 + $0x6c0] ss:$8 sps:$4 sm:$0xff]   ;;  %v3246_v6 = vld [vmem:[%s4398_s1 + $0x2d4] ss:$8 sps:$4 sm:$0xff]  }
  0x8e   :  { %2282 = vmatprep.subr.bf16.mxu0 %v3159_v7  ;;  %v3249_v7 = vld [vmem:[%s4398_s1 + $0x6d4] ss:$8 sps:$4 sm:$0xff]  }
  0x90   :  { %2071 = vmatpush1.bf16.msra.mxu1 %v3154_v8  ;;  %v3244_v8 = vld [vmem:[%s4398_s1 + $0x2d0] ss:$8 sps:$4 sm:$0xff]  }
  0x91   :  { %2283 = vmatpush1.bf16.msra.mxu0 %v3157_v9  ;;  %2093 = vmatprep.subr.bf16.mxu1 %v3165_v10  ;;  %v3247_v9 = vld [vmem:[%s4398_s1 + $0x6d0] ss:$8 sps:$4 sm:$0xff]   ;;  %v3254_v10 = vld [vmem:[%s4398_s1 + $0x2e4] ss:$8 sps:$4 sm:$0xff]  }
  0x92   :  { %2305 = vmatprep.subr.bf16.mxu0 %v3171_v11  ;;  %v3259_v11 = vld [vmem:[%s4398_s1 + $0x6e4] ss:$8 sps:$4 sm:$0xff]  }
  0x93   :  { %2073 = vmatmul.mubr.bf16.vlgmr.msra.gmra.mrb[0].mxu1 %v3160_v12  ;;  %v3252_v12 = vld [vmem:[%s4398_s1 + $0x2e0] ss:$8 sps:$4 sm:$0xff]  }
  0x94   :  { %2285 = vmatmul.mubr.bf16.vlgmr.msra.gmra.mrb[0].mxu0 %v3166_v14  ;;  %2094 = vmatpush1.bf16.msra.mxu1 %v3163_v13  ;;  %v3257_v13 = vld [vmem:[%s4398_s1 + $0x6e0] ss:$8 sps:$4 sm:$0xff]   ;;  %v3264_v14 = vld [vmem:[%s4398_s1 + $0x2f4] ss:$8 sps:$4 sm:$0xff]  }
  0x95   :  { %2306 = vmatpush1.bf16.msra.mxu0 %v3169_v15  ;;  %2095 = vmatprep.subr.bf16.mxu1 %v3174_v16  ;;  %v3267_v15 = vld [vmem:[%s4398_s1 + $0x6f4] ss:$8 sps:$4 sm:$0xff]   ;;  %v3262_v16 = vld [vmem:[%s4398_s1 + $0x2f0] ss:$8 sps:$4 sm:$0xff]  }
  0x96   :  { %2307 = vmatprep.subr.bf16.mxu0 %v3177_v17  ;;  %2082 = vmatprep.mubr.bf16.mxu1 %v3250_v20  ;;  %v3265_v17 = vld [vmem:[%s4398_s1 + $0x6f0] ss:$8 sps:$4 sm:$0xff]  }
  0x97   :  { %2294 = vmatprep.mubr.bf16.mxu0 %v3255_v23  ;;  %v3268_v20 = vld [vmem:[#allocation2 + $0x10] ss:$72 sps:$4 sm:$0xff]   ;;  %v3277_v23 = vld [vmem:[%s4398_s1 + $0x700] ss:$8 sps:$4 sm:$0xff]  }
  0x98   :  { %2096 = vmatpush1.bf16.msra.mxu1 %v3172_v18  ;;  %v3273_v18 = vld [vmem:[%s4398_s1 + $0x304] ss:$8 sps:$4 sm:$0xff]  }
  0x99   :  { %2308 = vmatpush1.bf16.msra.mxu0 %v3175_v19  ;;  %2097 = vmatprep.subr.bf16.mxu1 %v3180_v21  ;;  %v3279_v19 = vld [vmem:[%s4398_s1 + $0x704] ss:$8 sps:$4 sm:$0xff]   ;;  %v3271_v21 = vld [vmem:[%s4398_s1 + $0x300] ss:$8 sps:$4 sm:$0xff]  }
  0x9a   :  { %2309 = vmatprep.subr.bf16.mxu0 %v3183_v22  ;;  %v3274_v22 = vld [vmem:[#allocation2 + $0x30] ss:$72 sps:$4 sm:$0xff]  }
  0x9b   :  { %2083 = vmatmul.mubr.bf16.gmra.mrb[4].mxu1 %v3260_v26  ;;  %v3358_v26 = vld [vmem:[#allocation2 + $0xa4] ss:$72 sps:$4 sm:$0xff]  }
  0x9c   :  { %2295 = vmatmul.mubr.bf16.gmra.mrb[4].mxu0 %v3261_v27  ;;  %2098 = vmatpush1.bf16.msra.mxu1 %v3178_v24  ;;  %v3282_v24 = vld [vmem:[%s4398_s1 + $0x314] ss:$8 sps:$4 sm:$0xff]   ;;  %v3360_v27 = vld [vmem:[#allocation2 + $0xc4] ss:$72 sps:$4 sm:$0xff]  }
  0x9d   :  { %2310 = vmatpush1.bf16.msra.mxu0 %v3181_v25  ;;  %2099 = vmatprep.subr.bf16.mxu1 %v3186_v28  ;;  %v3285_v25 = vld [vmem:[%s4398_s1 + $0x714] ss:$8 sps:$4 sm:$0xff]   ;;  %v3280_v28 = vld [vmem:[%s4398_s1 + $0x310] ss:$8 sps:$4 sm:$0xff]  }
  0x9e   :  { %2311 = vmatprep.subr.bf16.mxu0 %v3189_v29  ;;  %2125 = vmatprep.mubr.bf16.mxu1 %v3270_v32  ;;  %v3283_v29 = vld [vmem:[%s4398_s1 + $0x710] ss:$8 sps:$4 sm:$0xff]   ;;  %v3286_v32 = vld [vmem:[%s4398_s1 + $0x320] ss:$8 sps:$4 sm:$0xff]  }
  0x9f   :  { %2337 = vmatprep.mubr.bf16.mxu0 %v3276_v35  ;;  %v3366_v35 = vld [vmem:[#allocation2 + $0xc0] ss:$72 sps:$4 sm:$0xff]  }
  0xa0   :  { %2100 = vmatpush1.bf16.msra.mxu1 %v3184_v30  ;;  %v3288_v30 = vld [vmem:[%s4398_s1 + $0x324] ss:$8 sps:$4 sm:$0xff]  }
  0xa1   :  { %2312 = vmatpush1.bf16.msra.mxu0 %v3187_v31  ;;  %2101 = vmatprep.subr.bf16.mxu1 %v3192_v33  ;;  %v3291_v31 = vld [vmem:[%s4398_s1 + $0x724] ss:$8 sps:$4 sm:$0xff]   ;;  %v3289_v33 = vld [vmem:[%s4398_s1 + $0x720] ss:$8 sps:$4 sm:$0xff]  }
  0xa2   :  { %2313 = vmatprep.subr.bf16.mxu0 %v3195_v34  ;;  %v3362_v34 = vld [vmem:[#allocation2 + $0xa0] ss:$72 sps:$4 sm:$0xff]  }
  0xa4   :  { %2102 = vmatpush1.bf16.msra.mxu1 %v3190_v36  ;;  %v3294_v36 = vld [vmem:[%s4398_s1 + $0x334] ss:$8 sps:$4 sm:$0xff]  }
  0xa5   :  { %2314 = vmatpush1.bf16.msra.mxu0 %v3193_v37  ;;  %2103 = vmatprep.subr.bf16.mxu1 %v3198_v38  ;;  %v3297_v37 = vld [vmem:[%s4398_s1 + $0x734] ss:$8 sps:$4 sm:$0xff]  }
  0xa6   :  { %2315 = vmatprep.subr.bf16.mxu0 %v3201_v39  ;;  %v3378_v38 = vld [vmem:[#allocation2 + $0x1c] ss:$72 sps:$4 sm:$0xff]  }
  0xa7   :  { %v3381_v39 = vld [vmem:[#allocation2 + $0x3c] ss:$72 sps:$4 sm:$0xff]  }
  0xa8   :  { %2104 = vmatpush1.bf16.msra.mxu1 %v3196_v40  ;;  %v3292_v40 = vld [vmem:[%s4398_s1 + $0x330] ss:$8 sps:$4 sm:$0xff]  }
  0xa9   :  { %2316 = vmatpush1.bf16.msra.mxu0 %v3199_v41  ;;  %2105 = vmatprep.subr.bf16.mxu1 %v3204_v42  ;;  %v3295_v41 = vld [vmem:[%s4398_s1 + $0x730] ss:$8 sps:$4 sm:$0xff]   ;;  %v3300_v42 = vld [vmem:[%s4398_s1 + $0x344] ss:$8 sps:$4 sm:$0xff]  }
  0xaa   :  { %2317 = vmatprep.subr.bf16.mxu0 %v3207_v43  ;;  %v3303_v43 = vld [vmem:[%s4398_s1 + $0x744] ss:$8 sps:$4 sm:$0xff]  }
  0xac   :  { %2106 = vmatpush1.bf16.msra.mxu1 %v3202_v44  ;;  %v3298_v44 = vld [vmem:[%s4398_s1 + $0x340] ss:$8 sps:$4 sm:$0xff]  }
  0xad   :  { %2318 = vmatpush1.bf16.msra.mxu0 %v3205_v45  ;;  %2107 = vmatprep.subr.bf16.mxu1 %v3210_v46  ;;  %v3301_v45 = vld [vmem:[%s4398_s1 + $0x740] ss:$8 sps:$4 sm:$0xff]   ;;  %v3306_v46 = vld [vmem:[%s4398_s1 + $0x354] ss:$8 sps:$4 sm:$0xff]  }
  0xae   :  { %2319 = vmatprep.subr.bf16.mxu0 %v3213_v47  ;;  %v3309_v47 = vld [vmem:[%s4398_s1 + $0x754] ss:$8 sps:$4 sm:$0xff]  }
  0xb0   :  { %2108 = vmatpush1.bf16.msra.mxu1 %v3208_v48  ;;  %v3304_v48 = vld [vmem:[%s4398_s1 + $0x350] ss:$8 sps:$4 sm:$0xff]  }
  0xb1   :  { %2320 = vmatpush1.bf16.msra.mxu0 %v3211_v49  ;;  %2109 = vmatprep.subr.bf16.mxu1 %v3216_v50  ;;  %v3307_v49 = vld [vmem:[%s4398_s1 + $0x750] ss:$8 sps:$4 sm:$0xff]   ;;  %v3312_v50 = vld [vmem:[%s4398_s1 + $0x364] ss:$8 sps:$4 sm:$0xff]  }
  0xb2   :  { %2321 = vmatprep.subr.bf16.mxu0 %v3219_v51  ;;  %v3315_v51 = vld [vmem:[%s4398_s1 + $0x764] ss:$8 sps:$4 sm:$0xff]  }
  0xb4   :  { %2110 = vmatpush1.bf16.msra.mxu1 %v3214_v52  ;;  %v3310_v52 = vld [vmem:[%s4398_s1 + $0x360] ss:$8 sps:$4 sm:$0xff]  }
  0xb5   :  { %2322 = vmatpush1.bf16.msra.mxu0 %v3217_v53  ;;  %2111 = vmatprep.subr.bf16.mxu1 %v3222_v54  ;;  %v3313_v53 = vld [vmem:[%s4398_s1 + $0x760] ss:$8 sps:$4 sm:$0xff]   ;;  %v3318_v54 = vld [vmem:[%s4398_s1 + $0x374] ss:$8 sps:$4 sm:$0xff]  }
  0xb6   :  { %2323 = vmatprep.subr.bf16.mxu0 %v3225_v55  ;;  %v3321_v55 = vld [vmem:[%s4398_s1 + $0x774] ss:$8 sps:$4 sm:$0xff]  }
  0xb8   :  { %2112 = vmatpush1.bf16.msra.mxu1 %v3220_v56  ;;  %v3316_v56 = vld [vmem:[%s4398_s1 + $0x370] ss:$8 sps:$4 sm:$0xff]  }
  0xb9   :  { %2324 = vmatpush1.bf16.msra.mxu0 %v3223_v57  ;;  %2113 = vmatprep.subr.bf16.mxu1 %v3228_v58  ;;  %v3319_v57 = vld [vmem:[%s4398_s1 + $0x770] ss:$8 sps:$4 sm:$0xff]   ;;  %v3324_v58 = vld [vmem:[%s4398_s1 + $0x384] ss:$8 sps:$4 sm:$0xff]  }
  0xba   :  { %2325 = vmatprep.subr.bf16.mxu0 %v3231_v59  ;;  %v3327_v59 = vld [vmem:[%s4398_s1 + $0x784] ss:$8 sps:$4 sm:$0xff]  }
  0xbc   :  { %2114 = vmatpush1.bf16.msra.mxu1 %v3226_v60  ;;  %v3322_v60 = vld [vmem:[%s4398_s1 + $0x380] ss:$8 sps:$4 sm:$0xff]  }
  0xbd   :  { %2326 = vmatpush1.bf16.msra.mxu0 %v3229_v61  ;;  %2115 = vmatprep.subr.bf16.mxu1 %v3234_v62  ;;  %v3325_v61 = vld [vmem:[%s4398_s1 + $0x780] ss:$8 sps:$4 sm:$0xff]   ;;  %v3330_v62 = vld [vmem:[%s4398_s1 + $0x394] ss:$8 sps:$4 sm:$0xff]  }
  0xbe   :  { %2327 = vmatprep.subr.bf16.mxu0 %v3237_v63  ;;  %v3333_v63 = vld [vmem:[%s4398_s1 + $0x794] ss:$8 sps:$4 sm:$0xff]  }
  0xc0   :  { %2116 = vmatpush1.bf16.msra.mxu1 %v3232_v0  ;;  %v3328_v0 = vld [vmem:[%s4398_s1 + $0x390] ss:$8 sps:$4 sm:$0xff]  }
  0xc1   :  { %2328 = vmatpush1.bf16.msra.mxu0 %v3235_v1  ;;  %2117 = vmatprep.subr.bf16.mxu1 %v3240_v2  ;;  %v3331_v1 = vld [vmem:[%s4398_s1 + $0x790] ss:$8 sps:$4 sm:$0xff]   ;;  %v3336_v2 = vld [vmem:[%s4398_s1 + $0x3a4] ss:$8 sps:$4 sm:$0xff]  }
  0xc2   :  { %2329 = vmatprep.subr.bf16.mxu0 %v3243_v3  ;;  %v3339_v3 = vld [vmem:[%s4398_s1 + $0x7a4] ss:$8 sps:$4 sm:$0xff]  }
  0xc4   :  { %2118 = vmatpush1.bf16.msra.mxu1 %v3238_v4  ;;  %v3334_v4 = vld [vmem:[%s4398_s1 + $0x3a0] ss:$8 sps:$4 sm:$0xff]  }
  0xc5   :  { %2330 = vmatpush1.bf16.msra.mxu0 %v3241_v5  ;;  %2119 = vmatprep.subr.bf16.mxu1 %v3246_v6  ;;  %v3337_v5 = vld [vmem:[%s4398_s1 + $0x7a0] ss:$8 sps:$4 sm:$0xff]   ;;  %v3342_v6 = vld [vmem:[%s4398_s1 + $0x3b4] ss:$8 sps:$4 sm:$0xff]  }
  0xc6   :  { %2331 = vmatprep.subr.bf16.mxu0 %v3249_v7  ;;  %v3345_v7 = vld [vmem:[%s4398_s1 + $0x7b4] ss:$8 sps:$4 sm:$0xff]  }
  0xc8   :  { %2120 = vmatpush1.bf16.msra.mxu1 %v3244_v8  ;;  %v3340_v8 = vld [vmem:[%s4398_s1 + $0x3b0] ss:$8 sps:$4 sm:$0xff]  }
  0xc9   :  { %2332 = vmatpush1.bf16.msra.mxu0 %v3247_v9  ;;  %2121 = vmatprep.subr.bf16.mxu1 %v3254_v10  ;;  %v3343_v9 = vld [vmem:[%s4398_s1 + $0x7b0] ss:$8 sps:$4 sm:$0xff]   ;;  %v3348_v10 = vld [vmem:[%s4398_s1 + $0x3c4] ss:$8 sps:$4 sm:$0xff]  }
  0xca   :  { %2333 = vmatprep.subr.bf16.mxu0 %v3259_v11  ;;  %v3351_v11 = vld [vmem:[%s4398_s1 + $0x7c4] ss:$8 sps:$4 sm:$0xff]  }
  0xcc   :  { %2122 = vmatpush1.bf16.msra.mxu1 %v3252_v12  ;;  %v3346_v12 = vld [vmem:[%s4398_s1 + $0x3c0] ss:$8 sps:$4 sm:$0xff]  }
  0xcd   :  { %2334 = vmatpush1.bf16.msra.mxu0 %v3257_v13  ;;  %2123 = vmatprep.subr.bf16.mxu1 %v3264_v14  ;;  %v3349_v13 = vld [vmem:[%s4398_s1 + $0x7c0] ss:$8 sps:$4 sm:$0xff]   ;;  %v3354_v14 = vld [vmem:[%s4398_s1 + $0x3d4] ss:$8 sps:$4 sm:$0xff]  }
  0xce   :  { %2335 = vmatprep.subr.bf16.mxu0 %v3267_v15  ;;  %v3357_v15 = vld [vmem:[%s4398_s1 + $0x7d4] ss:$8 sps:$4 sm:$0xff]  }
  0xd0   :  { %2124 = vmatpush1.bf16.msra.mxu1 %v3262_v16  ;;  %v3352_v16 = vld [vmem:[%s4398_s1 + $0x3d0] ss:$8 sps:$4 sm:$0xff]  }
  0xd1   :  { %2336 = vmatpush1.bf16.msra.mxu0 %v3265_v17  ;;  %2146 = vmatprep.subr.bf16.mxu1 %v3273_v18  ;;  %v3355_v17 = vld [vmem:[%s4398_s1 + $0x7d0] ss:$8 sps:$4 sm:$0xff]   ;;  %v3365_v18 = vld [vmem:[%s4398_s1 + $0x3e4] ss:$8 sps:$4 sm:$0xff]  }
  0xd2   :  { %2358 = vmatprep.subr.bf16.mxu0 %v3279_v19  ;;  %v3369_v19 = vld [vmem:[%s4398_s1 + $0x7e4] ss:$8 sps:$4 sm:$0xff]  }
  0xd3   :  { %2126 = vmatmul.mubr.bf16.vlgmr.msra.gmra.mrb[0].mxu1 %v3268_v20  ;;  %v3363_v20 = vld [vmem:[%s4398_s1 + $0x3e0] ss:$8 sps:$4 sm:$0xff]  }
  0xd4   :  { %2338 = vmatmul.mubr.bf16.vlgmr.msra.gmra.mrb[0].mxu0 %v3274_v22  ;;  %2147 = vmatpush1.bf16.msra.mxu1 %v3271_v21  ;;  %v3367_v21 = vld [vmem:[%s4398_s1 + $0x7e0] ss:$8 sps:$4 sm:$0xff]   ;;  %v3372_v22 = vld [vmem:[%s4398_s1 + $0x3f4] ss:$8 sps:$4 sm:$0xff]  }
  0xd5   :  { %2359 = vmatpush1.bf16.msra.mxu0 %v3277_v23  ;;  %2148 = vmatprep.subr.bf16.mxu1 %v3282_v24  ;;  %v3375_v23 = vld [vmem:[%s4398_s1 + $0x7f4] ss:$8 sps:$4 sm:$0xff]   ;;  %v3370_v24 = vld [vmem:[%s4398_s1 + $0x3f0] ss:$8 sps:$4 sm:$0xff]  }
  0xd6   :  { %2360 = vmatprep.subr.bf16.mxu0 %v3285_v25  ;;  %2135 = vmatprep.mubr.bf16.mxu1 %v3358_v26  ;;  %v3373_v25 = vld [vmem:[%s4398_s1 + $0x7f0] ss:$8 sps:$4 sm:$0xff]   ;;  %v3384_v26 = vld [vmem:[%s4398_s1 + $0x804] ss:$8 sps:$4 sm:$0xff]  }
  0xd7   :  { %2347 = vmatprep.mubr.bf16.mxu0 %v3360_v27  ;;  %v3376_v27 = vld [vmem:[#allocation2 + $0x18] ss:$72 sps:$4 sm:$0xff]  }
  0xd8   :  { %2149 = vmatpush1.bf16.msra.mxu1 %v3280_v28  ;;  %v3379_v28 = vld [vmem:[#allocation2 + $0x38] ss:$72 sps:$4 sm:$0xff]  }
  0xd9   :  { %2361 = vmatpush1.bf16.msra.mxu0 %v3283_v29  ;;  %2150 = vmatprep.subr.bf16.mxu1 %v3288_v30  ;;  %v3382_v29 = vld [vmem:[%s4398_s1 + $0x800] ss:$8 sps:$4 sm:$0xff]   ;;  %v3387_v30 = vld [vmem:[%s4398_s1 + $0x814] ss:$8 sps:$4 sm:$0xff]  }
  0xda   :  { %2362 = vmatprep.subr.bf16.mxu0 %v3291_v31  ;;  %v3388_v31 = vld [vmem:[#allocation2 + $0xac] ss:$72 sps:$4 sm:$0xff]  }
  0xdb   :  { %2136 = vmatmul.mubr.bf16.gmra.mrb[4].mxu1 %v3362_v34  ;;  %v3396_v34 = vld [vmem:[%s4398_s1 + $0x824] ss:$8 sps:$4 sm:$0xff]  }
  0xdc   :  { %2348 = vmatmul.mubr.bf16.gmra.mrb[4].mxu0 %v3366_v35  ;;  %2151 = vmatpush1.bf16.msra.mxu1 %v3286_v32  ;;  %v3390_v32 = vld [vmem:[#allocation2 + $0xcc] ss:$72 sps:$4 sm:$0xff]   ;;  %v3392_v35 = vld [vmem:[#allocation2 + $0xa8] ss:$72 sps:$4 sm:$0xff]  }
  0xdd   :  { %2363 = vmatpush1.bf16.msra.mxu0 %v3289_v33  ;;  %2152 = vmatprep.subr.bf16.mxu1 %v3294_v36  ;;  %v3385_v33 = vld [vmem:[%s4398_s1 + $0x810] ss:$8 sps:$4 sm:$0xff]  }
  0xde   :  { %2364 = vmatprep.subr.bf16.mxu0 %v3297_v37  ;;  %2178 = vmatprep.mubr.bf16.mxu1 %v3378_v38  ;;  %v3393_v36 = vld [vmem:[#allocation2 + $0xc8] ss:$72 sps:$4 sm:$0xff]   ;;  %v3399_v38 = vld [vmem:[%s4398_s1 + $0x834] ss:$8 sps:$4 sm:$0xff]  }
  0xdf   :  { %2390 = vmatprep.mubr.bf16.mxu0 %v3381_v39  ;;  %v3394_v37 = vld [vmem:[%s4398_s1 + $0x820] ss:$8 sps:$4 sm:$0xff]   ;;  %v3438_v39 = vld [vmem:[#allocation2 + $0x44] ss:$72 sps:$4 sm:$0xff]  }
  0xe0   :  { %2153 = vmatpush1.bf16.msra.mxu1 %v3292_v40  ;;  %v3441_v40 = vld [vmem:[#allocation2 + $0xd4] ss:$72 sps:$4 sm:$0xff]  }
  0xe1   :  { %2365 = vmatpush1.bf16.msra.mxu0 %v3295_v41  ;;  %2154 = vmatprep.subr.bf16.mxu1 %v3300_v42  ;;  %v3397_v41 = vld [vmem:[%s4398_s1 + $0x830] ss:$8 sps:$4 sm:$0xff]   ;;  %v3402_v42 = vld [vmem:[%s4398_s1 + $0x844] ss:$8 sps:$4 sm:$0xff]  }
  0xe2   :  { %2366 = vmatprep.subr.bf16.mxu0 %v3303_v43  ;;  %v3400_v43 = vld [vmem:[%s4398_s1 + $0x840] ss:$8 sps:$4 sm:$0xff]  }
  0xe4   :  { %2155 = vmatpush1.bf16.msra.mxu1 %v3298_v44  ;;  %v3405_v44 = vld [vmem:[%s4398_s1 + $0x854] ss:$8 sps:$4 sm:$0xff]  }
  0xe5   :  { %2367 = vmatpush1.bf16.msra.mxu0 %v3301_v45  ;;  %2156 = vmatprep.subr.bf16.mxu1 %v3306_v46  ;;  %v3403_v45 = vld [vmem:[%s4398_s1 + $0x850] ss:$8 sps:$4 sm:$0xff]   ;;  %v3408_v46 = vld [vmem:[%s4398_s1 + $0x864] ss:$8 sps:$4 sm:$0xff]  }
  0xe6   :  { %2368 = vmatprep.subr.bf16.mxu0 %v3309_v47  ;;  %v3406_v47 = vld [vmem:[%s4398_s1 + $0x860] ss:$8 sps:$4 sm:$0xff]  }
  0xe8   :  { %2157 = vmatpush1.bf16.msra.mxu1 %v3304_v48  ;;  %v3411_v48 = vld [vmem:[%s4398_s1 + $0x874] ss:$8 sps:$4 sm:$0xff]  }
  0xe9   :  { %2369 = vmatpush1.bf16.msra.mxu0 %v3307_v49  ;;  %2158 = vmatprep.subr.bf16.mxu1 %v3312_v50  ;;  %v3409_v49 = vld [vmem:[%s4398_s1 + $0x870] ss:$8 sps:$4 sm:$0xff]   ;;  %v3414_v50 = vld [vmem:[%s4398_s1 + $0x884] ss:$8 sps:$4 sm:$0xff]  }
  0xea   :  { %2370 = vmatprep.subr.bf16.mxu0 %v3315_v51  ;;  %v3412_v51 = vld [vmem:[%s4398_s1 + $0x880] ss:$8 sps:$4 sm:$0xff]  }
  0xec   :  { %2159 = vmatpush1.bf16.msra.mxu1 %v3310_v52  ;;  %v3417_v52 = vld [vmem:[%s4398_s1 + $0x894] ss:$8 sps:$4 sm:$0xff]  }
  0xed   :  { %2371 = vmatpush1.bf16.msra.mxu0 %v3313_v53  ;;  %2160 = vmatprep.subr.bf16.mxu1 %v3318_v54  ;;  %v3415_v53 = vld [vmem:[%s4398_s1 + $0x890] ss:$8 sps:$4 sm:$0xff]   ;;  %v3420_v54 = vld [vmem:[%s4398_s1 + $0x8a4] ss:$8 sps:$4 sm:$0xff]  }
  0xee   :  { %2372 = vmatprep.subr.bf16.mxu0 %v3321_v55  ;;  %v3418_v55 = vld [vmem:[%s4398_s1 + $0x8a0] ss:$8 sps:$4 sm:$0xff]  }
  0xf0   :  { %2161 = vmatpush1.bf16.msra.mxu1 %v3316_v56  ;;  %v3423_v56 = vld [vmem:[%s4398_s1 + $0x8b4] ss:$8 sps:$4 sm:$0xff]  }
  0xf1   :  { %2373 = vmatpush1.bf16.msra.mxu0 %v3319_v57  ;;  %2162 = vmatprep.subr.bf16.mxu1 %v3324_v58  ;;  %v3421_v57 = vld [vmem:[%s4398_s1 + $0x8b0] ss:$8 sps:$4 sm:$0xff]   ;;  %v3426_v58 = vld [vmem:[%s4398_s1 + $0x8c4] ss:$8 sps:$4 sm:$0xff]  }
  0xf2   :  { %2374 = vmatprep.subr.bf16.mxu0 %v3327_v59  ;;  %v3424_v59 = vld [vmem:[%s4398_s1 + $0x8c0] ss:$8 sps:$4 sm:$0xff]  }
  0xf4   :  { %2163 = vmatpush1.bf16.msra.mxu1 %v3322_v60  ;;  %v3429_v60 = vld [vmem:[%s4398_s1 + $0x8d4] ss:$8 sps:$4 sm:$0xff]  }
  0xf5   :  { %2375 = vmatpush1.bf16.msra.mxu0 %v3325_v61  ;;  %2164 = vmatprep.subr.bf16.mxu1 %v3330_v62  ;;  %v3427_v61 = vld [vmem:[%s4398_s1 + $0x8d0] ss:$8 sps:$4 sm:$0xff]   ;;  %v3432_v62 = vld [vmem:[%s4398_s1 + $0x8e4] ss:$8 sps:$4 sm:$0xff]  }
  0xf6   :  { %2376 = vmatprep.subr.bf16.mxu0 %v3333_v63  ;;  %v3430_v63 = vld [vmem:[%s4398_s1 + $0x8e0] ss:$8 sps:$4 sm:$0xff]  }
  0xf8   :  { %2165 = vmatpush1.bf16.msra.mxu1 %v3328_v0  ;;  %v3435_v0 = vld [vmem:[%s4398_s1 + $0x8f4] ss:$8 sps:$4 sm:$0xff]  }
  0xf9   :  { %2377 = vmatpush1.bf16.msra.mxu0 %v3331_v1  ;;  %2166 = vmatprep.subr.bf16.mxu1 %v3336_v2  ;;  %v3433_v1 = vld [vmem:[%s4398_s1 + $0x8f0] ss:$8 sps:$4 sm:$0xff]   ;;  %v3436_v2 = vld [vmem:[#allocation2 + $0x40] ss:$72 sps:$4 sm:$0xff]  }
  0xfa   :  { %2378 = vmatprep.subr.bf16.mxu0 %v3339_v3  ;;  %v3439_v3 = vld [vmem:[#allocation2 + $0xd0] ss:$72 sps:$4 sm:$0xff]  }
  0xfc   :  { %2167 = vmatpush1.bf16.msra.mxu1 %v3334_v4  ;;  %v357_v4 = vlaneseq }
  0xfd   :  { %2379 = vmatpush1.bf16.msra.mxu0 %v3337_v5  ;;  %2168 = vmatprep.subr.bf16.mxu1 %v3342_v6 }
  0xfe   :  { %2380 = vmatprep.subr.bf16.mxu0 %v3345_v7  ;;  %v358_v5 = vshrl.u32 %v357_v4, 7 }
 0x100   :  { %2169 = vmatpush1.bf16.msra.mxu1 %v3340_v8 }
 0x101   :  { %2381 = vmatpush1.bf16.msra.mxu0 %v3343_v9  ;;  %2170 = vmatprep.subr.bf16.mxu1 %v3348_v10  ;;  %v359_v9 = vsub.s32 0, %v358_v5 }
 0x102   :  { %2382 = vmatprep.subr.bf16.mxu0 %v3351_v11  ;;  %v355_v11 = vld [vmem:[%s4399_s2] sm:$0x3] }
 0x104   :  { %2171 = vmatpush1.bf16.msra.mxu1 %v3346_v12  ;;  %v363_v12 = vsub.s32 1, %v358_v5 }
 0x105   :  { %2383 = vmatpush1.bf16.msra.mxu0 %v3349_v13  ;;  %2172 = vmatprep.subr.bf16.mxu1 %v3354_v14  ;;  %v360_v13 = vrot.slane %v355_v11, %v359_v9 }
 0x106   :  { %2384 = vmatprep.subr.bf16.mxu0 %v3357_v15  ;;  %v364_v14 = vrot.slane %v355_v11, %v363_v12 }
 0x108   :  { %2173 = vmatpush1.bf16.msra.mxu1 %v3352_v16 }
 0x109   :  { %2385 = vmatpush1.bf16.msra.mxu0 %v3355_v17  ;;  %2174 = vmatprep.subr.bf16.mxu1 %v3365_v18 }
 0x10a   :  { %2386 = vmatprep.subr.bf16.mxu0 %v3369_v19 }
 0x10c   :  { %2175 = vmatpush1.bf16.msra.mxu1 %v3363_v20 }
 0x10d   :  { %2387 = vmatpush1.bf16.msra.mxu0 %v3367_v21  ;;  %2176 = vmatprep.subr.bf16.mxu1 %v3372_v22 }
 0x10e   :  { %2388 = vmatprep.subr.bf16.mxu0 %v3375_v23 }
 0x110   :  { %2177 = vmatpush1.bf16.msra.mxu1 %v3370_v24 }
 0x111   :  { %2389 = vmatpush1.bf16.msra.mxu0 %v3373_v25  ;;  %2849 = vmatprep.subr.bf16.mxu1 %v3384_v26 }
 0x112   :  { %2411 = vmatprep.subr.bf16.mxu0 %v3384_v26 }
 0x113   :  { %2179 = vmatmul.mubr.bf16.vlgmr.msra.gmra.mrb[0].mxu1 %v3376_v27 }
 0x114   :  { %2391 = vmatmul.mubr.bf16.vlgmr.msra.gmra.mrb[0].mxu0 %v3379_v28  ;;  %2865 = vmatpush1.bf16.msra.mxu1 %v3382_v29 }
 0x115   :  { %2412 = vmatpush1.bf16.msra.mxu0 %v3382_v29  ;;  %2850 = vmatprep.subr.bf16.mxu1 %v3387_v30 }
 0x116   :  { %2413 = vmatprep.subr.bf16.mxu0 %v3387_v30  ;;  %2188 = vmatprep.mubr.bf16.mxu1 %v3388_v31  ;;  %v2464_v31 = vld [vmem:[%s4400_s3] sm:$0xff] }
 0x117   :  { %2400 = vmatprep.mubr.bf16.mxu0 %v3390_v32  ;;  %v2466_v32 = vld [vmem:[%s4400_s3 + $0x10] sm:$0xff] }
 0x118   :  { %2866 = vmatpush1.bf16.msra.mxu1 %v3385_v33 }
 0x119   :  { %2414 = vmatpush1.bf16.msra.mxu0 %v3385_v33  ;;  %2851 = vmatprep.subr.bf16.mxu1 %v3396_v34  ;;  %v2465_v33 = vld [vmem:[%s4400_s3 + $0x8] sm:$0xff] }
 0x11a   :  { %2415 = vmatprep.subr.bf16.mxu0 %v3396_v34  ;;  %v2467_v34 = vld [vmem:[%s4400_s3 + $0x18] sm:$0xff] }
 0x11b   :  { %2189 = vmatmul.mubr.bf16.gmra.mrb[4].mxu1 %v3392_v35 }
 0x11c   :  { %2401 = vmatmul.mubr.bf16.gmra.mrb[4].mxu0 %v3393_v36  ;;  %2867 = vmatpush1.bf16.msra.mxu1 %v3394_v37  ;;  %v2468_v36 = vunpack.c.l.bf16 %v2464_v31 }
 0x11d   :  { %2416 = vmatpush1.bf16.msra.mxu0 %v3394_v37  ;;  %2852 = vmatprep.subr.bf16.mxu1 %v3399_v38  ;;  %v2472_v37 = vunpack.c.l.bf16 %v2466_v32 }
 0x11e   :  { %2417 = vmatprep.subr.bf16.mxu0 %v3399_v38  ;;  %2443 = vmatprep.mubr.bf16.mxu0 %v3438_v39  ;;  %v2469_v38 = vunpack.c.h.bf16 %v2464_v31 }
 0x11f   :  { %2453 = vmatprep.mubr.bf16.mxu1 %v3441_v40 }
 0x120   :  { %2868 = vmatpush1.bf16.msra.mxu1 %v3397_v41 }
 0x121   :  { %2418 = vmatpush1.bf16.msra.mxu0 %v3397_v41  ;;  %2853 = vmatprep.subr.bf16.mxu1 %v3402_v42 }
 0x122   :  { %2419 = vmatprep.subr.bf16.mxu0 %v3402_v42  ;;  %v2473_v42 = vunpack.c.h.bf16 %v2466_v32 }
 0x124   :  { %2869 = vmatpush1.bf16.msra.mxu1 %v3400_v43 }
 0x125   :  { %2420 = vmatpush1.bf16.msra.mxu0 %v3400_v43  ;;  %2854 = vmatprep.subr.bf16.mxu1 %v3405_v44  ;;  %v2470_v43 = vunpack.c.l.bf16 %v2465_v33 }
 0x126   :  { %2421 = vmatprep.subr.bf16.mxu0 %v3405_v44  ;;  %v2474_v44 = vunpack.c.l.bf16 %v2467_v34 }
 0x128   :  { %2870 = vmatpush1.bf16.msra.mxu1 %v3403_v45 }
 0x129   :  { %2422 = vmatpush1.bf16.msra.mxu0 %v3403_v45  ;;  %2855 = vmatprep.subr.bf16.mxu1 %v3408_v46 }
 0x12a   :  { %2423 = vmatprep.subr.bf16.mxu0 %v3408_v46 }
 0x12c   :  { %2871 = vmatpush1.bf16.msra.mxu1 %v3406_v47 }
 0x12d   :  { %2424 = vmatpush1.bf16.msra.mxu0 %v3406_v47  ;;  %2856 = vmatprep.subr.bf16.mxu1 %v3411_v48 }
 0x12e   :  { %2425 = vmatprep.subr.bf16.mxu0 %v3411_v48 }
 0x130   :  { %2872 = vmatpush1.bf16.msra.mxu1 %v3409_v49 }
 0x131   :  { %2426 = vmatpush1.bf16.msra.mxu0 %v3409_v49  ;;  %2857 = vmatprep.subr.bf16.mxu1 %v3414_v50 }
 0x132   :  { %2427 = vmatprep.subr.bf16.mxu0 %v3414_v50  ;;  %v2471_v50 = vunpack.c.h.bf16 %v2465_v33 }
 0x134   :  { %2873 = vmatpush1.bf16.msra.mxu1 %v3412_v51 }
 0x135   :  { %2428 = vmatpush1.bf16.msra.mxu0 %v3412_v51  ;;  %2858 = vmatprep.subr.bf16.mxu1 %v3417_v52 }
 0x136   :  { %2429 = vmatprep.subr.bf16.mxu0 %v3417_v52 }
 0x138   :  { %2874 = vmatpush1.bf16.msra.mxu1 %v3415_v53 }
 0x139   :  { %2430 = vmatpush1.bf16.msra.mxu0 %v3415_v53  ;;  %2859 = vmatprep.subr.bf16.mxu1 %v3420_v54 }
 0x13a   :  { %2431 = vmatprep.subr.bf16.mxu0 %v3420_v54 }
 0x13c   :  { %2875 = vmatpush1.bf16.msra.mxu1 %v3418_v55 }
 0x13d   :  { %2432 = vmatpush1.bf16.msra.mxu0 %v3418_v55  ;;  %2860 = vmatprep.subr.bf16.mxu1 %v3423_v56 }
 0x13e   :  { %2433 = vmatprep.subr.bf16.mxu0 %v3423_v56  ;;  %v2475_v56 = vunpack.c.h.bf16 %v2467_v34 }
 0x140   :  { %2876 = vmatpush1.bf16.msra.mxu1 %v3421_v57 }
 0x141   :  { %2434 = vmatpush1.bf16.msra.mxu0 %v3421_v57  ;;  %2861 = vmatprep.subr.bf16.mxu1 %v3426_v58 }
 0x142   :  { %2435 = vmatprep.subr.bf16.mxu0 %v3426_v58 }
 0x144   :  { %2877 = vmatpush1.bf16.msra.mxu1 %v3424_v59 }
 0x145   :  { %2436 = vmatpush1.bf16.msra.mxu0 %v3424_v59  ;;  %2862 = vmatprep.subr.bf16.mxu1 %v3429_v60 }
 0x146   :  { %2437 = vmatprep.subr.bf16.mxu0 %v3429_v60 }
 0x148   :  { %2878 = vmatpush1.bf16.msra.mxu1 %v3427_v61 }
 0x149   :  { %2438 = vmatpush1.bf16.msra.mxu0 %v3427_v61  ;;  %2863 = vmatprep.subr.bf16.mxu1 %v3432_v62 }
 0x14a   :  { %2439 = vmatprep.subr.bf16.mxu0 %v3432_v62 }
 0x14c   :  { %2879 = vmatpush1.bf16.msra.mxu1 %v3430_v63 }
 0x14d   :  { %2440 = vmatpush1.bf16.msra.mxu0 %v3430_v63  ;;  %2864 = vmatprep.subr.bf16.mxu1 %v3435_v0 }
 0x14e   :  { %2441 = vmatprep.subr.bf16.mxu0 %v3435_v0 }
 0x150   :  { %2880 = vmatpush1.bf16.msra.mxu1 %v3433_v1 }
 0x151   :  { %2442 = vmatpush1.bf16.msra.mxu0 %v3433_v1 }
 0x153   :  { %2454 = vmatmul.mubr.bf16.vlgmr.msra.gmra.mrb[8].mxu1 %v3439_v3 }
 0x154   :  { %2444 = vmatmul.mubr.bf16.vlgmr.msra.gmra.mrb[0].mxu0 %v3436_v2 }
 0x1e6   :  { %v2180_v6 = vpop.f32.mrb[0].mxu1 }
 0x1e7   :  { %v2182_v7 = vpop.f32.mrb[1].mxu1  ;;  %v2881_v35 = vadd.f32 %v2180_v6, %v360_v13 }
 0x1e8   :  { %v2184_v8 = vpop.f32.mrb[2].mxu1  ;;  %v2883_v39 = vadd.f32 %v2182_v7, %v364_v14 }
 0x1e9   :  { %v2186_v10 = vpop.f32.mrb[3].mxu1  ;;  %v2885_v45 = vadd.f32 %v2184_v8, %v360_v13 }
 0x1ea   :  { %v2887_v51 = vadd.f32 %v2186_v10, %v364_v14 }
 0x1ee   :  { %v2190_v15 = vpop.f32.mrb[4].mxu1 }
 0x1ef   :  { %v2402_v16 = vpop.f32.mrb[4].mxu0  ;;  %v2889_v17 = vadd.f32 %v2190_v15, %v360_v13  ;;  %v2192_v18 = vpop.f32.mrb[5].mxu1 }
 0x1f0   :  { %v2404_v19 = vpop.f32.mrb[5].mxu0  ;;  %v2892_v20 = vadd.f32 %v2192_v18, %v364_v14  ;;  %v2194_v21 = vpop.f32.mrb[6].mxu1 }
 0x1f1   :  { %v2406_v22 = vpop.f32.mrb[6].mxu0  ;;  %v2890_v23 = vadd.f32 %v2889_v17, %v2402_v16  ;;  %v2895_v24 = vadd.f32 %v2194_v21, %v360_v13  ;;  %v2196_v25 = vpop.f32.mrb[7].mxu1 }
 0x1f2   :  { %v2408_v26 = vpop.f32.mrb[7].mxu0  ;;  %v2893_v27 = vadd.f32 %v2892_v20, %v2404_v19  ;;  %v2898_v28 = vadd.f32 %v2196_v25, %v364_v14 }
 0x1f3   :  { %v2896_v29 = vadd.f32 %v2895_v24, %v2406_v22 }
 0x1f4   :  { %v2899_v30 = vadd.f32 %v2898_v28, %v2408_v26 }
 0x226   :  { %v2455_v41 = vpop.f32.mrb[8].mxu1 }
 0x227   :  { %v2445_v40 = vpop.f32.mrb[0].mxu0  ;;  %v2891_v47 = vadd.f32 %v2890_v23, %v2455_v41  ;;  %v2457_v49 = vpop.f32.mrb[9].mxu1 }
 0x228   :  { %v2882_v46 = vadd.f32 %v2881_v35, %v2445_v40  ;;  %v2447_v48 = vpop.f32.mrb[1].mxu0  ;;  %v2894_v53 = vadd.f32 %v2893_v27, %v2457_v49  ;;  %v2459_v55 = vpop.f32.mrb[10].mxu1 }
 0x229   :  { %v2884_v52 = vadd.f32 %v2883_v39, %v2447_v48  ;;  %v2449_v54 = vpop.f32.mrb[2].mxu0  ;;  %v2480_v58 = vadd.f32 %v2891_v47, %v2472_v37  ;;  %v2897_v60 = vadd.f32 %v2896_v29, %v2459_v55  ;;  %v2461_v62 = vpop.f32.mrb[11].mxu1 }
 0x22a   :  { %v2476_v57 = vadd.f32 %v2882_v46, %v2468_v36  ;;  %v2886_v59 = vadd.f32 %v2885_v45, %v2449_v54  ;;  %v2451_v61 = vpop.f32.mrb[3].mxu0  ;;  %v2481_v0 = vadd.f32 %v2894_v53, %v2473_v42  ;;  %v2900_v2 = vadd.f32 %v2899_v30, %v2461_v62 }
 0x22b   :  { %v2477_v63 = vadd.f32 %v2884_v52, %v2469_v38  ;;  %v2888_v1 = vadd.f32 %v2887_v51, %v2451_v61  ;;  %v2482_v4 = vadd.f32 %v2897_v60, %v2474_v44 }
 0x22c   :  { %v2478_v3 = vadd.f32 %v2886_v59, %v2470_v43  ;;  %v2847_v6 = vpack.c.bf16 %v2481_v0, %v2480_v58  ;;  %v2483_v8 = vadd.f32 %v2900_v2, %v2475_v56 }
 0x22d   :  { %v2845_v5 = vpack.c.bf16 %v2477_v63, %v2476_v57  ;;  %v2479_v7 = vadd.f32 %v2888_v1, %v2471_v50 }
 0x22e   :  { %2510 = vst [vmem:[%s4401_s4 + $0x10] sm:$0xff] %v2847_v6  ;;  %v2848_v10 = vpack.c.bf16 %v2483_v8, %v2482_v4 }
 0x22f   :  { %2508 = vst [vmem:[%s4401_s4] sm:$0xff] %v2845_v5  ;;  %v2846_v9 = vpack.c.bf16 %v2479_v7, %v2478_v3 }
 0x230   :  { %2511 = vst [vmem:[%s4401_s4 + $0x18] sm:$0xff] %v2848_v10 }
 0x231   :  { %2509 = vst [vmem:[%s4401_s4 + $0x8] sm:$0xff] %v2846_v9 }
 0x232   :  { %2516 = vsyncpa [#allocation3], 1 }

// kernel: resnet_generator_forward.18
= control target key start
LH: loop header
LB: loop body
LE: loop exit
PB: predicated region body
PF: predicated region fallthrough
CT: control target
= control target key end

     0   :  { %s4448_s1 = inlined_call_operand.vmem [shape: bf16[2304,256], index: 1, kind: input, shape index: {}]   ;;  %s4449_s0 = inlined_call_operand.vmem [shape: bf16[32,2304], index: 0, kind: input, shape index: {}]   ;;  %s4450_s2 = inlined_call_operand.vmem [shape: f32[1,256], index: 2, kind: input, shape index: {}]   ;;  %s4451_s3 = inlined_call_operand.vmem [shape: bf16[32,256], index: 3, kind: input, shape index: {}]   ;;  %s4452_s4 = inlined_call_operand.vmem [shape: bf16[32,256], index: 4, kind: output, shape index: {}]  }
   0x1   :  { %v2938_v0 = vld [vmem:[%s4448_s1 + $0x4] ss:$8 sps:$4 sm:$0xff]   ;;  %v2942_v2 = vld [vmem:[%s4448_s1] ss:$8 sps:$4 sm:$0xff]   ;;  %v2944_v4 = vld [vmem:[%s4448_s1 + $0x14] ss:$8 sps:$4 sm:$0xff]  }
   0x2   :  { %v2940_v1 = vld [vmem:[%s4448_s1 + $0x404] ss:$8 sps:$4 sm:$0xff]   ;;  %1973 = vmatprep.subr.bf16.mxu1 %v2938_v0  ;;  %v2943_v3 = vld [vmem:[%s4448_s1 + $0x400] ss:$8 sps:$4 sm:$0xff]   ;;  %v2946_v5 = vld [vmem:[%s4448_s1 + $0x414] ss:$8 sps:$4 sm:$0xff]  }
   0x3   :  { %2185 = vmatprep.subr.bf16.mxu0 %v2940_v1  ;;  %1974 = vmatpush1.bf16.msra.mxu1 %v2942_v2  ;;  %v2948_v6 = vld [vmem:[%s4448_s1 + $0x10] ss:$8 sps:$4 sm:$0xff]   ;;  %v2950_v8 = vld [vmem:[%s4448_s1 + $0x24] ss:$8 sps:$4 sm:$0xff]   ;;  %v2954_v10 = vld [vmem:[%s4448_s1 + $0x20] ss:$8 sps:$4 sm:$0xff]  }
   0x4   :  { %2186 = vmatpush1.bf16.msra.mxu0 %v2943_v3  ;;  %1975 = vmatprep.subr.bf16.mxu1 %v2944_v4  ;;  %v2949_v7 = vld [vmem:[%s4448_s1 + $0x410] ss:$8 sps:$4 sm:$0xff]   ;;  %v2952_v9 = vld [vmem:[%s4448_s1 + $0x424] ss:$8 sps:$4 sm:$0xff]   ;;  %v2955_v11 = vld [vmem:[%s4448_s1 + $0x420] ss:$8 sps:$4 sm:$0xff]  }
   0x5   :  { %2187 = vmatprep.subr.bf16.mxu0 %v2946_v5  ;;  %v2956_v12 = vld [vmem:[%s4448_s1 + $0x34] ss:$8 sps:$4 sm:$0xff]   ;;  %v2960_v14 = vld [vmem:[%s4448_s1 + $0x30] ss:$8 sps:$4 sm:$0xff]   ;;  %v2962_v16 = vld [vmem:[%s4448_s1 + $0x44] ss:$8 sps:$4 sm:$0xff]  }
   0x6   :  { %v2958_v13 = vld [vmem:[%s4448_s1 + $0x434] ss:$8 sps:$4 sm:$0xff]   ;;  %v2961_v15 = vld [vmem:[%s4448_s1 + $0x430] ss:$8 sps:$4 sm:$0xff]   ;;  %v2964_v17 = vld [vmem:[%s4448_s1 + $0x444] ss:$8 sps:$4 sm:$0xff]  }
   0x7   :  { %1976 = vmatpush1.bf16.msra.mxu1 %v2948_v6  ;;  %v2966_v18 = vld [vmem:[%s4448_s1 + $0x40] ss:$8 sps:$4 sm:$0xff]   ;;  %v2968_v20 = vld [vmem:[%s4448_s1 + $0x54] ss:$8 sps:$4 sm:$0xff]   ;;  %v2972_v22 = vld [vmem:[%s4448_s1 + $0x50] ss:$8 sps:$4 sm:$0xff]  }
   0x8   :  { %2188 = vmatpush1.bf16.msra.mxu0 %v2949_v7  ;;  %1977 = vmatprep.subr.bf16.mxu1 %v2950_v8  ;;  %v2967_v19 = vld [vmem:[%s4448_s1 + $0x440] ss:$8 sps:$4 sm:$0xff]   ;;  %v2970_v21 = vld [vmem:[%s4448_s1 + $0x454] ss:$8 sps:$4 sm:$0xff]   ;;  %v2973_v23 = vld [vmem:[%s4448_s1 + $0x450] ss:$8 sps:$4 sm:$0xff]  }
   0x9   :  { %2189 = vmatprep.subr.bf16.mxu0 %v2952_v9  ;;  %v2974_v24 = vld [vmem:[%s4448_s1 + $0x64] ss:$8 sps:$4 sm:$0xff]   ;;  %v2978_v26 = vld [vmem:[%s4448_s1 + $0x60] ss:$8 sps:$4 sm:$0xff]   ;;  %v2980_v28 = vld [vmem:[%s4448_s1 + $0x74] ss:$8 sps:$4 sm:$0xff]  }
   0xa   :  { %v2976_v25 = vld [vmem:[%s4448_s1 + $0x464] ss:$8 sps:$4 sm:$0xff]   ;;  %v2979_v27 = vld [vmem:[%s4448_s1 + $0x460] ss:$8 sps:$4 sm:$0xff]   ;;  %v2982_v29 = vld [vmem:[%s4448_s1 + $0x474] ss:$8 sps:$4 sm:$0xff]  }
   0xb   :  { %1978 = vmatpush1.bf16.msra.mxu1 %v2954_v10  ;;  %v2984_v30 = vld [vmem:[%s4448_s1 + $0x70] ss:$8 sps:$4 sm:$0xff]   ;;  %v2986_v32 = vld [vmem:[%s4448_s1 + $0x84] ss:$8 sps:$4 sm:$0xff]   ;;  %v2990_v34 = vld [vmem:[%s4448_s1 + $0x80] ss:$8 sps:$4 sm:$0xff]  }
   0xc   :  { %2190 = vmatpush1.bf16.msra.mxu0 %v2955_v11  ;;  %1979 = vmatprep.subr.bf16.mxu1 %v2956_v12  ;;  %v2985_v31 = vld [vmem:[%s4448_s1 + $0x470] ss:$8 sps:$4 sm:$0xff]   ;;  %v2988_v33 = vld [vmem:[%s4448_s1 + $0x484] ss:$8 sps:$4 sm:$0xff]   ;;  %v2991_v35 = vld [vmem:[%s4448_s1 + $0x480] ss:$8 sps:$4 sm:$0xff]  }
   0xd   :  { %2191 = vmatprep.subr.bf16.mxu0 %v2958_v13  ;;  %v2992_v36 = vld [vmem:[%s4448_s1 + $0x94] ss:$8 sps:$4 sm:$0xff]   ;;  %v2996_v38 = vld [vmem:[%s4448_s1 + $0x90] ss:$8 sps:$4 sm:$0xff]   ;;  %v2998_v40 = vld [vmem:[%s4448_s1 + $0xa4] ss:$8 sps:$4 sm:$0xff]  }
   0xe   :  { %v2994_v37 = vld [vmem:[%s4448_s1 + $0x494] ss:$8 sps:$4 sm:$0xff]   ;;  %v2997_v39 = vld [vmem:[%s4448_s1 + $0x490] ss:$8 sps:$4 sm:$0xff]   ;;  %v3000_v41 = vld [vmem:[%s4448_s1 + $0x4a4] ss:$8 sps:$4 sm:$0xff]  }
   0xf   :  { %1980 = vmatpush1.bf16.msra.mxu1 %v2960_v14  ;;  %v3002_v42 = vld [vmem:[%s4448_s1 + $0xa0] ss:$8 sps:$4 sm:$0xff]   ;;  %v3004_v44 = vld [vmem:[%s4448_s1 + $0xb4] ss:$8 sps:$4 sm:$0xff]   ;;  %v3008_v46 = vld [vmem:[%s4448_s1 + $0xb0] ss:$8 sps:$4 sm:$0xff]  }
  0x10   :  { %2192 = vmatpush1.bf16.msra.mxu0 %v2961_v15  ;;  %1981 = vmatprep.subr.bf16.mxu1 %v2962_v16  ;;  %v3003_v43 = vld [vmem:[%s4448_s1 + $0x4a0] ss:$8 sps:$4 sm:$0xff]   ;;  %v3006_v45 = vld [vmem:[%s4448_s1 + $0x4b4] ss:$8 sps:$4 sm:$0xff]   ;;  %v3009_v47 = vld [vmem:[%s4448_s1 + $0x4b0] ss:$8 sps:$4 sm:$0xff]  }
  0x11   :  { %2193 = vmatprep.subr.bf16.mxu0 %v2964_v17  ;;  %v3036_v48 = vld [vmem:[%s4449_s0 + $0x4] ss:$72 sps:$4 sm:$0xff]   ;;  %v3014_v52 = vld [vmem:[%s4448_s1 + $0xc0] ss:$8 sps:$4 sm:$0xff]   ;;  %v3016_v54 = vld [vmem:[%s4448_s1 + $0xd4] ss:$8 sps:$4 sm:$0xff]  }
  0x12   :  { %v3010_v49 = vld [vmem:[%s4448_s1 + $0xc4] ss:$8 sps:$4 sm:$0xff]   ;;  %2005 = vmatprep.mubr.bf16.mxu1 %v3036_v48  ;;  %v3015_v53 = vld [vmem:[%s4448_s1 + $0x4c0] ss:$8 sps:$4 sm:$0xff]   ;;  %v3018_v55 = vld [vmem:[%s4448_s1 + $0x4d4] ss:$8 sps:$4 sm:$0xff]  }
  0x13   :  { %1982 = vmatpush1.bf16.msra.mxu1 %v2966_v18  ;;  %v3012_v50 = vld [vmem:[%s4448_s1 + $0x4c4] ss:$8 sps:$4 sm:$0xff]   ;;  %v3020_v56 = vld [vmem:[%s4448_s1 + $0xd0] ss:$8 sps:$4 sm:$0xff]   ;;  %v3026_v60 = vld [vmem:[%s4448_s1 + $0xe0] ss:$8 sps:$4 sm:$0xff]  }
  0x14   :  { %2194 = vmatpush1.bf16.msra.mxu0 %v2967_v19  ;;  %1983 = vmatprep.subr.bf16.mxu1 %v2968_v20  ;;  %v3042_v51 = vld [vmem:[%s4449_s0 + $0x24] ss:$72 sps:$4 sm:$0xff]   ;;  %v3021_v57 = vld [vmem:[%s4448_s1 + $0x4d0] ss:$8 sps:$4 sm:$0xff]   ;;  %v3027_v61 = vld [vmem:[%s4448_s1 + $0x4e0] ss:$8 sps:$4 sm:$0xff]  }
  0x15   :  { %2195 = vmatprep.subr.bf16.mxu0 %v2970_v21  ;;  %2217 = vmatprep.mubr.bf16.mxu0 %v3042_v51  ;;  %v3022_v58 = vld [vmem:[%s4448_s1 + $0xe4] ss:$8 sps:$4 sm:$0xff]   ;;  %v3028_v62 = vld [vmem:[%s4448_s1 + $0xf4] ss:$8 sps:$4 sm:$0xff]   ;;  %v3032_v0 = vld [vmem:[%s4448_s1 + $0xf0] ss:$8 sps:$4 sm:$0xff]  }
  0x16   :  { %v3024_v59 = vld [vmem:[%s4448_s1 + $0x4e4] ss:$8 sps:$4 sm:$0xff]   ;;  %v3030_v63 = vld [vmem:[%s4448_s1 + $0x4f4] ss:$8 sps:$4 sm:$0xff]   ;;  %v3033_v1 = vld [vmem:[%s4448_s1 + $0x4f0] ss:$8 sps:$4 sm:$0xff]  }
  0x17   :  { %1984 = vmatpush1.bf16.msra.mxu1 %v2972_v22  ;;  %v3039_v2 = vld [vmem:[%s4448_s1 + $0x104] ss:$8 sps:$4 sm:$0xff]   ;;  %v3034_v4 = vld [vmem:[%s4449_s0] ss:$72 sps:$4 sm:$0xff]   ;;  %v3048_v8 = vld [vmem:[%s4448_s1 + $0x114] ss:$8 sps:$4 sm:$0xff]  }
  0x18   :  { %2196 = vmatpush1.bf16.msra.mxu0 %v2973_v23  ;;  %1985 = vmatprep.subr.bf16.mxu1 %v2974_v24  ;;  %v3045_v3 = vld [vmem:[%s4448_s1 + $0x504] ss:$8 sps:$4 sm:$0xff]   ;;  %v3037_v5 = vld [vmem:[%s4448_s1 + $0x100] ss:$8 sps:$4 sm:$0xff]   ;;  %v3051_v9 = vld [vmem:[%s4448_s1 + $0x514] ss:$8 sps:$4 sm:$0xff]  }
  0x19   :  { %2197 = vmatprep.subr.bf16.mxu0 %v2976_v25  ;;  %v3040_v6 = vld [vmem:[%s4449_s0 + $0x20] ss:$72 sps:$4 sm:$0xff]   ;;  %v3046_v10 = vld [vmem:[%s4448_s1 + $0x110] ss:$8 sps:$4 sm:$0xff]   ;;  %v3054_v12 = vld [vmem:[%s4448_s1 + $0x124] ss:$8 sps:$4 sm:$0xff]  }
  0x1a   :  { %v3043_v7 = vld [vmem:[%s4448_s1 + $0x500] ss:$8 sps:$4 sm:$0xff]   ;;  %v3049_v11 = vld [vmem:[%s4448_s1 + $0x510] ss:$8 sps:$4 sm:$0xff]   ;;  %v3057_v13 = vld [vmem:[%s4448_s1 + $0x524] ss:$8 sps:$4 sm:$0xff]  }
  0x1b   :  { %1986 = vmatpush1.bf16.msra.mxu1 %v2978_v26  ;;  %v3052_v14 = vld [vmem:[%s4448_s1 + $0x120] ss:$8 sps:$4 sm:$0xff]   ;;  %v3060_v16 = vld [vmem:[%s4448_s1 + $0x134] ss:$8 sps:$4 sm:$0xff]   ;;  %v3058_v18 = vld [vmem:[%s4448_s1 + $0x130] ss:$8 sps:$4 sm:$0xff]  }
  0x1c   :  { %2198 = vmatpush1.bf16.msra.mxu0 %v2979_v27  ;;  %1987 = vmatprep.subr.bf16.mxu1 %v2980_v28  ;;  %v3055_v15 = vld [vmem:[%s4448_s1 + $0x520] ss:$8 sps:$4 sm:$0xff]   ;;  %v3063_v17 = vld [vmem:[%s4448_s1 + $0x534] ss:$8 sps:$4 sm:$0xff]   ;;  %v3061_v19 = vld [vmem:[%s4448_s1 + $0x530] ss:$8 sps:$4 sm:$0xff]  }
  0x1d   :  { %2199 = vmatprep.subr.bf16.mxu0 %v2982_v29  ;;  %v3066_v20 = vld [vmem:[%s4448_s1 + $0x144] ss:$8 sps:$4 sm:$0xff]   ;;  %v3064_v22 = vld [vmem:[%s4448_s1 + $0x140] ss:$8 sps:$4 sm:$0xff]   ;;  %v3072_v24 = vld [vmem:[%s4448_s1 + $0x154] ss:$8 sps:$4 sm:$0xff]  }
  0x1e   :  { %v3069_v21 = vld [vmem:[%s4448_s1 + $0x544] ss:$8 sps:$4 sm:$0xff]   ;;  %v3067_v23 = vld [vmem:[%s4448_s1 + $0x540] ss:$8 sps:$4 sm:$0xff]   ;;  %v3075_v25 = vld [vmem:[%s4448_s1 + $0x554] ss:$8 sps:$4 sm:$0xff]  }
  0x1f   :  { %1988 = vmatpush1.bf16.msra.mxu1 %v2984_v30  ;;  %v3070_v26 = vld [vmem:[%s4448_s1 + $0x150] ss:$8 sps:$4 sm:$0xff]   ;;  %v3124_v28 = vld [vmem:[%s4449_s0 + $0x94] ss:$72 sps:$4 sm:$0xff]   ;;  %v3078_v29 = vld [vmem:[%s4448_s1 + $0x164] ss:$8 sps:$4 sm:$0xff]  }
  0x20   :  { %2200 = vmatpush1.bf16.msra.mxu0 %v2985_v31  ;;  %1989 = vmatprep.subr.bf16.mxu1 %v2986_v32  ;;  %v3073_v27 = vld [vmem:[%s4448_s1 + $0x550] ss:$8 sps:$4 sm:$0xff]   ;;  %v3081_v30 = vld [vmem:[%s4448_s1 + $0x564] ss:$8 sps:$4 sm:$0xff]   ;;  %v3129_v31 = vld [vmem:[%s4449_s0 + $0xb4] ss:$72 sps:$4 sm:$0xff]  }
  0x21   :  { %2201 = vmatprep.subr.bf16.mxu0 %v2988_v33  ;;  %v3076_v32 = vld [vmem:[%s4448_s1 + $0x160] ss:$8 sps:$4 sm:$0xff]   ;;  %v3094_v48 = vld [vmem:[%s4448_s1 + $0x190] ss:$8 sps:$4 sm:$0xff]   ;;  %v3105_v51 = vld [vmem:[%s4448_s1 + $0x5a4] ss:$8 sps:$4 sm:$0xff]  }
  0x22   :  { %v3079_v33 = vld [vmem:[%s4448_s1 + $0x560] ss:$8 sps:$4 sm:$0xff]  }
  0x23   :  { %1990 = vmatpush1.bf16.msra.mxu1 %v2990_v34  ;;  %v3134_v34 = vld [vmem:[%s4449_s0 + $0x90] ss:$72 sps:$4 sm:$0xff]  }
  0x24   :  { %2202 = vmatpush1.bf16.msra.mxu0 %v2991_v35  ;;  %1991 = vmatprep.subr.bf16.mxu1 %v2992_v36  ;;  %v3135_v35 = vld [vmem:[%s4449_s0 + $0xb0] ss:$72 sps:$4 sm:$0xff]   ;;  %v3084_v36 = vld [vmem:[%s4448_s1 + $0x174] ss:$8 sps:$4 sm:$0xff]  }
  0x25   :  { %2203 = vmatprep.subr.bf16.mxu0 %v2994_v37  ;;  %v3087_v37 = vld [vmem:[%s4448_s1 + $0x574] ss:$8 sps:$4 sm:$0xff]  }
  0x27   :  { %1992 = vmatpush1.bf16.msra.mxu1 %v2996_v38  ;;  %v3082_v38 = vld [vmem:[%s4448_s1 + $0x170] ss:$8 sps:$4 sm:$0xff]  }
  0x28   :  { %2204 = vmatpush1.bf16.msra.mxu0 %v2997_v39  ;;  %1993 = vmatprep.subr.bf16.mxu1 %v2998_v40  ;;  %v3085_v39 = vld [vmem:[%s4448_s1 + $0x570] ss:$8 sps:$4 sm:$0xff]   ;;  %v3144_v40 = vld [vmem:[%s4449_s0 + $0xc] ss:$72 sps:$4 sm:$0xff]  }
  0x29   :  { %2205 = vmatprep.subr.bf16.mxu0 %v3000_v41  ;;  %v3090_v41 = vld [vmem:[%s4448_s1 + $0x184] ss:$8 sps:$4 sm:$0xff]  }
  0x2b   :  { %1994 = vmatpush1.bf16.msra.mxu1 %v3002_v42  ;;  %v3093_v42 = vld [vmem:[%s4448_s1 + $0x584] ss:$8 sps:$4 sm:$0xff]  }
  0x2c   :  { %2206 = vmatpush1.bf16.msra.mxu0 %v3003_v43  ;;  %1995 = vmatprep.subr.bf16.mxu1 %v3004_v44  ;;  %v3150_v43 = vld [vmem:[%s4449_s0 + $0x2c] ss:$72 sps:$4 sm:$0xff]   ;;  %v3088_v44 = vld [vmem:[%s4448_s1 + $0x180] ss:$8 sps:$4 sm:$0xff]  }
  0x2d   :  { %2207 = vmatprep.subr.bf16.mxu0 %v3006_v45  ;;  %v3091_v45 = vld [vmem:[%s4448_s1 + $0x580] ss:$8 sps:$4 sm:$0xff]  }
  0x2f   :  { %1996 = vmatpush1.bf16.msra.mxu1 %v3008_v46  ;;  %v3096_v46 = vld [vmem:[%s4448_s1 + $0x194] ss:$8 sps:$4 sm:$0xff]  }
  0x30   :  { %2208 = vmatpush1.bf16.msra.mxu0 %v3009_v47  ;;  %1997 = vmatprep.subr.bf16.mxu1 %v3010_v49  ;;  %v3099_v47 = vld [vmem:[%s4448_s1 + $0x594] ss:$8 sps:$4 sm:$0xff]   ;;  %v3097_v49 = vld [vmem:[%s4448_s1 + $0x590] ss:$8 sps:$4 sm:$0xff]  }
  0x31   :  { %2209 = vmatprep.subr.bf16.mxu0 %v3012_v50  ;;  %v3102_v50 = vld [vmem:[%s4448_s1 + $0x1a4] ss:$8 sps:$4 sm:$0xff]  }
  0x33   :  { %1998 = vmatpush1.bf16.msra.mxu1 %v3014_v52  ;;  %v3100_v52 = vld [vmem:[%s4448_s1 + $0x1a0] ss:$8 sps:$4 sm:$0xff]  }
  0x34   :  { %2210 = vmatpush1.bf16.msra.mxu0 %v3015_v53  ;;  %1999 = vmatprep.subr.bf16.mxu1 %v3016_v54  ;;  %v3103_v53 = vld [vmem:[%s4448_s1 + $0x5a0] ss:$8 sps:$4 sm:$0xff]   ;;  %v3108_v54 = vld [vmem:[%s4448_s1 + $0x1b4] ss:$8 sps:$4 sm:$0xff]  }
  0x35   :  { %2211 = vmatprep.subr.bf16.mxu0 %v3018_v55  ;;  %v3111_v55 = vld [vmem:[%s4448_s1 + $0x5b4] ss:$8 sps:$4 sm:$0xff]  }
  0x37   :  { %2000 = vmatpush1.bf16.msra.mxu1 %v3020_v56  ;;  %v3106_v56 = vld [vmem:[%s4448_s1 + $0x1b0] ss:$8 sps:$4 sm:$0xff]  }
  0x38   :  { %2212 = vmatpush1.bf16.msra.mxu0 %v3021_v57  ;;  %2001 = vmatprep.subr.bf16.mxu1 %v3022_v58  ;;  %v3109_v57 = vld [vmem:[%s4448_s1 + $0x5b0] ss:$8 sps:$4 sm:$0xff]   ;;  %v3114_v58 = vld [vmem:[%s4448_s1 + $0x1c4] ss:$8 sps:$4 sm:$0xff]  }
  0x39   :  { %2213 = vmatprep.subr.bf16.mxu0 %v3024_v59  ;;  %v3117_v59 = vld [vmem:[%s4448_s1 + $0x5c4] ss:$8 sps:$4 sm:$0xff]  }
  0x3b   :  { %2002 = vmatpush1.bf16.msra.mxu1 %v3026_v60  ;;  %v3112_v60 = vld [vmem:[%s4448_s1 + $0x1c0] ss:$8 sps:$4 sm:$0xff]  }
  0x3c   :  { %2214 = vmatpush1.bf16.msra.mxu0 %v3027_v61  ;;  %2003 = vmatprep.subr.bf16.mxu1 %v3028_v62  ;;  %v3115_v61 = vld [vmem:[%s4448_s1 + $0x5c0] ss:$8 sps:$4 sm:$0xff]   ;;  %v3120_v62 = vld [vmem:[%s4448_s1 + $0x1d4] ss:$8 sps:$4 sm:$0xff]  }
  0x3d   :  { %2215 = vmatprep.subr.bf16.mxu0 %v3030_v63  ;;  %v3123_v63 = vld [vmem:[%s4448_s1 + $0x5d4] ss:$8 sps:$4 sm:$0xff]  }
  0x3f   :  { %2004 = vmatpush1.bf16.msra.mxu1 %v3032_v0  ;;  %v3118_v0 = vld [vmem:[%s4448_s1 + $0x1d0] ss:$8 sps:$4 sm:$0xff]  }
  0x40   :  { %2216 = vmatpush1.bf16.msra.mxu0 %v3033_v1  ;;  %2026 = vmatprep.subr.bf16.mxu1 %v3039_v2  ;;  %v3121_v1 = vld [vmem:[%s4448_s1 + $0x5d0] ss:$8 sps:$4 sm:$0xff]   ;;  %v3128_v2 = vld [vmem:[%s4448_s1 + $0x1e4] ss:$8 sps:$4 sm:$0xff]  }
  0x41   :  { %2238 = vmatprep.subr.bf16.mxu0 %v3045_v3  ;;  %v3133_v3 = vld [vmem:[%s4448_s1 + $0x5e4] ss:$8 sps:$4 sm:$0xff]  }
  0x42   :  { %2006 = vmatmul.mubr.bf16.vlgmr.msra.gmra.mrb[0].mxu1 %v3034_v4  ;;  %v3126_v4 = vld [vmem:[%s4448_s1 + $0x1e0] ss:$8 sps:$4 sm:$0xff]  }
  0x43   :  { %2218 = vmatmul.mubr.bf16.vlgmr.msra.gmra.mrb[0].mxu0 %v3040_v6  ;;  %2027 = vmatpush1.bf16.msra.mxu1 %v3037_v5  ;;  %v3131_v5 = vld [vmem:[%s4448_s1 + $0x5e0] ss:$8 sps:$4 sm:$0xff]   ;;  %v3138_v6 = vld [vmem:[%s4448_s1 + $0x1f4] ss:$8 sps:$4 sm:$0xff]  }
  0x44   :  { %2239 = vmatpush1.bf16.msra.mxu0 %v3043_v7  ;;  %2028 = vmatprep.subr.bf16.mxu1 %v3048_v8  ;;  %v3141_v7 = vld [vmem:[%s4448_s1 + $0x5f4] ss:$8 sps:$4 sm:$0xff]   ;;  %v3136_v8 = vld [vmem:[%s4448_s1 + $0x1f0] ss:$8 sps:$4 sm:$0xff]  }
  0x45   :  { %2240 = vmatprep.subr.bf16.mxu0 %v3051_v9  ;;  %2015 = vmatprep.mubr.bf16.mxu1 %v3124_v28  ;;  %v3139_v9 = vld [vmem:[%s4448_s1 + $0x5f0] ss:$8 sps:$4 sm:$0xff]   ;;  %v3168_v28 = vld [vmem:[%s4448_s1 + $0x234] ss:$8 sps:$4 sm:$0xff]  }
  0x46   :  { %2227 = vmatprep.mubr.bf16.mxu0 %v3129_v31  ;;  %v3169_v31 = vld [vmem:[%s4448_s1 + $0x630] ss:$8 sps:$4 sm:$0xff]  }
  0x47   :  { %2029 = vmatpush1.bf16.msra.mxu1 %v3046_v10  ;;  %v3147_v10 = vld [vmem:[%s4448_s1 + $0x204] ss:$8 sps:$4 sm:$0xff]  }
  0x48   :  { %2241 = vmatpush1.bf16.msra.mxu0 %v3049_v11  ;;  %2030 = vmatprep.subr.bf16.mxu1 %v3054_v12  ;;  %v3153_v11 = vld [vmem:[%s4448_s1 + $0x604] ss:$8 sps:$4 sm:$0xff]   ;;  %v3142_v12 = vld [vmem:[%s4449_s0 + $0x8] ss:$72 sps:$4 sm:$0xff]  }
  0x49   :  { %2242 = vmatprep.subr.bf16.mxu0 %v3057_v13  ;;  %v3145_v13 = vld [vmem:[%s4448_s1 + $0x200] ss:$8 sps:$4 sm:$0xff]  }
  0x4a   :  { %2016 = vmatmul.mubr.bf16.gmra.mrb[4].mxu1 %v3134_v34  ;;  %v3177_v34 = vld [vmem:[%s4448_s1 + $0x644] ss:$8 sps:$4 sm:$0xff]  }
  0x4b   :  { %2031 = vmatpush1.bf16.msra.mxu1 %v3052_v14  ;;  %2228 = vmatmul.mubr.bf16.gmra.mrb[4].mxu0 %v3135_v35  ;;  %v3148_v14 = vld [vmem:[%s4449_s0 + $0x28] ss:$72 sps:$4 sm:$0xff]   ;;  %v3258_v35 = vld [vmem:[%s4449_s0 + $0x34] ss:$72 sps:$4 sm:$0xff]  }
  0x4c   :  { %2243 = vmatpush1.bf16.msra.mxu0 %v3055_v15  ;;  %2032 = vmatprep.subr.bf16.mxu1 %v3060_v16  ;;  %v3151_v15 = vld [vmem:[%s4448_s1 + $0x600] ss:$8 sps:$4 sm:$0xff]   ;;  %v3156_v16 = vld [vmem:[%s4448_s1 + $0x214] ss:$8 sps:$4 sm:$0xff]  }
  0x4d   :  { %2244 = vmatprep.subr.bf16.mxu0 %v3063_v17  ;;  %2058 = vmatprep.mubr.bf16.mxu1 %v3144_v40  ;;  %v3159_v17 = vld [vmem:[%s4448_s1 + $0x614] ss:$8 sps:$4 sm:$0xff]   ;;  %v3178_v40 = vld [vmem:[%s4448_s1 + $0x250] ss:$8 sps:$4 sm:$0xff]  }
  0x4e   :  { %2270 = vmatprep.mubr.bf16.mxu0 %v3150_v43  ;;  %v3189_v43 = vld [vmem:[%s4448_s1 + $0x664] ss:$8 sps:$4 sm:$0xff]  }
  0x4f   :  { %2033 = vmatpush1.bf16.msra.mxu1 %v3058_v18  ;;  %v3154_v18 = vld [vmem:[%s4448_s1 + $0x210] ss:$8 sps:$4 sm:$0xff]  }
  0x50   :  { %2245 = vmatpush1.bf16.msra.mxu0 %v3061_v19  ;;  %2034 = vmatprep.subr.bf16.mxu1 %v3066_v20  ;;  %v3157_v19 = vld [vmem:[%s4448_s1 + $0x610] ss:$8 sps:$4 sm:$0xff]   ;;  %v3232_v20 = vld [vmem:[%s4449_s0 + $0x9c] ss:$72 sps:$4 sm:$0xff]  }
  0x51   :  { %2246 = vmatprep.subr.bf16.mxu0 %v3069_v21  ;;  %v3162_v21 = vld [vmem:[%s4448_s1 + $0x224] ss:$8 sps:$4 sm:$0xff]  }
  0x53   :  { %2035 = vmatpush1.bf16.msra.mxu1 %v3064_v22  ;;  %v3165_v22 = vld [vmem:[%s4448_s1 + $0x624] ss:$8 sps:$4 sm:$0xff]  }
  0x54   :  { %2247 = vmatpush1.bf16.msra.mxu0 %v3067_v23  ;;  %2036 = vmatprep.subr.bf16.mxu1 %v3072_v24  ;;  %v3237_v23 = vld [vmem:[%s4449_s0 + $0xbc] ss:$72 sps:$4 sm:$0xff]   ;;  %v3160_v24 = vld [vmem:[%s4448_s1 + $0x220] ss:$8 sps:$4 sm:$0xff]  }
  0x55   :  { %2248 = vmatprep.subr.bf16.mxu0 %v3075_v25  ;;  %v3163_v25 = vld [vmem:[%s4448_s1 + $0x620] ss:$8 sps:$4 sm:$0xff]  }
  0x57   :  { %2037 = vmatpush1.bf16.msra.mxu1 %v3070_v26  ;;  %v3242_v26 = vld [vmem:[%s4449_s0 + $0x98] ss:$72 sps:$4 sm:$0xff]  }
  0x58   :  { %2249 = vmatpush1.bf16.msra.mxu0 %v3073_v27  ;;  %2038 = vmatprep.subr.bf16.mxu1 %v3078_v29  ;;  %v3243_v27 = vld [vmem:[%s4449_s0 + $0xb8] ss:$72 sps:$4 sm:$0xff]   ;;  %v3171_v29 = vld [vmem:[%s4448_s1 + $0x634] ss:$8 sps:$4 sm:$0xff]  }
  0x59   :  { %2250 = vmatprep.subr.bf16.mxu0 %v3081_v30  ;;  %v3166_v30 = vld [vmem:[%s4448_s1 + $0x230] ss:$8 sps:$4 sm:$0xff]  }
  0x5b   :  { %2039 = vmatpush1.bf16.msra.mxu1 %v3076_v32  ;;  %v3252_v32 = vld [vmem:[%s4449_s0 + $0x14] ss:$72 sps:$4 sm:$0xff]  }
  0x5c   :  { %2251 = vmatpush1.bf16.msra.mxu0 %v3079_v33  ;;  %2040 = vmatprep.subr.bf16.mxu1 %v3084_v36  ;;  %v3174_v33 = vld [vmem:[%s4448_s1 + $0x244] ss:$8 sps:$4 sm:$0xff]   ;;  %v3172_v36 = vld [vmem:[%s4448_s1 + $0x240] ss:$8 sps:$4 sm:$0xff]  }
  0x5d   :  { %2252 = vmatprep.subr.bf16.mxu0 %v3087_v37  ;;  %v3175_v37 = vld [vmem:[%s4448_s1 + $0x640] ss:$8 sps:$4 sm:$0xff]  }
  0x5f   :  { %2041 = vmatpush1.bf16.msra.mxu1 %v3082_v38  ;;  %v3180_v38 = vld [vmem:[%s4448_s1 + $0x254] ss:$8 sps:$4 sm:$0xff]  }
  0x60   :  { %2253 = vmatpush1.bf16.msra.mxu0 %v3085_v39  ;;  %2042 = vmatprep.subr.bf16.mxu1 %v3090_v41  ;;  %v3183_v39 = vld [vmem:[%s4448_s1 + $0x654] ss:$8 sps:$4 sm:$0xff]   ;;  %v3181_v41 = vld [vmem:[%s4448_s1 + $0x650] ss:$8 sps:$4 sm:$0xff]  }
  0x61   :  { %2254 = vmatprep.subr.bf16.mxu0 %v3093_v42  ;;  %v3186_v42 = vld [vmem:[%s4448_s1 + $0x264] ss:$8 sps:$4 sm:$0xff]  }
  0x63   :  { %2043 = vmatpush1.bf16.msra.mxu1 %v3088_v44  ;;  %v3184_v44 = vld [vmem:[%s4448_s1 + $0x260] ss:$8 sps:$4 sm:$0xff]  }
  0x64   :  { %2255 = vmatpush1.bf16.msra.mxu0 %v3091_v45  ;;  %2044 = vmatprep.subr.bf16.mxu1 %v3096_v46  ;;  %v3187_v45 = vld [vmem:[%s4448_s1 + $0x660] ss:$8 sps:$4 sm:$0xff]   ;;  %v3192_v46 = vld [vmem:[%s4448_s1 + $0x274] ss:$8 sps:$4 sm:$0xff]  }
  0x65   :  { %2256 = vmatprep.subr.bf16.mxu0 %v3099_v47  ;;  %v3195_v47 = vld [vmem:[%s4448_s1 + $0x674] ss:$8 sps:$4 sm:$0xff]  }
  0x67   :  { %2045 = vmatpush1.bf16.msra.mxu1 %v3094_v48  ;;  %v3190_v48 = vld [vmem:[%s4448_s1 + $0x270] ss:$8 sps:$4 sm:$0xff]  }
  0x68   :  { %2257 = vmatpush1.bf16.msra.mxu0 %v3097_v49  ;;  %2046 = vmatprep.subr.bf16.mxu1 %v3102_v50  ;;  %v3193_v49 = vld [vmem:[%s4448_s1 + $0x670] ss:$8 sps:$4 sm:$0xff]   ;;  %v3198_v50 = vld [vmem:[%s4448_s1 + $0x284] ss:$8 sps:$4 sm:$0xff]  }
  0x69   :  { %2258 = vmatprep.subr.bf16.mxu0 %v3105_v51  ;;  %v3201_v51 = vld [vmem:[%s4448_s1 + $0x684] ss:$8 sps:$4 sm:$0xff]  }
  0x6b   :  { %2047 = vmatpush1.bf16.msra.mxu1 %v3100_v52  ;;  %v3196_v52 = vld [vmem:[%s4448_s1 + $0x280] ss:$8 sps:$4 sm:$0xff]  }
  0x6c   :  { %2259 = vmatpush1.bf16.msra.mxu0 %v3103_v53  ;;  %2048 = vmatprep.subr.bf16.mxu1 %v3108_v54  ;;  %v3199_v53 = vld [vmem:[%s4448_s1 + $0x680] ss:$8 sps:$4 sm:$0xff]   ;;  %v3204_v54 = vld [vmem:[%s4448_s1 + $0x294] ss:$8 sps:$4 sm:$0xff]  }
  0x6d   :  { %2260 = vmatprep.subr.bf16.mxu0 %v3111_v55  ;;  %v3207_v55 = vld [vmem:[%s4448_s1 + $0x694] ss:$8 sps:$4 sm:$0xff]  }
  0x6f   :  { %2049 = vmatpush1.bf16.msra.mxu1 %v3106_v56  ;;  %v3202_v56 = vld [vmem:[%s4448_s1 + $0x290] ss:$8 sps:$4 sm:$0xff]  }
  0x70   :  { %2261 = vmatpush1.bf16.msra.mxu0 %v3109_v57  ;;  %2050 = vmatprep.subr.bf16.mxu1 %v3114_v58  ;;  %v3205_v57 = vld [vmem:[%s4448_s1 + $0x690] ss:$8 sps:$4 sm:$0xff]   ;;  %v3210_v58 = vld [vmem:[%s4448_s1 + $0x2a4] ss:$8 sps:$4 sm:$0xff]  }
  0x71   :  { %2262 = vmatprep.subr.bf16.mxu0 %v3117_v59  ;;  %v3213_v59 = vld [vmem:[%s4448_s1 + $0x6a4] ss:$8 sps:$4 sm:$0xff]  }
  0x73   :  { %2051 = vmatpush1.bf16.msra.mxu1 %v3112_v60  ;;  %v3208_v60 = vld [vmem:[%s4448_s1 + $0x2a0] ss:$8 sps:$4 sm:$0xff]  }
  0x74   :  { %2263 = vmatpush1.bf16.msra.mxu0 %v3115_v61  ;;  %2052 = vmatprep.subr.bf16.mxu1 %v3120_v62  ;;  %v3211_v61 = vld [vmem:[%s4448_s1 + $0x6a0] ss:$8 sps:$4 sm:$0xff]   ;;  %v3216_v62 = vld [vmem:[%s4448_s1 + $0x2b4] ss:$8 sps:$4 sm:$0xff]  }
  0x75   :  { %2264 = vmatprep.subr.bf16.mxu0 %v3123_v63  ;;  %v3219_v63 = vld [vmem:[%s4448_s1 + $0x6b4] ss:$8 sps:$4 sm:$0xff]  }
  0x77   :  { %2053 = vmatpush1.bf16.msra.mxu1 %v3118_v0  ;;  %v3214_v0 = vld [vmem:[%s4448_s1 + $0x2b0] ss:$8 sps:$4 sm:$0xff]  }
  0x78   :  { %2265 = vmatpush1.bf16.msra.mxu0 %v3121_v1  ;;  %2054 = vmatprep.subr.bf16.mxu1 %v3128_v2  ;;  %v3217_v1 = vld [vmem:[%s4448_s1 + $0x6b0] ss:$8 sps:$4 sm:$0xff]   ;;  %v3222_v2 = vld [vmem:[%s4448_s1 + $0x2c4] ss:$8 sps:$4 sm:$0xff]  }
  0x79   :  { %2266 = vmatprep.subr.bf16.mxu0 %v3133_v3  ;;  %v3225_v3 = vld [vmem:[%s4448_s1 + $0x6c4] ss:$8 sps:$4 sm:$0xff]  }
  0x7b   :  { %2055 = vmatpush1.bf16.msra.mxu1 %v3126_v4  ;;  %v3220_v4 = vld [vmem:[%s4448_s1 + $0x2c0] ss:$8 sps:$4 sm:$0xff]  }
  0x7c   :  { %2267 = vmatpush1.bf16.msra.mxu0 %v3131_v5  ;;  %2056 = vmatprep.subr.bf16.mxu1 %v3138_v6  ;;  %v3223_v5 = vld [vmem:[%s4448_s1 + $0x6c0] ss:$8 sps:$4 sm:$0xff]   ;;  %v3228_v6 = vld [vmem:[%s4448_s1 + $0x2d4] ss:$8 sps:$4 sm:$0xff]  }
  0x7d   :  { %2268 = vmatprep.subr.bf16.mxu0 %v3141_v7  ;;  %v3231_v7 = vld [vmem:[%s4448_s1 + $0x6d4] ss:$8 sps:$4 sm:$0xff]  }
  0x7f   :  { %2057 = vmatpush1.bf16.msra.mxu1 %v3136_v8  ;;  %v3226_v8 = vld [vmem:[%s4448_s1 + $0x2d0] ss:$8 sps:$4 sm:$0xff]  }
  0x80   :  { %2269 = vmatpush1.bf16.msra.mxu0 %v3139_v9  ;;  %2079 = vmatprep.subr.bf16.mxu1 %v3147_v10  ;;  %v3229_v9 = vld [vmem:[%s4448_s1 + $0x6d0] ss:$8 sps:$4 sm:$0xff]   ;;  %v3236_v10 = vld [vmem:[%s4448_s1 + $0x2e4] ss:$8 sps:$4 sm:$0xff]  }
  0x81   :  { %2291 = vmatprep.subr.bf16.mxu0 %v3153_v11  ;;  %v3241_v11 = vld [vmem:[%s4448_s1 + $0x6e4] ss:$8 sps:$4 sm:$0xff]  }
  0x82   :  { %2059 = vmatmul.mubr.bf16.vlgmr.msra.gmra.mrb[0].mxu1 %v3142_v12  ;;  %v3234_v12 = vld [vmem:[%s4448_s1 + $0x2e0] ss:$8 sps:$4 sm:$0xff]  }
  0x83   :  { %2271 = vmatmul.mubr.bf16.vlgmr.msra.gmra.mrb[0].mxu0 %v3148_v14  ;;  %2080 = vmatpush1.bf16.msra.mxu1 %v3145_v13  ;;  %v3239_v13 = vld [vmem:[%s4448_s1 + $0x6e0] ss:$8 sps:$4 sm:$0xff]   ;;  %v3246_v14 = vld [vmem:[%s4448_s1 + $0x2f4] ss:$8 sps:$4 sm:$0xff]  }
  0x84   :  { %2292 = vmatpush1.bf16.msra.mxu0 %v3151_v15  ;;  %2081 = vmatprep.subr.bf16.mxu1 %v3156_v16  ;;  %v3249_v15 = vld [vmem:[%s4448_s1 + $0x6f4] ss:$8 sps:$4 sm:$0xff]   ;;  %v3244_v16 = vld [vmem:[%s4448_s1 + $0x2f0] ss:$8 sps:$4 sm:$0xff]  }
  0x85   :  { %2293 = vmatprep.subr.bf16.mxu0 %v3159_v17  ;;  %2068 = vmatprep.mubr.bf16.mxu1 %v3232_v20  ;;  %v3247_v17 = vld [vmem:[%s4448_s1 + $0x6f0] ss:$8 sps:$4 sm:$0xff]  }
  0x86   :  { %2280 = vmatprep.mubr.bf16.mxu0 %v3237_v23  ;;  %v3250_v20 = vld [vmem:[%s4449_s0 + $0x10] ss:$72 sps:$4 sm:$0xff]   ;;  %v3259_v23 = vld [vmem:[%s4448_s1 + $0x700] ss:$8 sps:$4 sm:$0xff]  }
  0x87   :  { %2082 = vmatpush1.bf16.msra.mxu1 %v3154_v18  ;;  %v3255_v18 = vld [vmem:[%s4448_s1 + $0x304] ss:$8 sps:$4 sm:$0xff]  }
  0x88   :  { %2294 = vmatpush1.bf16.msra.mxu0 %v3157_v19  ;;  %2083 = vmatprep.subr.bf16.mxu1 %v3162_v21  ;;  %v3261_v19 = vld [vmem:[%s4448_s1 + $0x704] ss:$8 sps:$4 sm:$0xff]   ;;  %v3253_v21 = vld [vmem:[%s4448_s1 + $0x300] ss:$8 sps:$4 sm:$0xff]  }
  0x89   :  { %2295 = vmatprep.subr.bf16.mxu0 %v3165_v22  ;;  %v3256_v22 = vld [vmem:[%s4449_s0 + $0x30] ss:$72 sps:$4 sm:$0xff]  }
  0x8a   :  { %2069 = vmatmul.mubr.bf16.gmra.mrb[4].mxu1 %v3242_v26  ;;  %v3340_v26 = vld [vmem:[%s4449_s0 + $0xa4] ss:$72 sps:$4 sm:$0xff]  }
  0x8b   :  { %2281 = vmatmul.mubr.bf16.gmra.mrb[4].mxu0 %v3243_v27  ;;  %2084 = vmatpush1.bf16.msra.mxu1 %v3160_v24  ;;  %v3264_v24 = vld [vmem:[%s4448_s1 + $0x314] ss:$8 sps:$4 sm:$0xff]   ;;  %v3342_v27 = vld [vmem:[%s4449_s0 + $0xc4] ss:$72 sps:$4 sm:$0xff]  }
  0x8c   :  { %2296 = vmatpush1.bf16.msra.mxu0 %v3163_v25  ;;  %2085 = vmatprep.subr.bf16.mxu1 %v3168_v28  ;;  %v3267_v25 = vld [vmem:[%s4448_s1 + $0x714] ss:$8 sps:$4 sm:$0xff]   ;;  %v3262_v28 = vld [vmem:[%s4448_s1 + $0x310] ss:$8 sps:$4 sm:$0xff]  }
  0x8d   :  { %2297 = vmatprep.subr.bf16.mxu0 %v3171_v29  ;;  %2111 = vmatprep.mubr.bf16.mxu1 %v3252_v32  ;;  %v3265_v29 = vld [vmem:[%s4448_s1 + $0x710] ss:$8 sps:$4 sm:$0xff]   ;;  %v3268_v32 = vld [vmem:[%s4448_s1 + $0x320] ss:$8 sps:$4 sm:$0xff]  }
  0x8e   :  { %2323 = vmatprep.mubr.bf16.mxu0 %v3258_v35  ;;  %v3348_v35 = vld [vmem:[%s4449_s0 + $0xc0] ss:$72 sps:$4 sm:$0xff]  }
  0x8f   :  { %2086 = vmatpush1.bf16.msra.mxu1 %v3166_v30  ;;  %v3270_v30 = vld [vmem:[%s4448_s1 + $0x324] ss:$8 sps:$4 sm:$0xff]  }
  0x90   :  { %2298 = vmatpush1.bf16.msra.mxu0 %v3169_v31  ;;  %2087 = vmatprep.subr.bf16.mxu1 %v3174_v33  ;;  %v3273_v31 = vld [vmem:[%s4448_s1 + $0x724] ss:$8 sps:$4 sm:$0xff]   ;;  %v3271_v33 = vld [vmem:[%s4448_s1 + $0x720] ss:$8 sps:$4 sm:$0xff]  }
  0x91   :  { %2299 = vmatprep.subr.bf16.mxu0 %v3177_v34  ;;  %v3344_v34 = vld [vmem:[%s4449_s0 + $0xa0] ss:$72 sps:$4 sm:$0xff]  }
  0x93   :  { %2088 = vmatpush1.bf16.msra.mxu1 %v3172_v36  ;;  %v3276_v36 = vld [vmem:[%s4448_s1 + $0x334] ss:$8 sps:$4 sm:$0xff]  }
  0x94   :  { %2300 = vmatpush1.bf16.msra.mxu0 %v3175_v37  ;;  %2089 = vmatprep.subr.bf16.mxu1 %v3180_v38  ;;  %v3279_v37 = vld [vmem:[%s4448_s1 + $0x734] ss:$8 sps:$4 sm:$0xff]  }
  0x95   :  { %2301 = vmatprep.subr.bf16.mxu0 %v3183_v39  ;;  %v3360_v38 = vld [vmem:[%s4449_s0 + $0x1c] ss:$72 sps:$4 sm:$0xff]  }
  0x96   :  { %v3363_v39 = vld [vmem:[%s4449_s0 + $0x3c] ss:$72 sps:$4 sm:$0xff]  }
  0x97   :  { %2090 = vmatpush1.bf16.msra.mxu1 %v3178_v40  ;;  %v3274_v40 = vld [vmem:[%s4448_s1 + $0x330] ss:$8 sps:$4 sm:$0xff]  }
  0x98   :  { %2302 = vmatpush1.bf16.msra.mxu0 %v3181_v41  ;;  %2091 = vmatprep.subr.bf16.mxu1 %v3186_v42  ;;  %v3277_v41 = vld [vmem:[%s4448_s1 + $0x730] ss:$8 sps:$4 sm:$0xff]   ;;  %v3282_v42 = vld [vmem:[%s4448_s1 + $0x344] ss:$8 sps:$4 sm:$0xff]  }
  0x99   :  { %2303 = vmatprep.subr.bf16.mxu0 %v3189_v43  ;;  %v3285_v43 = vld [vmem:[%s4448_s1 + $0x744] ss:$8 sps:$4 sm:$0xff]  }
  0x9b   :  { %2092 = vmatpush1.bf16.msra.mxu1 %v3184_v44  ;;  %v3280_v44 = vld [vmem:[%s4448_s1 + $0x340] ss:$8 sps:$4 sm:$0xff]  }
  0x9c   :  { %2304 = vmatpush1.bf16.msra.mxu0 %v3187_v45  ;;  %2093 = vmatprep.subr.bf16.mxu1 %v3192_v46  ;;  %v3283_v45 = vld [vmem:[%s4448_s1 + $0x740] ss:$8 sps:$4 sm:$0xff]   ;;  %v3288_v46 = vld [vmem:[%s4448_s1 + $0x354] ss:$8 sps:$4 sm:$0xff]  }
  0x9d   :  { %2305 = vmatprep.subr.bf16.mxu0 %v3195_v47  ;;  %v3291_v47 = vld [vmem:[%s4448_s1 + $0x754] ss:$8 sps:$4 sm:$0xff]  }
  0x9f   :  { %2094 = vmatpush1.bf16.msra.mxu1 %v3190_v48  ;;  %v3286_v48 = vld [vmem:[%s4448_s1 + $0x350] ss:$8 sps:$4 sm:$0xff]  }
  0xa0   :  { %2306 = vmatpush1.bf16.msra.mxu0 %v3193_v49  ;;  %2095 = vmatprep.subr.bf16.mxu1 %v3198_v50  ;;  %v3289_v49 = vld [vmem:[%s4448_s1 + $0x750] ss:$8 sps:$4 sm:$0xff]   ;;  %v3294_v50 = vld [vmem:[%s4448_s1 + $0x364] ss:$8 sps:$4 sm:$0xff]  }
  0xa1   :  { %2307 = vmatprep.subr.bf16.mxu0 %v3201_v51  ;;  %v3297_v51 = vld [vmem:[%s4448_s1 + $0x764] ss:$8 sps:$4 sm:$0xff]  }
  0xa3   :  { %2096 = vmatpush1.bf16.msra.mxu1 %v3196_v52  ;;  %v3292_v52 = vld [vmem:[%s4448_s1 + $0x360] ss:$8 sps:$4 sm:$0xff]  }
  0xa4   :  { %2308 = vmatpush1.bf16.msra.mxu0 %v3199_v53  ;;  %2097 = vmatprep.subr.bf16.mxu1 %v3204_v54  ;;  %v3295_v53 = vld [vmem:[%s4448_s1 + $0x760] ss:$8 sps:$4 sm:$0xff]   ;;  %v3300_v54 = vld [vmem:[%s4448_s1 + $0x374] ss:$8 sps:$4 sm:$0xff]  }
  0xa5   :  { %2309 = vmatprep.subr.bf16.mxu0 %v3207_v55  ;;  %v3303_v55 = vld [vmem:[%s4448_s1 + $0x774] ss:$8 sps:$4 sm:$0xff]  }
  0xa7   :  { %2098 = vmatpush1.bf16.msra.mxu1 %v3202_v56  ;;  %v3298_v56 = vld [vmem:[%s4448_s1 + $0x370] ss:$8 sps:$4 sm:$0xff]  }
  0xa8   :  { %2310 = vmatpush1.bf16.msra.mxu0 %v3205_v57  ;;  %2099 = vmatprep.subr.bf16.mxu1 %v3210_v58  ;;  %v3301_v57 = vld [vmem:[%s4448_s1 + $0x770] ss:$8 sps:$4 sm:$0xff]   ;;  %v3306_v58 = vld [vmem:[%s4448_s1 + $0x384] ss:$8 sps:$4 sm:$0xff]  }
  0xa9   :  { %2311 = vmatprep.subr.bf16.mxu0 %v3213_v59  ;;  %v3309_v59 = vld [vmem:[%s4448_s1 + $0x784] ss:$8 sps:$4 sm:$0xff]  }
  0xab   :  { %2100 = vmatpush1.bf16.msra.mxu1 %v3208_v60  ;;  %v3304_v60 = vld [vmem:[%s4448_s1 + $0x380] ss:$8 sps:$4 sm:$0xff]  }
  0xac   :  { %2312 = vmatpush1.bf16.msra.mxu0 %v3211_v61  ;;  %2101 = vmatprep.subr.bf16.mxu1 %v3216_v62  ;;  %v3307_v61 = vld [vmem:[%s4448_s1 + $0x780] ss:$8 sps:$4 sm:$0xff]   ;;  %v3312_v62 = vld [vmem:[%s4448_s1 + $0x394] ss:$8 sps:$4 sm:$0xff]  }
  0xad   :  { %2313 = vmatprep.subr.bf16.mxu0 %v3219_v63  ;;  %v3315_v63 = vld [vmem:[%s4448_s1 + $0x794] ss:$8 sps:$4 sm:$0xff]  }
  0xaf   :  { %2102 = vmatpush1.bf16.msra.mxu1 %v3214_v0  ;;  %v3310_v0 = vld [vmem:[%s4448_s1 + $0x390] ss:$8 sps:$4 sm:$0xff]  }
  0xb0   :  { %2314 = vmatpush1.bf16.msra.mxu0 %v3217_v1  ;;  %2103 = vmatprep.subr.bf16.mxu1 %v3222_v2  ;;  %v3313_v1 = vld [vmem:[%s4448_s1 + $0x790] ss:$8 sps:$4 sm:$0xff]   ;;  %v3318_v2 = vld [vmem:[%s4448_s1 + $0x3a4] ss:$8 sps:$4 sm:$0xff]  }
  0xb1   :  { %2315 = vmatprep.subr.bf16.mxu0 %v3225_v3  ;;  %v3321_v3 = vld [vmem:[%s4448_s1 + $0x7a4] ss:$8 sps:$4 sm:$0xff]  }
  0xb3   :  { %2104 = vmatpush1.bf16.msra.mxu1 %v3220_v4  ;;  %v3316_v4 = vld [vmem:[%s4448_s1 + $0x3a0] ss:$8 sps:$4 sm:$0xff]  }
  0xb4   :  { %2316 = vmatpush1.bf16.msra.mxu0 %v3223_v5  ;;  %2105 = vmatprep.subr.bf16.mxu1 %v3228_v6  ;;  %v3319_v5 = vld [vmem:[%s4448_s1 + $0x7a0] ss:$8 sps:$4 sm:$0xff]   ;;  %v3324_v6 = vld [vmem:[%s4448_s1 + $0x3b4] ss:$8 sps:$4 sm:$0xff]  }
  0xb5   :  { %2317 = vmatprep.subr.bf16.mxu0 %v3231_v7  ;;  %v3327_v7 = vld [vmem:[%s4448_s1 + $0x7b4] ss:$8 sps:$4 sm:$0xff]  }
  0xb7   :  { %2106 = vmatpush1.bf16.msra.mxu1 %v3226_v8  ;;  %v3322_v8 = vld [vmem:[%s4448_s1 + $0x3b0] ss:$8 sps:$4 sm:$0xff]  }
  0xb8   :  { %2318 = vmatpush1.bf16.msra.mxu0 %v3229_v9  ;;  %2107 = vmatprep.subr.bf16.mxu1 %v3236_v10  ;;  %v3325_v9 = vld [vmem:[%s4448_s1 + $0x7b0] ss:$8 sps:$4 sm:$0xff]   ;;  %v3330_v10 = vld [vmem:[%s4448_s1 + $0x3c4] ss:$8 sps:$4 sm:$0xff]  }
  0xb9   :  { %2319 = vmatprep.subr.bf16.mxu0 %v3241_v11  ;;  %v3333_v11 = vld [vmem:[%s4448_s1 + $0x7c4] ss:$8 sps:$4 sm:$0xff]  }
  0xbb   :  { %2108 = vmatpush1.bf16.msra.mxu1 %v3234_v12  ;;  %v3328_v12 = vld [vmem:[%s4448_s1 + $0x3c0] ss:$8 sps:$4 sm:$0xff]  }
  0xbc   :  { %2320 = vmatpush1.bf16.msra.mxu0 %v3239_v13  ;;  %2109 = vmatprep.subr.bf16.mxu1 %v3246_v14  ;;  %v3331_v13 = vld [vmem:[%s4448_s1 + $0x7c0] ss:$8 sps:$4 sm:$0xff]   ;;  %v3336_v14 = vld [vmem:[%s4448_s1 + $0x3d4] ss:$8 sps:$4 sm:$0xff]  }
  0xbd   :  { %2321 = vmatprep.subr.bf16.mxu0 %v3249_v15  ;;  %v3339_v15 = vld [vmem:[%s4448_s1 + $0x7d4] ss:$8 sps:$4 sm:$0xff]  }
  0xbf   :  { %2110 = vmatpush1.bf16.msra.mxu1 %v3244_v16  ;;  %v3334_v16 = vld [vmem:[%s4448_s1 + $0x3d0] ss:$8 sps:$4 sm:$0xff]  }
  0xc0   :  { %2322 = vmatpush1.bf16.msra.mxu0 %v3247_v17  ;;  %2132 = vmatprep.subr.bf16.mxu1 %v3255_v18  ;;  %v3337_v17 = vld [vmem:[%s4448_s1 + $0x7d0] ss:$8 sps:$4 sm:$0xff]   ;;  %v3347_v18 = vld [vmem:[%s4448_s1 + $0x3e4] ss:$8 sps:$4 sm:$0xff]  }
  0xc1   :  { %2344 = vmatprep.subr.bf16.mxu0 %v3261_v19  ;;  %v3351_v19 = vld [vmem:[%s4448_s1 + $0x7e4] ss:$8 sps:$4 sm:$0xff]  }
  0xc2   :  { %2112 = vmatmul.mubr.bf16.vlgmr.msra.gmra.mrb[0].mxu1 %v3250_v20  ;;  %v3345_v20 = vld [vmem:[%s4448_s1 + $0x3e0] ss:$8 sps:$4 sm:$0xff]  }
  0xc3   :  { %2324 = vmatmul.mubr.bf16.vlgmr.msra.gmra.mrb[0].mxu0 %v3256_v22  ;;  %2133 = vmatpush1.bf16.msra.mxu1 %v3253_v21  ;;  %v3349_v21 = vld [vmem:[%s4448_s1 + $0x7e0] ss:$8 sps:$4 sm:$0xff]   ;;  %v3354_v22 = vld [vmem:[%s4448_s1 + $0x3f4] ss:$8 sps:$4 sm:$0xff]  }
  0xc4   :  { %2345 = vmatpush1.bf16.msra.mxu0 %v3259_v23  ;;  %2134 = vmatprep.subr.bf16.mxu1 %v3264_v24  ;;  %v3357_v23 = vld [vmem:[%s4448_s1 + $0x7f4] ss:$8 sps:$4 sm:$0xff]   ;;  %v3352_v24 = vld [vmem:[%s4448_s1 + $0x3f0] ss:$8 sps:$4 sm:$0xff]  }
  0xc5   :  { %2346 = vmatprep.subr.bf16.mxu0 %v3267_v25  ;;  %2121 = vmatprep.mubr.bf16.mxu1 %v3340_v26  ;;  %v3355_v25 = vld [vmem:[%s4448_s1 + $0x7f0] ss:$8 sps:$4 sm:$0xff]   ;;  %v3366_v26 = vld [vmem:[%s4448_s1 + $0x804] ss:$8 sps:$4 sm:$0xff]  }
  0xc6   :  { %2333 = vmatprep.mubr.bf16.mxu0 %v3342_v27  ;;  %v3358_v27 = vld [vmem:[%s4449_s0 + $0x18] ss:$72 sps:$4 sm:$0xff]  }
  0xc7   :  { %2135 = vmatpush1.bf16.msra.mxu1 %v3262_v28  ;;  %v3361_v28 = vld [vmem:[%s4449_s0 + $0x38] ss:$72 sps:$4 sm:$0xff]  }
  0xc8   :  { %2347 = vmatpush1.bf16.msra.mxu0 %v3265_v29  ;;  %2136 = vmatprep.subr.bf16.mxu1 %v3270_v30  ;;  %v3364_v29 = vld [vmem:[%s4448_s1 + $0x800] ss:$8 sps:$4 sm:$0xff]   ;;  %v3369_v30 = vld [vmem:[%s4448_s1 + $0x814] ss:$8 sps:$4 sm:$0xff]  }
  0xc9   :  { %2348 = vmatprep.subr.bf16.mxu0 %v3273_v31  ;;  %v3370_v31 = vld [vmem:[%s4449_s0 + $0xac] ss:$72 sps:$4 sm:$0xff]  }
  0xca   :  { %2122 = vmatmul.mubr.bf16.gmra.mrb[4].mxu1 %v3344_v34  ;;  %v3378_v34 = vld [vmem:[%s4448_s1 + $0x824] ss:$8 sps:$4 sm:$0xff]  }
  0xcb   :  { %2334 = vmatmul.mubr.bf16.gmra.mrb[4].mxu0 %v3348_v35  ;;  %2137 = vmatpush1.bf16.msra.mxu1 %v3268_v32  ;;  %v3372_v32 = vld [vmem:[%s4449_s0 + $0xcc] ss:$72 sps:$4 sm:$0xff]   ;;  %v3374_v35 = vld [vmem:[%s4449_s0 + $0xa8] ss:$72 sps:$4 sm:$0xff]  }
  0xcc   :  { %2349 = vmatpush1.bf16.msra.mxu0 %v3271_v33  ;;  %2138 = vmatprep.subr.bf16.mxu1 %v3276_v36  ;;  %v3367_v33 = vld [vmem:[%s4448_s1 + $0x810] ss:$8 sps:$4 sm:$0xff]  }
  0xcd   :  { %2350 = vmatprep.subr.bf16.mxu0 %v3279_v37  ;;  %2164 = vmatprep.mubr.bf16.mxu1 %v3360_v38  ;;  %v3375_v36 = vld [vmem:[%s4449_s0 + $0xc8] ss:$72 sps:$4 sm:$0xff]   ;;  %v3381_v38 = vld [vmem:[%s4448_s1 + $0x834] ss:$8 sps:$4 sm:$0xff]  }
  0xce   :  { %2376 = vmatprep.mubr.bf16.mxu0 %v3363_v39  ;;  %v3376_v37 = vld [vmem:[%s4448_s1 + $0x820] ss:$8 sps:$4 sm:$0xff]   ;;  %v3420_v39 = vld [vmem:[%s4449_s0 + $0x44] ss:$72 sps:$4 sm:$0xff]  }
  0xcf   :  { %2139 = vmatpush1.bf16.msra.mxu1 %v3274_v40  ;;  %v3423_v40 = vld [vmem:[%s4449_s0 + $0xd4] ss:$72 sps:$4 sm:$0xff]  }
  0xd0   :  { %2351 = vmatpush1.bf16.msra.mxu0 %v3277_v41  ;;  %2140 = vmatprep.subr.bf16.mxu1 %v3282_v42  ;;  %v3379_v41 = vld [vmem:[%s4448_s1 + $0x830] ss:$8 sps:$4 sm:$0xff]   ;;  %v3384_v42 = vld [vmem:[%s4448_s1 + $0x844] ss:$8 sps:$4 sm:$0xff]  }
  0xd1   :  { %2352 = vmatprep.subr.bf16.mxu0 %v3285_v43  ;;  %v3382_v43 = vld [vmem:[%s4448_s1 + $0x840] ss:$8 sps:$4 sm:$0xff]  }
  0xd3   :  { %2141 = vmatpush1.bf16.msra.mxu1 %v3280_v44  ;;  %v3387_v44 = vld [vmem:[%s4448_s1 + $0x854] ss:$8 sps:$4 sm:$0xff]  }
  0xd4   :  { %2353 = vmatpush1.bf16.msra.mxu0 %v3283_v45  ;;  %2142 = vmatprep.subr.bf16.mxu1 %v3288_v46  ;;  %v3385_v45 = vld [vmem:[%s4448_s1 + $0x850] ss:$8 sps:$4 sm:$0xff]   ;;  %v3390_v46 = vld [vmem:[%s4448_s1 + $0x864] ss:$8 sps:$4 sm:$0xff]  }
  0xd5   :  { %2354 = vmatprep.subr.bf16.mxu0 %v3291_v47  ;;  %v3388_v47 = vld [vmem:[%s4448_s1 + $0x860] ss:$8 sps:$4 sm:$0xff]  }
  0xd7   :  { %2143 = vmatpush1.bf16.msra.mxu1 %v3286_v48  ;;  %v3393_v48 = vld [vmem:[%s4448_s1 + $0x874] ss:$8 sps:$4 sm:$0xff]  }
  0xd8   :  { %2355 = vmatpush1.bf16.msra.mxu0 %v3289_v49  ;;  %2144 = vmatprep.subr.bf16.mxu1 %v3294_v50  ;;  %v3391_v49 = vld [vmem:[%s4448_s1 + $0x870] ss:$8 sps:$4 sm:$0xff]   ;;  %v3396_v50 = vld [vmem:[%s4448_s1 + $0x884] ss:$8 sps:$4 sm:$0xff]  }
  0xd9   :  { %2356 = vmatprep.subr.bf16.mxu0 %v3297_v51  ;;  %v3394_v51 = vld [vmem:[%s4448_s1 + $0x880] ss:$8 sps:$4 sm:$0xff]  }
  0xdb   :  { %2145 = vmatpush1.bf16.msra.mxu1 %v3292_v52  ;;  %v3399_v52 = vld [vmem:[%s4448_s1 + $0x894] ss:$8 sps:$4 sm:$0xff]  }
  0xdc   :  { %2357 = vmatpush1.bf16.msra.mxu0 %v3295_v53  ;;  %2146 = vmatprep.subr.bf16.mxu1 %v3300_v54  ;;  %v3397_v53 = vld [vmem:[%s4448_s1 + $0x890] ss:$8 sps:$4 sm:$0xff]   ;;  %v3402_v54 = vld [vmem:[%s4448_s1 + $0x8a4] ss:$8 sps:$4 sm:$0xff]  }
  0xdd   :  { %2358 = vmatprep.subr.bf16.mxu0 %v3303_v55  ;;  %v3400_v55 = vld [vmem:[%s4448_s1 + $0x8a0] ss:$8 sps:$4 sm:$0xff]  }
  0xdf   :  { %2147 = vmatpush1.bf16.msra.mxu1 %v3298_v56  ;;  %v3405_v56 = vld [vmem:[%s4448_s1 + $0x8b4] ss:$8 sps:$4 sm:$0xff]  }
  0xe0   :  { %2359 = vmatpush1.bf16.msra.mxu0 %v3301_v57  ;;  %2148 = vmatprep.subr.bf16.mxu1 %v3306_v58  ;;  %v3403_v57 = vld [vmem:[%s4448_s1 + $0x8b0] ss:$8 sps:$4 sm:$0xff]   ;;  %v3408_v58 = vld [vmem:[%s4448_s1 + $0x8c4] ss:$8 sps:$4 sm:$0xff]  }
  0xe1   :  { %2360 = vmatprep.subr.bf16.mxu0 %v3309_v59  ;;  %v3406_v59 = vld [vmem:[%s4448_s1 + $0x8c0] ss:$8 sps:$4 sm:$0xff]  }
  0xe3   :  { %2149 = vmatpush1.bf16.msra.mxu1 %v3304_v60  ;;  %v3411_v60 = vld [vmem:[%s4448_s1 + $0x8d4] ss:$8 sps:$4 sm:$0xff]  }
  0xe4   :  { %2361 = vmatpush1.bf16.msra.mxu0 %v3307_v61  ;;  %2150 = vmatprep.subr.bf16.mxu1 %v3312_v62  ;;  %v3409_v61 = vld [vmem:[%s4448_s1 + $0x8d0] ss:$8 sps:$4 sm:$0xff]   ;;  %v3414_v62 = vld [vmem:[%s4448_s1 + $0x8e4] ss:$8 sps:$4 sm:$0xff]  }
  0xe5   :  { %2362 = vmatprep.subr.bf16.mxu0 %v3315_v63  ;;  %v3412_v63 = vld [vmem:[%s4448_s1 + $0x8e0] ss:$8 sps:$4 sm:$0xff]  }
  0xe7   :  { %2151 = vmatpush1.bf16.msra.mxu1 %v3310_v0  ;;  %v3417_v0 = vld [vmem:[%s4448_s1 + $0x8f4] ss:$8 sps:$4 sm:$0xff]  }
  0xe8   :  { %2363 = vmatpush1.bf16.msra.mxu0 %v3313_v1  ;;  %2152 = vmatprep.subr.bf16.mxu1 %v3318_v2  ;;  %v3415_v1 = vld [vmem:[%s4448_s1 + $0x8f0] ss:$8 sps:$4 sm:$0xff]   ;;  %v3418_v2 = vld [vmem:[%s4449_s0 + $0x40] ss:$72 sps:$4 sm:$0xff]  }
  0xe9   :  { %2364 = vmatprep.subr.bf16.mxu0 %v3321_v3  ;;  %v3421_v3 = vld [vmem:[%s4449_s0 + $0xd0] ss:$72 sps:$4 sm:$0xff]  }
  0xeb   :  { %2153 = vmatpush1.bf16.msra.mxu1 %v3316_v4  ;;  %v343_v4 = vlaneseq }
  0xec   :  { %2365 = vmatpush1.bf16.msra.mxu0 %v3319_v5  ;;  %2154 = vmatprep.subr.bf16.mxu1 %v3324_v6 }
  0xed   :  { %2366 = vmatprep.subr.bf16.mxu0 %v3327_v7  ;;  %v344_v5 = vshrl.u32 %v343_v4, 7 }
  0xef   :  { %2155 = vmatpush1.bf16.msra.mxu1 %v3322_v8 }
  0xf0   :  { %2367 = vmatpush1.bf16.msra.mxu0 %v3325_v9  ;;  %2156 = vmatprep.subr.bf16.mxu1 %v3330_v10  ;;  %v345_v9 = vsub.s32 0, %v344_v5 }
  0xf1   :  { %2368 = vmatprep.subr.bf16.mxu0 %v3333_v11  ;;  %v341_v11 = vld [vmem:[%s4450_s2] sm:$0x3] }
  0xf3   :  { %2157 = vmatpush1.bf16.msra.mxu1 %v3328_v12  ;;  %v349_v12 = vsub.s32 1, %v344_v5 }
  0xf4   :  { %2369 = vmatpush1.bf16.msra.mxu0 %v3331_v13  ;;  %2158 = vmatprep.subr.bf16.mxu1 %v3336_v14  ;;  %v346_v13 = vrot.slane %v341_v11, %v345_v9 }
  0xf5   :  { %2370 = vmatprep.subr.bf16.mxu0 %v3339_v15  ;;  %v350_v14 = vrot.slane %v341_v11, %v349_v12 }
  0xf7   :  { %2159 = vmatpush1.bf16.msra.mxu1 %v3334_v16 }
  0xf8   :  { %2371 = vmatpush1.bf16.msra.mxu0 %v3337_v17  ;;  %2160 = vmatprep.subr.bf16.mxu1 %v3347_v18 }
  0xf9   :  { %2372 = vmatprep.subr.bf16.mxu0 %v3351_v19 }
  0xfb   :  { %2161 = vmatpush1.bf16.msra.mxu1 %v3345_v20 }
  0xfc   :  { %2373 = vmatpush1.bf16.msra.mxu0 %v3349_v21  ;;  %2162 = vmatprep.subr.bf16.mxu1 %v3354_v22 }
  0xfd   :  { %2374 = vmatprep.subr.bf16.mxu0 %v3357_v23 }
  0xff   :  { %2163 = vmatpush1.bf16.msra.mxu1 %v3352_v24 }
 0x100   :  { %2375 = vmatpush1.bf16.msra.mxu0 %v3355_v25  ;;  %2834 = vmatprep.subr.bf16.mxu1 %v3366_v26 }
 0x101   :  { %2397 = vmatprep.subr.bf16.mxu0 %v3366_v26 }
 0x102   :  { %2165 = vmatmul.mubr.bf16.vlgmr.msra.gmra.mrb[0].mxu1 %v3358_v27 }
 0x103   :  { %2377 = vmatmul.mubr.bf16.vlgmr.msra.gmra.mrb[0].mxu0 %v3361_v28  ;;  %2850 = vmatpush1.bf16.msra.mxu1 %v3364_v29 }
 0x104   :  { %2398 = vmatpush1.bf16.msra.mxu0 %v3364_v29  ;;  %2835 = vmatprep.subr.bf16.mxu1 %v3369_v30 }
 0x105   :  { %2399 = vmatprep.subr.bf16.mxu0 %v3369_v30  ;;  %2174 = vmatprep.mubr.bf16.mxu1 %v3370_v31  ;;  %v2450_v31 = vld [vmem:[%s4451_s3] sm:$0xff] }
 0x106   :  { %2386 = vmatprep.mubr.bf16.mxu0 %v3372_v32  ;;  %v2452_v32 = vld [vmem:[%s4451_s3 + $0x10] sm:$0xff] }
 0x107   :  { %2851 = vmatpush1.bf16.msra.mxu1 %v3367_v33 }
 0x108   :  { %2400 = vmatpush1.bf16.msra.mxu0 %v3367_v33  ;;  %2836 = vmatprep.subr.bf16.mxu1 %v3378_v34  ;;  %v2451_v33 = vld [vmem:[%s4451_s3 + $0x8] sm:$0xff] }
 0x109   :  { %2401 = vmatprep.subr.bf16.mxu0 %v3378_v34  ;;  %v2453_v34 = vld [vmem:[%s4451_s3 + $0x18] sm:$0xff] }
 0x10a   :  { %2175 = vmatmul.mubr.bf16.gmra.mrb[4].mxu1 %v3374_v35 }
 0x10b   :  { %2387 = vmatmul.mubr.bf16.gmra.mrb[4].mxu0 %v3375_v36  ;;  %2852 = vmatpush1.bf16.msra.mxu1 %v3376_v37  ;;  %v2454_v36 = vunpack.c.l.bf16 %v2450_v31 }
 0x10c   :  { %2402 = vmatpush1.bf16.msra.mxu0 %v3376_v37  ;;  %2837 = vmatprep.subr.bf16.mxu1 %v3381_v38  ;;  %v2458_v37 = vunpack.c.l.bf16 %v2452_v32 }
 0x10d   :  { %2403 = vmatprep.subr.bf16.mxu0 %v3381_v38  ;;  %2429 = vmatprep.mubr.bf16.mxu0 %v3420_v39  ;;  %v2455_v38 = vunpack.c.h.bf16 %v2450_v31 }
 0x10e   :  { %2439 = vmatprep.mubr.bf16.mxu1 %v3423_v40 }
 0x10f   :  { %2853 = vmatpush1.bf16.msra.mxu1 %v3379_v41 }
 0x110   :  { %2404 = vmatpush1.bf16.msra.mxu0 %v3379_v41  ;;  %2838 = vmatprep.subr.bf16.mxu1 %v3384_v42 }
 0x111   :  { %2405 = vmatprep.subr.bf16.mxu0 %v3384_v42  ;;  %v2459_v42 = vunpack.c.h.bf16 %v2452_v32 }
 0x113   :  { %2854 = vmatpush1.bf16.msra.mxu1 %v3382_v43 }
 0x114   :  { %2406 = vmatpush1.bf16.msra.mxu0 %v3382_v43  ;;  %2839 = vmatprep.subr.bf16.mxu1 %v3387_v44  ;;  %v2456_v43 = vunpack.c.l.bf16 %v2451_v33 }
 0x115   :  { %2407 = vmatprep.subr.bf16.mxu0 %v3387_v44  ;;  %v2460_v44 = vunpack.c.l.bf16 %v2453_v34 }
 0x117   :  { %2855 = vmatpush1.bf16.msra.mxu1 %v3385_v45 }
 0x118   :  { %2408 = vmatpush1.bf16.msra.mxu0 %v3385_v45  ;;  %2840 = vmatprep.subr.bf16.mxu1 %v3390_v46 }
 0x119   :  { %2409 = vmatprep.subr.bf16.mxu0 %v3390_v46 }
 0x11b   :  { %2856 = vmatpush1.bf16.msra.mxu1 %v3388_v47 }
 0x11c   :  { %2410 = vmatpush1.bf16.msra.mxu0 %v3388_v47  ;;  %2841 = vmatprep.subr.bf16.mxu1 %v3393_v48 }
 0x11d   :  { %2411 = vmatprep.subr.bf16.mxu0 %v3393_v48 }
 0x11f   :  { %2857 = vmatpush1.bf16.msra.mxu1 %v3391_v49 }
 0x120   :  { %2412 = vmatpush1.bf16.msra.mxu0 %v3391_v49  ;;  %2842 = vmatprep.subr.bf16.mxu1 %v3396_v50 }
 0x121   :  { %2413 = vmatprep.subr.bf16.mxu0 %v3396_v50  ;;  %v2457_v50 = vunpack.c.h.bf16 %v2451_v33 }
 0x123   :  { %2858 = vmatpush1.bf16.msra.mxu1 %v3394_v51 }
 0x124   :  { %2414 = vmatpush1.bf16.msra.mxu0 %v3394_v51  ;;  %2843 = vmatprep.subr.bf16.mxu1 %v3399_v52 }
 0x125   :  { %2415 = vmatprep.subr.bf16.mxu0 %v3399_v52 }
 0x127   :  { %2859 = vmatpush1.bf16.msra.mxu1 %v3397_v53 }
 0x128   :  { %2416 = vmatpush1.bf16.msra.mxu0 %v3397_v53  ;;  %2844 = vmatprep.subr.bf16.mxu1 %v3402_v54 }
 0x129   :  { %2417 = vmatprep.subr.bf16.mxu0 %v3402_v54 }
 0x12b   :  { %2860 = vmatpush1.bf16.msra.mxu1 %v3400_v55 }
 0x12c   :  { %2418 = vmatpush1.bf16.msra.mxu0 %v3400_v55  ;;  %2845 = vmatprep.subr.bf16.mxu1 %v3405_v56 }
 0x12d   :  { %2419 = vmatprep.subr.bf16.mxu0 %v3405_v56  ;;  %v2461_v56 = vunpack.c.h.bf16 %v2453_v34 }
 0x12f   :  { %2861 = vmatpush1.bf16.msra.mxu1 %v3403_v57 }
 0x130   :  { %2420 = vmatpush1.bf16.msra.mxu0 %v3403_v57  ;;  %2846 = vmatprep.subr.bf16.mxu1 %v3408_v58 }
 0x131   :  { %2421 = vmatprep.subr.bf16.mxu0 %v3408_v58 }
 0x133   :  { %2862 = vmatpush1.bf16.msra.mxu1 %v3406_v59 }
 0x134   :  { %2422 = vmatpush1.bf16.msra.mxu0 %v3406_v59  ;;  %2847 = vmatprep.subr.bf16.mxu1 %v3411_v60 }
 0x135   :  { %2423 = vmatprep.subr.bf16.mxu0 %v3411_v60 }
 0x137   :  { %2863 = vmatpush1.bf16.msra.mxu1 %v3409_v61 }
 0x138   :  { %2424 = vmatpush1.bf16.msra.mxu0 %v3409_v61  ;;  %2848 = vmatprep.subr.bf16.mxu1 %v3414_v62 }
 0x139   :  { %2425 = vmatprep.subr.bf16.mxu0 %v3414_v62 }
 0x13b   :  { %2864 = vmatpush1.bf16.msra.mxu1 %v3412_v63 }
 0x13c   :  { %2426 = vmatpush1.bf16.msra.mxu0 %v3412_v63  ;;  %2849 = vmatprep.subr.bf16.mxu1 %v3417_v0 }
 0x13d   :  { %2427 = vmatprep.subr.bf16.mxu0 %v3417_v0 }
 0x13f   :  { %2865 = vmatpush1.bf16.msra.mxu1 %v3415_v1 }
 0x140   :  { %2428 = vmatpush1.bf16.msra.mxu0 %v3415_v1 }
 0x142   :  { %2440 = vmatmul.mubr.bf16.vlgmr.msra.gmra.mrb[8].mxu1 %v3421_v3 }
 0x143   :  { %2430 = vmatmul.mubr.bf16.vlgmr.msra.gmra.mrb[0].mxu0 %v3418_v2 }
 0x1d5   :  { %v2166_v6 = vpop.f32.mrb[0].mxu1 }
 0x1d6   :  { %v2168_v7 = vpop.f32.mrb[1].mxu1  ;;  %v2866_v35 = vadd.f32 %v2166_v6, %v346_v13 }
 0x1d7   :  { %v2170_v8 = vpop.f32.mrb[2].mxu1  ;;  %v2868_v39 = vadd.f32 %v2168_v7, %v350_v14 }
 0x1d8   :  { %v2172_v10 = vpop.f32.mrb[3].mxu1  ;;  %v2870_v45 = vadd.f32 %v2170_v8, %v346_v13 }
 0x1d9   :  { %v2872_v51 = vadd.f32 %v2172_v10, %v350_v14 }
 0x1dd   :  { %v2176_v15 = vpop.f32.mrb[4].mxu1 }
 0x1de   :  { %v2388_v16 = vpop.f32.mrb[4].mxu0  ;;  %v2874_v17 = vadd.f32 %v2176_v15, %v346_v13  ;;  %v2178_v18 = vpop.f32.mrb[5].mxu1 }
 0x1df   :  { %v2390_v19 = vpop.f32.mrb[5].mxu0  ;;  %v2877_v20 = vadd.f32 %v2178_v18, %v350_v14  ;;  %v2180_v21 = vpop.f32.mrb[6].mxu1 }
 0x1e0   :  { %v2392_v22 = vpop.f32.mrb[6].mxu0  ;;  %v2875_v23 = vadd.f32 %v2874_v17, %v2388_v16  ;;  %v2880_v24 = vadd.f32 %v2180_v21, %v346_v13  ;;  %v2182_v25 = vpop.f32.mrb[7].mxu1 }
 0x1e1   :  { %v2394_v26 = vpop.f32.mrb[7].mxu0  ;;  %v2878_v27 = vadd.f32 %v2877_v20, %v2390_v19  ;;  %v2883_v28 = vadd.f32 %v2182_v25, %v350_v14 }
 0x1e2   :  { %v2881_v29 = vadd.f32 %v2880_v24, %v2392_v22 }
 0x1e3   :  { %v2884_v30 = vadd.f32 %v2883_v28, %v2394_v26 }
 0x215   :  { %v2441_v41 = vpop.f32.mrb[8].mxu1 }
 0x216   :  { %v2431_v40 = vpop.f32.mrb[0].mxu0  ;;  %v2876_v47 = vadd.f32 %v2875_v23, %v2441_v41  ;;  %v2443_v49 = vpop.f32.mrb[9].mxu1 }
 0x217   :  { %v2867_v46 = vadd.f32 %v2866_v35, %v2431_v40  ;;  %v2433_v48 = vpop.f32.mrb[1].mxu0  ;;  %v2879_v53 = vadd.f32 %v2878_v27, %v2443_v49  ;;  %v2445_v55 = vpop.f32.mrb[10].mxu1 }
 0x218   :  { %v2869_v52 = vadd.f32 %v2868_v39, %v2433_v48  ;;  %v2435_v54 = vpop.f32.mrb[2].mxu0  ;;  %v2466_v58 = vadd.f32 %v2876_v47, %v2458_v37  ;;  %v2882_v60 = vadd.f32 %v2881_v29, %v2445_v55  ;;  %v2447_v62 = vpop.f32.mrb[11].mxu1 }
 0x219   :  { %v2462_v57 = vadd.f32 %v2867_v46, %v2454_v36  ;;  %v2871_v59 = vadd.f32 %v2870_v45, %v2435_v54  ;;  %v2437_v61 = vpop.f32.mrb[3].mxu0  ;;  %v2467_v0 = vadd.f32 %v2879_v53, %v2459_v42  ;;  %v2885_v2 = vadd.f32 %v2884_v30, %v2447_v62 }
 0x21a   :  { %v2463_v63 = vadd.f32 %v2869_v52, %v2455_v38  ;;  %v2873_v1 = vadd.f32 %v2872_v51, %v2437_v61  ;;  %v2468_v4 = vadd.f32 %v2882_v60, %v2460_v44 }
 0x21b   :  { %v2464_v3 = vadd.f32 %v2871_v59, %v2456_v43  ;;  %v2832_v6 = vpack.c.bf16 %v2467_v0, %v2466_v58  ;;  %v2469_v8 = vadd.f32 %v2885_v2, %v2461_v56 }
 0x21c   :  { %v2830_v5 = vpack.c.bf16 %v2463_v63, %v2462_v57  ;;  %v2465_v7 = vadd.f32 %v2873_v1, %v2457_v50 }
 0x21d   :  { %2496 = vst [vmem:[%s4452_s4 + $0x10] sm:$0xff] %v2832_v6  ;;  %v2833_v10 = vpack.c.bf16 %v2469_v8, %v2468_v4 }
 0x21e   :  { %2494 = vst [vmem:[%s4452_s4] sm:$0xff] %v2830_v5  ;;  %v2831_v9 = vpack.c.bf16 %v2465_v7, %v2464_v3 }
 0x21f   :  { %2497 = vst [vmem:[%s4452_s4 + $0x18] sm:$0xff] %v2833_v10 }
 0x220   :  { %2495 = vst [vmem:[%s4452_s4 + $0x8] sm:$0xff] %v2831_v9 }

// kernel: resnet_generator_forward.27
= control target key start
LH: loop header
LB: loop body
LE: loop exit
PB: predicated region body
PF: predicated region fallthrough
CT: control target
= control target key end

     0   :  { %s3791_s1 = inlined_call_operand.vmem [shape: bf16[1024,512], index: 1, kind: input, shape index: {}]   ;;  %s3792_s0 = inlined_call_operand.vmem [shape: bf16[32,1024], index: 0, kind: input, shape index: {}]   ;;  %s3793_s2 = inlined_call_operand.vmem [shape: f32[1,512], index: 2, kind: input, shape index: {}]   ;;  %s3794_s3 = inlined_call_operand.vmem [shape: bf16[32,512], index: 3, kind: output, shape index: {}]  }
   0x1   :  { %v2520_v0 = vld [vmem:[%s3791_s1 + $0x4] ss:$16 sps:$4 sm:$0xff]   ;;  %v2522_v1 = vld [vmem:[%s3791_s1 + $0xc] ss:$16 sps:$4 sm:$0xff]   ;;  %v2524_v2 = vld [vmem:[%s3791_s1] ss:$16 sps:$4 sm:$0xff]  }
   0x2   :  { %1668 = vmatprep.subr.bf16.mxu0 %v2520_v0  ;;  %v2525_v3 = vld [vmem:[%s3791_s1 + $0x8] ss:$16 sps:$4 sm:$0xff]   ;;  %1880 = vmatprep.subr.bf16.mxu1 %v2522_v1  ;;  %v2526_v4 = vld [vmem:[%s3791_s1 + $0x24] ss:$16 sps:$4 sm:$0xff]   ;;  %v2528_v5 = vld [vmem:[%s3791_s1 + $0x2c] ss:$16 sps:$4 sm:$0xff]  }
   0x3   :  { %1669 = vmatpush1.bf16.msra.mxu0 %v2524_v2  ;;  %1881 = vmatpush1.bf16.msra.mxu1 %v2525_v3  ;;  %v2530_v6 = vld [vmem:[%s3791_s1 + $0x20] ss:$16 sps:$4 sm:$0xff]   ;;  %v2531_v7 = vld [vmem:[%s3791_s1 + $0x28] ss:$16 sps:$4 sm:$0xff]   ;;  %v2532_v8 = vld [vmem:[%s3791_s1 + $0x44] ss:$16 sps:$4 sm:$0xff]  }
   0x4   :  { %1670 = vmatprep.subr.bf16.mxu0 %v2526_v4  ;;  %1882 = vmatprep.subr.bf16.mxu1 %v2528_v5  ;;  %v2534_v9 = vld [vmem:[%s3791_s1 + $0x4c] ss:$16 sps:$4 sm:$0xff]   ;;  %v2536_v10 = vld [vmem:[%s3791_s1 + $0x40] ss:$16 sps:$4 sm:$0xff]   ;;  %v2537_v11 = vld [vmem:[%s3791_s1 + $0x48] ss:$16 sps:$4 sm:$0xff]  }
   0x5   :  { %v2538_v12 = vld [vmem:[%s3791_s1 + $0x64] ss:$16 sps:$4 sm:$0xff]   ;;  %v2540_v13 = vld [vmem:[%s3791_s1 + $0x6c] ss:$16 sps:$4 sm:$0xff]   ;;  %v2542_v14 = vld [vmem:[%s3791_s1 + $0x60] ss:$16 sps:$4 sm:$0xff]  }
   0x6   :  { %v2543_v15 = vld [vmem:[%s3791_s1 + $0x68] ss:$16 sps:$4 sm:$0xff]   ;;  %v2544_v16 = vld [vmem:[%s3791_s1 + $0x84] ss:$16 sps:$4 sm:$0xff]   ;;  %v2546_v17 = vld [vmem:[%s3791_s1 + $0x8c] ss:$16 sps:$4 sm:$0xff]  }
   0x7   :  { %1671 = vmatpush1.bf16.msra.mxu0 %v2530_v6  ;;  %1883 = vmatpush1.bf16.msra.mxu1 %v2531_v7  ;;  %v2548_v18 = vld [vmem:[%s3791_s1 + $0x80] ss:$16 sps:$4 sm:$0xff]   ;;  %v2549_v19 = vld [vmem:[%s3791_s1 + $0x88] ss:$16 sps:$4 sm:$0xff]   ;;  %v2550_v20 = vld [vmem:[%s3791_s1 + $0xa4] ss:$16 sps:$4 sm:$0xff]  }
   0x8   :  { %1672 = vmatprep.subr.bf16.mxu0 %v2532_v8  ;;  %1884 = vmatprep.subr.bf16.mxu1 %v2534_v9  ;;  %v2552_v21 = vld [vmem:[%s3791_s1 + $0xac] ss:$16 sps:$4 sm:$0xff]   ;;  %v2554_v22 = vld [vmem:[%s3791_s1 + $0xa0] ss:$16 sps:$4 sm:$0xff]   ;;  %v2555_v23 = vld [vmem:[%s3791_s1 + $0xa8] ss:$16 sps:$4 sm:$0xff]  }
   0x9   :  { %v2556_v24 = vld [vmem:[%s3791_s1 + $0xc4] ss:$16 sps:$4 sm:$0xff]   ;;  %v2558_v25 = vld [vmem:[%s3791_s1 + $0xcc] ss:$16 sps:$4 sm:$0xff]   ;;  %v2560_v26 = vld [vmem:[%s3791_s1 + $0xc0] ss:$16 sps:$4 sm:$0xff]  }
   0xa   :  { %v2561_v27 = vld [vmem:[%s3791_s1 + $0xc8] ss:$16 sps:$4 sm:$0xff]   ;;  %v2562_v28 = vld [vmem:[%s3791_s1 + $0xe4] ss:$16 sps:$4 sm:$0xff]   ;;  %v2564_v29 = vld [vmem:[%s3791_s1 + $0xec] ss:$16 sps:$4 sm:$0xff]  }
   0xb   :  { %1673 = vmatpush1.bf16.msra.mxu0 %v2536_v10  ;;  %1885 = vmatpush1.bf16.msra.mxu1 %v2537_v11  ;;  %v2566_v30 = vld [vmem:[%s3791_s1 + $0xe0] ss:$16 sps:$4 sm:$0xff]   ;;  %v2567_v31 = vld [vmem:[%s3791_s1 + $0xe8] ss:$16 sps:$4 sm:$0xff]   ;;  %v2568_v32 = vld [vmem:[%s3791_s1 + $0x104] ss:$16 sps:$4 sm:$0xff]  }
   0xc   :  { %1674 = vmatprep.subr.bf16.mxu0 %v2538_v12  ;;  %1886 = vmatprep.subr.bf16.mxu1 %v2540_v13  ;;  %v2570_v33 = vld [vmem:[%s3791_s1 + $0x10c] ss:$16 sps:$4 sm:$0xff]   ;;  %v2572_v34 = vld [vmem:[%s3791_s1 + $0x100] ss:$16 sps:$4 sm:$0xff]   ;;  %v2573_v35 = vld [vmem:[%s3791_s1 + $0x108] ss:$16 sps:$4 sm:$0xff]  }
   0xd   :  { %v2574_v36 = vld [vmem:[%s3791_s1 + $0x124] ss:$16 sps:$4 sm:$0xff]   ;;  %v2576_v37 = vld [vmem:[%s3791_s1 + $0x12c] ss:$16 sps:$4 sm:$0xff]   ;;  %v2578_v38 = vld [vmem:[%s3791_s1 + $0x120] ss:$16 sps:$4 sm:$0xff]  }
   0xe   :  { %v2579_v39 = vld [vmem:[%s3791_s1 + $0x128] ss:$16 sps:$4 sm:$0xff]   ;;  %v2580_v40 = vld [vmem:[%s3791_s1 + $0x144] ss:$16 sps:$4 sm:$0xff]   ;;  %v2582_v41 = vld [vmem:[%s3791_s1 + $0x14c] ss:$16 sps:$4 sm:$0xff]  }
   0xf   :  { %1675 = vmatpush1.bf16.msra.mxu0 %v2542_v14  ;;  %1887 = vmatpush1.bf16.msra.mxu1 %v2543_v15  ;;  %v2584_v42 = vld [vmem:[%s3791_s1 + $0x140] ss:$16 sps:$4 sm:$0xff]   ;;  %v2585_v43 = vld [vmem:[%s3791_s1 + $0x148] ss:$16 sps:$4 sm:$0xff]   ;;  %v2586_v44 = vld [vmem:[%s3791_s1 + $0x164] ss:$16 sps:$4 sm:$0xff]  }
  0x10   :  { %1676 = vmatprep.subr.bf16.mxu0 %v2544_v16  ;;  %1888 = vmatprep.subr.bf16.mxu1 %v2546_v17  ;;  %v2588_v45 = vld [vmem:[%s3791_s1 + $0x16c] ss:$16 sps:$4 sm:$0xff]   ;;  %v14_v46 = vld [vmem:[%s3792_s0] sm:$0xff]  ;;  %v2591_v49 = vld [vmem:[%s3791_s1 + $0x168] ss:$16 sps:$4 sm:$0xff]  }
  0x11   :  { %v18_v47 = vld [vmem:[%s3792_s0 + $0x20] sm:$0xff]  ;;  %v2594_v52 = vld [vmem:[%s3791_s1 + $0x18c] ss:$16 sps:$4 sm:$0xff]   ;;  %v2597_v54 = vld [vmem:[%s3791_s1 + $0x188] ss:$16 sps:$4 sm:$0xff]  }
  0x12   :  { %v2590_v48 = vld [vmem:[%s3791_s1 + $0x160] ss:$16 sps:$4 sm:$0xff]   ;;  %v2169_v50 = vcombine.high %v14_v46, %v18_v47  ;;  %v2592_v51 = vld [vmem:[%s3791_s1 + $0x184] ss:$16 sps:$4 sm:$0xff]   ;;  %v2600_v56 = vld [vmem:[%s3791_s1 + $0x1ac] ss:$16 sps:$4 sm:$0xff]   ;;  %v2168_v5 = vcombine.low %v14_v46, %v18_v47 }
  0x13   :  { %1677 = vmatpush1.bf16.msra.mxu0 %v2548_v18  ;;  %1889 = vmatpush1.bf16.msra.mxu1 %v2549_v19  ;;  %v2596_v53 = vld [vmem:[%s3791_s1 + $0x180] ss:$16 sps:$4 sm:$0xff]   ;;  %v2598_v55 = vld [vmem:[%s3791_s1 + $0x1a4] ss:$16 sps:$4 sm:$0xff]   ;;  %v2603_v58 = vld [vmem:[%s3791_s1 + $0x1a8] ss:$16 sps:$4 sm:$0xff]  }
  0x14   :  { %1678 = vmatprep.subr.bf16.mxu0 %v2550_v20  ;;  %1890 = vmatprep.subr.bf16.mxu1 %v2552_v21  ;;  %v2602_v57 = vld [vmem:[%s3791_s1 + $0x1a0] ss:$16 sps:$4 sm:$0xff]   ;;  %v2604_v59 = vld [vmem:[%s3791_s1 + $0x1c4] ss:$16 sps:$4 sm:$0xff]   ;;  %v2606_v60 = vld [vmem:[%s3791_s1 + $0x1cc] ss:$16 sps:$4 sm:$0xff]  }
  0x15   :  { %1700 = vmatprep.mubr.bf16.mxu0 %v2169_v50  ;;  %1912 = vmatprep.mubr.bf16.mxu1 %v2169_v50  ;;  %v2608_v61 = vld [vmem:[%s3791_s1 + $0x1c0] ss:$16 sps:$4 sm:$0xff]   ;;  %v2609_v62 = vld [vmem:[%s3791_s1 + $0x1c8] ss:$16 sps:$4 sm:$0xff]   ;;  %v2610_v63 = vld [vmem:[%s3791_s1 + $0x1e4] ss:$16 sps:$4 sm:$0xff]  }
  0x16   :  { %v2612_v0 = vld [vmem:[%s3791_s1 + $0x1ec] ss:$16 sps:$4 sm:$0xff]   ;;  %v2614_v1 = vld [vmem:[%s3791_s1 + $0x1e0] ss:$16 sps:$4 sm:$0xff]   ;;  %v2615_v2 = vld [vmem:[%s3791_s1 + $0x1e8] ss:$16 sps:$4 sm:$0xff]  }
  0x17   :  { %1679 = vmatpush1.bf16.msra.mxu0 %v2554_v22  ;;  %1891 = vmatpush1.bf16.msra.mxu1 %v2555_v23  ;;  %v2618_v3 = vld [vmem:[%s3791_s1 + $0x204] ss:$16 sps:$4 sm:$0xff]   ;;  %v2621_v4 = vld [vmem:[%s3791_s1 + $0x20c] ss:$16 sps:$4 sm:$0xff]   ;;  %v2616_v6 = vld [vmem:[%s3791_s1 + $0x200] ss:$16 sps:$4 sm:$0xff]  }
  0x18   :  { %1680 = vmatprep.subr.bf16.mxu0 %v2556_v24  ;;  %1892 = vmatprep.subr.bf16.mxu1 %v2558_v25  ;;  %v2619_v7 = vld [vmem:[%s3791_s1 + $0x208] ss:$16 sps:$4 sm:$0xff]   ;;  %v2624_v8 = vld [vmem:[%s3791_s1 + $0x224] ss:$16 sps:$4 sm:$0xff]   ;;  %v2627_v9 = vld [vmem:[%s3791_s1 + $0x22c] ss:$16 sps:$4 sm:$0xff]  }
  0x19   :  { %v2622_v10 = vld [vmem:[%s3791_s1 + $0x220] ss:$16 sps:$4 sm:$0xff]   ;;  %v2625_v11 = vld [vmem:[%s3791_s1 + $0x228] ss:$16 sps:$4 sm:$0xff]   ;;  %v2630_v12 = vld [vmem:[%s3791_s1 + $0x244] ss:$16 sps:$4 sm:$0xff]  }
  0x1a   :  { %v2633_v13 = vld [vmem:[%s3791_s1 + $0x24c] ss:$16 sps:$4 sm:$0xff]   ;;  %v2628_v14 = vld [vmem:[%s3791_s1 + $0x240] ss:$16 sps:$4 sm:$0xff]   ;;  %v2631_v15 = vld [vmem:[%s3791_s1 + $0x248] ss:$16 sps:$4 sm:$0xff]  }
  0x1b   :  { %1681 = vmatpush1.bf16.msra.mxu0 %v2560_v26  ;;  %1893 = vmatpush1.bf16.msra.mxu1 %v2561_v27  ;;  %v2636_v16 = vld [vmem:[%s3791_s1 + $0x264] ss:$16 sps:$4 sm:$0xff]   ;;  %v2639_v17 = vld [vmem:[%s3791_s1 + $0x26c] ss:$16 sps:$4 sm:$0xff]   ;;  %v2634_v18 = vld [vmem:[%s3791_s1 + $0x260] ss:$16 sps:$4 sm:$0xff]  }
  0x1c   :  { %1682 = vmatprep.subr.bf16.mxu0 %v2562_v28  ;;  %1894 = vmatprep.subr.bf16.mxu1 %v2564_v29  ;;  %v2637_v19 = vld [vmem:[%s3791_s1 + $0x268] ss:$16 sps:$4 sm:$0xff]   ;;  %v2642_v20 = vld [vmem:[%s3791_s1 + $0x284] ss:$16 sps:$4 sm:$0xff]   ;;  %v2645_v21 = vld [vmem:[%s3791_s1 + $0x28c] ss:$16 sps:$4 sm:$0xff]  }
  0x1d   :  { %v2640_v22 = vld [vmem:[%s3791_s1 + $0x280] ss:$16 sps:$4 sm:$0xff]   ;;  %v2643_v23 = vld [vmem:[%s3791_s1 + $0x288] ss:$16 sps:$4 sm:$0xff]   ;;  %v2648_v24 = vld [vmem:[%s3791_s1 + $0x2a4] ss:$16 sps:$4 sm:$0xff]  }
  0x1e   :  { %v2651_v25 = vld [vmem:[%s3791_s1 + $0x2ac] ss:$16 sps:$4 sm:$0xff]   ;;  %v22_v26 = vld [vmem:[%s3792_s0 + $0x40] sm:$0xff]  ;;  %v2667_v46 = vld [vmem:[%s3791_s1 + $0x308] ss:$16 sps:$4 sm:$0xff]  }
  0x1f   :  { %1683 = vmatpush1.bf16.msra.mxu0 %v2566_v30  ;;  %1895 = vmatpush1.bf16.msra.mxu1 %v2567_v31  ;;  %v26_v27 = vld [vmem:[%s3792_s0 + $0x60] sm:$0xff]  ;;  %v2649_v30 = vld [vmem:[%s3791_s1 + $0x2a8] ss:$16 sps:$4 sm:$0xff]  }
  0x20   :  { %1684 = vmatprep.subr.bf16.mxu0 %v2568_v32  ;;  %1896 = vmatprep.subr.bf16.mxu1 %v2570_v33  ;;  %v2177_v28 = vcombine.high %v22_v26, %v26_v27  ;;  %v2646_v29 = vld [vmem:[%s3791_s1 + $0x2a0] ss:$16 sps:$4 sm:$0xff]   ;;  %v2176_v31 = vcombine.low %v22_v26, %v26_v27  ;;  %v2654_v32 = vld [vmem:[%s3791_s1 + $0x2c4] ss:$16 sps:$4 sm:$0xff]   ;;  %v2657_v33 = vld [vmem:[%s3791_s1 + $0x2cc] ss:$16 sps:$4 sm:$0xff]  }
  0x21   :  { %v2672_v47 = vld [vmem:[%s3791_s1 + $0x324] ss:$16 sps:$4 sm:$0xff]   ;;  %v2673_v50 = vld [vmem:[%s3791_s1 + $0x328] ss:$16 sps:$4 sm:$0xff]  }
  0x22   :  { %v3378_v27 = vld [vmem:[%s3792_s0 + $0x30] sm:$0xff] }
  0x23   :  { %1685 = vmatpush1.bf16.msra.mxu0 %v2572_v34  ;;  %1897 = vmatpush1.bf16.msra.mxu1 %v2573_v35  ;;  %v3209_v34 = vld [vmem:[%s3792_s0 + $0x8] sm:$0xff] }
  0x24   :  { %1686 = vmatprep.subr.bf16.mxu0 %v2574_v36  ;;  %1898 = vmatprep.subr.bf16.mxu1 %v2576_v37  ;;  %v3214_v35 = vld [vmem:[%s3792_s0 + $0x28] sm:$0xff]  ;;  %v2652_v36 = vld [vmem:[%s3791_s1 + $0x2c0] ss:$16 sps:$4 sm:$0xff]  }
  0x25   :  { %v2655_v37 = vld [vmem:[%s3791_s1 + $0x2c8] ss:$16 sps:$4 sm:$0xff]  }
  0x27   :  { %1687 = vmatpush1.bf16.msra.mxu0 %v2578_v38  ;;  %1899 = vmatpush1.bf16.msra.mxu1 %v2579_v39  ;;  %v2171_v38 = vcombine.high %v3209_v34, %v3214_v35  ;;  %v2660_v39 = vld [vmem:[%s3791_s1 + $0x2e4] ss:$16 sps:$4 sm:$0xff]  }
  0x28   :  { %1688 = vmatprep.subr.bf16.mxu0 %v2580_v40  ;;  %1900 = vmatprep.subr.bf16.mxu1 %v2582_v41  ;;  %v2663_v40 = vld [vmem:[%s3791_s1 + $0x2ec] ss:$16 sps:$4 sm:$0xff]   ;;  %v2658_v41 = vld [vmem:[%s3791_s1 + $0x2e0] ss:$16 sps:$4 sm:$0xff]  }
  0x2b   :  { %1689 = vmatpush1.bf16.msra.mxu0 %v2584_v42  ;;  %1901 = vmatpush1.bf16.msra.mxu1 %v2585_v43  ;;  %v2661_v42 = vld [vmem:[%s3791_s1 + $0x2e8] ss:$16 sps:$4 sm:$0xff]   ;;  %v2666_v43 = vld [vmem:[%s3791_s1 + $0x304] ss:$16 sps:$4 sm:$0xff]  }
  0x2c   :  { %1690 = vmatprep.subr.bf16.mxu0 %v2586_v44  ;;  %1902 = vmatprep.subr.bf16.mxu1 %v2588_v45  ;;  %v2669_v44 = vld [vmem:[%s3791_s1 + $0x30c] ss:$16 sps:$4 sm:$0xff]   ;;  %v2664_v45 = vld [vmem:[%s3791_s1 + $0x300] ss:$16 sps:$4 sm:$0xff]  }
  0x2f   :  { %1691 = vmatpush1.bf16.msra.mxu0 %v2590_v48  ;;  %1903 = vmatpush1.bf16.msra.mxu1 %v2591_v49  ;;  %v2675_v48 = vld [vmem:[%s3791_s1 + $0x32c] ss:$16 sps:$4 sm:$0xff]   ;;  %v2670_v49 = vld [vmem:[%s3791_s1 + $0x320] ss:$16 sps:$4 sm:$0xff]  }
  0x30   :  { %1692 = vmatprep.subr.bf16.mxu0 %v2592_v51  ;;  %1904 = vmatprep.subr.bf16.mxu1 %v2594_v52  ;;  %v2678_v51 = vld [vmem:[%s3791_s1 + $0x344] ss:$16 sps:$4 sm:$0xff]   ;;  %v2681_v52 = vld [vmem:[%s3791_s1 + $0x34c] ss:$16 sps:$4 sm:$0xff]  }
  0x33   :  { %1693 = vmatpush1.bf16.msra.mxu0 %v2596_v53  ;;  %1905 = vmatpush1.bf16.msra.mxu1 %v2597_v54  ;;  %v2676_v53 = vld [vmem:[%s3791_s1 + $0x340] ss:$16 sps:$4 sm:$0xff]   ;;  %v2679_v54 = vld [vmem:[%s3791_s1 + $0x348] ss:$16 sps:$4 sm:$0xff]  }
  0x34   :  { %1694 = vmatprep.subr.bf16.mxu0 %v2598_v55  ;;  %1906 = vmatprep.subr.bf16.mxu1 %v2600_v56  ;;  %v2684_v55 = vld [vmem:[%s3791_s1 + $0x364] ss:$16 sps:$4 sm:$0xff]   ;;  %v2687_v56 = vld [vmem:[%s3791_s1 + $0x36c] ss:$16 sps:$4 sm:$0xff]  }
  0x37   :  { %1695 = vmatpush1.bf16.msra.mxu0 %v2602_v57  ;;  %1907 = vmatpush1.bf16.msra.mxu1 %v2603_v58  ;;  %v2682_v57 = vld [vmem:[%s3791_s1 + $0x360] ss:$16 sps:$4 sm:$0xff]   ;;  %v2685_v58 = vld [vmem:[%s3791_s1 + $0x368] ss:$16 sps:$4 sm:$0xff]  }
  0x38   :  { %1696 = vmatprep.subr.bf16.mxu0 %v2604_v59  ;;  %1908 = vmatprep.subr.bf16.mxu1 %v2606_v60  ;;  %v2690_v59 = vld [vmem:[%s3791_s1 + $0x384] ss:$16 sps:$4 sm:$0xff]   ;;  %v2693_v60 = vld [vmem:[%s3791_s1 + $0x38c] ss:$16 sps:$4 sm:$0xff]  }
  0x3b   :  { %1697 = vmatpush1.bf16.msra.mxu0 %v2608_v61  ;;  %1909 = vmatpush1.bf16.msra.mxu1 %v2609_v62  ;;  %v2688_v61 = vld [vmem:[%s3791_s1 + $0x380] ss:$16 sps:$4 sm:$0xff]   ;;  %v2691_v62 = vld [vmem:[%s3791_s1 + $0x388] ss:$16 sps:$4 sm:$0xff]  }
  0x3c   :  { %1698 = vmatprep.subr.bf16.mxu0 %v2610_v63  ;;  %1910 = vmatprep.subr.bf16.mxu1 %v2612_v0  ;;  %v2696_v63 = vld [vmem:[%s3791_s1 + $0x3a4] ss:$16 sps:$4 sm:$0xff]   ;;  %v2699_v0 = vld [vmem:[%s3791_s1 + $0x3ac] ss:$16 sps:$4 sm:$0xff]  }
  0x3f   :  { %1699 = vmatpush1.bf16.msra.mxu0 %v2614_v1  ;;  %1911 = vmatpush1.bf16.msra.mxu1 %v2615_v2  ;;  %v2694_v1 = vld [vmem:[%s3791_s1 + $0x3a0] ss:$16 sps:$4 sm:$0xff]   ;;  %v2697_v2 = vld [vmem:[%s3791_s1 + $0x3a8] ss:$16 sps:$4 sm:$0xff]  }
  0x40   :  { %1721 = vmatprep.subr.bf16.mxu0 %v2618_v3  ;;  %1933 = vmatprep.subr.bf16.mxu1 %v2621_v4  ;;  %v2702_v3 = vld [vmem:[%s3791_s1 + $0x3c4] ss:$16 sps:$4 sm:$0xff]   ;;  %v2705_v4 = vld [vmem:[%s3791_s1 + $0x3cc] ss:$16 sps:$4 sm:$0xff]  }
  0x42   :  { %1701 = vmatmul.mubr.bf16.vlgmr.msra.gmra.mrb[0].mxu0 %v2168_v5  ;;  %1913 = vmatmul.mubr.bf16.vlgmr.msra.gmra.mrb[0].mxu1 %v2168_v5  ;;  %v2700_v5 = vld [vmem:[%s3791_s1 + $0x3c0] ss:$16 sps:$4 sm:$0xff]  }
  0x43   :  { %1722 = vmatpush1.bf16.msra.mxu0 %v2616_v6  ;;  %1934 = vmatpush1.bf16.msra.mxu1 %v2619_v7  ;;  %v2703_v6 = vld [vmem:[%s3791_s1 + $0x3c8] ss:$16 sps:$4 sm:$0xff]   ;;  %v2708_v7 = vld [vmem:[%s3791_s1 + $0x3e4] ss:$16 sps:$4 sm:$0xff]  }
  0x44   :  { %1723 = vmatprep.subr.bf16.mxu0 %v2624_v8  ;;  %1935 = vmatprep.subr.bf16.mxu1 %v2627_v9  ;;  %v2711_v8 = vld [vmem:[%s3791_s1 + $0x3ec] ss:$16 sps:$4 sm:$0xff]   ;;  %v2706_v9 = vld [vmem:[%s3791_s1 + $0x3e0] ss:$16 sps:$4 sm:$0xff]  }
  0x45   :  { %1710 = vmatprep.mubr.bf16.mxu0 %v2177_v28  ;;  %1922 = vmatprep.mubr.bf16.mxu1 %v2177_v28  ;;  %v2724_v28 = vld [vmem:[%s3791_s1 + $0x440] ss:$16 sps:$4 sm:$0xff]  }
  0x47   :  { %1724 = vmatpush1.bf16.msra.mxu0 %v2622_v10  ;;  %1936 = vmatpush1.bf16.msra.mxu1 %v2625_v11  ;;  %v2709_v10 = vld [vmem:[%s3791_s1 + $0x3e8] ss:$16 sps:$4 sm:$0xff]   ;;  %v2714_v11 = vld [vmem:[%s3791_s1 + $0x404] ss:$16 sps:$4 sm:$0xff]  }
  0x48   :  { %1725 = vmatprep.subr.bf16.mxu0 %v2630_v12  ;;  %1937 = vmatprep.subr.bf16.mxu1 %v2633_v13  ;;  %v2717_v12 = vld [vmem:[%s3791_s1 + $0x40c] ss:$16 sps:$4 sm:$0xff]   ;;  %v2712_v13 = vld [vmem:[%s3791_s1 + $0x400] ss:$16 sps:$4 sm:$0xff]  }
  0x4a   :  { %1711 = vmatmul.mubr.bf16.gmra.mrb[4].mxu0 %v2176_v31  ;;  %1923 = vmatmul.mubr.bf16.gmra.mrb[4].mxu1 %v2176_v31  ;;  %v2735_v31 = vld [vmem:[%s3791_s1 + $0x46c] ss:$16 sps:$4 sm:$0xff]  }
  0x4b   :  { %1726 = vmatpush1.bf16.msra.mxu0 %v2628_v14  ;;  %1938 = vmatpush1.bf16.msra.mxu1 %v2631_v15  ;;  %v2715_v14 = vld [vmem:[%s3791_s1 + $0x408] ss:$16 sps:$4 sm:$0xff]   ;;  %v2170_v15 = vcombine.low %v3209_v34, %v3214_v35  ;;  %v2738_v35 = vld [vmem:[%s3791_s1 + $0x484] ss:$16 sps:$4 sm:$0xff]  }
  0x4c   :  { %1727 = vmatprep.subr.bf16.mxu0 %v2636_v16  ;;  %1939 = vmatprep.subr.bf16.mxu1 %v2639_v17  ;;  %v23_v16 = vld [vmem:[%s3792_s0 + $0x48] sm:$0xff] }
  0x4d   :  { %1753 = vmatprep.mubr.bf16.mxu0 %v2171_v38  ;;  %1965 = vmatprep.mubr.bf16.mxu1 %v2171_v38  ;;  %v27_v17 = vld [vmem:[%s3792_s0 + $0x68] sm:$0xff] }
  0x4e   :  { %v2178_v26 = vcombine.low %v23_v16, %v27_v17  ;;  %v2733_v34 = vld [vmem:[%s3791_s1 + $0x468] ss:$16 sps:$4 sm:$0xff]  }
  0x4f   :  { %1728 = vmatpush1.bf16.msra.mxu0 %v2634_v18  ;;  %1940 = vmatpush1.bf16.msra.mxu1 %v2637_v19  ;;  %v2720_v18 = vld [vmem:[%s3791_s1 + $0x424] ss:$16 sps:$4 sm:$0xff]   ;;  %v2723_v19 = vld [vmem:[%s3791_s1 + $0x42c] ss:$16 sps:$4 sm:$0xff]   ;;  %v2739_v38 = vld [vmem:[%s3791_s1 + $0x488] ss:$16 sps:$4 sm:$0xff]  }
  0x50   :  { %1729 = vmatprep.subr.bf16.mxu0 %v2642_v20  ;;  %1941 = vmatprep.subr.bf16.mxu1 %v2645_v21  ;;  %v2179_v20 = vcombine.high %v23_v16, %v27_v17  ;;  %v2718_v21 = vld [vmem:[%s3791_s1 + $0x420] ss:$16 sps:$4 sm:$0xff]   ;;  %v2807_v16 = vld [vmem:[%s3791_s1 + $0x5ec] ss:$16 sps:$4 sm:$0xff]  }
  0x51   :  { %v2802_v17 = vld [vmem:[%s3791_s1 + $0x5e0] ss:$16 sps:$4 sm:$0xff]  }
  0x53   :  { %1730 = vmatpush1.bf16.msra.mxu0 %v2640_v22  ;;  %1942 = vmatpush1.bf16.msra.mxu1 %v2643_v23  ;;  %v2721_v22 = vld [vmem:[%s3791_s1 + $0x428] ss:$16 sps:$4 sm:$0xff]   ;;  %v2726_v23 = vld [vmem:[%s3791_s1 + $0x444] ss:$16 sps:$4 sm:$0xff]  }
  0x54   :  { %1731 = vmatprep.subr.bf16.mxu0 %v2648_v24  ;;  %1943 = vmatprep.subr.bf16.mxu1 %v2651_v25  ;;  %v2729_v24 = vld [vmem:[%s3791_s1 + $0x44c] ss:$16 sps:$4 sm:$0xff]   ;;  %v3373_v25 = vld [vmem:[%s3792_s0 + $0x10] sm:$0xff] }
  0x57   :  { %1732 = vmatpush1.bf16.msra.mxu0 %v2646_v29  ;;  %1944 = vmatpush1.bf16.msra.mxu1 %v2649_v30  ;;  %v2727_v29 = vld [vmem:[%s3791_s1 + $0x448] ss:$16 sps:$4 sm:$0xff]   ;;  %v2732_v30 = vld [vmem:[%s3791_s1 + $0x464] ss:$16 sps:$4 sm:$0xff]  }
  0x58   :  { %1733 = vmatprep.subr.bf16.mxu0 %v2654_v32  ;;  %1945 = vmatprep.subr.bf16.mxu1 %v2657_v33  ;;  %v2173_v32 = vcombine.high %v3373_v25, %v3378_v27  ;;  %v2730_v33 = vld [vmem:[%s3791_s1 + $0x460] ss:$16 sps:$4 sm:$0xff]  }
  0x5b   :  { %1734 = vmatpush1.bf16.msra.mxu0 %v2652_v36  ;;  %1946 = vmatpush1.bf16.msra.mxu1 %v2655_v37  ;;  %v2741_v36 = vld [vmem:[%s3791_s1 + $0x48c] ss:$16 sps:$4 sm:$0xff]   ;;  %v2736_v37 = vld [vmem:[%s3791_s1 + $0x480] ss:$16 sps:$4 sm:$0xff]  }
  0x5c   :  { %1735 = vmatprep.subr.bf16.mxu0 %v2660_v39  ;;  %1947 = vmatprep.subr.bf16.mxu1 %v2663_v40  ;;  %v2744_v39 = vld [vmem:[%s3791_s1 + $0x4a4] ss:$16 sps:$4 sm:$0xff]   ;;  %v2747_v40 = vld [vmem:[%s3791_s1 + $0x4ac] ss:$16 sps:$4 sm:$0xff]  }
  0x5f   :  { %1736 = vmatpush1.bf16.msra.mxu0 %v2658_v41  ;;  %1948 = vmatpush1.bf16.msra.mxu1 %v2661_v42  ;;  %v2742_v41 = vld [vmem:[%s3791_s1 + $0x4a0] ss:$16 sps:$4 sm:$0xff]   ;;  %v2745_v42 = vld [vmem:[%s3791_s1 + $0x4a8] ss:$16 sps:$4 sm:$0xff]  }
  0x60   :  { %1737 = vmatprep.subr.bf16.mxu0 %v2666_v43  ;;  %1949 = vmatprep.subr.bf16.mxu1 %v2669_v44  ;;  %v2750_v43 = vld [vmem:[%s3791_s1 + $0x4c4] ss:$16 sps:$4 sm:$0xff]   ;;  %v2753_v44 = vld [vmem:[%s3791_s1 + $0x4cc] ss:$16 sps:$4 sm:$0xff]  }
  0x63   :  { %1738 = vmatpush1.bf16.msra.mxu0 %v2664_v45  ;;  %1950 = vmatpush1.bf16.msra.mxu1 %v2667_v46  ;;  %v2748_v45 = vld [vmem:[%s3791_s1 + $0x4c0] ss:$16 sps:$4 sm:$0xff]   ;;  %v2751_v46 = vld [vmem:[%s3791_s1 + $0x4c8] ss:$16 sps:$4 sm:$0xff]  }
  0x64   :  { %1739 = vmatprep.subr.bf16.mxu0 %v2672_v47  ;;  %1951 = vmatprep.subr.bf16.mxu1 %v2675_v48  ;;  %v2756_v47 = vld [vmem:[%s3791_s1 + $0x4e4] ss:$16 sps:$4 sm:$0xff]   ;;  %v2759_v48 = vld [vmem:[%s3791_s1 + $0x4ec] ss:$16 sps:$4 sm:$0xff]  }
  0x67   :  { %1740 = vmatpush1.bf16.msra.mxu0 %v2670_v49  ;;  %1952 = vmatpush1.bf16.msra.mxu1 %v2673_v50  ;;  %v2754_v49 = vld [vmem:[%s3791_s1 + $0x4e0] ss:$16 sps:$4 sm:$0xff]   ;;  %v2757_v50 = vld [vmem:[%s3791_s1 + $0x4e8] ss:$16 sps:$4 sm:$0xff]  }
  0x68   :  { %1741 = vmatprep.subr.bf16.mxu0 %v2678_v51  ;;  %1953 = vmatprep.subr.bf16.mxu1 %v2681_v52  ;;  %v2762_v51 = vld [vmem:[%s3791_s1 + $0x504] ss:$16 sps:$4 sm:$0xff]   ;;  %v2765_v52 = vld [vmem:[%s3791_s1 + $0x50c] ss:$16 sps:$4 sm:$0xff]  }
  0x6b   :  { %1742 = vmatpush1.bf16.msra.mxu0 %v2676_v53  ;;  %1954 = vmatpush1.bf16.msra.mxu1 %v2679_v54  ;;  %v2760_v53 = vld [vmem:[%s3791_s1 + $0x500] ss:$16 sps:$4 sm:$0xff]   ;;  %v2763_v54 = vld [vmem:[%s3791_s1 + $0x508] ss:$16 sps:$4 sm:$0xff]  }
  0x6c   :  { %1743 = vmatprep.subr.bf16.mxu0 %v2684_v55  ;;  %1955 = vmatprep.subr.bf16.mxu1 %v2687_v56  ;;  %v2768_v55 = vld [vmem:[%s3791_s1 + $0x524] ss:$16 sps:$4 sm:$0xff]   ;;  %v2771_v56 = vld [vmem:[%s3791_s1 + $0x52c] ss:$16 sps:$4 sm:$0xff]  }
  0x6f   :  { %1744 = vmatpush1.bf16.msra.mxu0 %v2682_v57  ;;  %1956 = vmatpush1.bf16.msra.mxu1 %v2685_v58  ;;  %v2766_v57 = vld [vmem:[%s3791_s1 + $0x520] ss:$16 sps:$4 sm:$0xff]   ;;  %v2769_v58 = vld [vmem:[%s3791_s1 + $0x528] ss:$16 sps:$4 sm:$0xff]  }
  0x70   :  { %1745 = vmatprep.subr.bf16.mxu0 %v2690_v59  ;;  %1957 = vmatprep.subr.bf16.mxu1 %v2693_v60  ;;  %v2774_v59 = vld [vmem:[%s3791_s1 + $0x544] ss:$16 sps:$4 sm:$0xff]   ;;  %v2777_v60 = vld [vmem:[%s3791_s1 + $0x54c] ss:$16 sps:$4 sm:$0xff]  }
  0x73   :  { %1746 = vmatpush1.bf16.msra.mxu0 %v2688_v61  ;;  %1958 = vmatpush1.bf16.msra.mxu1 %v2691_v62  ;;  %v2772_v61 = vld [vmem:[%s3791_s1 + $0x540] ss:$16 sps:$4 sm:$0xff]   ;;  %v2775_v62 = vld [vmem:[%s3791_s1 + $0x548] ss:$16 sps:$4 sm:$0xff]  }
  0x74   :  { %1747 = vmatprep.subr.bf16.mxu0 %v2696_v63  ;;  %1959 = vmatprep.subr.bf16.mxu1 %v2699_v0  ;;  %v2780_v63 = vld [vmem:[%s3791_s1 + $0x564] ss:$16 sps:$4 sm:$0xff]   ;;  %v2783_v0 = vld [vmem:[%s3791_s1 + $0x56c] ss:$16 sps:$4 sm:$0xff]  }
  0x77   :  { %1748 = vmatpush1.bf16.msra.mxu0 %v2694_v1  ;;  %1960 = vmatpush1.bf16.msra.mxu1 %v2697_v2  ;;  %v2778_v1 = vld [vmem:[%s3791_s1 + $0x560] ss:$16 sps:$4 sm:$0xff]   ;;  %v2781_v2 = vld [vmem:[%s3791_s1 + $0x568] ss:$16 sps:$4 sm:$0xff]  }
  0x78   :  { %1749 = vmatprep.subr.bf16.mxu0 %v2702_v3  ;;  %1961 = vmatprep.subr.bf16.mxu1 %v2705_v4  ;;  %v2786_v3 = vld [vmem:[%s3791_s1 + $0x584] ss:$16 sps:$4 sm:$0xff]   ;;  %v2789_v4 = vld [vmem:[%s3791_s1 + $0x58c] ss:$16 sps:$4 sm:$0xff]  }
  0x7b   :  { %1750 = vmatpush1.bf16.msra.mxu0 %v2700_v5  ;;  %1962 = vmatpush1.bf16.msra.mxu1 %v2703_v6  ;;  %v2784_v5 = vld [vmem:[%s3791_s1 + $0x580] ss:$16 sps:$4 sm:$0xff]   ;;  %v2787_v6 = vld [vmem:[%s3791_s1 + $0x588] ss:$16 sps:$4 sm:$0xff]  }
  0x7c   :  { %1751 = vmatprep.subr.bf16.mxu0 %v2708_v7  ;;  %1963 = vmatprep.subr.bf16.mxu1 %v2711_v8  ;;  %v2792_v7 = vld [vmem:[%s3791_s1 + $0x5a4] ss:$16 sps:$4 sm:$0xff]   ;;  %v2795_v8 = vld [vmem:[%s3791_s1 + $0x5ac] ss:$16 sps:$4 sm:$0xff]  }
  0x7f   :  { %1752 = vmatpush1.bf16.msra.mxu0 %v2706_v9  ;;  %1964 = vmatpush1.bf16.msra.mxu1 %v2709_v10  ;;  %v2790_v9 = vld [vmem:[%s3791_s1 + $0x5a0] ss:$16 sps:$4 sm:$0xff]   ;;  %v2793_v10 = vld [vmem:[%s3791_s1 + $0x5a8] ss:$16 sps:$4 sm:$0xff]  }
  0x80   :  { %1774 = vmatprep.subr.bf16.mxu0 %v2714_v11  ;;  %1986 = vmatprep.subr.bf16.mxu1 %v2717_v12  ;;  %v2798_v11 = vld [vmem:[%s3791_s1 + $0x5c4] ss:$16 sps:$4 sm:$0xff]   ;;  %v2801_v12 = vld [vmem:[%s3791_s1 + $0x5cc] ss:$16 sps:$4 sm:$0xff]  }
  0x82   :  { %1754 = vmatmul.mubr.bf16.vlgmr.msra.gmra.mrb[0].mxu0 %v2170_v15  ;;  %1966 = vmatmul.mubr.bf16.vlgmr.msra.gmra.mrb[0].mxu1 %v2170_v15  ;;  %v2804_v15 = vld [vmem:[%s3791_s1 + $0x5e4] ss:$16 sps:$4 sm:$0xff]  }
  0x83   :  { %1775 = vmatpush1.bf16.msra.mxu0 %v2712_v13  ;;  %1987 = vmatpush1.bf16.msra.mxu1 %v2715_v14  ;;  %v2796_v13 = vld [vmem:[%s3791_s1 + $0x5c0] ss:$16 sps:$4 sm:$0xff]   ;;  %v2799_v14 = vld [vmem:[%s3791_s1 + $0x5c8] ss:$16 sps:$4 sm:$0xff]  }
  0x84   :  { %1776 = vmatprep.subr.bf16.mxu0 %v2720_v18  ;;  %1988 = vmatprep.subr.bf16.mxu1 %v2723_v19  ;;  %v2805_v18 = vld [vmem:[%s3791_s1 + $0x5e8] ss:$16 sps:$4 sm:$0xff]   ;;  %v2810_v19 = vld [vmem:[%s3791_s1 + $0x604] ss:$16 sps:$4 sm:$0xff]  }
  0x85   :  { %1763 = vmatprep.mubr.bf16.mxu0 %v2179_v20  ;;  %1975 = vmatprep.mubr.bf16.mxu1 %v2179_v20  ;;  %v2813_v20 = vld [vmem:[%s3791_s1 + $0x60c] ss:$16 sps:$4 sm:$0xff]  }
  0x87   :  { %1777 = vmatpush1.bf16.msra.mxu0 %v2718_v21  ;;  %1989 = vmatpush1.bf16.msra.mxu1 %v2721_v22  ;;  %v2172_v21 = vcombine.low %v3373_v25, %v3378_v27  ;;  %v24_v22 = vld [vmem:[%s3792_s0 + $0x50] sm:$0xff]  ;;  %v2819_v27 = vld [vmem:[%s3791_s1 + $0x62c] ss:$16 sps:$4 sm:$0xff]  }
  0x88   :  { %1778 = vmatprep.subr.bf16.mxu0 %v2726_v23  ;;  %1990 = vmatprep.subr.bf16.mxu1 %v2729_v24  ;;  %v28_v23 = vld [vmem:[%s3792_s0 + $0x70] sm:$0xff] }
  0x89   :  { %v2808_v24 = vld [vmem:[%s3791_s1 + $0x600] ss:$16 sps:$4 sm:$0xff]   ;;  %v2816_v25 = vld [vmem:[%s3791_s1 + $0x624] ss:$16 sps:$4 sm:$0xff]  }
  0x8a   :  { %1764 = vmatmul.mubr.bf16.gmra.mrb[4].mxu0 %v2178_v26  ;;  %1976 = vmatmul.mubr.bf16.gmra.mrb[4].mxu1 %v2178_v26  ;;  %v2811_v26 = vld [vmem:[%s3791_s1 + $0x608] ss:$16 sps:$4 sm:$0xff]  }
  0x8b   :  { %1779 = vmatpush1.bf16.msra.mxu0 %v2724_v28  ;;  %1991 = vmatpush1.bf16.msra.mxu1 %v2727_v29  ;;  %v2181_v28 = vcombine.high %v24_v22, %v28_v23  ;;  %v2814_v29 = vld [vmem:[%s3791_s1 + $0x620] ss:$16 sps:$4 sm:$0xff]  }
  0x8c   :  { %1780 = vmatprep.subr.bf16.mxu0 %v2732_v30  ;;  %1992 = vmatprep.subr.bf16.mxu1 %v2735_v31  ;;  %v2817_v30 = vld [vmem:[%s3791_s1 + $0x628] ss:$16 sps:$4 sm:$0xff]   ;;  %v2822_v31 = vld [vmem:[%s3791_s1 + $0x644] ss:$16 sps:$4 sm:$0xff]  }
  0x8d   :  { %1806 = vmatprep.mubr.bf16.mxu0 %v2173_v32  ;;  %2018 = vmatprep.mubr.bf16.mxu1 %v2173_v32  ;;  %v2825_v32 = vld [vmem:[%s3791_s1 + $0x64c] ss:$16 sps:$4 sm:$0xff]  }
  0x8f   :  { %1781 = vmatpush1.bf16.msra.mxu0 %v2730_v33  ;;  %1993 = vmatpush1.bf16.msra.mxu1 %v2733_v34  ;;  %v2180_v33 = vcombine.low %v24_v22, %v28_v23  ;;  %v3585_v34 = vld [vmem:[%s3792_s0 + $0x18] sm:$0xff]  ;;  %v2900_v23 = vld [vmem:[%s3791_s1 + $0x7e4] ss:$16 sps:$4 sm:$0xff]  }
  0x90   :  { %1782 = vmatprep.subr.bf16.mxu0 %v2738_v35  ;;  %1994 = vmatprep.subr.bf16.mxu1 %v2741_v36  ;;  %v3590_v35 = vld [vmem:[%s3792_s0 + $0x38] sm:$0xff]  ;;  %v2820_v36 = vld [vmem:[%s3791_s1 + $0x640] ss:$16 sps:$4 sm:$0xff]  }
  0x91   :  { %v2895_v22 = vld [vmem:[%s3791_s1 + $0x7c8] ss:$16 sps:$4 sm:$0xff]  }
  0x93   :  { %1783 = vmatpush1.bf16.msra.mxu0 %v2736_v37  ;;  %1995 = vmatpush1.bf16.msra.mxu1 %v2739_v38  ;;  %v2823_v37 = vld [vmem:[%s3791_s1 + $0x648] ss:$16 sps:$4 sm:$0xff]   ;;  %v2828_v38 = vld [vmem:[%s3791_s1 + $0x664] ss:$16 sps:$4 sm:$0xff]  }
  0x94   :  { %1784 = vmatprep.subr.bf16.mxu0 %v2744_v39  ;;  %1996 = vmatprep.subr.bf16.mxu1 %v2747_v40  ;;  %v2831_v39 = vld [vmem:[%s3791_s1 + $0x66c] ss:$16 sps:$4 sm:$0xff]   ;;  %v2175_v40 = vcombine.high %v3585_v34, %v3590_v35 }
  0x97   :  { %1785 = vmatpush1.bf16.msra.mxu0 %v2742_v41  ;;  %1997 = vmatpush1.bf16.msra.mxu1 %v2745_v42  ;;  %v2826_v41 = vld [vmem:[%s3791_s1 + $0x660] ss:$16 sps:$4 sm:$0xff]   ;;  %v2829_v42 = vld [vmem:[%s3791_s1 + $0x668] ss:$16 sps:$4 sm:$0xff]  }
  0x98   :  { %1786 = vmatprep.subr.bf16.mxu0 %v2750_v43  ;;  %1998 = vmatprep.subr.bf16.mxu1 %v2753_v44  ;;  %v2834_v43 = vld [vmem:[%s3791_s1 + $0x684] ss:$16 sps:$4 sm:$0xff]   ;;  %v2837_v44 = vld [vmem:[%s3791_s1 + $0x68c] ss:$16 sps:$4 sm:$0xff]  }
  0x9b   :  { %1787 = vmatpush1.bf16.msra.mxu0 %v2748_v45  ;;  %1999 = vmatpush1.bf16.msra.mxu1 %v2751_v46  ;;  %v2832_v45 = vld [vmem:[%s3791_s1 + $0x680] ss:$16 sps:$4 sm:$0xff]   ;;  %v2835_v46 = vld [vmem:[%s3791_s1 + $0x688] ss:$16 sps:$4 sm:$0xff]  }
  0x9c   :  { %1788 = vmatprep.subr.bf16.mxu0 %v2756_v47  ;;  %2000 = vmatprep.subr.bf16.mxu1 %v2759_v48  ;;  %v2840_v47 = vld [vmem:[%s3791_s1 + $0x6a4] ss:$16 sps:$4 sm:$0xff]   ;;  %v2843_v48 = vld [vmem:[%s3791_s1 + $0x6ac] ss:$16 sps:$4 sm:$0xff]  }
  0x9f   :  { %1789 = vmatpush1.bf16.msra.mxu0 %v2754_v49  ;;  %2001 = vmatpush1.bf16.msra.mxu1 %v2757_v50  ;;  %v2838_v49 = vld [vmem:[%s3791_s1 + $0x6a0] ss:$16 sps:$4 sm:$0xff]   ;;  %v2841_v50 = vld [vmem:[%s3791_s1 + $0x6a8] ss:$16 sps:$4 sm:$0xff]  }
  0xa0   :  { %1790 = vmatprep.subr.bf16.mxu0 %v2762_v51  ;;  %2002 = vmatprep.subr.bf16.mxu1 %v2765_v52  ;;  %v2846_v51 = vld [vmem:[%s3791_s1 + $0x6c4] ss:$16 sps:$4 sm:$0xff]   ;;  %v2849_v52 = vld [vmem:[%s3791_s1 + $0x6cc] ss:$16 sps:$4 sm:$0xff]  }
  0xa3   :  { %1791 = vmatpush1.bf16.msra.mxu0 %v2760_v53  ;;  %2003 = vmatpush1.bf16.msra.mxu1 %v2763_v54  ;;  %v2844_v53 = vld [vmem:[%s3791_s1 + $0x6c0] ss:$16 sps:$4 sm:$0xff]   ;;  %v2847_v54 = vld [vmem:[%s3791_s1 + $0x6c8] ss:$16 sps:$4 sm:$0xff]  }
  0xa4   :  { %1792 = vmatprep.subr.bf16.mxu0 %v2768_v55  ;;  %2004 = vmatprep.subr.bf16.mxu1 %v2771_v56  ;;  %v2852_v55 = vld [vmem:[%s3791_s1 + $0x6e4] ss:$16 sps:$4 sm:$0xff]   ;;  %v2855_v56 = vld [vmem:[%s3791_s1 + $0x6ec] ss:$16 sps:$4 sm:$0xff]  }
  0xa7   :  { %1793 = vmatpush1.bf16.msra.mxu0 %v2766_v57  ;;  %2005 = vmatpush1.bf16.msra.mxu1 %v2769_v58  ;;  %v2850_v57 = vld [vmem:[%s3791_s1 + $0x6e0] ss:$16 sps:$4 sm:$0xff]   ;;  %v2853_v58 = vld [vmem:[%s3791_s1 + $0x6e8] ss:$16 sps:$4 sm:$0xff]  }
  0xa8   :  { %1794 = vmatprep.subr.bf16.mxu0 %v2774_v59  ;;  %2006 = vmatprep.subr.bf16.mxu1 %v2777_v60  ;;  %v2858_v59 = vld [vmem:[%s3791_s1 + $0x704] ss:$16 sps:$4 sm:$0xff]   ;;  %v2861_v60 = vld [vmem:[%s3791_s1 + $0x70c] ss:$16 sps:$4 sm:$0xff]  }
  0xab   :  { %1795 = vmatpush1.bf16.msra.mxu0 %v2772_v61  ;;  %2007 = vmatpush1.bf16.msra.mxu1 %v2775_v62  ;;  %v2856_v61 = vld [vmem:[%s3791_s1 + $0x700] ss:$16 sps:$4 sm:$0xff]   ;;  %v2859_v62 = vld [vmem:[%s3791_s1 + $0x708] ss:$16 sps:$4 sm:$0xff]  }
  0xac   :  { %1796 = vmatprep.subr.bf16.mxu0 %v2780_v63  ;;  %2008 = vmatprep.subr.bf16.mxu1 %v2783_v0  ;;  %v2864_v63 = vld [vmem:[%s3791_s1 + $0x724] ss:$16 sps:$4 sm:$0xff]   ;;  %v2867_v0 = vld [vmem:[%s3791_s1 + $0x72c] ss:$16 sps:$4 sm:$0xff]  }
  0xaf   :  { %1797 = vmatpush1.bf16.msra.mxu0 %v2778_v1  ;;  %2009 = vmatpush1.bf16.msra.mxu1 %v2781_v2  ;;  %v2862_v1 = vld [vmem:[%s3791_s1 + $0x720] ss:$16 sps:$4 sm:$0xff]   ;;  %v2865_v2 = vld [vmem:[%s3791_s1 + $0x728] ss:$16 sps:$4 sm:$0xff]  }
  0xb0   :  { %1798 = vmatprep.subr.bf16.mxu0 %v2786_v3  ;;  %2010 = vmatprep.subr.bf16.mxu1 %v2789_v4  ;;  %v2870_v3 = vld [vmem:[%s3791_s1 + $0x744] ss:$16 sps:$4 sm:$0xff]   ;;  %v2873_v4 = vld [vmem:[%s3791_s1 + $0x74c] ss:$16 sps:$4 sm:$0xff]  }
  0xb3   :  { %1799 = vmatpush1.bf16.msra.mxu0 %v2784_v5  ;;  %2011 = vmatpush1.bf16.msra.mxu1 %v2787_v6  ;;  %v2868_v5 = vld [vmem:[%s3791_s1 + $0x740] ss:$16 sps:$4 sm:$0xff]   ;;  %v2871_v6 = vld [vmem:[%s3791_s1 + $0x748] ss:$16 sps:$4 sm:$0xff]  }
  0xb4   :  { %1800 = vmatprep.subr.bf16.mxu0 %v2792_v7  ;;  %2012 = vmatprep.subr.bf16.mxu1 %v2795_v8  ;;  %v2876_v7 = vld [vmem:[%s3791_s1 + $0x764] ss:$16 sps:$4 sm:$0xff]   ;;  %v2879_v8 = vld [vmem:[%s3791_s1 + $0x76c] ss:$16 sps:$4 sm:$0xff]  }
  0xb7   :  { %1801 = vmatpush1.bf16.msra.mxu0 %v2790_v9  ;;  %2013 = vmatpush1.bf16.msra.mxu1 %v2793_v10  ;;  %v2874_v9 = vld [vmem:[%s3791_s1 + $0x760] ss:$16 sps:$4 sm:$0xff]   ;;  %v2877_v10 = vld [vmem:[%s3791_s1 + $0x768] ss:$16 sps:$4 sm:$0xff]  }
  0xb8   :  { %1802 = vmatprep.subr.bf16.mxu0 %v2798_v11  ;;  %2014 = vmatprep.subr.bf16.mxu1 %v2801_v12  ;;  %v2882_v11 = vld [vmem:[%s3791_s1 + $0x784] ss:$16 sps:$4 sm:$0xff]   ;;  %v2885_v12 = vld [vmem:[%s3791_s1 + $0x78c] ss:$16 sps:$4 sm:$0xff]  }
  0xbb   :  { %1803 = vmatpush1.bf16.msra.mxu0 %v2796_v13  ;;  %2015 = vmatpush1.bf16.msra.mxu1 %v2799_v14  ;;  %v2880_v13 = vld [vmem:[%s3791_s1 + $0x780] ss:$16 sps:$4 sm:$0xff]   ;;  %v2883_v14 = vld [vmem:[%s3791_s1 + $0x788] ss:$16 sps:$4 sm:$0xff]  }
  0xbc   :  { %1804 = vmatprep.subr.bf16.mxu0 %v2804_v15  ;;  %2016 = vmatprep.subr.bf16.mxu1 %v2807_v16  ;;  %v2888_v15 = vld [vmem:[%s3791_s1 + $0x7a4] ss:$16 sps:$4 sm:$0xff]   ;;  %v2891_v16 = vld [vmem:[%s3791_s1 + $0x7ac] ss:$16 sps:$4 sm:$0xff]  }
  0xbf   :  { %1805 = vmatpush1.bf16.msra.mxu0 %v2802_v17  ;;  %2017 = vmatpush1.bf16.msra.mxu1 %v2805_v18  ;;  %v2886_v17 = vld [vmem:[%s3791_s1 + $0x7a0] ss:$16 sps:$4 sm:$0xff]   ;;  %v2889_v18 = vld [vmem:[%s3791_s1 + $0x7a8] ss:$16 sps:$4 sm:$0xff]  }
  0xc0   :  { %1827 = vmatprep.subr.bf16.mxu0 %v2810_v19  ;;  %2039 = vmatprep.subr.bf16.mxu1 %v2813_v20  ;;  %v2894_v19 = vld [vmem:[%s3791_s1 + $0x7c4] ss:$16 sps:$4 sm:$0xff]   ;;  %v2897_v20 = vld [vmem:[%s3791_s1 + $0x7cc] ss:$16 sps:$4 sm:$0xff]  }
  0xc2   :  { %1807 = vmatmul.mubr.bf16.vlgmr.msra.gmra.mrb[0].mxu0 %v2172_v21  ;;  %2019 = vmatmul.mubr.bf16.vlgmr.msra.gmra.mrb[0].mxu1 %v2172_v21  ;;  %v2892_v21 = vld [vmem:[%s3791_s1 + $0x7c0] ss:$16 sps:$4 sm:$0xff]  }
  0xc3   :  { %1828 = vmatpush1.bf16.msra.mxu0 %v2808_v24  ;;  %2040 = vmatpush1.bf16.msra.mxu1 %v2811_v26  ;;  %v2903_v24 = vld [vmem:[%s3791_s1 + $0x7ec] ss:$16 sps:$4 sm:$0xff]   ;;  %v2898_v26 = vld [vmem:[%s3791_s1 + $0x7e0] ss:$16 sps:$4 sm:$0xff]  }
  0xc4   :  { %1829 = vmatprep.subr.bf16.mxu0 %v2816_v25  ;;  %2041 = vmatprep.subr.bf16.mxu1 %v2819_v27  ;;  %v2901_v25 = vld [vmem:[%s3791_s1 + $0x7e8] ss:$16 sps:$4 sm:$0xff]  }
  0xc5   :  { %1816 = vmatprep.mubr.bf16.mxu0 %v2181_v28  ;;  %2028 = vmatprep.mubr.bf16.mxu1 %v2181_v28  ;;  %v25_v27 = vld [vmem:[%s3792_s0 + $0x58] sm:$0xff] }
  0xc6   :  { %v29_v28 = vld [vmem:[%s3792_s0 + $0x78] sm:$0xff] }
  0xc7   :  { %1830 = vmatpush1.bf16.msra.mxu0 %v2814_v29  ;;  %2042 = vmatpush1.bf16.msra.mxu1 %v2817_v30  ;;  %v2174_v29 = vcombine.low %v3585_v34, %v3590_v35  ;;  %v2183_v30 = vcombine.high %v25_v27, %v29_v28 }
  0xc8   :  { %1831 = vmatprep.subr.bf16.mxu0 %v2822_v31  ;;  %2043 = vmatprep.subr.bf16.mxu1 %v2825_v32  ;;  %v2182_v31 = vcombine.low %v25_v27, %v29_v28  ;;  %v288_v32 = vlaneseq }
  0xca   :  { %1817 = vmatmul.mubr.bf16.gmra.mrb[4].mxu0 %v2180_v33  ;;  %2029 = vmatmul.mubr.bf16.gmra.mrb[4].mxu1 %v2180_v33  ;;  %v289_v33 = vshrl.u32 %v288_v32, 7 }
  0xcb   :  { %1832 = vmatpush1.bf16.msra.mxu0 %v2820_v36  ;;  %2044 = vmatpush1.bf16.msra.mxu1 %v2823_v37 }
  0xcc   :  { %1833 = vmatprep.subr.bf16.mxu0 %v2828_v38  ;;  %2045 = vmatprep.subr.bf16.mxu1 %v2831_v39  ;;  %v290_v36 = vsub.s32 0, %v289_v33  ;;  %v298_v37 = vsub.s32 2, %v289_v33  ;;  %v286_v38 = vld [vmem:[%s3793_s2] sm:$0xf]  ;;  %v294_v39 = vsub.s32 1, %v289_v33  ;;  %v302_v34 = vsub.s32 3, %v289_v33 }
  0xcd   :  { %1859 = vmatprep.mubr.bf16.mxu0 %v2175_v40  ;;  %2071 = vmatprep.mubr.bf16.mxu1 %v2175_v40 }
  0xce   :  { %v291_v35 = vrot.slane %v286_v38, %v290_v36  ;;  %v299_v40 = vrot.slane %v286_v38, %v298_v37 }
  0xcf   :  { %1834 = vmatpush1.bf16.msra.mxu0 %v2826_v41  ;;  %2046 = vmatpush1.bf16.msra.mxu1 %v2829_v42  ;;  %v295_v41 = vrot.slane %v286_v38, %v294_v39  ;;  %v303_v42 = vrot.slane %v286_v38, %v302_v34 }
  0xd0   :  { %1835 = vmatprep.subr.bf16.mxu0 %v2834_v43  ;;  %2047 = vmatprep.subr.bf16.mxu1 %v2837_v44 }
  0xd3   :  { %1836 = vmatpush1.bf16.msra.mxu0 %v2832_v45  ;;  %2048 = vmatpush1.bf16.msra.mxu1 %v2835_v46 }
  0xd4   :  { %1837 = vmatprep.subr.bf16.mxu0 %v2840_v47  ;;  %2049 = vmatprep.subr.bf16.mxu1 %v2843_v48 }
  0xd7   :  { %1838 = vmatpush1.bf16.msra.mxu0 %v2838_v49  ;;  %2050 = vmatpush1.bf16.msra.mxu1 %v2841_v50 }
  0xd8   :  { %1839 = vmatprep.subr.bf16.mxu0 %v2846_v51  ;;  %2051 = vmatprep.subr.bf16.mxu1 %v2849_v52 }
  0xdb   :  { %1840 = vmatpush1.bf16.msra.mxu0 %v2844_v53  ;;  %2052 = vmatpush1.bf16.msra.mxu1 %v2847_v54 }
  0xdc   :  { %1841 = vmatprep.subr.bf16.mxu0 %v2852_v55  ;;  %2053 = vmatprep.subr.bf16.mxu1 %v2855_v56 }
  0xdf   :  { %1842 = vmatpush1.bf16.msra.mxu0 %v2850_v57  ;;  %2054 = vmatpush1.bf16.msra.mxu1 %v2853_v58 }
  0xe0   :  { %1843 = vmatprep.subr.bf16.mxu0 %v2858_v59  ;;  %2055 = vmatprep.subr.bf16.mxu1 %v2861_v60 }
  0xe3   :  { %1844 = vmatpush1.bf16.msra.mxu0 %v2856_v61  ;;  %2056 = vmatpush1.bf16.msra.mxu1 %v2859_v62 }
  0xe4   :  { %1845 = vmatprep.subr.bf16.mxu0 %v2864_v63  ;;  %2057 = vmatprep.subr.bf16.mxu1 %v2867_v0 }
  0xe7   :  { %1846 = vmatpush1.bf16.msra.mxu0 %v2862_v1  ;;  %2058 = vmatpush1.bf16.msra.mxu1 %v2865_v2 }
  0xe8   :  { %1847 = vmatprep.subr.bf16.mxu0 %v2870_v3  ;;  %2059 = vmatprep.subr.bf16.mxu1 %v2873_v4 }
  0xeb   :  { %1848 = vmatpush1.bf16.msra.mxu0 %v2868_v5  ;;  %2060 = vmatpush1.bf16.msra.mxu1 %v2871_v6 }
  0xec   :  { %1849 = vmatprep.subr.bf16.mxu0 %v2876_v7  ;;  %2061 = vmatprep.subr.bf16.mxu1 %v2879_v8 }
  0xef   :  { %1850 = vmatpush1.bf16.msra.mxu0 %v2874_v9  ;;  %2062 = vmatpush1.bf16.msra.mxu1 %v2877_v10 }
  0xf0   :  { %1851 = vmatprep.subr.bf16.mxu0 %v2882_v11  ;;  %2063 = vmatprep.subr.bf16.mxu1 %v2885_v12 }
  0xf3   :  { %1852 = vmatpush1.bf16.msra.mxu0 %v2880_v13  ;;  %2064 = vmatpush1.bf16.msra.mxu1 %v2883_v14 }
  0xf4   :  { %1853 = vmatprep.subr.bf16.mxu0 %v2888_v15  ;;  %2065 = vmatprep.subr.bf16.mxu1 %v2891_v16 }
  0xf7   :  { %1854 = vmatpush1.bf16.msra.mxu0 %v2886_v17  ;;  %2066 = vmatpush1.bf16.msra.mxu1 %v2889_v18 }
  0xf8   :  { %1855 = vmatprep.subr.bf16.mxu0 %v2894_v19  ;;  %2067 = vmatprep.subr.bf16.mxu1 %v2897_v20 }
  0xfb   :  { %1856 = vmatpush1.bf16.msra.mxu0 %v2892_v21  ;;  %2068 = vmatpush1.bf16.msra.mxu1 %v2895_v22 }
  0xfc   :  { %1857 = vmatprep.subr.bf16.mxu0 %v2900_v23  ;;  %2069 = vmatprep.subr.bf16.mxu1 %v2903_v24 }
  0xff   :  { %1858 = vmatpush1.bf16.msra.mxu0 %v2898_v26  ;;  %2070 = vmatpush1.bf16.msra.mxu1 %v2901_v25 }
 0x102   :  { %1860 = vmatmul.mubr.bf16.vlgmr.msra.gmra.mrb[0].mxu0 %v2174_v29  ;;  %2072 = vmatmul.mubr.bf16.vlgmr.msra.gmra.mrb[0].mxu1 %v2174_v29 }
 0x103   :  { %1869 = vmatprep.mubr.bf16.mxu0 %v2183_v30  ;;  %2081 = vmatprep.mubr.bf16.mxu1 %v2183_v30 }
 0x10a   :  { %1870 = vmatmul.mubr.bf16.gmra.mrb[4].mxu0 %v2182_v31  ;;  %2082 = vmatmul.mubr.bf16.gmra.mrb[4].mxu1 %v2182_v31 }
 0x1d5   :  { %v1861_v43 = vpop.f32.mrb[0].mxu0  ;;  %v2073_v44 = vpop.f32.mrb[0].mxu1 }
 0x1d6   :  { %v2456_v45 = vadd.f32 %v1861_v43, %v291_v35  ;;  %v2464_v46 = vadd.f32 %v2073_v44, %v299_v40  ;;  %v1863_v47 = vpop.f32.mrb[1].mxu0  ;;  %v2075_v48 = vpop.f32.mrb[1].mxu1 }
 0x1d7   :  { %v2457_v49 = vadd.f32 %v1863_v47, %v295_v41  ;;  %v2465_v50 = vadd.f32 %v2075_v48, %v303_v42  ;;  %v1865_v51 = vpop.f32.mrb[2].mxu0  ;;  %v2077_v52 = vpop.f32.mrb[2].mxu1 }
 0x1d8   :  { %v2092_v53 = vmax.f32 %v2456_v45, 0.0  ;;  %v2094_v54 = vmax.f32 %v2464_v46, 0.0  ;;  %v2458_v55 = vadd.f32 %v1865_v51, %v291_v35  ;;  %v2466_v56 = vadd.f32 %v2077_v52, %v299_v40  ;;  %v1867_v57 = vpop.f32.mrb[3].mxu0  ;;  %v2079_v58 = vpop.f32.mrb[3].mxu1 }
 0x1d9   :  { %v2093_v59 = vmax.f32 %v2457_v49, 0.0  ;;  %v2095_v60 = vmax.f32 %v2465_v50, 0.0  ;;  %v2459_v61 = vadd.f32 %v1867_v57, %v295_v41  ;;  %v2467_v62 = vadd.f32 %v2079_v58, %v303_v42 }
 0x1da   :  { %v2096_v63 = vmax.f32 %v2458_v55, 0.0  ;;  %v2098_v0 = vmax.f32 %v2466_v56, 0.0 }
 0x1db   :  { %v2448_v1 = vpack.c.bf16 %v2093_v59, %v2092_v53  ;;  %v2449_v2 = vpack.c.bf16 %v2095_v60, %v2094_v54  ;;  %v2097_v3 = vmax.f32 %v2459_v61, 0.0  ;;  %v2099_v4 = vmax.f32 %v2467_v62, 0.0 }
 0x1dd   :  { %2156 = vst [vmem:[%s3794_s3] sm:$0xff] %v2448_v1  ;;  %2157 = vst [vmem:[%s3794_s3 + $0x8] sm:$0xff] %v2449_v2  ;;  %v2450_v5 = vpack.c.bf16 %v2097_v3, %v2096_v63  ;;  %v2451_v6 = vpack.c.bf16 %v2099_v4, %v2098_v0  ;;  %v1871_v7 = vpop.f32.mrb[4].mxu0  ;;  %v2083_v8 = vpop.f32.mrb[4].mxu1 }
 0x1de   :  { %v2460_v9 = vadd.f32 %v1871_v7, %v291_v35  ;;  %v2468_v10 = vadd.f32 %v2083_v8, %v299_v40  ;;  %v1873_v11 = vpop.f32.mrb[5].mxu0  ;;  %v2085_v12 = vpop.f32.mrb[5].mxu1 }
 0x1df   :  { %2158 = vst [vmem:[%s3794_s3 + $0x10] sm:$0xff] %v2450_v5  ;;  %2159 = vst [vmem:[%s3794_s3 + $0x18] sm:$0xff] %v2451_v6  ;;  %v2461_v13 = vadd.f32 %v1873_v11, %v295_v41  ;;  %v2469_v14 = vadd.f32 %v2085_v12, %v303_v42  ;;  %v1875_v15 = vpop.f32.mrb[6].mxu0  ;;  %v2087_v16 = vpop.f32.mrb[6].mxu1 }
 0x1e0   :  { %v2100_v17 = vmax.f32 %v2460_v9, 0.0  ;;  %v2102_v18 = vmax.f32 %v2468_v10, 0.0  ;;  %v2462_v19 = vadd.f32 %v1875_v15, %v291_v35  ;;  %v2470_v20 = vadd.f32 %v2087_v16, %v299_v40  ;;  %v1877_v21 = vpop.f32.mrb[7].mxu0  ;;  %v2089_v22 = vpop.f32.mrb[7].mxu1 }
 0x1e1   :  { %v2101_v23 = vmax.f32 %v2461_v13, 0.0  ;;  %v2103_v24 = vmax.f32 %v2469_v14, 0.0  ;;  %v2463_v26 = vadd.f32 %v1877_v21, %v295_v41  ;;  %v2471_v25 = vadd.f32 %v2089_v22, %v303_v42 }
 0x1e2   :  { %v2104_v27 = vmax.f32 %v2462_v19, 0.0  ;;  %v2106_v28 = vmax.f32 %v2470_v20, 0.0 }
 0x1e3   :  { %v2452_v29 = vpack.c.bf16 %v2101_v23, %v2100_v17  ;;  %v2453_v30 = vpack.c.bf16 %v2103_v24, %v2102_v18  ;;  %v2105_v31 = vmax.f32 %v2463_v26, 0.0  ;;  %v2107_v32 = vmax.f32 %v2471_v25, 0.0 }
 0x1e5   :  { %2160 = vst [vmem:[%s3794_s3 + $0x20] sm:$0xff] %v2452_v29  ;;  %2161 = vst [vmem:[%s3794_s3 + $0x28] sm:$0xff] %v2453_v30  ;;  %v2454_v33 = vpack.c.bf16 %v2105_v31, %v2104_v27  ;;  %v2455_v36 = vpack.c.bf16 %v2107_v32, %v2106_v28 }
 0x1e7   :  { %2162 = vst [vmem:[%s3794_s3 + $0x30] sm:$0xff] %v2454_v33  ;;  %2163 = vst [vmem:[%s3794_s3 + $0x38] sm:$0xff] %v2455_v36 }

// kernel: resnet_generator_forward.28
= control target key start
LH: loop header
LB: loop body
LE: loop exit
PB: predicated region body
PF: predicated region fallthrough
CT: control target
= control target key end

     0   :  { %s1707_s1 = inlined_call_operand.vmem [shape: bf16[512,256], index: 1, kind: input, shape index: {}]   ;;  %s1708_s0 = inlined_call_operand.vmem [shape: bf16[128,512], index: 0, kind: input, shape index: {}]   ;;  %s1709_s2 = inlined_call_operand.vmem [shape: f32[1,256], index: 2, kind: input, shape index: {}]   ;;  %s1710_s3 = inlined_call_operand.vmem [shape: bf16[128,256], index: 3, kind: output, shape index: {}]  }
   0x1   :  { %v1168_v0 = vld [vmem:[%s1707_s1 + $0x4] ss:$8 sps:$4 sm:$0xff]   ;;  %v1172_v2 = vld [vmem:[%s1707_s1] ss:$8 sps:$4 sm:$0xff]   ;;  %v1174_v4 = vld [vmem:[%s1707_s1 + $0x14] ss:$8 sps:$4 sm:$0xff]  }
   0x2   :  { %v1170_v1 = vld [vmem:[%s1707_s1 + $0x104] ss:$8 sps:$4 sm:$0xff]   ;;  %602 = vmatprep.subr.bf16.mxu1 %v1168_v0  ;;  %v1173_v3 = vld [vmem:[%s1707_s1 + $0x100] ss:$8 sps:$4 sm:$0xff]   ;;  %v1176_v5 = vld [vmem:[%s1707_s1 + $0x114] ss:$8 sps:$4 sm:$0xff]  }
   0x3   :  { %715 = vmatprep.subr.bf16.mxu0 %v1170_v1  ;;  %603 = vmatpush1.bf16.msra.mxu1 %v1172_v2  ;;  %v1178_v6 = vld [vmem:[%s1707_s1 + $0x10] ss:$8 sps:$4 sm:$0xff]   ;;  %v1180_v8 = vld [vmem:[%s1707_s1 + $0x24] ss:$8 sps:$4 sm:$0xff]   ;;  %v1184_v10 = vld [vmem:[%s1707_s1 + $0x20] ss:$8 sps:$4 sm:$0xff]  }
   0x4   :  { %716 = vmatpush1.bf16.msra.mxu0 %v1173_v3  ;;  %604 = vmatprep.subr.bf16.mxu1 %v1174_v4  ;;  %v1179_v7 = vld [vmem:[%s1707_s1 + $0x110] ss:$8 sps:$4 sm:$0xff]   ;;  %v1182_v9 = vld [vmem:[%s1707_s1 + $0x124] ss:$8 sps:$4 sm:$0xff]   ;;  %v1185_v11 = vld [vmem:[%s1707_s1 + $0x120] ss:$8 sps:$4 sm:$0xff]  }
   0x5   :  { %717 = vmatprep.subr.bf16.mxu0 %v1176_v5  ;;  %v1186_v12 = vld [vmem:[%s1707_s1 + $0x34] ss:$8 sps:$4 sm:$0xff]   ;;  %v1190_v14 = vld [vmem:[%s1707_s1 + $0x30] ss:$8 sps:$4 sm:$0xff]   ;;  %v1192_v16 = vld [vmem:[%s1707_s1 + $0x44] ss:$8 sps:$4 sm:$0xff]  }
   0x6   :  { %v1188_v13 = vld [vmem:[%s1707_s1 + $0x134] ss:$8 sps:$4 sm:$0xff]   ;;  %v1191_v15 = vld [vmem:[%s1707_s1 + $0x130] ss:$8 sps:$4 sm:$0xff]   ;;  %v1194_v17 = vld [vmem:[%s1707_s1 + $0x144] ss:$8 sps:$4 sm:$0xff]  }
   0x7   :  { %605 = vmatpush1.bf16.msra.mxu1 %v1178_v6  ;;  %v1196_v18 = vld [vmem:[%s1707_s1 + $0x40] ss:$8 sps:$4 sm:$0xff]   ;;  %v1198_v20 = vld [vmem:[%s1707_s1 + $0x54] ss:$8 sps:$4 sm:$0xff]   ;;  %v1202_v22 = vld [vmem:[%s1707_s1 + $0x50] ss:$8 sps:$4 sm:$0xff]  }
   0x8   :  { %718 = vmatpush1.bf16.msra.mxu0 %v1179_v7  ;;  %606 = vmatprep.subr.bf16.mxu1 %v1180_v8  ;;  %v1197_v19 = vld [vmem:[%s1707_s1 + $0x140] ss:$8 sps:$4 sm:$0xff]   ;;  %v1200_v21 = vld [vmem:[%s1707_s1 + $0x154] ss:$8 sps:$4 sm:$0xff]   ;;  %v1203_v23 = vld [vmem:[%s1707_s1 + $0x150] ss:$8 sps:$4 sm:$0xff]  }
   0x9   :  { %719 = vmatprep.subr.bf16.mxu0 %v1182_v9  ;;  %v1204_v24 = vld [vmem:[%s1707_s1 + $0x64] ss:$8 sps:$4 sm:$0xff]   ;;  %v1208_v26 = vld [vmem:[%s1707_s1 + $0x60] ss:$8 sps:$4 sm:$0xff]   ;;  %v1210_v28 = vld [vmem:[%s1707_s1 + $0x74] ss:$8 sps:$4 sm:$0xff]  }
   0xa   :  { %v1206_v25 = vld [vmem:[%s1707_s1 + $0x164] ss:$8 sps:$4 sm:$0xff]   ;;  %v1209_v27 = vld [vmem:[%s1707_s1 + $0x160] ss:$8 sps:$4 sm:$0xff]   ;;  %v1212_v29 = vld [vmem:[%s1707_s1 + $0x174] ss:$8 sps:$4 sm:$0xff]  }
   0xb   :  { %607 = vmatpush1.bf16.msra.mxu1 %v1184_v10  ;;  %v1214_v30 = vld [vmem:[%s1707_s1 + $0x70] ss:$8 sps:$4 sm:$0xff]   ;;  %v1216_v32 = vld [vmem:[%s1707_s1 + $0x84] ss:$8 sps:$4 sm:$0xff]   ;;  %v1220_v34 = vld [vmem:[%s1707_s1 + $0x80] ss:$8 sps:$4 sm:$0xff]  }
   0xc   :  { %720 = vmatpush1.bf16.msra.mxu0 %v1185_v11  ;;  %608 = vmatprep.subr.bf16.mxu1 %v1186_v12  ;;  %v1215_v31 = vld [vmem:[%s1707_s1 + $0x170] ss:$8 sps:$4 sm:$0xff]   ;;  %v1218_v33 = vld [vmem:[%s1707_s1 + $0x184] ss:$8 sps:$4 sm:$0xff]   ;;  %v1221_v35 = vld [vmem:[%s1707_s1 + $0x180] ss:$8 sps:$4 sm:$0xff]  }
   0xd   :  { %721 = vmatprep.subr.bf16.mxu0 %v1188_v13  ;;  %v1222_v36 = vld [vmem:[%s1707_s1 + $0x94] ss:$8 sps:$4 sm:$0xff]   ;;  %v1226_v38 = vld [vmem:[%s1707_s1 + $0x90] ss:$8 sps:$4 sm:$0xff]   ;;  %v1228_v40 = vld [vmem:[%s1707_s1 + $0xa4] ss:$8 sps:$4 sm:$0xff]  }
   0xe   :  { %v1224_v37 = vld [vmem:[%s1707_s1 + $0x194] ss:$8 sps:$4 sm:$0xff]   ;;  %v1227_v39 = vld [vmem:[%s1707_s1 + $0x190] ss:$8 sps:$4 sm:$0xff]   ;;  %v1230_v41 = vld [vmem:[%s1707_s1 + $0x1a4] ss:$8 sps:$4 sm:$0xff]  }
   0xf   :  { %609 = vmatpush1.bf16.msra.mxu1 %v1190_v14  ;;  %v1232_v42 = vld [vmem:[%s1707_s1 + $0xa0] ss:$8 sps:$4 sm:$0xff]   ;;  %v1234_v44 = vld [vmem:[%s1707_s1 + $0xb4] ss:$8 sps:$4 sm:$0xff]   ;;  %v1238_v46 = vld [vmem:[%s1707_s1 + $0xb0] ss:$8 sps:$4 sm:$0xff]  }
  0x10   :  { %722 = vmatpush1.bf16.msra.mxu0 %v1191_v15  ;;  %610 = vmatprep.subr.bf16.mxu1 %v1192_v16  ;;  %v1233_v43 = vld [vmem:[%s1707_s1 + $0x1a0] ss:$8 sps:$4 sm:$0xff]   ;;  %v1236_v45 = vld [vmem:[%s1707_s1 + $0x1b4] ss:$8 sps:$4 sm:$0xff]   ;;  %v1239_v47 = vld [vmem:[%s1707_s1 + $0x1b0] ss:$8 sps:$4 sm:$0xff]  }
  0x11   :  { %723 = vmatprep.subr.bf16.mxu0 %v1194_v17  ;;  %v1240_v48 = vld [vmem:[%s1707_s1 + $0xc4] ss:$8 sps:$4 sm:$0xff]   ;;  %v1244_v52 = vld [vmem:[%s1707_s1 + $0xc0] ss:$8 sps:$4 sm:$0xff]   ;;  %v1246_v54 = vld [vmem:[%s1707_s1 + $0xd4] ss:$8 sps:$4 sm:$0xff]  }
  0x12   :  { %v1266_v49 = vld [vmem:[%s1708_s0 + $0x4] ss:$16 sps:$4 sm:$0xff]   ;;  %v1269_v51 = vld [vmem:[%s1708_s0 + $0xc] ss:$16 sps:$4 sm:$0xff]   ;;  %v1245_v53 = vld [vmem:[%s1707_s1 + $0x1c0] ss:$8 sps:$4 sm:$0xff]  }
  0x13   :  { %611 = vmatpush1.bf16.msra.mxu1 %v1196_v18  ;;  %v1242_v50 = vld [vmem:[%s1707_s1 + $0x1c4] ss:$8 sps:$4 sm:$0xff]   ;;  %634 = vmatprep.mubr.bf16.mxu1 %v1266_v49  ;;  %v1248_v55 = vld [vmem:[%s1707_s1 + $0x1d4] ss:$8 sps:$4 sm:$0xff]   ;;  %v1250_v56 = vld [vmem:[%s1707_s1 + $0xd0] ss:$8 sps:$4 sm:$0xff]  }
  0x14   :  { %724 = vmatpush1.bf16.msra.mxu0 %v1197_v19  ;;  %612 = vmatprep.subr.bf16.mxu1 %v1198_v20  ;;  %v1251_v57 = vld [vmem:[%s1707_s1 + $0x1d0] ss:$8 sps:$4 sm:$0xff]   ;;  %v1252_v58 = vld [vmem:[%s1707_s1 + $0xe4] ss:$8 sps:$4 sm:$0xff]   ;;  %v1256_v60 = vld [vmem:[%s1707_s1 + $0xe0] ss:$8 sps:$4 sm:$0xff]  }
  0x15   :  { %725 = vmatprep.subr.bf16.mxu0 %v1200_v21  ;;  %747 = vmatprep.mubr.bf16.mxu0 %v1269_v51  ;;  %v1254_v59 = vld [vmem:[%s1707_s1 + $0x1e4] ss:$8 sps:$4 sm:$0xff]   ;;  %v1257_v61 = vld [vmem:[%s1707_s1 + $0x1e0] ss:$8 sps:$4 sm:$0xff]   ;;  %v1258_v62 = vld [vmem:[%s1707_s1 + $0xf4] ss:$8 sps:$4 sm:$0xff]  }
  0x16   :  { %v1260_v63 = vld [vmem:[%s1707_s1 + $0x1f4] ss:$8 sps:$4 sm:$0xff]   ;;  %v1262_v0 = vld [vmem:[%s1707_s1 + $0xf0] ss:$8 sps:$4 sm:$0xff]  }
  0x17   :  { %613 = vmatpush1.bf16.msra.mxu1 %v1202_v22  ;;  %v1263_v1 = vld [vmem:[%s1707_s1 + $0x1f0] ss:$8 sps:$4 sm:$0xff]   ;;  %v1270_v4 = vld [vmem:[%s1708_s0 + $0x24] ss:$16 sps:$4 sm:$0xff]   ;;  %v1272_v5 = vld [vmem:[%s1708_s0 + $0x2c] ss:$16 sps:$4 sm:$0xff]  }
  0x18   :  { %726 = vmatpush1.bf16.msra.mxu0 %v1203_v23  ;;  %614 = vmatprep.subr.bf16.mxu1 %v1204_v24  ;;  %v1264_v2 = vld [vmem:[%s1708_s0] ss:$16 sps:$4 sm:$0xff]   ;;  %v1267_v3 = vld [vmem:[%s1708_s0 + $0x8] ss:$16 sps:$4 sm:$0xff]   ;;  %v1276_v8 = vld [vmem:[%s1708_s0 + $0x44] ss:$16 sps:$4 sm:$0xff]  }
  0x19   :  { %727 = vmatprep.subr.bf16.mxu0 %v1206_v25  ;;  %v1274_v6 = vld [vmem:[%s1708_s0 + $0x20] ss:$16 sps:$4 sm:$0xff]   ;;  %v1275_v7 = vld [vmem:[%s1708_s0 + $0x28] ss:$16 sps:$4 sm:$0xff]   ;;  %v1278_v9 = vld [vmem:[%s1708_s0 + $0x4c] ss:$16 sps:$4 sm:$0xff]  }
  0x1a   :  { %v1280_v10 = vld [vmem:[%s1708_s0 + $0x40] ss:$16 sps:$4 sm:$0xff]   ;;  %v1281_v11 = vld [vmem:[%s1708_s0 + $0x48] ss:$16 sps:$4 sm:$0xff]   ;;  %v1282_v12 = vld [vmem:[%s1708_s0 + $0x64] ss:$16 sps:$4 sm:$0xff]  }
  0x1b   :  { %615 = vmatpush1.bf16.msra.mxu1 %v1208_v26  ;;  %v1284_v13 = vld [vmem:[%s1708_s0 + $0x6c] ss:$16 sps:$4 sm:$0xff]   ;;  %v1286_v14 = vld [vmem:[%s1708_s0 + $0x60] ss:$16 sps:$4 sm:$0xff]   ;;  %v1287_v15 = vld [vmem:[%s1708_s0 + $0x68] ss:$16 sps:$4 sm:$0xff]  }
  0x1c   :  { %728 = vmatpush1.bf16.msra.mxu0 %v1209_v27  ;;  %616 = vmatprep.subr.bf16.mxu1 %v1210_v28  ;;  %v1288_v16 = vld [vmem:[%s1708_s0 + $0x84] ss:$16 sps:$4 sm:$0xff]   ;;  %v1290_v17 = vld [vmem:[%s1708_s0 + $0x8c] ss:$16 sps:$4 sm:$0xff]   ;;  %v1292_v18 = vld [vmem:[%s1708_s0 + $0x80] ss:$16 sps:$4 sm:$0xff]  }
  0x1d   :  { %729 = vmatprep.subr.bf16.mxu0 %v1212_v29  ;;  %v1293_v19 = vld [vmem:[%s1708_s0 + $0x88] ss:$16 sps:$4 sm:$0xff]   ;;  %v1294_v20 = vld [vmem:[%s1708_s0 + $0xa4] ss:$16 sps:$4 sm:$0xff]   ;;  %v1296_v21 = vld [vmem:[%s1708_s0 + $0xac] ss:$16 sps:$4 sm:$0xff]  }
  0x1e   :  { %v1298_v22 = vld [vmem:[%s1708_s0 + $0xa0] ss:$16 sps:$4 sm:$0xff]   ;;  %v1299_v23 = vld [vmem:[%s1708_s0 + $0xa8] ss:$16 sps:$4 sm:$0xff]   ;;  %v1300_v24 = vld [vmem:[%s1708_s0 + $0xc4] ss:$16 sps:$4 sm:$0xff]  }
  0x1f   :  { %617 = vmatpush1.bf16.msra.mxu1 %v1214_v30  ;;  %v1302_v25 = vld [vmem:[%s1708_s0 + $0xcc] ss:$16 sps:$4 sm:$0xff]   ;;  %v1304_v26 = vld [vmem:[%s1708_s0 + $0xc0] ss:$16 sps:$4 sm:$0xff]   ;;  %v1305_v27 = vld [vmem:[%s1708_s0 + $0xc8] ss:$16 sps:$4 sm:$0xff]  }
  0x20   :  { %730 = vmatpush1.bf16.msra.mxu0 %v1215_v31  ;;  %618 = vmatprep.subr.bf16.mxu1 %v1216_v32  ;;  %v1306_v28 = vld [vmem:[%s1708_s0 + $0xe4] ss:$16 sps:$4 sm:$0xff]   ;;  %v1308_v29 = vld [vmem:[%s1708_s0 + $0xec] ss:$16 sps:$4 sm:$0xff]   ;;  %v1310_v30 = vld [vmem:[%s1708_s0 + $0xe0] ss:$16 sps:$4 sm:$0xff]   ;;  %v112_v32 = vlaneseq }
  0x21   :  { %731 = vmatprep.subr.bf16.mxu0 %v1218_v33  ;;  %v1311_v31 = vld [vmem:[%s1708_s0 + $0xe8] ss:$16 sps:$4 sm:$0xff]  }
  0x22   :  { %v113_v33 = vshrl.u32 %v112_v32, 7 }
  0x23   :  { %619 = vmatpush1.bf16.msra.mxu1 %v1220_v34 }
  0x24   :  { %732 = vmatpush1.bf16.msra.mxu0 %v1221_v35  ;;  %620 = vmatprep.subr.bf16.mxu1 %v1222_v36  ;;  %v114_v34 = vsub.s32 0, %v113_v33  ;;  %v110_v35 = vld [vmem:[%s1709_s2] sm:$0x3]  ;;  %v118_v36 = vsub.s32 1, %v113_v33 }
  0x25   :  { %733 = vmatprep.subr.bf16.mxu0 %v1224_v37 }
  0x26   :  { %v1623_v37 = vrot.slane %v110_v35, %v114_v34 }
  0x27   :  { %621 = vmatpush1.bf16.msra.mxu1 %v1226_v38  ;;  %v1625_v38 = vrot.slane %v110_v35, %v118_v36 }
  0x28   :  { %734 = vmatpush1.bf16.msra.mxu0 %v1227_v39  ;;  %622 = vmatprep.subr.bf16.mxu1 %v1228_v40 }
  0x29   :  { %735 = vmatprep.subr.bf16.mxu0 %v1230_v41 }
  0x2b   :  { %623 = vmatpush1.bf16.msra.mxu1 %v1232_v42 }
  0x2c   :  { %736 = vmatpush1.bf16.msra.mxu0 %v1233_v43  ;;  %624 = vmatprep.subr.bf16.mxu1 %v1234_v44 }
  0x2d   :  { %737 = vmatprep.subr.bf16.mxu0 %v1236_v45 }
  0x2f   :  { %625 = vmatpush1.bf16.msra.mxu1 %v1238_v46 }
  0x30   :  { %738 = vmatpush1.bf16.msra.mxu0 %v1239_v47  ;;  %626 = vmatprep.subr.bf16.mxu1 %v1240_v48 }
  0x31   :  { %739 = vmatprep.subr.bf16.mxu0 %v1242_v50 }
  0x33   :  { %627 = vmatpush1.bf16.msra.mxu1 %v1244_v52 }
  0x34   :  { %740 = vmatpush1.bf16.msra.mxu0 %v1245_v53  ;;  %628 = vmatprep.subr.bf16.mxu1 %v1246_v54 }
  0x35   :  { %741 = vmatprep.subr.bf16.mxu0 %v1248_v55 }
  0x37   :  { %629 = vmatpush1.bf16.msra.mxu1 %v1250_v56 }
  0x38   :  { %742 = vmatpush1.bf16.msra.mxu0 %v1251_v57  ;;  %630 = vmatprep.subr.bf16.mxu1 %v1252_v58 }
  0x39   :  { %743 = vmatprep.subr.bf16.mxu0 %v1254_v59 }
  0x3b   :  { %631 = vmatpush1.bf16.msra.mxu1 %v1256_v60 }
  0x3c   :  { %744 = vmatpush1.bf16.msra.mxu0 %v1257_v61  ;;  %632 = vmatprep.subr.bf16.mxu1 %v1258_v62 }
  0x3d   :  { %745 = vmatprep.subr.bf16.mxu0 %v1260_v63 }
  0x3f   :  { %633 = vmatpush1.bf16.msra.mxu1 %v1262_v0 }
  0x40   :  { %746 = vmatpush1.bf16.msra.mxu0 %v1263_v1 }
  0x42   :  { %635 = vmatmul.mubr.bf16.vlgmr.msra.gmra.mrb[0].mxu1 %v1264_v2 }
  0x43   :  { %748 = vmatmul.mubr.bf16.vlgmr.msra.gmra.mrb[0].mxu0 %v1267_v3  ;;  %644 = vmatprep.mubr.bf16.mxu1 %v1270_v4 }
  0x44   :  { %757 = vmatprep.mubr.bf16.mxu0 %v1272_v5 }
  0x4a   :  { %645 = vmatmul.mubr.bf16.gmra.mrb[4].mxu1 %v1274_v6 }
  0x4b   :  { %758 = vmatmul.mubr.bf16.gmra.mrb[4].mxu0 %v1275_v7  ;;  %654 = vmatprep.mubr.bf16.mxu1 %v1276_v8 }
  0x4c   :  { %767 = vmatprep.mubr.bf16.mxu0 %v1278_v9 }
  0x52   :  { %655 = vmatmul.mubr.bf16.gmra.mrb[8].mxu1 %v1280_v10 }
  0x53   :  { %768 = vmatmul.mubr.bf16.gmra.mrb[8].mxu0 %v1281_v11  ;;  %664 = vmatprep.mubr.bf16.mxu1 %v1282_v12 }
  0x54   :  { %777 = vmatprep.mubr.bf16.mxu0 %v1284_v13 }
  0x5a   :  { %665 = vmatmul.mubr.bf16.gmra.mrb[12].mxu1 %v1286_v14 }
  0x5b   :  { %778 = vmatmul.mubr.bf16.gmra.mrb[12].mxu0 %v1287_v15  ;;  %674 = vmatprep.mubr.bf16.mxu1 %v1288_v16 }
  0x5c   :  { %787 = vmatprep.mubr.bf16.mxu0 %v1290_v17 }
  0x62   :  { %675 = vmatmul.mubr.bf16.gmra.mrb[16].mxu1 %v1292_v18 }
  0x63   :  { %788 = vmatmul.mubr.bf16.gmra.mrb[16].mxu0 %v1293_v19  ;;  %684 = vmatprep.mubr.bf16.mxu1 %v1294_v20 }
  0x64   :  { %797 = vmatprep.mubr.bf16.mxu0 %v1296_v21 }
  0x6a   :  { %685 = vmatmul.mubr.bf16.gmra.mrb[20].mxu1 %v1298_v22 }
  0x6b   :  { %798 = vmatmul.mubr.bf16.gmra.mrb[20].mxu0 %v1299_v23  ;;  %694 = vmatprep.mubr.bf16.mxu1 %v1300_v24 }
  0x6c   :  { %807 = vmatprep.mubr.bf16.mxu0 %v1302_v25 }
  0x72   :  { %695 = vmatmul.mubr.bf16.gmra.mrb[24].mxu1 %v1304_v26 }
  0x73   :  { %808 = vmatmul.mubr.bf16.gmra.mrb[24].mxu0 %v1305_v27  ;;  %704 = vmatprep.mubr.bf16.mxu1 %v1306_v28 }
  0x74   :  { %817 = vmatprep.mubr.bf16.mxu0 %v1308_v29 }
  0x7a   :  { %705 = vmatmul.mubr.bf16.gmra.mrb[28].mxu1 %v1310_v30 }
  0x7b   :  { %818 = vmatmul.mubr.bf16.gmra.mrb[28].mxu0 %v1311_v31 }
 0x115   :  { %v636_v39 = vpop.f32.mrb[0].mxu1 }
 0x116   :  { %v749_v40 = vpop.f32.mrb[0].mxu0  ;;  %v637_v41 = vadd.f32 %v636_v39, %v1623_v37  ;;  %v638_v42 = vpop.f32.mrb[1].mxu1 }
 0x117   :  { %v751_v43 = vpop.f32.mrb[1].mxu0  ;;  %v639_v44 = vadd.f32 %v638_v42, %v1625_v38  ;;  %v640_v45 = vpop.f32.mrb[2].mxu1 }
 0x118   :  { %v753_v46 = vpop.f32.mrb[2].mxu0  ;;  %v750_v47 = vadd.f32 %v749_v40, %v637_v41  ;;  %v641_v48 = vadd.f32 %v640_v45, %v1623_v37  ;;  %v642_v49 = vpop.f32.mrb[3].mxu1 }
 0x119   :  { %v755_v50 = vpop.f32.mrb[3].mxu0  ;;  %v752_v51 = vadd.f32 %v751_v43, %v639_v44  ;;  %v643_v52 = vadd.f32 %v642_v49, %v1625_v38 }
 0x11a   :  { %v828_v53 = vmax.f32 %v750_v47, 0.0  ;;  %v754_v54 = vadd.f32 %v753_v46, %v641_v48 }
 0x11b   :  { %v829_v55 = vmax.f32 %v752_v51, 0.0  ;;  %v756_v56 = vadd.f32 %v755_v50, %v643_v52 }
 0x11c   :  { %v830_v57 = vmax.f32 %v754_v54, 0.0 }
 0x11d   :  { %v1088_v58 = vpack.c.bf16 %v829_v55, %v828_v53  ;;  %v831_v59 = vmax.f32 %v756_v56, 0.0  ;;  %v646_v60 = vpop.f32.mrb[4].mxu1 }
 0x11e   :  { %v759_v61 = vpop.f32.mrb[4].mxu0  ;;  %v647_v62 = vadd.f32 %v646_v60, %v1623_v37  ;;  %v648_v63 = vpop.f32.mrb[5].mxu1 }
 0x11f   :  { %v761_v0 = vpop.f32.mrb[5].mxu0  ;;  %956 = vst [vmem:[%s1710_s3] sm:$0xff] %v1088_v58  ;;  %v1089_v1 = vpack.c.bf16 %v831_v59, %v830_v57  ;;  %v649_v2 = vadd.f32 %v648_v63, %v1625_v38  ;;  %v650_v3 = vpop.f32.mrb[6].mxu1 }
 0x120   :  { %v763_v4 = vpop.f32.mrb[6].mxu0  ;;  %v760_v5 = vadd.f32 %v759_v61, %v647_v62  ;;  %v651_v6 = vadd.f32 %v650_v3, %v1623_v37  ;;  %v652_v7 = vpop.f32.mrb[7].mxu1 }
 0x121   :  { %v765_v8 = vpop.f32.mrb[7].mxu0  ;;  %957 = vst [vmem:[%s1710_s3 + $0x8] sm:$0xff] %v1089_v1  ;;  %v762_v9 = vadd.f32 %v761_v0, %v649_v2  ;;  %v653_v10 = vadd.f32 %v652_v7, %v1625_v38 }
 0x122   :  { %v832_v11 = vmax.f32 %v760_v5, 0.0  ;;  %v764_v12 = vadd.f32 %v763_v4, %v651_v6 }
 0x123   :  { %v833_v13 = vmax.f32 %v762_v9, 0.0  ;;  %v766_v14 = vadd.f32 %v765_v8, %v653_v10 }
 0x124   :  { %v834_v15 = vmax.f32 %v764_v12, 0.0 }
 0x125   :  { %v1090_v16 = vpack.c.bf16 %v833_v13, %v832_v11  ;;  %v835_v17 = vmax.f32 %v766_v14, 0.0  ;;  %v656_v18 = vpop.f32.mrb[8].mxu1 }
 0x126   :  { %v769_v19 = vpop.f32.mrb[8].mxu0  ;;  %v657_v20 = vadd.f32 %v656_v18, %v1623_v37  ;;  %v658_v21 = vpop.f32.mrb[9].mxu1 }
 0x127   :  { %v771_v22 = vpop.f32.mrb[9].mxu0  ;;  %958 = vst [vmem:[%s1710_s3 + $0x10] sm:$0xff] %v1090_v16  ;;  %v1091_v23 = vpack.c.bf16 %v835_v17, %v834_v15  ;;  %v659_v24 = vadd.f32 %v658_v21, %v1625_v38  ;;  %v660_v25 = vpop.f32.mrb[10].mxu1 }
 0x128   :  { %v773_v26 = vpop.f32.mrb[10].mxu0  ;;  %v770_v27 = vadd.f32 %v769_v19, %v657_v20  ;;  %v661_v28 = vadd.f32 %v660_v25, %v1623_v37  ;;  %v662_v29 = vpop.f32.mrb[11].mxu1 }
 0x129   :  { %v775_v30 = vpop.f32.mrb[11].mxu0  ;;  %959 = vst [vmem:[%s1710_s3 + $0x18] sm:$0xff] %v1091_v23  ;;  %v772_v31 = vadd.f32 %v771_v22, %v659_v24  ;;  %v663_v32 = vadd.f32 %v662_v29, %v1625_v38 }
 0x12a   :  { %v836_v33 = vmax.f32 %v770_v27, 0.0  ;;  %v774_v34 = vadd.f32 %v773_v26, %v661_v28 }
 0x12b   :  { %v837_v35 = vmax.f32 %v772_v31, 0.0  ;;  %v776_v36 = vadd.f32 %v775_v30, %v663_v32 }
 0x12c   :  { %v838_v39 = vmax.f32 %v774_v34, 0.0 }
 0x12d   :  { %v1092_v40 = vpack.c.bf16 %v837_v35, %v836_v33  ;;  %v839_v41 = vmax.f32 %v776_v36, 0.0  ;;  %v666_v42 = vpop.f32.mrb[12].mxu1 }
 0x12e   :  { %v779_v43 = vpop.f32.mrb[12].mxu0  ;;  %v667_v44 = vadd.f32 %v666_v42, %v1623_v37  ;;  %v668_v45 = vpop.f32.mrb[13].mxu1 }
 0x12f   :  { %v781_v46 = vpop.f32.mrb[13].mxu0  ;;  %960 = vst [vmem:[%s1710_s3 + $0x20] sm:$0xff] %v1092_v40  ;;  %v1093_v47 = vpack.c.bf16 %v839_v41, %v838_v39  ;;  %v669_v48 = vadd.f32 %v668_v45, %v1625_v38  ;;  %v670_v49 = vpop.f32.mrb[14].mxu1 }
 0x130   :  { %v783_v50 = vpop.f32.mrb[14].mxu0  ;;  %v780_v51 = vadd.f32 %v779_v43, %v667_v44  ;;  %v671_v52 = vadd.f32 %v670_v49, %v1623_v37  ;;  %v672_v53 = vpop.f32.mrb[15].mxu1 }
 0x131   :  { %v785_v54 = vpop.f32.mrb[15].mxu0  ;;  %961 = vst [vmem:[%s1710_s3 + $0x28] sm:$0xff] %v1093_v47  ;;  %v782_v55 = vadd.f32 %v781_v46, %v669_v48  ;;  %v673_v56 = vadd.f32 %v672_v53, %v1625_v38 }
 0x132   :  { %v840_v57 = vmax.f32 %v780_v51, 0.0  ;;  %v784_v58 = vadd.f32 %v783_v50, %v671_v52 }
 0x133   :  { %v841_v59 = vmax.f32 %v782_v55, 0.0  ;;  %v786_v60 = vadd.f32 %v785_v54, %v673_v56 }
 0x134   :  { %v842_v61 = vmax.f32 %v784_v58, 0.0 }
 0x135   :  { %v1094_v62 = vpack.c.bf16 %v841_v59, %v840_v57  ;;  %v843_v63 = vmax.f32 %v786_v60, 0.0  ;;  %v676_v0 = vpop.f32.mrb[16].mxu1 }
 0x136   :  { %v789_v1 = vpop.f32.mrb[16].mxu0  ;;  %v677_v2 = vadd.f32 %v676_v0, %v1623_v37  ;;  %v678_v3 = vpop.f32.mrb[17].mxu1 }
 0x137   :  { %v791_v4 = vpop.f32.mrb[17].mxu0  ;;  %962 = vst [vmem:[%s1710_s3 + $0x30] sm:$0xff] %v1094_v62  ;;  %v1095_v5 = vpack.c.bf16 %v843_v63, %v842_v61  ;;  %v679_v6 = vadd.f32 %v678_v3, %v1625_v38  ;;  %v680_v7 = vpop.f32.mrb[18].mxu1 }
 0x138   :  { %v793_v8 = vpop.f32.mrb[18].mxu0  ;;  %v790_v9 = vadd.f32 %v789_v1, %v677_v2  ;;  %v681_v10 = vadd.f32 %v680_v7, %v1623_v37  ;;  %v682_v11 = vpop.f32.mrb[19].mxu1 }
 0x139   :  { %v795_v12 = vpop.f32.mrb[19].mxu0  ;;  %963 = vst [vmem:[%s1710_s3 + $0x38] sm:$0xff] %v1095_v5  ;;  %v792_v13 = vadd.f32 %v791_v4, %v679_v6  ;;  %v683_v14 = vadd.f32 %v682_v11, %v1625_v38 }
 0x13a   :  { %v844_v15 = vmax.f32 %v790_v9, 0.0  ;;  %v794_v16 = vadd.f32 %v793_v8, %v681_v10 }
 0x13b   :  { %v845_v17 = vmax.f32 %v792_v13, 0.0  ;;  %v796_v18 = vadd.f32 %v795_v12, %v683_v14 }
 0x13c   :  { %v846_v19 = vmax.f32 %v794_v16, 0.0 }
 0x13d   :  { %v1096_v20 = vpack.c.bf16 %v845_v17, %v844_v15  ;;  %v847_v21 = vmax.f32 %v796_v18, 0.0  ;;  %v686_v22 = vpop.f32.mrb[20].mxu1 }
 0x13e   :  { %v799_v23 = vpop.f32.mrb[20].mxu0  ;;  %v687_v24 = vadd.f32 %v686_v22, %v1623_v37  ;;  %v688_v25 = vpop.f32.mrb[21].mxu1 }
 0x13f   :  { %v801_v26 = vpop.f32.mrb[21].mxu0  ;;  %964 = vst [vmem:[%s1710_s3 + $0x40] sm:$0xff] %v1096_v20  ;;  %v1097_v27 = vpack.c.bf16 %v847_v21, %v846_v19  ;;  %v689_v28 = vadd.f32 %v688_v25, %v1625_v38  ;;  %v690_v29 = vpop.f32.mrb[22].mxu1 }
 0x140   :  { %v803_v30 = vpop.f32.mrb[22].mxu0  ;;  %v800_v31 = vadd.f32 %v799_v23, %v687_v24  ;;  %v691_v32 = vadd.f32 %v690_v29, %v1623_v37  ;;  %v692_v33 = vpop.f32.mrb[23].mxu1 }
 0x141   :  { %v805_v34 = vpop.f32.mrb[23].mxu0  ;;  %965 = vst [vmem:[%s1710_s3 + $0x48] sm:$0xff] %v1097_v27  ;;  %v802_v35 = vadd.f32 %v801_v26, %v689_v28  ;;  %v693_v36 = vadd.f32 %v692_v33, %v1625_v38 }
 0x142   :  { %v848_v39 = vmax.f32 %v800_v31, 0.0  ;;  %v804_v40 = vadd.f32 %v803_v30, %v691_v32 }
 0x143   :  { %v849_v41 = vmax.f32 %v802_v35, 0.0  ;;  %v806_v42 = vadd.f32 %v805_v34, %v693_v36 }
 0x144   :  { %v850_v43 = vmax.f32 %v804_v40, 0.0 }
 0x145   :  { %v1098_v44 = vpack.c.bf16 %v849_v41, %v848_v39  ;;  %v851_v45 = vmax.f32 %v806_v42, 0.0  ;;  %v696_v46 = vpop.f32.mrb[24].mxu1 }
 0x146   :  { %v809_v47 = vpop.f32.mrb[24].mxu0  ;;  %v697_v48 = vadd.f32 %v696_v46, %v1623_v37  ;;  %v698_v49 = vpop.f32.mrb[25].mxu1 }
 0x147   :  { %v811_v50 = vpop.f32.mrb[25].mxu0  ;;  %966 = vst [vmem:[%s1710_s3 + $0x50] sm:$0xff] %v1098_v44  ;;  %v1099_v51 = vpack.c.bf16 %v851_v45, %v850_v43  ;;  %v699_v52 = vadd.f32 %v698_v49, %v1625_v38  ;;  %v700_v53 = vpop.f32.mrb[26].mxu1 }
 0x148   :  { %v813_v54 = vpop.f32.mrb[26].mxu0  ;;  %v810_v55 = vadd.f32 %v809_v47, %v697_v48  ;;  %v701_v56 = vadd.f32 %v700_v53, %v1623_v37  ;;  %v702_v57 = vpop.f32.mrb[27].mxu1 }
 0x149   :  { %v815_v58 = vpop.f32.mrb[27].mxu0  ;;  %967 = vst [vmem:[%s1710_s3 + $0x58] sm:$0xff] %v1099_v51  ;;  %v812_v59 = vadd.f32 %v811_v50, %v699_v52  ;;  %v703_v60 = vadd.f32 %v702_v57, %v1625_v38 }
 0x14a   :  { %v852_v61 = vmax.f32 %v810_v55, 0.0  ;;  %v814_v62 = vadd.f32 %v813_v54, %v701_v56 }
 0x14b   :  { %v853_v63 = vmax.f32 %v812_v59, 0.0  ;;  %v816_v0 = vadd.f32 %v815_v58, %v703_v60 }
 0x14c   :  { %v854_v1 = vmax.f32 %v814_v62, 0.0 }
 0x14d   :  { %v1100_v2 = vpack.c.bf16 %v853_v63, %v852_v61  ;;  %v855_v3 = vmax.f32 %v816_v0, 0.0  ;;  %v706_v4 = vpop.f32.mrb[28].mxu1 }
 0x14e   :  { %v819_v5 = vpop.f32.mrb[28].mxu0  ;;  %v707_v6 = vadd.f32 %v706_v4, %v1623_v37  ;;  %v708_v7 = vpop.f32.mrb[29].mxu1 }
 0x14f   :  { %v821_v8 = vpop.f32.mrb[29].mxu0  ;;  %968 = vst [vmem:[%s1710_s3 + $0x60] sm:$0xff] %v1100_v2  ;;  %v1101_v9 = vpack.c.bf16 %v855_v3, %v854_v1  ;;  %v709_v10 = vadd.f32 %v708_v7, %v1625_v38  ;;  %v710_v11 = vpop.f32.mrb[30].mxu1 }
 0x150   :  { %v823_v12 = vpop.f32.mrb[30].mxu0  ;;  %v820_v13 = vadd.f32 %v819_v5, %v707_v6  ;;  %v711_v14 = vadd.f32 %v710_v11, %v1623_v37  ;;  %v712_v15 = vpop.f32.mrb[31].mxu1 }
 0x151   :  { %v825_v16 = vpop.f32.mrb[31].mxu0  ;;  %969 = vst [vmem:[%s1710_s3 + $0x68] sm:$0xff] %v1101_v9  ;;  %v822_v17 = vadd.f32 %v821_v8, %v709_v10  ;;  %v713_v18 = vadd.f32 %v712_v15, %v1625_v38 }
 0x152   :  { %v856_v19 = vmax.f32 %v820_v13, 0.0  ;;  %v824_v20 = vadd.f32 %v823_v12, %v711_v14 }
 0x153   :  { %v857_v21 = vmax.f32 %v822_v17, 0.0  ;;  %v826_v22 = vadd.f32 %v825_v16, %v713_v18 }
 0x154   :  { %v858_v23 = vmax.f32 %v824_v20, 0.0 }
 0x155   :  { %v1102_v24 = vpack.c.bf16 %v857_v21, %v856_v19  ;;  %v859_v25 = vmax.f32 %v826_v22, 0.0 }
 0x157   :  { %970 = vst [vmem:[%s1710_s3 + $0x70] sm:$0xff] %v1102_v24  ;;  %v1103_v37 = vpack.c.bf16 %v859_v25, %v858_v23 }
 0x159   :  { %971 = vst [vmem:[%s1710_s3 + $0x78] sm:$0xff] %v1103_v37 }

// kernel: resnet_generator_forward.29
= control target key start
LH: loop header
LB: loop body
LE: loop exit
PB: predicated region body
PF: predicated region fallthrough
CT: control target
= control target key end

     0   :  { %s9365_s12 = smov 0   ;;  %s11594_s0 = inlined_call_operand.vmem [shape: bf16[512,3136], index: 0, kind: input, shape index: {}]   ;;  %s11595_s1 = inlined_call_operand.vmem [shape: bf16[3136,128], index: 1, kind: input, shape index: {}]   ;;  %s11596_s2 = inlined_call_operand.vmem [shape: f32[1,128], index: 2, kind: input, shape index: {}]   ;;  %s11597_s3 = inlined_call_operand.vmem [shape: f32[512,128], index: 3, kind: output, shape index: {}]  }
   0x1 LB: > { %s6431_s13 = sadd.s32 4294967295, %s9343_s12   ;;  %p6435_p0 = scmp.ge.s32.totalorder %s9343_s12, 1  ;;  %s9343_s12 = sphi %s9365_s12, %s13_s12  }
   0x2   : > { %p139_p1 = scmp.lt.s32.totalorder %s9343_s12, 3 }
   0x4   : > { %p140_p2 = pnand %p6435_p0, %p139_p1 }
   0x5   : > { %v8484_v0 = vld [vmem:[%s11595_s1 + $0x40] sm:$0xff] (!%p140_p2)   ;;  %s6436_s16 = sshll.u32 (!%p140_p2), %s6431_s13, 5  ;;  %v8486_v2 = vld [vmem:[%s11595_s1 + $0x48] sm:$0xff] (!%p140_p2)   ;;  %v8488_v4 = vld [vmem:[%s11595_s1 + $0x50] sm:$0xff] (!%p140_p2)   ;;  %vm4169_vm0 = vcmask (!%p140_p2), 523264  }
   0x6   : > { %143 = sbr.rel (%p140_p2) target bundleno = 1064 (0x428), region = 32  ;;  %v8485_v1 = vld [vmem:[%s11595_s1] sm:$0xff] (!%p140_p2)   ;;  %7055 = vmatprep.subr.bf16.mxu0 (!%p140_p2), %v8484_v0  ;;  %8459 = vmatprep.subr.bf16.mxu1 (!%p140_p2), %v8484_v0  ;;  %p165_p3 = scmp.lt.s32.totalorder (!%p140_p2), %s6436_s16, 63  ;;  %v8487_v3 = vld [vmem:[%s11595_s1 + $0x8] sm:$0xff] (!%p140_p2)   ;;  %v8489_v5 = vld [vmem:[%s11595_s1 + $0x10] sm:$0xff] (!%p140_p2)  }
   0x7   : > { %7056 = vmatpush3.bf16.msra.mxu0 (!%p140_p2), %v8485_v1  ;;  %8467 = vmatpush3.bf16.msra.mxu1 (!%p140_p2), %v8485_v1  ;;  %v8490_v6 = vld [vmem:[%s11595_s1 + $0x58] sm:$0xff] (!%p140_p2)   ;;  %v8492_v8 = vld [vmem:[%s11595_s1 + $0x60] sm:$0xff] (!%p140_p2)   ;;  %v8494_v10 = vld [vmem:[%s11595_s1 + $0x68] sm:$0xff] (!%p140_p2)  }
   0x8   : > { %7057 = vmatprep.subr.bf16.mxu0 (!%p140_p2), %v8486_v2  ;;  %8460 = vmatprep.subr.bf16.mxu1 (!%p140_p2), %v8486_v2  ;;  %v8491_v7 = vld [vmem:[%s11595_s1 + $0x18] sm:$0xff] (!%p140_p2)   ;;  %v8493_v9 = vld [vmem:[%s11595_s1 + $0x20] sm:$0xff] (!%p140_p2)   ;;  %v8495_v13 = vld [vmem:[%s11595_s1 + $0x28] sm:$0xff] (!%p140_p2)  }
   0x9   : > { %v8496_v14 = vld [vmem:[%s11595_s1 + $0x70] sm:$0xff] (!%p140_p2)   ;;  %v8498_v16 = vld [vmem:[%s11595_s1 + $0x78] sm:$0xff] (!%p140_p2)   ;;  %v8506_v18 = vld [vmem:[%s11595_s1 + $0xc0] sm:$0xff] (!%p140_p2)  }
   0xa   : > { %v8497_v15 = vld [vmem:[%s11595_s1 + $0x30] sm:$0xff] (!%p140_p2)   ;;  %v8499_v17 = vld [vmem:[%s11595_s1 + $0x38] sm:$0xff] (!%p140_p2)   ;;  %v8509_v21 = vld [vmem:[%s11595_s1 + $0x140] sm:$0xff] (!%p140_p2)  }
   0xb   : > { %7058 = vmatpush3.bf16.msra.mxu0 (!%p140_p2), %v8487_v3  ;;  %8468 = vmatpush3.bf16.msra.mxu1 (!%p140_p2), %v8487_v3  ;;  %v8507_v22 = vld [vmem:[%s11595_s1 + $0x80] sm:$0xff] (!%p140_p2)   ;;  %v8508_v23 = vld [vmem:[%s11595_s1 + $0xc8] sm:$0xff] (!%p140_p2)   ;;  %v8518_v31 = vld [vmem:[%s11595_s1 + $0xd0] sm:$0xff] (!%p140_p2)  }
   0xc   : > { %7059 = vmatprep.subr.bf16.mxu0 (!%p140_p2), %v8488_v4  ;;  %8461 = vmatprep.subr.bf16.mxu1 (!%p140_p2), %v8488_v4  ;;  %v8511_v24 = vld [vmem:[%s11595_s1 + $0x100] sm:$0xff] (!%p140_p2)   ;;  %v8510_v27 = vld [vmem:[%s11595_s1 + $0x88] sm:$0xff] (!%p140_p2)   ;;  %v8519_v32 = vld [vmem:[%s11595_s1 + $0x90] sm:$0xff] (!%p140_p2)  }
   0xd   : > { %s11599_s16 = smov (!%p165_p3, %s6436_s16), 63  ;;  %v8529_v28 = vld [vmem:[%s11595_s1 + $0x148] sm:$0xff]   ;;  %v8520_v34 = vld [vmem:[%s11595_s1 + $0xd8] sm:$0xff]   ;;  %v8528_v40 = vld [vmem:[%s11595_s1 + $0xe0] sm:$0xff]  }
   0xe   : > { %s8475_s29 = smul.u32 100, %s11599_s16  ;;  %v8531_v33 = vld [vmem:[%s11595_s1 + $0x108] sm:$0xff]   ;;  %v8521_v37 = vld [vmem:[%s11595_s1 + $0x98] sm:$0xff]   ;;  %v8530_v41 = vld [vmem:[%s11595_s1 + $0xa0] sm:$0xff]  }
   0xf   : > { %7060 = vmatpush3.bf16.msra.mxu0 %v8489_v5  ;;  %8469 = vmatpush3.bf16.msra.mxu1 %v8489_v5  ;;  %v8532_v42 = vld [vmem:[%s11595_s1 + $0xe8] sm:$0xff]   ;;  %v8543_v43 = vld [vmem:[%s11595_s1 + $0x150] sm:$0xff]   ;;  %v8542_v52 = vld [vmem:[%s11595_s1 + $0xf8] sm:$0xff]  }
  0x10   : > { %7061 = vmatprep.subr.bf16.mxu0 %v8490_v6  ;;  %8462 = vmatprep.subr.bf16.mxu1 %v8490_v6  ;;  %s9406_s9 = scalar_lea.vmem %s11594_s0, %s8475_s29  ;;  %v8545_v46 = vld [vmem:[%s11595_s1 + $0x110] sm:$0xff]   ;;  %v8533_v47 = vld [vmem:[%s11595_s1 + $0xa8] sm:$0xff]   ;;  %v8560_v55 = vld [vmem:[%s11595_s1 + $0x158] sm:$0xff]  }
  0x11   : > { %v8502_v11 = vld [vmem:[%s9406_s9 + $0x4] ss:$100 sps:$4 sm:$0xff]   ;;  %v8512_v25 = vld [vmem:[%s9406_s9 + $0xcc] ss:$100 sps:$4 sm:$0xff]   ;;  %v8522_v35 = vld [vmem:[%s9406_s9 + $0x194] ss:$100 sps:$4 sm:$0xff]  }
  0x12   : > { %v8505_v12 = vld [vmem:[%s9406_s9 + $0x964] ss:$100 sps:$4 sm:$0xff]   ;;  %4250 = vmatprep.mubr.bf16.mxu0 %v8502_v11  ;;  %v8514_v26 = vld [vmem:[%s9406_s9 + $0xa2c] ss:$100 sps:$4 sm:$0xff]   ;;  %v8524_v36 = vld [vmem:[%s9406_s9 + $0xaf4] ss:$100 sps:$4 sm:$0xff]  }
  0x13   : > { %7062 = vmatpush3.bf16.msra.mxu0 %v8491_v7  ;;  %8470 = vmatpush3.bf16.msra.mxu1 %v8491_v7  ;;  %v8500_v19 = vld [vmem:[%s9406_s9] ss:$100 sps:$4 sm:$0xff]   ;;  %v8516_v29 = vld [vmem:[%s9406_s9 + $0xc8] ss:$100 sps:$4 sm:$0xff]   ;;  %v8526_v38 = vld [vmem:[%s9406_s9 + $0x190] ss:$100 sps:$4 sm:$0xff]  }
  0x14   : > { %7063 = vmatprep.subr.bf16.mxu0 %v8492_v8  ;;  %8463 = vmatprep.subr.bf16.mxu1 %v8492_v8  ;;  %v8503_v20 = vld [vmem:[%s9406_s9 + $0x960] ss:$100 sps:$4 sm:$0xff]   ;;  %v8517_v30 = vld [vmem:[%s9406_s9 + $0xa28] ss:$100 sps:$4 sm:$0xff]   ;;  %v8527_v39 = vld [vmem:[%s9406_s9 + $0xaf0] ss:$100 sps:$4 sm:$0xff]  }
  0x15   : > { %4346 = vmatprep.mubr.bf16.mxu1 %v8505_v12  ;;  %v8534_v44 = vld [vmem:[%s9406_s9 + $0x25c] ss:$100 sps:$4 sm:$0xff]   ;;  %v8540_v48 = vld [vmem:[%s11595_s1 + $0xf0] sm:$0xff]   ;;  %v8546_v53 = vld [vmem:[%s9406_s9 + $0x324] ss:$100 sps:$4 sm:$0xff]  }
  0x16   : > { %v8536_v45 = vld [vmem:[%s9406_s9 + $0xbbc] ss:$100 sps:$4 sm:$0xff]   ;;  %v8541_v51 = vld [vmem:[%s11595_s1 + $0xb0] sm:$0xff]   ;;  %v8548_v58 = vld [vmem:[%s9406_s9 + $0x8] ss:$100 sps:$4 sm:$0xff]  }
  0x17   : > { %7064 = vmatpush3.bf16.msra.mxu0 %v8493_v9  ;;  %8471 = vmatpush3.bf16.msra.mxu1 %v8493_v9  ;;  %v8538_v49 = vld [vmem:[%s9406_s9 + $0x258] ss:$100 sps:$4 sm:$0xff]   ;;  %v8550_v54 = vld [vmem:[%s9406_s9 + $0xc] ss:$100 sps:$4 sm:$0xff]   ;;  %v8551_v59 = vld [vmem:[%s9406_s9 + $0x320] ss:$100 sps:$4 sm:$0xff]  }
  0x18   : > { %7065 = vmatprep.subr.bf16.mxu0 %v8494_v10  ;;  %8464 = vmatprep.subr.bf16.mxu1 %v8494_v10  ;;  %v8539_v50 = vld [vmem:[%s9406_s9 + $0xbb8] ss:$100 sps:$4 sm:$0xff]   ;;  %v8552_v60 = vld [vmem:[%s11595_s1 + $0x1c0] sm:$0xff]   ;;  %v8554_v62 = vld [vmem:[%s9406_s9 + $0x3ec] ss:$100 sps:$4 sm:$0xff]  }
  0x19   : > { %v8561_v56 = vld [vmem:[%s11595_s1 + $0x118] sm:$0xff]   ;;  %v8553_v61 = vld [vmem:[%s11595_s1 + $0x180] sm:$0xff]   ;;  %v8568_v1 = vld [vmem:[%s11595_s1 + $0x1c8] sm:$0xff]  }
  0x1a   : > { %v8544_v57 = vld [vmem:[%s11595_s1 + $0xb8] sm:$0xff]   ;;  %v8570_v0 = vld [vmem:[%s11595_s1 + $0x160] sm:$0xff]   ;;  %v8569_v3 = vld [vmem:[%s11595_s1 + $0x188] sm:$0xff]  }
  0x1b   : > { %7066 = vmatpush3.bf16.msra.mxu0 %v8495_v13  ;;  %8472 = vmatpush3.bf16.msra.mxu1 %v8495_v13  ;;  %v8556_v63 = vld [vmem:[%s9406_s9 + $0xd4] ss:$100 sps:$4 sm:$0xff]   ;;  %v8571_v2 = vld [vmem:[%s11595_s1 + $0x120] sm:$0xff]   ;;  %v8558_v4 = vld [vmem:[%s9406_s9 + $0x3e8] ss:$100 sps:$4 sm:$0xff]  }
  0x1c   : > { %7067 = vmatprep.subr.bf16.mxu0 %v8496_v14  ;;  %8465 = vmatprep.subr.bf16.mxu1 %v8496_v14  ;;  %v8559_v5 = vld [vmem:[%s9406_s9 + $0xd0] ss:$100 sps:$4 sm:$0xff]   ;;  %v8564_v7 = vld [vmem:[%s9406_s9 + $0x19c] ss:$100 sps:$4 sm:$0xff]   ;;  %v8584_v8 = vld [vmem:[%s11595_s1 + $0x168] sm:$0xff]  }
  0x1d   : > { %v8562_v6 = vld [vmem:[%s9406_s9 + $0x4b4] ss:$100 sps:$4 sm:$0xff]   ;;  %v8586_v10 = vld [vmem:[%s11595_s1 + $0x128] sm:$0xff]   ;;  %v8572_v14 = vld [vmem:[%s9406_s9 + $0x57c] ss:$100 sps:$4 sm:$0xff]  }
  0x1e   : > { %v8585_v9 = vld [vmem:[%s11595_s1 + $0x1d0] sm:$0xff]   ;;  %v8567_v13 = vld [vmem:[%s9406_s9 + $0x198] ss:$100 sps:$4 sm:$0xff]  }
  0x1f   : > { %7068 = vmatpush3.bf16.msra.mxu0 %v8497_v15  ;;  %8473 = vmatpush3.bf16.msra.mxu1 %v8497_v15  ;;  %v8587_v11 = vld [vmem:[%s11595_s1 + $0x190] sm:$0xff]  }
  0x20   : > { %7069 = vmatprep.subr.bf16.mxu0 %v8498_v16  ;;  %8466 = vmatprep.subr.bf16.mxu1 %v8498_v16  ;;  %v8566_v12 = vld [vmem:[%s9406_s9 + $0x4b0] ss:$100 sps:$4 sm:$0xff]  }
  0x21   : > { %v8594_v15 = vld [vmem:[%s11595_s1 + $0x170] sm:$0xff]  }
  0x22   : > { %v8595_v16 = vld [vmem:[%s11595_s1 + $0x130] sm:$0xff]  }
  0x23   : > { %7070 = vmatpush3.bf16.msra.mxu0 %v8499_v17  ;;  %8474 = vmatpush3.bf16.msra.mxu1 %v8499_v17  ;;  %v8574_v17 = vld [vmem:[%s9406_s9 + $0x264] ss:$100 sps:$4 sm:$0xff]  }
  0x24   : > { %7167 = vmatprep.subr.bf16.mxu1 %v8506_v18  ;;  %7279 = vmatprep.subr.bf16.mxu0 %v8509_v21  ;;  %v8602_v18 = vld [vmem:[%s11595_s1 + $0x1d8] sm:$0xff]   ;;  %v8577_v21 = vld [vmem:[%s9406_s9 + $0x260] ss:$100 sps:$4 sm:$0xff]  }
  0x26   : > { %4251 = vmatmul.mubr.bf16.vlgmr.msra.gmra.mrb[0].mxu0 %v8500_v19  ;;  %4347 = vmatmul.mubr.bf16.vlgmr.msra.gmra.mrb[0].mxu1 %v8503_v20  ;;  %v8603_v19 = vld [vmem:[%s11595_s1 + $0x198] sm:$0xff]  }
  0x27   : > { %7168 = vmatpush3.bf16.msra.mxu1 %v8507_v22  ;;  %7280 = vmatpush3.bf16.msra.mxu0 %v8511_v24  ;;  %v8576_v20 = vld [vmem:[%s9406_s9 + $0x578] ss:$100 sps:$4 sm:$0xff]   ;;  %v8578_v22 = vld [vmem:[%s9406_s9 + $0x644] ss:$100 sps:$4 sm:$0xff]  }
  0x28   : > { %7169 = vmatprep.subr.bf16.mxu1 %v8508_v23  ;;  %4258 = vmatprep.mubr.bf16.mxu0 %v8512_v25  ;;  %v8580_v23 = vld [vmem:[%s9406_s9 + $0x32c] ss:$100 sps:$4 sm:$0xff]   ;;  %v8610_v24 = vld [vmem:[%s11595_s1 + $0x178] sm:$0xff]  }
  0x29   : > { %4354 = vmatprep.mubr.bf16.mxu1 %v8514_v26  ;;  %7281 = vmatprep.subr.bf16.mxu0 %v8529_v28  ;;  %v8611_v25 = vld [vmem:[%s11595_s1 + $0x138] sm:$0xff]   ;;  %v8618_v26 = vld [vmem:[%s11595_s1 + $0x1e0] sm:$0xff]   ;;  %v8583_v28 = vld [vmem:[%s9406_s9 + $0x328] ss:$100 sps:$4 sm:$0xff]  }
  0x2b   : > { %7170 = vmatpush3.bf16.msra.mxu1 %v8510_v27  ;;  %7282 = vmatpush3.bf16.msra.mxu0 %v8531_v33  ;;  %v8582_v27 = vld [vmem:[%s9406_s9 + $0x640] ss:$100 sps:$4 sm:$0xff]   ;;  %v8592_v33 = vld [vmem:[%s9406_s9 + $0x708] ss:$100 sps:$4 sm:$0xff]  }
  0x2c   : > { %7171 = vmatprep.subr.bf16.mxu1 %v8518_v31  ;;  %7283 = vmatprep.subr.bf16.mxu0 %v8543_v43  ;;  %v8588_v31 = vld [vmem:[%s9406_s9 + $0x70c] ss:$100 sps:$4 sm:$0xff]  }
  0x2d   : > { %v8650_v43 = vld [vmem:[%s11595_s1 + $0x1f0] sm:$0xff]  }
  0x2e   : > { %4259 = vmatmul.mubr.bf16.gmra.mrb[4].mxu0 %v8516_v29  ;;  %4355 = vmatmul.mubr.bf16.gmra.mrb[4].mxu1 %v8517_v30  ;;  %v8619_v29 = vld [vmem:[%s11595_s1 + $0x1a0] sm:$0xff]  }
  0x2f   : > { %7172 = vmatpush3.bf16.msra.mxu1 %v8519_v32  ;;  %4266 = vmatprep.mubr.bf16.mxu0 %v8522_v35  ;;  %v8620_v30 = vld [vmem:[%s11595_s1 + $0x240] sm:$0xff]   ;;  %v8590_v32 = vld [vmem:[%s9406_s9 + $0x3f4] ss:$100 sps:$4 sm:$0xff]   ;;  %v8634_v35 = vld [vmem:[%s11595_s1 + $0x1e8] sm:$0xff]  }
  0x30   : > { %7173 = vmatprep.subr.bf16.mxu1 %v8520_v34  ;;  %4362 = vmatprep.mubr.bf16.mxu1 %v8524_v36  ;;  %v8593_v34 = vld [vmem:[%s9406_s9 + $0x3f0] ss:$100 sps:$4 sm:$0xff]   ;;  %v8635_v36 = vld [vmem:[%s11595_s1 + $0x1a8] sm:$0xff]  }
  0x31   : > { %7284 = vmatpush3.bf16.msra.mxu0 %v8545_v46  ;;  %v8609_v46 = vld [vmem:[%s9406_s9 + $0x580] ss:$100 sps:$4 sm:$0xff]  }
  0x32   : > { %7285 = vmatprep.subr.bf16.mxu0 %v8560_v55  ;;  %v8624_v55 = vld [vmem:[%s9406_s9 + $0xdc] ss:$100 sps:$4 sm:$0xff]  }
  0x33   : > { %7174 = vmatpush3.bf16.msra.mxu1 %v8521_v37  ;;  %v8596_v37 = vld [vmem:[%s9406_s9 + $0x7d4] ss:$100 sps:$4 sm:$0xff]  }
  0x34   : > { %7175 = vmatprep.subr.bf16.mxu1 %v8528_v40  ;;  %v8601_v40 = vld [vmem:[%s9406_s9 + $0x4b8] ss:$100 sps:$4 sm:$0xff]  }
  0x35   : > { %7286 = vmatpush3.bf16.msra.mxu0 %v8561_v56  ;;  %v8636_v56 = vld [vmem:[%s11595_s1 + $0x248] sm:$0xff]  }
  0x36   : > { %4267 = vmatmul.mubr.bf16.gmra.mrb[8].mxu0 %v8526_v38  ;;  %4363 = vmatmul.mubr.bf16.gmra.mrb[8].mxu1 %v8527_v39  ;;  %v8598_v38 = vld [vmem:[%s9406_s9 + $0x4bc] ss:$100 sps:$4 sm:$0xff]   ;;  %v8600_v39 = vld [vmem:[%s9406_s9 + $0x7d0] ss:$100 sps:$4 sm:$0xff]  }
  0x37   : > { %7176 = vmatpush3.bf16.msra.mxu1 %v8530_v41  ;;  %4274 = vmatprep.mubr.bf16.mxu0 %v8534_v44  ;;  %v8604_v41 = vld [vmem:[%s9406_s9 + $0x89c] ss:$100 sps:$4 sm:$0xff]   ;;  %v8651_v44 = vld [vmem:[%s11595_s1 + $0x1b0] sm:$0xff]  }
  0x38   : > { %7177 = vmatprep.subr.bf16.mxu1 %v8532_v42  ;;  %4370 = vmatprep.mubr.bf16.mxu1 %v8536_v45  ;;  %v8606_v42 = vld [vmem:[%s9406_s9 + $0x584] ss:$100 sps:$4 sm:$0xff]   ;;  %v8608_v45 = vld [vmem:[%s9406_s9 + $0x898] ss:$100 sps:$4 sm:$0xff]  }
  0x39   : > { %7287 = vmatprep.subr.bf16.mxu0 %v8570_v0  ;;  %v8653_v0 = vld [vmem:[%s11595_s1 + $0x210] sm:$0xff]  }
  0x3a   : > { %7288 = vmatpush3.bf16.msra.mxu0 %v8571_v2  ;;  %v8632_v2 = vld [vmem:[%s9406_s9 + $0x7d8] ss:$100 sps:$4 sm:$0xff]  }
  0x3b   : > { %7178 = vmatpush3.bf16.msra.mxu1 %v8533_v47  ;;  %7289 = vmatprep.subr.bf16.mxu0 %v8584_v8  ;;  %v8612_v47 = vld [vmem:[%s9406_s9 + $0x64c] ss:$100 sps:$4 sm:$0xff]   ;;  %v8685_v8 = vld [vmem:[%s11595_s1 + $0x220] sm:$0xff]  }
  0x3c   : > { %7179 = vmatprep.subr.bf16.mxu1 %v8540_v48  ;;  %v8616_v48 = vld [vmem:[%s9406_s9 + $0x14] ss:$100 sps:$4 sm:$0xff]  }
  0x3e   : > { %4275 = vmatmul.mubr.bf16.gmra.mrb[12].mxu0 %v8538_v49  ;;  %4371 = vmatmul.mubr.bf16.gmra.mrb[12].mxu1 %v8539_v50  ;;  %v8666_v49 = vld [vmem:[%s11595_s1 + $0x1f8] sm:$0xff]  }
  0x3f   : > { %7180 = vmatpush3.bf16.msra.mxu1 %v8541_v51  ;;  %4282 = vmatprep.mubr.bf16.mxu0 %v8546_v53  ;;  %v8667_v50 = vld [vmem:[%s11595_s1 + $0x1b8] sm:$0xff]   ;;  %v8614_v51 = vld [vmem:[%s9406_s9 + $0x10] ss:$100 sps:$4 sm:$0xff]   ;;  %v8621_v53 = vld [vmem:[%s11595_s1 + $0x200] sm:$0xff]  }
  0x40   : > { %7181 = vmatprep.subr.bf16.mxu1 %v8542_v52  ;;  %4411 = vmatprep.mubr.bf16.mxu1 %v8550_v54  ;;  %v8617_v52 = vld [vmem:[%s9406_s9 + $0x648] ss:$100 sps:$4 sm:$0xff]   ;;  %v8622_v54 = vld [vmem:[%s9406_s9 + $0x714] ss:$100 sps:$4 sm:$0xff]  }
  0x41   : > { %7290 = vmatpush3.bf16.msra.mxu0 %v8586_v10  ;;  %v8642_v10 = vld [vmem:[%s9406_s9 + $0x8a0] ss:$100 sps:$4 sm:$0xff]  }
  0x42   : > { %7291 = vmatprep.subr.bf16.mxu0 %v8594_v15  ;;  %v8646_v15 = vld [vmem:[%s9406_s9 + $0x334] ss:$100 sps:$4 sm:$0xff]  }
  0x43   : > { %7182 = vmatpush3.bf16.msra.mxu1 %v8544_v57  ;;  %v8682_v57 = vld [vmem:[%s11595_s1 + $0x2c0] sm:$0xff]  }
  0x44   : > { %7391 = vmatprep.subr.bf16.mxu1 %v8552_v60  ;;  %v8626_v60 = vld [vmem:[%s9406_s9 + $0x710] ss:$100 sps:$4 sm:$0xff]  }
  0x45   : > { %7292 = vmatpush3.bf16.msra.mxu0 %v8595_v16  ;;  %v8717_v16 = vld [vmem:[%s11595_s1 + $0x230] sm:$0xff]  }
  0x46   : > { %4283 = vmatmul.mubr.bf16.gmra.mrb[16].mxu0 %v8551_v59  ;;  %4412 = vmatmul.mubr.bf16.vlgmr.msra.gmra.mrb[16].mxu1 %v8548_v58  ;;  %v8637_v58 = vld [vmem:[%s11595_s1 + $0x208] sm:$0xff]   ;;  %v8652_v59 = vld [vmem:[%s11595_s1 + $0x250] sm:$0xff]  }
  0x47   : > { %7392 = vmatpush3.bf16.msra.mxu1 %v8553_v61  ;;  %4290 = vmatprep.mubr.bf16.mxu0 %v8554_v62  ;;  %v8627_v61 = vld [vmem:[%s9406_s9 + $0xd8] ss:$100 sps:$4 sm:$0xff]  }
  0x48   : > { %4419 = vmatprep.mubr.bf16.mxu1 %v8556_v63  ;;  %7393 = vmatprep.subr.bf16.mxu1 %v8568_v1  ;;  %v8628_v62 = vld [vmem:[%s9406_s9 + $0x7dc] ss:$100 sps:$4 sm:$0xff]   ;;  %v8630_v63 = vld [vmem:[%s9406_s9 + $0x1a4] ss:$100 sps:$4 sm:$0xff]  }
  0x49   : > { %7293 = vmatprep.subr.bf16.mxu0 %v8610_v24  ;;  %v8668_v1 = vld [vmem:[%s11595_s1 + $0x258] sm:$0xff]  }
  0x4a   : > { %7294 = vmatpush3.bf16.msra.mxu0 %v8611_v25  ;;  %v8659_v24 = vld [vmem:[%s9406_s9 + $0x3f8] ss:$100 sps:$4 sm:$0xff]  }
  0x4b   : > { %7394 = vmatpush3.bf16.msra.mxu1 %v8569_v3  ;;  %7503 = vmatprep.subr.bf16.mxu0 %v8620_v30  ;;  %v8669_v3 = vld [vmem:[%s11595_s1 + $0x218] sm:$0xff]   ;;  %v8670_v30 = vld [vmem:[%s9406_s9 + $0xbc4] ss:$100 sps:$4 sm:$0xff]  }
  0x4c   : > { %7395 = vmatprep.subr.bf16.mxu1 %v8585_v9  ;;  %v8700_v9 = vld [vmem:[%s11595_s1 + $0x268] sm:$0xff]   ;;  %v8660_v25 = vld [vmem:[%s9406_s9 + $0xafc] ss:$100 sps:$4 sm:$0xff]  }
  0x4e   : > { %4291 = vmatmul.mubr.bf16.gmra.mrb[20].mxu0 %v8558_v4  ;;  %4420 = vmatmul.mubr.bf16.gmra.mrb[20].mxu1 %v8559_v5  ;;  %v8684_v4 = vld [vmem:[%s11595_s1 + $0x260] sm:$0xff]  }
  0x4f   : > { %4298 = vmatprep.mubr.bf16.mxu0 %v8562_v6  ;;  %4427 = vmatprep.mubr.bf16.mxu1 %v8564_v7  ;;  %v8633_v5 = vld [vmem:[%s9406_s9 + $0x1a0] ss:$100 sps:$4 sm:$0xff]   ;;  %v8640_v7 = vld [vmem:[%s9406_s9 + $0x26c] ss:$100 sps:$4 sm:$0xff]  }
  0x50   : > { %7396 = vmatpush3.bf16.msra.mxu1 %v8587_v11  ;;  %v8638_v6 = vld [vmem:[%s9406_s9 + $0x8a4] ss:$100 sps:$4 sm:$0xff]  }
  0x51   : > { %7397 = vmatprep.subr.bf16.mxu1 %v8602_v18  ;;  %v8643_v11 = vld [vmem:[%s9406_s9 + $0x268] ss:$100 sps:$4 sm:$0xff]   ;;  %v8649_v18 = vld [vmem:[%s9406_s9 + $0x330] ss:$100 sps:$4 sm:$0xff]  }
  0x54   : > { %7398 = vmatpush3.bf16.msra.mxu1 %v8603_v19  ;;  %v8654_v19 = vld [vmem:[%s9406_s9 + $0xa34] ss:$100 sps:$4 sm:$0xff]  }
  0x55   : > { %7399 = vmatprep.subr.bf16.mxu1 %v8618_v26  ;;  %v8662_v26 = vld [vmem:[%s9406_s9 + $0x4c4] ss:$100 sps:$4 sm:$0xff]  }
  0x56   : > { %4299 = vmatmul.mubr.bf16.gmra.mrb[24].mxu0 %v8566_v12  ;;  %4428 = vmatmul.mubr.bf16.gmra.mrb[24].mxu1 %v8567_v13  ;;  %v8701_v12 = vld [vmem:[%s11595_s1 + $0x228] sm:$0xff]   ;;  %v8716_v13 = vld [vmem:[%s11595_s1 + $0x270] sm:$0xff]  }
  0x57   : > { %4306 = vmatprep.mubr.bf16.mxu0 %v8572_v14  ;;  %4435 = vmatprep.mubr.bf16.mxu1 %v8574_v17  ;;  %v8644_v14 = vld [vmem:[%s9406_s9 + $0x96c] ss:$100 sps:$4 sm:$0xff]  }
  0x58   : > { %7400 = vmatpush3.bf16.msra.mxu1 %v8619_v29  ;;  %v8648_v17 = vld [vmem:[%s9406_s9 + $0x968] ss:$100 sps:$4 sm:$0xff]   ;;  %v8665_v29 = vld [vmem:[%s9406_s9 + $0x4c0] ss:$100 sps:$4 sm:$0xff]  }
  0x59   : > { %7401 = vmatprep.subr.bf16.mxu1 %v8634_v35  ;;  %v8680_v35 = vld [vmem:[%s9406_s9 + $0x1c] ss:$100 sps:$4 sm:$0xff]  }
  0x5c   : > { %7402 = vmatpush3.bf16.msra.mxu1 %v8635_v36  ;;  %v8678_v36 = vld [vmem:[%s9406_s9 + $0x18] ss:$100 sps:$4 sm:$0xff]  }
  0x5d   : > { %7403 = vmatprep.subr.bf16.mxu1 %v8650_v43  ;;  %v8714_v43 = vld [vmem:[%s11595_s1 + $0x2d0] sm:$0xff]  }
  0x5e   : > { %4307 = vmatmul.mubr.bf16.gmra.mrb[28].mxu0 %v8576_v20  ;;  %4436 = vmatmul.mubr.bf16.gmra.mrb[28].mxu1 %v8577_v21  ;;  %v8656_v20 = vld [vmem:[%s9406_s9 + $0x3fc] ss:$100 sps:$4 sm:$0xff]  }
  0x5f   : > { %4314 = vmatprep.mubr.bf16.mxu0 %v8578_v22  ;;  %4443 = vmatprep.mubr.bf16.mxu1 %v8580_v23  ;;  %v8732_v21 = vld [vmem:[%s11595_s1 + $0x278] sm:$0xff]   ;;  %v8658_v23 = vld [vmem:[%s9406_s9 + $0xa30] ss:$100 sps:$4 sm:$0xff]  }
  0x60   : > { %7404 = vmatpush3.bf16.msra.mxu1 %v8651_v44  ;;  %v8733_v22 = vld [vmem:[%s11595_s1 + $0x238] sm:$0xff]  }
  0x61   : > { %7405 = vmatprep.subr.bf16.mxu1 %v8666_v49  ;;  %v8690_v44 = vld [vmem:[%s9406_s9 + $0x718] ss:$100 sps:$4 sm:$0xff]  }
  0x62   : > { %v8730_v49 = vld [vmem:[%s11595_s1 + $0x2d8] sm:$0xff]  }
  0x64   : > { %7406 = vmatpush3.bf16.msra.mxu1 %v8667_v50  ;;  %v8696_v50 = vld [vmem:[%s9406_s9 + $0x7e0] ss:$100 sps:$4 sm:$0xff]  }
  0x65   : > { %7615 = vmatprep.subr.bf16.mxu1 %v8682_v57  ;;  %v8762_v57 = vld [vmem:[%s11595_s1 + $0x2e8] sm:$0xff]  }
  0x66   : > { %4315 = vmatmul.mubr.bf16.gmra.mrb[32].mxu0 %v8582_v27  ;;  %4444 = vmatmul.mubr.bf16.gmra.mrb[32].mxu1 %v8583_v28  ;;  %v8748_v27 = vld [vmem:[%s11595_s1 + $0x340] sm:$0xff]   ;;  %v8664_v28 = vld [vmem:[%s9406_s9 + $0xaf8] ss:$100 sps:$4 sm:$0xff]  }
  0x67   : > { %4322 = vmatprep.mubr.bf16.mxu0 %v8588_v31  ;;  %4451 = vmatprep.mubr.bf16.mxu1 %v8590_v32  ;;  %v8672_v31 = vld [vmem:[%s9406_s9 + $0x58c] ss:$100 sps:$4 sm:$0xff]   ;;  %v8674_v32 = vld [vmem:[%s9406_s9 + $0xbc0] ss:$100 sps:$4 sm:$0xff]  }
  0x6e   : > { %4323 = vmatmul.mubr.bf16.gmra.mrb[36].mxu0 %v8592_v33  ;;  %4452 = vmatmul.mubr.bf16.gmra.mrb[36].mxu1 %v8593_v34  ;;  %v8675_v33 = vld [vmem:[%s9406_s9 + $0x588] ss:$100 sps:$4 sm:$0xff]   ;;  %v8676_v34 = vld [vmem:[%s9406_s9 + $0x654] ss:$100 sps:$4 sm:$0xff]  }
  0x6f   : > { %4330 = vmatprep.mubr.bf16.mxu0 %v8596_v37  ;;  %4459 = vmatprep.mubr.bf16.mxu1 %v8598_v38  ;;  %v8681_v37 = vld [vmem:[%s9406_s9 + $0x650] ss:$100 sps:$4 sm:$0xff]   ;;  %v8683_v38 = vld [vmem:[%s11595_s1 + $0x280] sm:$0xff]  }
  0x76   : > { %4331 = vmatmul.mubr.bf16.gmra.mrb[40].mxu0 %v8600_v39  ;;  %4460 = vmatmul.mubr.bf16.gmra.mrb[40].mxu1 %v8601_v40  ;;  %v8686_v39 = vld [vmem:[%s9406_s9 + $0x71c] ss:$100 sps:$4 sm:$0xff]   ;;  %v8688_v40 = vld [vmem:[%s9406_s9 + $0xe4] ss:$100 sps:$4 sm:$0xff]  }
  0x77   : > { %4338 = vmatprep.mubr.bf16.mxu0 %v8604_v41  ;;  %4467 = vmatprep.mubr.bf16.mxu1 %v8606_v42  ;;  %v8698_v41 = vld [vmem:[%s11595_s1 + $0x2c8] sm:$0xff]  }
  0x78   : > { %v8699_v42 = vld [vmem:[%s11595_s1 + $0x288] sm:$0xff]  }
  0x7e   : > { %4339 = vmatmul.mubr.bf16.gmra.mrb[44].mxu0 %v8608_v45  ;;  %4468 = vmatmul.mubr.bf16.gmra.mrb[44].mxu1 %v8609_v46  ;;  %v8691_v45 = vld [vmem:[%s9406_s9 + $0xe0] ss:$100 sps:$4 sm:$0xff]  }
  0x7f   : > { %4475 = vmatprep.mubr.bf16.mxu1 %v8612_v47  ;;  %4572 = vmatprep.mubr.bf16.mxu0 %v8616_v48  ;;  %v8692_v46 = vld [vmem:[%s9406_s9 + $0x7e4] ss:$100 sps:$4 sm:$0xff]   ;;  %v8694_v47 = vld [vmem:[%s9406_s9 + $0x1ac] ss:$100 sps:$4 sm:$0xff]  }
  0x80   : > { %v8715_v48 = vld [vmem:[%s11595_s1 + $0x290] sm:$0xff]  }
  0x86   : > { %4476 = vmatmul.mubr.bf16.gmra.mrb[48].mxu1 %v8617_v52  ;;  %4573 = vmatmul.mubr.bf16.vlgmr.msra.gmra.mrb[48].mxu0 %v8614_v51  ;;  %v8697_v51 = vld [vmem:[%s9406_s9 + $0x1a8] ss:$100 sps:$4 sm:$0xff]   ;;  %v8731_v52 = vld [vmem:[%s11595_s1 + $0x298] sm:$0xff]  }
  0x87   : > { %7504 = vmatpush3.bf16.msra.mxu0 %v8621_v53  ;;  %4483 = vmatprep.mubr.bf16.mxu1 %v8622_v54  ;;  %v8746_v53 = vld [vmem:[%s11595_s1 + $0x2e0] sm:$0xff]   ;;  %v8702_v54 = vld [vmem:[%s9406_s9 + $0x8ac] ss:$100 sps:$4 sm:$0xff]  }
  0x88   : > { %4580 = vmatprep.mubr.bf16.mxu0 %v8624_v55  ;;  %7505 = vmatprep.subr.bf16.mxu0 %v8636_v56  ;;  %v8704_v55 = vld [vmem:[%s9406_s9 + $0x274] ss:$100 sps:$4 sm:$0xff]   ;;  %v8747_v56 = vld [vmem:[%s11595_s1 + $0x2a0] sm:$0xff]  }
  0x8b   : > { %7506 = vmatpush3.bf16.msra.mxu0 %v8637_v58  ;;  %v8706_v58 = vld [vmem:[%s9406_s9 + $0x8a8] ss:$100 sps:$4 sm:$0xff]  }
  0x8c   : > { %7507 = vmatprep.subr.bf16.mxu0 %v8652_v59  ;;  %v8707_v59 = vld [vmem:[%s9406_s9 + $0x270] ss:$100 sps:$4 sm:$0xff]  }
  0x8e   : > { %4484 = vmatmul.mubr.bf16.gmra.mrb[52].mxu1 %v8626_v60  ;;  %4581 = vmatmul.mubr.bf16.gmra.mrb[52].mxu0 %v8627_v61  ;;  %v8763_v60 = vld [vmem:[%s11595_s1 + $0x2a8] sm:$0xff]   ;;  %v8708_v61 = vld [vmem:[%s9406_s9 + $0x974] ss:$100 sps:$4 sm:$0xff]  }
  0x8f   : > { %4491 = vmatprep.mubr.bf16.mxu1 %v8628_v62  ;;  %4588 = vmatprep.mubr.bf16.mxu0 %v8630_v63  ;;  %v8778_v62 = vld [vmem:[%s11595_s1 + $0x2f0] sm:$0xff]   ;;  %v8710_v63 = vld [vmem:[%s9406_s9 + $0x33c] ss:$100 sps:$4 sm:$0xff]  }
  0x90   : > { %7508 = vmatpush3.bf16.msra.mxu0 %v8653_v0  ;;  %v8779_v0 = vld [vmem:[%s11595_s1 + $0x2b0] sm:$0xff]  }
  0x91   : > { %7509 = vmatprep.subr.bf16.mxu0 %v8668_v1  ;;  %v8794_v1 = vld [vmem:[%s11595_s1 + $0x2f8] sm:$0xff]  }
  0x94   : > { %7510 = vmatpush3.bf16.msra.mxu0 %v8669_v3  ;;  %v8810_v3 = vld [vmem:[%s11595_s1 + $0x3c0] sm:$0xff]  }
  0x95   : > { %7511 = vmatprep.subr.bf16.mxu0 %v8684_v4  ;;  %v8712_v4 = vld [vmem:[%s9406_s9 + $0x970] ss:$100 sps:$4 sm:$0xff]  }
  0x96   : > { %4492 = vmatmul.mubr.bf16.gmra.mrb[56].mxu1 %v8632_v2  ;;  %4589 = vmatmul.mubr.bf16.gmra.mrb[56].mxu0 %v8633_v5  ;;  %v8795_v2 = vld [vmem:[%s11595_s1 + $0x2b8] sm:$0xff]  }
  0x97   : > { %4499 = vmatprep.mubr.bf16.mxu1 %v8638_v6  ;;  %4596 = vmatprep.mubr.bf16.mxu0 %v8640_v7  ;;  %v8713_v5 = vld [vmem:[%s9406_s9 + $0x338] ss:$100 sps:$4 sm:$0xff]   ;;  %v8720_v7 = vld [vmem:[%s9406_s9 + $0x404] ss:$100 sps:$4 sm:$0xff]  }
  0x98   : > { %7512 = vmatpush3.bf16.msra.mxu0 %v8685_v8  ;;  %v8718_v6 = vld [vmem:[%s9406_s9 + $0xa3c] ss:$100 sps:$4 sm:$0xff]  }
  0x99   : > { %7513 = vmatprep.subr.bf16.mxu0 %v8700_v9  ;;  %v8722_v8 = vld [vmem:[%s9406_s9 + $0xa38] ss:$100 sps:$4 sm:$0xff]   ;;  %v8723_v9 = vld [vmem:[%s9406_s9 + $0x400] ss:$100 sps:$4 sm:$0xff]  }
  0x9c   : > { %7514 = vmatpush3.bf16.msra.mxu0 %v8701_v12  ;;  %v8728_v12 = vld [vmem:[%s9406_s9 + $0xb00] ss:$100 sps:$4 sm:$0xff]  }
  0x9d   : > { %7515 = vmatprep.subr.bf16.mxu0 %v8716_v13  ;;  %v8729_v13 = vld [vmem:[%s9406_s9 + $0x4c8] ss:$100 sps:$4 sm:$0xff]  }
  0x9e   : > { %4500 = vmatmul.mubr.bf16.gmra.mrb[60].mxu1 %v8642_v10  ;;  %4597 = vmatmul.mubr.bf16.gmra.mrb[60].mxu0 %v8643_v11  ;;  %v8724_v10 = vld [vmem:[%s9406_s9 + $0xb04] ss:$100 sps:$4 sm:$0xff]   ;;  %v8726_v11 = vld [vmem:[%s9406_s9 + $0x4cc] ss:$100 sps:$4 sm:$0xff]  }
  0x9f   : > { %4507 = vmatprep.mubr.bf16.mxu1 %v8644_v14  ;;  %4604 = vmatprep.mubr.bf16.mxu0 %v8646_v15  ;;  %v8734_v14 = vld [vmem:[%s9406_s9 + $0xbcc] ss:$100 sps:$4 sm:$0xff]   ;;  %v8736_v15 = vld [vmem:[%s9406_s9 + $0x594] ss:$100 sps:$4 sm:$0xff]  }
  0xa0   : > { %7516 = vmatpush3.bf16.msra.mxu0 %v8717_v16  ;;  %v8738_v16 = vld [vmem:[%s9406_s9 + $0xbc8] ss:$100 sps:$4 sm:$0xff]  }
  0xa1   : > { %7517 = vmatprep.subr.bf16.mxu0 %v8732_v21 }
  0xa4   : > { %7518 = vmatpush3.bf16.msra.mxu0 %v8733_v22 }
  0xa5   : > { %7727 = vmatprep.subr.bf16.mxu0 %v8748_v27  ;;  %v8744_v27 = vld [vmem:[%s9406_s9 + $0x24] ss:$100 sps:$4 sm:$0xff]  }
  0xa6   : > { %4508 = vmatmul.mubr.bf16.gmra.mrb[64].mxu1 %v8648_v17  ;;  %4605 = vmatmul.mubr.bf16.gmra.mrb[64].mxu0 %v8649_v18  ;;  %v8739_v17 = vld [vmem:[%s9406_s9 + $0x590] ss:$100 sps:$4 sm:$0xff]  }
  0xa7   : > { %4515 = vmatprep.mubr.bf16.mxu1 %v8654_v19  ;;  %4612 = vmatprep.mubr.bf16.mxu0 %v8656_v20 }
  0xae   : > { %4516 = vmatmul.mubr.bf16.gmra.mrb[68].mxu1 %v8658_v23  ;;  %4613 = vmatmul.mubr.bf16.gmra.mrb[68].mxu0 %v8659_v24 }
  0xaf   : > { %4523 = vmatprep.mubr.bf16.mxu1 %v8660_v25  ;;  %4620 = vmatprep.mubr.bf16.mxu0 %v8662_v26  ;;  %v8740_v26 = vld [vmem:[%s9406_s9 + $0x65c] ss:$100 sps:$4 sm:$0xff]  }
  0xb6   : > { %4524 = vmatmul.mubr.bf16.gmra.mrb[72].mxu1 %v8664_v28  ;;  %4621 = vmatmul.mubr.bf16.gmra.mrb[72].mxu0 %v8665_v29 }
  0xb7   : > { %4531 = vmatprep.mubr.bf16.mxu1 %v8670_v30  ;;  %4628 = vmatprep.mubr.bf16.mxu0 %v8672_v31 }
  0xbe   : > { %4532 = vmatmul.mubr.bf16.gmra.mrb[76].mxu1 %v8674_v32  ;;  %4629 = vmatmul.mubr.bf16.gmra.mrb[76].mxu0 %v8675_v33  ;;  %v8742_v32 = vld [vmem:[%s9406_s9 + $0x20] ss:$100 sps:$4 sm:$0xff]   ;;  %v8745_v33 = vld [vmem:[%s9406_s9 + $0x658] ss:$100 sps:$4 sm:$0xff]  }
  0xbf   : > { %4636 = vmatprep.mubr.bf16.mxu0 %v8676_v34  ;;  %4733 = vmatprep.mubr.bf16.mxu1 %v8680_v35 }
  0xc6   : > { %4637 = vmatmul.mubr.bf16.gmra.mrb[80].mxu0 %v8681_v37  ;;  %4734 = vmatmul.mubr.bf16.vlgmr.msra.gmra.mrb[80].mxu1 %v8678_v36 }
  0xc7   : > { %7616 = vmatpush3.bf16.msra.mxu1 %v8683_v38  ;;  %4644 = vmatprep.mubr.bf16.mxu0 %v8686_v39 }
  0xc8   : > { %4741 = vmatprep.mubr.bf16.mxu1 %v8688_v40  ;;  %7617 = vmatprep.subr.bf16.mxu1 %v8698_v41 }
  0xcb   : > { %7618 = vmatpush3.bf16.msra.mxu1 %v8699_v42  ;;  %v8749_v42 = vld [vmem:[%s11595_s1 + $0x300] sm:$0xff]  }
  0xcc   : > { %7619 = vmatprep.subr.bf16.mxu1 %v8714_v43  ;;  %v8750_v43 = vld [vmem:[%s9406_s9 + $0x724] ss:$100 sps:$4 sm:$0xff]  }
  0xce   : > { %4645 = vmatmul.mubr.bf16.gmra.mrb[84].mxu0 %v8690_v44  ;;  %4742 = vmatmul.mubr.bf16.gmra.mrb[84].mxu1 %v8691_v45 }
  0xcf   : > { %4652 = vmatprep.mubr.bf16.mxu0 %v8692_v46  ;;  %4749 = vmatprep.mubr.bf16.mxu1 %v8694_v47  ;;  %v8752_v46 = vld [vmem:[%s9406_s9 + $0xec] ss:$100 sps:$4 sm:$0xff]  }
  0xd0   : > { %7620 = vmatpush3.bf16.msra.mxu1 %v8715_v48  ;;  %v8764_v47 = vld [vmem:[%s11595_s1 + $0x348] sm:$0xff]  }
  0xd1   : > { %7621 = vmatprep.subr.bf16.mxu1 %v8730_v49 }
  0xd4   : > { %7622 = vmatpush3.bf16.msra.mxu1 %v8731_v52  ;;  %v8754_v52 = vld [vmem:[%s9406_s9 + $0x720] ss:$100 sps:$4 sm:$0xff]  }
  0xd5   : > { %7623 = vmatprep.subr.bf16.mxu1 %v8746_v53  ;;  %v8755_v53 = vld [vmem:[%s9406_s9 + $0xe8] ss:$100 sps:$4 sm:$0xff]  }
  0xd6   : > { %4653 = vmatmul.mubr.bf16.gmra.mrb[88].mxu0 %v8696_v50  ;;  %4750 = vmatmul.mubr.bf16.gmra.mrb[88].mxu1 %v8697_v51  ;;  %v8765_v50 = vld [vmem:[%s11595_s1 + $0x308] sm:$0xff]   ;;  %v8780_v51 = vld [vmem:[%s11595_s1 + $0x350] sm:$0xff]  }
  0xd7   : > { %4660 = vmatprep.mubr.bf16.mxu0 %v8702_v54  ;;  %4757 = vmatprep.mubr.bf16.mxu1 %v8704_v55 }
  0xd8   : > { %7624 = vmatpush3.bf16.msra.mxu1 %v8747_v56 }
  0xd9   : > { %7625 = vmatprep.subr.bf16.mxu1 %v8762_v57 }
  0xdc   : > { %7626 = vmatpush3.bf16.msra.mxu1 %v8763_v60 }
  0xdd   : > { %7627 = vmatprep.subr.bf16.mxu1 %v8778_v62  ;;  %v8756_v62 = vld [vmem:[%s9406_s9 + $0x7ec] ss:$100 sps:$4 sm:$0xff]  }
  0xde   : > { %4661 = vmatmul.mubr.bf16.gmra.mrb[92].mxu0 %v8706_v58  ;;  %4758 = vmatmul.mubr.bf16.gmra.mrb[92].mxu1 %v8707_v59 }
  0xdf   : > { %4668 = vmatprep.mubr.bf16.mxu0 %v8708_v61  ;;  %4765 = vmatprep.mubr.bf16.mxu1 %v8710_v63  ;;  %v8758_v63 = vld [vmem:[%s9406_s9 + $0x1b4] ss:$100 sps:$4 sm:$0xff]  }
  0xe0   : > { %7628 = vmatpush3.bf16.msra.mxu1 %v8779_v0 }
  0xe1   : > { %7629 = vmatprep.subr.bf16.mxu1 %v8794_v1 }
  0xe4   : > { %7630 = vmatpush3.bf16.msra.mxu1 %v8795_v2  ;;  %v8781_v2 = vld [vmem:[%s11595_s1 + $0x310] sm:$0xff]  }
  0xe5   : > { %7839 = vmatprep.subr.bf16.mxu1 %v8810_v3 }
  0xe6   : > { %4669 = vmatmul.mubr.bf16.gmra.mrb[96].mxu0 %v8712_v4  ;;  %4766 = vmatmul.mubr.bf16.gmra.mrb[96].mxu1 %v8713_v5  ;;  %v8796_v5 = vld [vmem:[%s11595_s1 + $0x358] sm:$0xff]  }
  0xe7   : > { %4676 = vmatprep.mubr.bf16.mxu0 %v8718_v6  ;;  %4773 = vmatprep.mubr.bf16.mxu1 %v8720_v7  ;;  %v8797_v6 = vld [vmem:[%s11595_s1 + $0x318] sm:$0xff]   ;;  %v8812_v7 = vld [vmem:[%s11595_s1 + $0x360] sm:$0xff]  }
  0xee   : > { %4677 = vmatmul.mubr.bf16.gmra.mrb[100].mxu0 %v8722_v8  ;;  %4774 = vmatmul.mubr.bf16.gmra.mrb[100].mxu1 %v8723_v9  ;;  %v8760_v8 = vld [vmem:[%s9406_s9 + $0x7e8] ss:$100 sps:$4 sm:$0xff]   ;;  %v8761_v9 = vld [vmem:[%s9406_s9 + $0x1b0] ss:$100 sps:$4 sm:$0xff]  }
  0xef   : > { %4684 = vmatprep.mubr.bf16.mxu0 %v8724_v10  ;;  %4781 = vmatprep.mubr.bf16.mxu1 %v8726_v11 }
  0xf6   : > { %4685 = vmatmul.mubr.bf16.gmra.mrb[104].mxu0 %v8728_v12  ;;  %4782 = vmatmul.mubr.bf16.gmra.mrb[104].mxu1 %v8729_v13 }
  0xf7   : > { %4692 = vmatprep.mubr.bf16.mxu0 %v8734_v14  ;;  %4789 = vmatprep.mubr.bf16.mxu1 %v8736_v15 }
  0xf9   : > { %v7143_v18 = vpop.f32.mrb[0].mxu1  ;;  %v7071_v19 = vpop.f32.mrb[0].mxu0 }
  0xfa   : > { %v7144_v20 = vpop.f32.mrb[1].mxu1  ;;  %v7072_v21 = vpop.f32.mrb[1].mxu0 }
  0xfb   : > { %v9787_v22 = vadd.f32 %v7144_v20, %v7143_v18  ;;  %v7146_v23 = vpop.f32.mrb[2].mxu1  ;;  %v9789_v24 = vadd.f32 %v7072_v21, %v7071_v19  ;;  %v7074_v25 = vpop.f32.mrb[2].mxu0  ;;  %v8766_v18 = vld [vmem:[%s9406_s9 + $0x8b4] ss:$100 sps:$4 sm:$0xff]   ;;  %v8768_v19 = vld [vmem:[%s9406_s9 + $0x27c] ss:$100 sps:$4 sm:$0xff]  }
  0xfc   : > { %v7147_v28 = vpop.f32.mrb[3].mxu1  ;;  %v7075_v29 = vpop.f32.mrb[3].mxu0 }
  0xfd   : > { %v9793_v30 = vadd.f32 %v7147_v28, %v7146_v23  ;;  %v9795_v31 = vadd.f32 %v7075_v29, %v7074_v25  ;;  %v8813_v23 = vld [vmem:[%s11595_s1 + $0x320] sm:$0xff]   ;;  %v8828_v25 = vld [vmem:[%s11595_s1 + $0x368] sm:$0xff]   ;;  %v8844_v29 = vld [vmem:[%s11595_s1 + $0x370] sm:$0xff]  }
  0xfe   : > { %4693 = vmatmul.mubr.bf16.gmra.mrb[108].mxu0 %v8738_v16  ;;  %4790 = vmatmul.mubr.bf16.gmra.mrb[108].mxu1 %v8739_v17  ;;  %v8829_v28 = vld [vmem:[%s11595_s1 + $0x328] sm:$0xff]  }
  0xff   : > { %4797 = vmatprep.mubr.bf16.mxu1 %v8740_v26  ;;  %4894 = vmatprep.mubr.bf16.mxu0 %v8744_v27 }
 0x101   : > { %v7149_v34 = vpop.f32.mrb[4].mxu1  ;;  %v7077_v35 = vpop.f32.mrb[4].mxu0 }
 0x102   : > { %v7150_v36 = vpop.f32.mrb[5].mxu1  ;;  %v7078_v37 = vpop.f32.mrb[5].mxu0 }
 0x103   : > { %v9799_v38 = vadd.f32 %v7150_v36, %v7149_v34  ;;  %v7152_v39 = vpop.f32.mrb[6].mxu1  ;;  %v9801_v40 = vadd.f32 %v7078_v37, %v7077_v35  ;;  %v7080_v41 = vpop.f32.mrb[6].mxu0  ;;  %v8771_v34 = vld [vmem:[%s9406_s9 + $0x278] ss:$100 sps:$4 sm:$0xff]  }
 0x104   : > { %v7153_v44 = vpop.f32.mrb[7].mxu1  ;;  %v7081_v45 = vpop.f32.mrb[7].mxu0 }
 0x105   : > { %v9811_v48 = vadd.f32 %v7153_v44, %v7152_v39  ;;  %v9813_v49 = vadd.f32 %v7081_v45, %v7080_v41 }
 0x106   : > { %4798 = vmatmul.mubr.bf16.gmra.mrb[112].mxu1 %v8745_v33  ;;  %4895 = vmatmul.mubr.bf16.vlgmr.msra.gmra.mrb[112].mxu0 %v8742_v32  ;;  %v9872_v32 = vld [vmem:[%s11596_s2] ss:$0 sm:$0xff]  ;;  %v8770_v33 = vld [vmem:[%s9406_s9 + $0x8b0] ss:$100 sps:$4 sm:$0xff]  }
 0x107   : > { %7728 = vmatpush3.bf16.msra.mxu0 %v8749_v42  ;;  %4805 = vmatprep.mubr.bf16.mxu1 %v8750_v43  ;;  %v4253_v41 = vadd.f32 %v9789_v24, %v9872_v32 }
 0x108   : > { %4902 = vmatprep.mubr.bf16.mxu0 %v8752_v46  ;;  %7729 = vmatprep.subr.bf16.mxu0 %v8764_v47  ;;  %v8772_v46 = vld [vmem:[%s9406_s9 + $0x97c] ss:$100 sps:$4 sm:$0xff]   ;;  %v8774_v47 = vld [vmem:[%s9406_s9 + $0x344] ss:$100 sps:$4 sm:$0xff]  }
 0x109   : > { %v7155_v54 = vpop.f32.mrb[8].mxu1  ;;  %v7083_v55 = vpop.f32.mrb[8].mxu0 }
 0x10a   : > { %v7156_v56 = vpop.f32.mrb[9].mxu1  ;;  %v7084_v57 = vpop.f32.mrb[9].mxu0 }
 0x10b   : > { %v9823_v58 = vadd.f32 %v7156_v56, %v7155_v54  ;;  %v7158_v59 = vpop.f32.mrb[10].mxu1  ;;  %v9825_v60 = vadd.f32 %v7084_v57, %v7083_v55  ;;  %v7086_v61 = vpop.f32.mrb[10].mxu0  ;;  %7730 = vmatpush3.bf16.msra.mxu0 %v8765_v50  ;;  %v8860_v56 = vld [vmem:[%s11595_s1 + $0x378] sm:$0xff]  }
 0x10c   : > { %v7159_v0 = vpop.f32.mrb[11].mxu1  ;;  %v7087_v1 = vpop.f32.mrb[11].mxu0  ;;  %7731 = vmatprep.subr.bf16.mxu0 %v8780_v51  ;;  %v8861_v57 = vld [vmem:[%s11595_s1 + $0x338] sm:$0xff]  }
 0x10d   : > { %v9832_v3 = vadd.f32 %v7159_v0, %v7158_v59  ;;  %v9834_v4 = vadd.f32 %v7087_v1, %v7086_v61  ;;  %v8776_v61 = vld [vmem:[%s9406_s9 + $0x978] ss:$100 sps:$4 sm:$0xff]  }
 0x10e   : > { %4806 = vmatmul.mubr.bf16.gmra.mrb[116].mxu1 %v8754_v52  ;;  %4903 = vmatmul.mubr.bf16.gmra.mrb[116].mxu0 %v8755_v53  ;;  %v8845_v52 = vld [vmem:[%s11595_s1 + $0x330] sm:$0xff]   ;;  %v4256_v53 = vadd.f32 %v9795_v31, %v9872_v32  ;;  %v8876_v31 = vld [vmem:[%s11595_s1 + $0x440] sm:$0xff]  }
 0x10f   : > { %4813 = vmatprep.mubr.bf16.mxu1 %v8756_v62  ;;  %4910 = vmatprep.mubr.bf16.mxu0 %v8758_v63  ;;  %v8777_v62 = vld [vmem:[%s9406_s9 + $0x340] ss:$100 sps:$4 sm:$0xff]  }
 0x110   : > { %7732 = vmatpush3.bf16.msra.mxu0 %v8781_v2 }
 0x111   : > { %v7161_v10 = vpop.f32.mrb[12].mxu1  ;;  %v7089_v11 = vpop.f32.mrb[12].mxu0  ;;  %7733 = vmatprep.subr.bf16.mxu0 %v8796_v5  ;;  %v4261_v5 = vadd.f32 %v9801_v40, %v9872_v32 }
 0x112   : > { %v7162_v12 = vpop.f32.mrb[13].mxu1  ;;  %v7090_v13 = vpop.f32.mrb[13].mxu0 }
 0x113   : > { %v9847_v14 = vadd.f32 %v7162_v12, %v7161_v10  ;;  %v7164_v15 = vpop.f32.mrb[14].mxu1  ;;  %v9849_v16 = vadd.f32 %v7090_v13, %v7089_v11  ;;  %v7092_v17 = vpop.f32.mrb[14].mxu0  ;;  %v8782_v10 = vld [vmem:[%s9406_s9 + $0xa44] ss:$100 sps:$4 sm:$0xff]   ;;  %v8784_v11 = vld [vmem:[%s9406_s9 + $0x40c] ss:$100 sps:$4 sm:$0xff]  }
 0x114   : > { %v7165_v20 = vpop.f32.mrb[15].mxu1  ;;  %v7093_v21 = vpop.f32.mrb[15].mxu0  ;;  %7734 = vmatpush3.bf16.msra.mxu0 %v8797_v6 }
 0x115   : > { %v9859_v26 = vadd.f32 %v7165_v20, %v7164_v15  ;;  %v9861_v27 = vadd.f32 %v7093_v21, %v7092_v17  ;;  %7735 = vmatprep.subr.bf16.mxu0 %v8812_v7  ;;  %v4264_v15 = vadd.f32 %v9813_v49, %v9872_v32  ;;  %v8786_v20 = vld [vmem:[%s9406_s9 + $0xa40] ss:$100 sps:$4 sm:$0xff]   ;;  %v8787_v21 = vld [vmem:[%s9406_s9 + $0x408] ss:$100 sps:$4 sm:$0xff]  }
 0x116   : > { %4814 = vmatmul.mubr.bf16.gmra.mrb[120].mxu1 %v8760_v8  ;;  %4911 = vmatmul.mubr.bf16.gmra.mrb[120].mxu0 %v8761_v9 }
 0x117   : > { %4821 = vmatprep.mubr.bf16.mxu1 %v8766_v18  ;;  %4918 = vmatprep.mubr.bf16.mxu0 %v8768_v19 }
 0x118   : > { %7736 = vmatpush3.bf16.msra.mxu0 %v8813_v23 }
 0x119   : > { %v7183_v35 = vpop.f32.mrb[16].mxu1  ;;  %v7095_v36 = vpop.f32.mrb[16].mxu0  ;;  %7737 = vmatprep.subr.bf16.mxu0 %v8828_v25 }
 0x11a   : > { %v7184_v37 = vpop.f32.mrb[17].mxu1  ;;  %v7096_v39 = vpop.f32.mrb[17].mxu0 }
 0x11b   : > { %v7185_v42 = vadd.f32 %v7184_v37, %v7183_v35  ;;  %v7186_v43 = vpop.f32.mrb[18].mxu1  ;;  %v9878_v44 = vadd.f32 %v7096_v39, %v7095_v36  ;;  %v7098_v45 = vpop.f32.mrb[18].mxu0  ;;  %v8788_v37 = vld [vmem:[%s9406_s9 + $0xb0c] ss:$100 sps:$4 sm:$0xff]   ;;  %v8790_v39 = vld [vmem:[%s9406_s9 + $0x4d4] ss:$100 sps:$4 sm:$0xff]  }
 0x11c   : > { %v7187_v50 = vpop.f32.mrb[19].mxu1  ;;  %v7099_v51 = vpop.f32.mrb[19].mxu0  ;;  %7738 = vmatpush3.bf16.msra.mxu0 %v8829_v28 }
 0x11d   : > { %v9887_v24 = vadd.f32 %v7185_v42, %v4253_v41  ;;  %v7188_v54 = vadd.f32 %v7187_v50, %v7186_v43  ;;  %v9889_v55 = vadd.f32 %v7099_v51, %v7098_v45  ;;  %7739 = vmatprep.subr.bf16.mxu0 %v8844_v29  ;;  %v4269_v29 = vadd.f32 %v9825_v60, %v9872_v32  ;;  %v8792_v50 = vld [vmem:[%s9406_s9 + $0xb08] ss:$100 sps:$4 sm:$0xff]   ;;  %v8793_v51 = vld [vmem:[%s9406_s9 + $0x4d0] ss:$100 sps:$4 sm:$0xff]  }
 0x11e   : > { %4822 = vmatmul.mubr.bf16.gmra.mrb[124].mxu1 %v8770_v33  ;;  %4919 = vmatmul.mubr.bf16.gmra.mrb[124].mxu0 %v8771_v34  ;;  %v4272_v43 = vadd.f32 %v9834_v4, %v9872_v32  ;;  %v4277_v4 = vadd.f32 %v9849_v16, %v9872_v32 }
 0x11f   : > { %v9897_v59 = vadd.f32 %v7188_v54, %v4256_v53  ;;  %4829 = vmatprep.mubr.bf16.mxu1 %v8772_v46  ;;  %4926 = vmatprep.mubr.bf16.mxu0 %v8774_v47 }
 0x120   : > { %7740 = vmatpush3.bf16.msra.mxu0 %v8845_v52 }
 0x121   : > { %v7189_v63 = vpop.f32.mrb[20].mxu1  ;;  %v7101_v0 = vpop.f32.mrb[20].mxu0  ;;  %7741 = vmatprep.subr.bf16.mxu0 %v8860_v56 }
 0x122   : > { %v7190_v1 = vpop.f32.mrb[21].mxu1  ;;  %v7102_v2 = vpop.f32.mrb[21].mxu0 }
 0x123   : > { %v7191_v6 = vadd.f32 %v7190_v1, %v7189_v63  ;;  %v7192_v7 = vpop.f32.mrb[22].mxu1  ;;  %v9906_v8 = vadd.f32 %v7102_v2, %v7101_v0  ;;  %v7104_v9 = vpop.f32.mrb[22].mxu0  ;;  %v8798_v63 = vld [vmem:[%s9406_s9 + $0xbd4] ss:$100 sps:$4 sm:$0xff]   ;;  %v8800_v0 = vld [vmem:[%s9406_s9 + $0x59c] ss:$100 sps:$4 sm:$0xff]  }
 0x124   : > { %v7193_v12 = vpop.f32.mrb[23].mxu1  ;;  %v7105_v13 = vpop.f32.mrb[23].mxu0  ;;  %7742 = vmatpush3.bf16.msra.mxu0 %v8861_v57 }
 0x125   : > { %v9912_v17 = vadd.f32 %v7191_v6, %v4261_v5  ;;  %v7194_v18 = vadd.f32 %v7193_v12, %v7192_v7  ;;  %v9914_v19 = vadd.f32 %v7105_v13, %v7104_v9  ;;  %7951 = vmatprep.subr.bf16.mxu0 %v8876_v31  ;;  %v4280_v5 = vadd.f32 %v9861_v27, %v9872_v32 }
 0x126   : > { %4830 = vmatmul.mubr.bf16.gmra.mrb[128].mxu1 %v8776_v61  ;;  %4927 = vmatmul.mubr.bf16.gmra.mrb[128].mxu0 %v8777_v62  ;;  %v4285_v27 = vadd.f32 %v9878_v44, %v9872_v32 }
 0x127   : > { %v9916_v40 = vadd.f32 %v7194_v18, %v4264_v15  ;;  %4837 = vmatprep.mubr.bf16.mxu1 %v8782_v10  ;;  %4934 = vmatprep.mubr.bf16.mxu0 %v8784_v11  ;;  %v8802_v10 = vld [vmem:[%s9406_s9 + $0xbd0] ss:$100 sps:$4 sm:$0xff]   ;;  %v8803_v11 = vld [vmem:[%s9406_s9 + $0x598] ss:$100 sps:$4 sm:$0xff]  }
 0x129   : > { %v7195_v23 = vpop.f32.mrb[24].mxu1  ;;  %v7107_v25 = vpop.f32.mrb[24].mxu0 }
 0x12a   : > { %v7196_v28 = vpop.f32.mrb[25].mxu1  ;;  %v7108_v49 = vpop.f32.mrb[25].mxu0 }
 0x12b   : > { %v7197_v33 = vadd.f32 %v7196_v28, %v7195_v23  ;;  %v7198_v34 = vpop.f32.mrb[26].mxu1  ;;  %v9922_v35 = vadd.f32 %v7108_v49, %v7107_v25  ;;  %v7110_v36 = vpop.f32.mrb[26].mxu0  ;;  %v8804_v28 = vld [vmem:[%s9406_s9 + $0x664] ss:$100 sps:$4 sm:$0xff]   ;;  %v8808_v49 = vld [vmem:[%s9406_s9 + $0x2c] ss:$100 sps:$4 sm:$0xff]  }
 0x12c   : > { %v7199_v41 = vpop.f32.mrb[27].mxu1  ;;  %v7111_v42 = vpop.f32.mrb[27].mxu0 }
 0x12d   : > { %v9928_v45 = vadd.f32 %v7197_v33, %v4269_v29  ;;  %v7200_v46 = vadd.f32 %v7199_v41, %v7198_v34  ;;  %v9930_v47 = vadd.f32 %v7111_v42, %v7110_v36  ;;  %v4288_v34 = vadd.f32 %v9889_v55, %v9872_v32  ;;  %v8806_v41 = vld [vmem:[%s9406_s9 + $0x28] ss:$100 sps:$4 sm:$0xff]   ;;  %v8809_v42 = vld [vmem:[%s9406_s9 + $0x660] ss:$100 sps:$4 sm:$0xff]  }
 0x12e   : > { %4838 = vmatmul.mubr.bf16.gmra.mrb[132].mxu1 %v8786_v20  ;;  %4935 = vmatmul.mubr.bf16.gmra.mrb[132].mxu0 %v8787_v21  ;;  %v4293_v55 = vadd.f32 %v9906_v8, %v9872_v32  ;;  %v4296_v8 = vadd.f32 %v9914_v19, %v9872_v32  ;;  %v8842_v19 = vld [vmem:[%s11595_s1 + $0x3d0] sm:$0xff]  }
 0x12f   : > { %v9932_v60 = vadd.f32 %v7200_v46, %v4272_v43  ;;  %4845 = vmatprep.mubr.bf16.mxu1 %v8788_v37  ;;  %4942 = vmatprep.mubr.bf16.mxu0 %v8790_v39 }
 0x131   : > { %v7201_v52 = vpop.f32.mrb[28].mxu1  ;;  %v7113_v53 = vpop.f32.mrb[28].mxu0 }
 0x132   : > { %v7202_v54 = vpop.f32.mrb[29].mxu1  ;;  %v7114_v56 = vpop.f32.mrb[29].mxu0 }
 0x133   : > { %v7203_v57 = vadd.f32 %v7202_v54, %v7201_v52  ;;  %v7204_v31 = vpop.f32.mrb[30].mxu1  ;;  %v9938_v61 = vadd.f32 %v7114_v56, %v7113_v53  ;;  %v7116_v62 = vpop.f32.mrb[30].mxu0 }
 0x134   : > { %v7205_v1 = vpop.f32.mrb[31].mxu1  ;;  %v7117_v2 = vpop.f32.mrb[31].mxu0 }
 0x135   : > { %v9944_v6 = vadd.f32 %v7203_v57, %v4277_v4  ;;  %v7206_v7 = vadd.f32 %v7205_v1, %v7204_v31  ;;  %v9946_v9 = vadd.f32 %v7117_v2, %v7116_v62  ;;  %v8811_v4 = vld [vmem:[%s11595_s1 + $0x380] sm:$0xff]   ;;  %v8814_v57 = vld [vmem:[%s9406_s9 + $0x72c] ss:$100 sps:$4 sm:$0xff]  }
 0x136   : > { %4846 = vmatmul.mubr.bf16.gmra.mrb[136].mxu1 %v8792_v50  ;;  %4943 = vmatmul.mubr.bf16.gmra.mrb[136].mxu0 %v8793_v51 }
 0x137   : > { %v9948_v16 = vadd.f32 %v7206_v7, %v4280_v5  ;;  %4853 = vmatprep.mubr.bf16.mxu1 %v8798_v63  ;;  %4950 = vmatprep.mubr.bf16.mxu0 %v8800_v0  ;;  %v8816_v63 = vld [vmem:[%s9406_s9 + $0xf4] ss:$100 sps:$4 sm:$0xff]   ;;  %v8826_v0 = vld [vmem:[%s11595_s1 + $0x3c8] sm:$0xff]  }
 0x139   : > { %v7207_v12 = vpop.f32.mrb[32].mxu1  ;;  %v7119_v13 = vpop.f32.mrb[32].mxu0 }
 0x13a   : > { %v7208_v15 = vpop.f32.mrb[33].mxu1  ;;  %v7120_v18 = vpop.f32.mrb[33].mxu0 }
 0x13b   : > { %v7209_v20 = vadd.f32 %v7208_v15, %v7207_v12  ;;  %v7210_v21 = vpop.f32.mrb[34].mxu1  ;;  %v9954_v23 = vadd.f32 %v7120_v18, %v7119_v13  ;;  %v7122_v25 = vpop.f32.mrb[34].mxu0  ;;  %v8819_v12 = vld [vmem:[%s9406_s9 + $0xf0] ss:$100 sps:$4 sm:$0xff]  }
 0x13c   : > { %v7211_v29 = vpop.f32.mrb[35].mxu1  ;;  %v7123_v33 = vpop.f32.mrb[35].mxu0 }
 0x13d   : > { %v9960_v36 = vadd.f32 %v7209_v20, %v4285_v27  ;;  %v7212_v37 = vadd.f32 %v7211_v29, %v7210_v21  ;;  %v9962_v39 = vadd.f32 %v7123_v33, %v7122_v25  ;;  %v4301_v20 = vadd.f32 %v9922_v35, %v9872_v32  ;;  %v8820_v29 = vld [vmem:[%s9406_s9 + $0x7f4] ss:$100 sps:$4 sm:$0xff]   ;;  %v8822_v33 = vld [vmem:[%s9406_s9 + $0x1bc] ss:$100 sps:$4 sm:$0xff]  }
 0x13e   : > { %4854 = vmatmul.mubr.bf16.gmra.mrb[140].mxu1 %v8802_v10  ;;  %4951 = vmatmul.mubr.bf16.gmra.mrb[140].mxu0 %v8803_v11  ;;  %v8827_v10 = vld [vmem:[%s11595_s1 + $0x388] sm:$0xff]   ;;  %v4304_v35 = vadd.f32 %v9930_v47, %v9872_v32  ;;  %v8874_v47 = vld [vmem:[%s11595_s1 + $0x3e0] sm:$0xff]  }
 0x13f   : > { %v9964_v44 = vadd.f32 %v7212_v37, %v4288_v34  ;;  %4958 = vmatprep.mubr.bf16.mxu0 %v8804_v28  ;;  %5055 = vmatprep.mubr.bf16.mxu1 %v8808_v49  ;;  %v8818_v11 = vld [vmem:[%s9406_s9 + $0x728] ss:$100 sps:$4 sm:$0xff]  }
 0x141   : > { %v7213_v43 = vpop.f32.mrb[36].mxu1  ;;  %v7125_v46 = vpop.f32.mrb[36].mxu0 }
 0x142   : > { %v7214_v50 = vpop.f32.mrb[37].mxu1  ;;  %v7126_v51 = vpop.f32.mrb[37].mxu0 }
 0x143   : > { %v7215_v52 = vadd.f32 %v7214_v50, %v7213_v43  ;;  %v7216_v53 = vpop.f32.mrb[38].mxu1  ;;  %v9970_v54 = vadd.f32 %v7126_v51, %v7125_v46  ;;  %v7128_v56 = vpop.f32.mrb[38].mxu0  ;;  %v8858_v50 = vld [vmem:[%s11595_s1 + $0x3d8] sm:$0xff]  }
 0x144   : > { %v7217_v31 = vpop.f32.mrb[39].mxu1  ;;  %v7129_v62 = vpop.f32.mrb[39].mxu0  ;;  %v8859_v51 = vld [vmem:[%s11595_s1 + $0x398] sm:$0xff]  }
 0x145   : > { %v9982_v1 = vadd.f32 %v7215_v52, %v4293_v55  ;;  %v7218_v2 = vadd.f32 %v7217_v31, %v7216_v53  ;;  %v9984_v5 = vadd.f32 %v7129_v62, %v7128_v56  ;;  %v8824_v52 = vld [vmem:[%s9406_s9 + $0x7f0] ss:$100 sps:$4 sm:$0xff]   ;;  %v8825_v53 = vld [vmem:[%s9406_s9 + $0x1b8] ss:$100 sps:$4 sm:$0xff]   ;;  %v4309_v62 = vadd.f32 %v9938_v61, %v9872_v32  ;;  %v8890_v61 = vld [vmem:[%s11595_s1 + $0x3e8] sm:$0xff]  }
 0x146   : > { %4959 = vmatmul.mubr.bf16.gmra.mrb[144].mxu0 %v8809_v42  ;;  %5056 = vmatmul.mubr.bf16.vlgmr.msra.gmra.mrb[144].mxu1 %v8806_v41  ;;  %v8843_v41 = vld [vmem:[%s11595_s1 + $0x390] sm:$0xff]  }
 0x147   : > { %v9986_v7 = vadd.f32 %v7218_v2, %v4296_v8  ;;  %7840 = vmatpush3.bf16.msra.mxu1 %v8811_v4  ;;  %4966 = vmatprep.mubr.bf16.mxu0 %v8814_v57 }
 0x148   : > { %5063 = vmatprep.mubr.bf16.mxu1 %v8816_v63  ;;  %7841 = vmatprep.subr.bf16.mxu1 %v8826_v0 }
 0x149   : > { %v7219_v13 = vpop.f32.mrb[40].mxu1  ;;  %v7131_v15 = vpop.f32.mrb[40].mxu0 }
 0x14a   : > { %v7220_v18 = vpop.f32.mrb[41].mxu1  ;;  %v7132_v27 = vpop.f32.mrb[41].mxu0 }
 0x14b   : > { %v7221_v21 = vadd.f32 %v7220_v18, %v7219_v13  ;;  %v7222_v25 = vpop.f32.mrb[42].mxu1  ;;  %v9998_v28 = vadd.f32 %v7132_v27, %v7131_v15  ;;  %v7134_v49 = vpop.f32.mrb[42].mxu0  ;;  %7842 = vmatpush3.bf16.msra.mxu1 %v8827_v10  ;;  %v8830_v10 = vld [vmem:[%s9406_s9 + $0x8bc] ss:$100 sps:$4 sm:$0xff]   ;;  %v4312_v15 = vadd.f32 %v9946_v9, %v9872_v32  ;;  %v8906_v9 = vld [vmem:[%s11595_s1 + $0x3f0] sm:$0xff]  }
 0x14c   : > { %v7223_v34 = vpop.f32.mrb[43].mxu1  ;;  %v7135_v37 = vpop.f32.mrb[43].mxu0  ;;  %7843 = vmatprep.subr.bf16.mxu1 %v8842_v19  ;;  %v8832_v19 = vld [vmem:[%s9406_s9 + $0x284] ss:$100 sps:$4 sm:$0xff]  }
 0x14d   : > { %v10007_v42 = vadd.f32 %v7221_v21, %v4301_v20  ;;  %v7224_v43 = vadd.f32 %v7223_v34, %v7222_v25  ;;  %v10009_v46 = vadd.f32 %v7135_v37, %v7134_v49  ;;  %v8875_v13 = vld [vmem:[%s11595_s1 + $0x3a0] sm:$0xff]   ;;  %v8891_v25 = vld [vmem:[%s11595_s1 + $0x3a8] sm:$0xff]   ;;  %v8834_v49 = vld [vmem:[%s9406_s9 + $0x8b8] ss:$100 sps:$4 sm:$0xff]  }
 0x14e   : > { %4967 = vmatmul.mubr.bf16.gmra.mrb[148].mxu0 %v8818_v11  ;;  %5064 = vmatmul.mubr.bf16.gmra.mrb[148].mxu1 %v8819_v12 }
 0x14f   : > { %v10017_v55 = vadd.f32 %v7224_v43, %v4304_v35  ;;  %4974 = vmatprep.mubr.bf16.mxu0 %v8820_v29  ;;  %5071 = vmatprep.mubr.bf16.mxu1 %v8822_v33  ;;  %v8835_v29 = vld [vmem:[%s9406_s9 + $0x280] ss:$100 sps:$4 sm:$0xff]   ;;  %v4317_v35 = vadd.f32 %v9954_v23, %v9872_v32 }
 0x150   : > { %7844 = vmatpush3.bf16.msra.mxu1 %v8843_v41 }
 0x151   : > { %v7225_v56 = vpop.f32.mrb[44].mxu1  ;;  %v7137_v4 = vpop.f32.mrb[44].mxu0  ;;  %7845 = vmatprep.subr.bf16.mxu1 %v8858_v50 }
 0x152   : > { %v7226_v57 = vpop.f32.mrb[45].mxu1  ;;  %v7138_v31 = vpop.f32.mrb[45].mxu0 }
 0x153   : > { %v7227_v63 = vadd.f32 %v7226_v57, %v7225_v56  ;;  %v7228_v0 = vpop.f32.mrb[46].mxu1  ;;  %v10026_v8 = vadd.f32 %v7138_v31, %v7137_v4  ;;  %v7140_v2 = vpop.f32.mrb[46].mxu0  ;;  %v4320_v56 = vadd.f32 %v9962_v39, %v9872_v32  ;;  %v8907_v31 = vld [vmem:[%s11595_s1 + $0x3b0] sm:$0xff]   ;;  %v8922_v39 = vld [vmem:[%s11595_s1 + $0x3f8] sm:$0xff]  }
 0x154   : > { %v7229_v11 = vpop.f32.mrb[47].mxu1  ;;  %v7141_v12 = vpop.f32.mrb[47].mxu0  ;;  %7846 = vmatpush3.bf16.msra.mxu1 %v8859_v51 }
 0x155   : > { %v10038_v18 = vadd.f32 %v7227_v63, %v4309_v62  ;;  %v7230_v27 = vadd.f32 %v7229_v11, %v7228_v0  ;;  %v10040_v20 = vadd.f32 %v7141_v12, %v7140_v2  ;;  %7847 = vmatprep.subr.bf16.mxu1 %v8874_v47  ;;  %v8923_v2 = vld [vmem:[%s11595_s1 + $0x3b8] sm:$0xff]   ;;  %v8840_v11 = vld [vmem:[%s9406_s9 + $0x980] ss:$100 sps:$4 sm:$0xff]   ;;  %v8841_v12 = vld [vmem:[%s9406_s9 + $0x348] ss:$100 sps:$4 sm:$0xff]  }
 0x156   : > { %4975 = vmatmul.mubr.bf16.gmra.mrb[152].mxu0 %v8824_v52  ;;  %5072 = vmatmul.mubr.bf16.gmra.mrb[152].mxu1 %v8825_v53  ;;  %v8836_v52 = vld [vmem:[%s9406_s9 + $0x984] ss:$100 sps:$4 sm:$0xff]   ;;  %v8838_v53 = vld [vmem:[%s9406_s9 + $0x34c] ss:$100 sps:$4 sm:$0xff]  }
 0x157   : > { %v10042_v21 = vadd.f32 %v7230_v27, %v4312_v15  ;;  %4982 = vmatprep.mubr.bf16.mxu0 %v8830_v10  ;;  %5079 = vmatprep.mubr.bf16.mxu1 %v8832_v19 }
 0x158   : > { %7848 = vmatpush3.bf16.msra.mxu1 %v8875_v13 }
 0x159   : > { %v7231_v33 = vpop.f32.mrb[48].mxu1  ;;  %v7295_v34 = vpop.f32.mrb[48].mxu0  ;;  %7849 = vmatprep.subr.bf16.mxu1 %v8890_v61 }
 0x15a   : > { %v7232_v37 = vpop.f32.mrb[49].mxu1  ;;  %v7296_v41 = vpop.f32.mrb[49].mxu0 }
 0x15b   : > { %v7233_v43 = vadd.f32 %v7232_v37, %v7231_v33  ;;  %v7297_v50 = vadd.f32 %v7296_v41, %v7295_v34  ;;  %v7234_v51 = vpop.f32.mrb[50].mxu1  ;;  %v7298_v47 = vpop.f32.mrb[50].mxu0  ;;  %v8846_v33 = vld [vmem:[%s9406_s9 + $0xa4c] ss:$100 sps:$4 sm:$0xff]   ;;  %v8848_v34 = vld [vmem:[%s9406_s9 + $0x414] ss:$100 sps:$4 sm:$0xff]   ;;  %v4328_v37 = vadd.f32 %v9984_v5, %v9872_v32 }
 0x15c   : > { %v7235_v4 = vpop.f32.mrb[51].mxu1  ;;  %v7299_v57 = vpop.f32.mrb[51].mxu0  ;;  %7850 = vmatpush3.bf16.msra.mxu1 %v8891_v25 }
 0x15d   : > { %v10061_v62 = vadd.f32 %v7233_v43, %v4317_v35  ;;  %v10064_v23 = vadd.f32 %v7297_v50, %v9887_v24  ;;  %v7236_v63 = vadd.f32 %v7235_v4, %v7234_v51  ;;  %v7300_v0 = vadd.f32 %v7299_v57, %v7298_v47  ;;  %7851 = vmatprep.subr.bf16.mxu1 %v8906_v9  ;;  %v8938_v24 = vld [vmem:[%s11595_s1 + $0x4c0] sm:$0xff]  }
 0x15e   : > { %4983 = vmatmul.mubr.bf16.gmra.mrb[156].mxu0 %v8834_v49  ;;  %5080 = vmatmul.mubr.bf16.gmra.mrb[156].mxu1 %v8835_v29 }
 0x15f   : > { %v10072_v10 = vadd.f32 %v7236_v63, %v4320_v56  ;;  %v10075_v19 = vadd.f32 %v7300_v0, %v9897_v59  ;;  %4990 = vmatprep.mubr.bf16.mxu0 %v8836_v52  ;;  %5087 = vmatprep.mubr.bf16.mxu1 %v8838_v53  ;;  %v4325_v59 = vadd.f32 %v9970_v54, %v9872_v32  ;;  %v8850_v52 = vld [vmem:[%s9406_s9 + $0xa48] ss:$100 sps:$4 sm:$0xff]   ;;  %v8851_v53 = vld [vmem:[%s9406_s9 + $0x410] ss:$100 sps:$4 sm:$0xff]  }
 0x160   : > { %7852 = vmatpush3.bf16.msra.mxu1 %v8907_v31  ;;  %v4333_v31 = vadd.f32 %v9998_v28, %v9872_v32 }
 0x161   : > { %v7237_v13 = vpop.f32.mrb[52].mxu1  ;;  %v7301_v61 = vpop.f32.mrb[52].mxu0  ;;  %7853 = vmatprep.subr.bf16.mxu1 %v8922_v39 }
 0x162   : > { %v7238_v15 = vpop.f32.mrb[53].mxu1  ;;  %v7302_v27 = vpop.f32.mrb[53].mxu0 }
 0x163   : > { %v7239_v25 = vadd.f32 %v7238_v15, %v7237_v13  ;;  %v7303_v9 = vadd.f32 %v7302_v27, %v7301_v61  ;;  %v7240_v49 = vpop.f32.mrb[54].mxu1  ;;  %v7304_v29 = vpop.f32.mrb[54].mxu0 }
 0x164   : > { %v7241_v41 = vpop.f32.mrb[55].mxu1  ;;  %v7305_v35 = vpop.f32.mrb[55].mxu0  ;;  %7854 = vmatpush3.bf16.msra.mxu1 %v8923_v2 }
 0x165   : > { %v10088_v43 = vadd.f32 %v7239_v25, %v4325_v59  ;;  %v10091_v50 = vadd.f32 %v7303_v9, %v9912_v17  ;;  %v7242_v54 = vadd.f32 %v7241_v41, %v7240_v49  ;;  %v7306_v51 = vadd.f32 %v7305_v35, %v7304_v29  ;;  %8063 = vmatprep.subr.bf16.mxu1 %v8938_v24  ;;  %v8852_v24 = vld [vmem:[%s9406_s9 + $0xb14] ss:$100 sps:$4 sm:$0xff]  }
 0x166   : > { %4991 = vmatmul.mubr.bf16.gmra.mrb[160].mxu0 %v8840_v11  ;;  %5088 = vmatmul.mubr.bf16.gmra.mrb[160].mxu1 %v8841_v12  ;;  %v4336_v11 = vadd.f32 %v10009_v46, %v9872_v32  ;;  %v8856_v46 = vld [vmem:[%s9406_s9 + $0xb10] ss:$100 sps:$4 sm:$0xff]   ;;  %v8857_v9 = vld [vmem:[%s9406_s9 + $0x4d8] ss:$100 sps:$4 sm:$0xff]  }
 0x167   : > { %v10093_v47 = vadd.f32 %v7242_v54, %v4328_v37  ;;  %v10096_v5 = vadd.f32 %v7306_v51, %v9916_v40  ;;  %4998 = vmatprep.mubr.bf16.mxu0 %v8846_v33  ;;  %5095 = vmatprep.mubr.bf16.mxu1 %v8848_v34  ;;  %v8854_v40 = vld [vmem:[%s9406_s9 + $0x4dc] ss:$100 sps:$4 sm:$0xff]   ;;  %v4341_v34 = vadd.f32 %v10026_v8, %v9872_v32 }
 0x168   : > { %v8862_v51 = vld [vmem:[%s9406_s9 + $0xbdc] ss:$100 sps:$4 sm:$0xff]  }
 0x169   : > { %v7243_v56 = vpop.f32.mrb[56].mxu1  ;;  %v7307_v4 = vpop.f32.mrb[56].mxu0 }
 0x16a   : > { %v7244_v17 = vpop.f32.mrb[57].mxu1  ;;  %v7308_v57 = vpop.f32.mrb[57].mxu0 }
 0x16b   : > { %v7245_v63 = vadd.f32 %v7244_v17, %v7243_v56  ;;  %v7309_v0 = vadd.f32 %v7308_v57, %v7307_v4  ;;  %v7246_v39 = vpop.f32.mrb[58].mxu1  ;;  %v7310_v2 = vpop.f32.mrb[58].mxu0 }
 0x16c   : > { %v7247_v12 = vpop.f32.mrb[59].mxu1  ;;  %v7311_v13 = vpop.f32.mrb[59].mxu0 }
 0x16d   : > { %v10106_v61 = vadd.f32 %v7245_v63, %v4333_v31  ;;  %v10109_v15 = vadd.f32 %v7309_v0, %v9928_v45  ;;  %v7248_v27 = vadd.f32 %v7247_v12, %v7246_v39  ;;  %v7312_v28 = vadd.f32 %v7311_v13, %v7310_v2  ;;  %v8867_v0 = vld [vmem:[%s9406_s9 + $0x5a0] ss:$100 sps:$4 sm:$0xff]  }
 0x16e   : > { %4999 = vmatmul.mubr.bf16.gmra.mrb[164].mxu0 %v8850_v52  ;;  %5096 = vmatmul.mubr.bf16.gmra.mrb[164].mxu1 %v8851_v53  ;;  %v8864_v52 = vld [vmem:[%s9406_s9 + $0x5a4] ss:$100 sps:$4 sm:$0xff]  }
 0x16f   : > { %v10111_v59 = vadd.f32 %v7248_v27, %v4336_v11  ;;  %v10114_v25 = vadd.f32 %v7312_v28, %v9932_v60  ;;  %5006 = vmatprep.mubr.bf16.mxu0 %v8852_v24  ;;  %5103 = vmatprep.mubr.bf16.mxu1 %v8854_v40  ;;  %v10125_v60 = vld [vmem:[%s11596_s2] ss:$0 sm:$0xff]  ;;  %v8868_v28 = vld [vmem:[%s9406_s9 + $0x66c] ss:$100 sps:$4 sm:$0xff]  }
 0x170   : > { %v4344_v53 = vadd.f32 %v10125_v60, %v10040_v20  ;;  %v8866_v20 = vld [vmem:[%s9406_s9 + $0xbd8] ss:$100 sps:$4 sm:$0xff]   ;;  %v4349_v40 = vadd.f32 %v10125_v60, %v9787_v22 }
 0x171   : > { %v7249_v49 = vpop.f32.mrb[60].mxu1  ;;  %v7313_v29 = vpop.f32.mrb[60].mxu0 }
 0x172   : > { %v7250_v33 = vpop.f32.mrb[61].mxu1  ;;  %v7314_v45 = vpop.f32.mrb[61].mxu0 }
 0x173   : > { %v7251_v37 = vadd.f32 %v7250_v33, %v7249_v49  ;;  %v7315_v41 = vadd.f32 %v7314_v45, %v7313_v29  ;;  %v7252_v35 = vpop.f32.mrb[62].mxu1  ;;  %v7316_v54 = vpop.f32.mrb[62].mxu0 }
 0x174   : > { %v7253_v56 = vpop.f32.mrb[63].mxu1  ;;  %v7317_v4 = vpop.f32.mrb[63].mxu0 }
 0x175   : > { %v10129_v17 = vadd.f32 %v7251_v37, %v4341_v34  ;;  %v10132_v32 = vadd.f32 %v7315_v41, %v9944_v6  ;;  %v7254_v8 = vadd.f32 %v7253_v56, %v7252_v35  ;;  %v7318_v57 = vadd.f32 %v7317_v4, %v7316_v54  ;;  %v8873_v41 = vld [vmem:[%s9406_s9 + $0x668] ss:$100 sps:$4 sm:$0xff]  }
 0x176   : > { %5007 = vmatmul.mubr.bf16.gmra.mrb[168].mxu0 %v8856_v46  ;;  %5104 = vmatmul.mubr.bf16.gmra.mrb[168].mxu1 %v8857_v9  ;;  %v4352_v46 = vadd.f32 %v10125_v60, %v9793_v30  ;;  %v8870_v30 = vld [vmem:[%s9406_s9 + $0x30] ss:$100 sps:$4 sm:$0xff]  }
 0x177   : > { %v10134_v31 = vadd.f32 %v7254_v8, %v4344_v53  ;;  %v10137_v63 = vadd.f32 %v7318_v57, %v9948_v16  ;;  %5014 = vmatprep.mubr.bf16.mxu0 %v8862_v51  ;;  %5111 = vmatprep.mubr.bf16.mxu1 %v8864_v52  ;;  %v8872_v16 = vld [vmem:[%s9406_s9 + $0x34] ss:$100 sps:$4 sm:$0xff]   ;;  %v4357_v52 = vadd.f32 %v10125_v60, %v9799_v38  ;;  %v8892_v38 = vld [vmem:[%s11595_s1 + $0x448] sm:$0xff]  }
 0x178   : > { %v8878_v57 = vld [vmem:[%s9406_s9 + $0x734] ss:$100 sps:$4 sm:$0xff]  }
 0x179   : > { %v7255_v39 = vpop.f32.mrb[64].mxu1  ;;  %v7319_v2 = vpop.f32.mrb[64].mxu0 }
 0x17a   : > { %v7256_v24 = vpop.f32.mrb[65].mxu1  ;;  %v7320_v6 = vpop.f32.mrb[65].mxu0 }
 0x17b   : > { %v7257_v11 = vadd.f32 %v7256_v24, %v7255_v39  ;;  %v7321_v12 = vadd.f32 %v7320_v6, %v7319_v2  ;;  %v7258_v13 = vpop.f32.mrb[66].mxu1  ;;  %v7322_v27 = vpop.f32.mrb[66].mxu0  ;;  %v8880_v2 = vld [vmem:[%s9406_s9 + $0xfc] ss:$100 sps:$4 sm:$0xff]  }
 0x17c   : > { %v7259_v9 = vpop.f32.mrb[67].mxu1  ;;  %v7323_v49 = vpop.f32.mrb[67].mxu0 }
 0x17d   : > { %v10147_v29 = vadd.f32 %v7257_v11, %v4349_v40  ;;  %v10150_v33 = vadd.f32 %v7321_v12, %v9960_v36  ;;  %v7260_v45 = vadd.f32 %v7259_v9, %v7258_v13  ;;  %v7324_v22 = vadd.f32 %v7323_v49, %v7322_v27  ;;  %v8908_v12 = vld [vmem:[%s11595_s1 + $0x450] sm:$0xff]  }
 0x17e   : > { %5015 = vmatmul.mubr.bf16.gmra.mrb[172].mxu0 %v8866_v20  ;;  %5112 = vmatmul.mubr.bf16.gmra.mrb[172].mxu1 %v8867_v0  ;;  %v4360_v20 = vadd.f32 %v10125_v60, %v9811_v48  ;;  %v8893_v48 = vld [vmem:[%s11595_s1 + $0x408] sm:$0xff]  }
 0x17f   : > { %v10152_v34 = vadd.f32 %v7260_v45, %v4352_v46  ;;  %v10155_v37 = vadd.f32 %v7324_v22, %v9964_v44  ;;  %5119 = vmatprep.mubr.bf16.mxu1 %v8868_v28  ;;  %5216 = vmatprep.mubr.bf16.mxu0 %v8872_v16  ;;  %v8877_v44 = vld [vmem:[%s11595_s1 + $0x400] sm:$0xff]   ;;  %v8883_v28 = vld [vmem:[%s9406_s9 + $0xf8] ss:$100 sps:$4 sm:$0xff]   ;;  %v4365_v45 = vadd.f32 %v10125_v60, %v9823_v58 }
 0x181   : > { %v7261_v35 = vpop.f32.mrb[68].mxu1  ;;  %v7325_v54 = vpop.f32.mrb[68].mxu0 }
 0x182   : > { %v7262_v51 = vpop.f32.mrb[69].mxu1  ;;  %v7326_v36 = vpop.f32.mrb[69].mxu0 }
 0x183   : > { %v7263_v53 = vadd.f32 %v7262_v51, %v7261_v35  ;;  %v7327_v56 = vadd.f32 %v7326_v36, %v7325_v54  ;;  %v7264_v4 = vpop.f32.mrb[70].mxu1  ;;  %v7328_v8 = vpop.f32.mrb[70].mxu0  ;;  %v8884_v35 = vld [vmem:[%s9406_s9 + $0x7fc] ss:$100 sps:$4 sm:$0xff]   ;;  %v8886_v54 = vld [vmem:[%s9406_s9 + $0x1c4] ss:$100 sps:$4 sm:$0xff]   ;;  %v4368_v51 = vadd.f32 %v10125_v60, %v9832_v3 }
 0x184   : > { %v7265_v0 = vpop.f32.mrb[71].mxu1  ;;  %v7329_v39 = vpop.f32.mrb[71].mxu0  ;;  %v8924_v3 = vld [vmem:[%s11595_s1 + $0x458] sm:$0xff]  }
 0x185   : > { %v10171_v24 = vadd.f32 %v7263_v53, %v4357_v52  ;;  %v10174_v6 = vadd.f32 %v7327_v56, %v9982_v1  ;;  %v7266_v40 = vadd.f32 %v7265_v0, %v7264_v4  ;;  %v7330_v11 = vadd.f32 %v7329_v39, %v7328_v8  ;;  %v8882_v1 = vld [vmem:[%s9406_s9 + $0x730] ss:$100 sps:$4 sm:$0xff]   ;;  %v8888_v0 = vld [vmem:[%s9406_s9 + $0x7f8] ss:$100 sps:$4 sm:$0xff]   ;;  %v8889_v39 = vld [vmem:[%s9406_s9 + $0x1c0] ss:$100 sps:$4 sm:$0xff]  }
 0x186   : > { %5120 = vmatmul.mubr.bf16.gmra.mrb[176].mxu1 %v8873_v41  ;;  %5217 = vmatmul.mubr.bf16.vlgmr.msra.gmra.mrb[176].mxu0 %v8870_v30  ;;  %v8909_v53 = vld [vmem:[%s11595_s1 + $0x410] sm:$0xff]  }
 0x187   : > { %v10182_v13 = vadd.f32 %v7266_v40, %v4360_v20  ;;  %v10185_v27 = vadd.f32 %v7330_v11, %v9986_v7  ;;  %7952 = vmatpush3.bf16.msra.mxu0 %v8877_v44  ;;  %5127 = vmatprep.mubr.bf16.mxu1 %v8878_v57  ;;  %v8925_v44 = vld [vmem:[%s11595_s1 + $0x418] sm:$0xff]  }
 0x188   : > { %5224 = vmatprep.mubr.bf16.mxu0 %v8880_v2  ;;  %7953 = vmatprep.subr.bf16.mxu0 %v8892_v38 }
 0x189   : > { %v7267_v16 = vpop.f32.mrb[72].mxu1  ;;  %v7331_v46 = vpop.f32.mrb[72].mxu0 }
 0x18a   : > { %v7268_v9 = vpop.f32.mrb[73].mxu1  ;;  %v7332_v49 = vpop.f32.mrb[73].mxu0 }
 0x18b   : > { %v7269_v22 = vadd.f32 %v7268_v9, %v7267_v16  ;;  %v7333_v30 = vadd.f32 %v7332_v49, %v7331_v46  ;;  %v7270_v41 = vpop.f32.mrb[74].mxu1  ;;  %v7334_v7 = vpop.f32.mrb[74].mxu0  ;;  %7954 = vmatpush3.bf16.msra.mxu0 %v8893_v48  ;;  %v8894_v16 = vld [vmem:[%s9406_s9 + $0x8c4] ss:$100 sps:$4 sm:$0xff]   ;;  %v8896_v46 = vld [vmem:[%s9406_s9 + $0x28c] ss:$100 sps:$4 sm:$0xff]   ;;  %v4376_v9 = vadd.f32 %v10125_v60, %v9859_v26 }
 0x18c   : > { %v7271_v36 = vpop.f32.mrb[75].mxu1  ;;  %v7335_v52 = vpop.f32.mrb[75].mxu0  ;;  %7955 = vmatprep.subr.bf16.mxu0 %v8908_v12 }
 0x18d   : > { %v10198_v58 = vadd.f32 %v7269_v22, %v4365_v45  ;;  %v10201_v56 = vadd.f32 %v7333_v30, %v10007_v42  ;;  %v7272_v4 = vadd.f32 %v7271_v36, %v7270_v41  ;;  %v7336_v8 = vadd.f32 %v7335_v52, %v7334_v7  ;;  %v8940_v42 = vld [vmem:[%s11595_s1 + $0x460] sm:$0xff]   ;;  %v8899_v36 = vld [vmem:[%s9406_s9 + $0x288] ss:$100 sps:$4 sm:$0xff]  }
 0x18e   : > { %5128 = vmatmul.mubr.bf16.gmra.mrb[180].mxu1 %v8882_v1  ;;  %5225 = vmatmul.mubr.bf16.gmra.mrb[180].mxu0 %v8883_v28  ;;  %v8941_v22 = vld [vmem:[%s11595_s1 + $0x420] sm:$0xff]  }
 0x18f   : > { %v10209_v57 = vadd.f32 %v7272_v4, %v4368_v51  ;;  %v10212_v20 = vadd.f32 %v7336_v8, %v10017_v55  ;;  %5135 = vmatprep.mubr.bf16.mxu1 %v8884_v35  ;;  %5232 = vmatprep.mubr.bf16.mxu0 %v8886_v54  ;;  %v4373_v55 = vadd.f32 %v10125_v60, %v9847_v14  ;;  %v8956_v14 = vld [vmem:[%s11595_s1 + $0x468] sm:$0xff]   ;;  %v8898_v51 = vld [vmem:[%s9406_s9 + $0x8c0] ss:$100 sps:$4 sm:$0xff]  }
 0x190   : > { %7956 = vmatpush3.bf16.msra.mxu0 %v8909_v53  ;;  %v8957_v60 = vld [vmem:[%s11595_s1 + $0x428] sm:$0xff]  }
 0x191   : > { %v7273_v2 = vpop.f32.mrb[76].mxu1  ;;  %v7337_v38 = vpop.f32.mrb[76].mxu0  ;;  %7957 = vmatprep.subr.bf16.mxu0 %v8924_v3 }
 0x192   : > { %v7274_v40 = vpop.f32.mrb[77].mxu1  ;;  %v7338_v11 = vpop.f32.mrb[77].mxu0 }
 0x193   : > { %v7275_v48 = vadd.f32 %v7274_v40, %v7273_v2  ;;  %v7339_v12 = vadd.f32 %v7338_v11, %v7337_v38  ;;  %v7276_v1 = vpop.f32.mrb[78].mxu1  ;;  %v7340_v28 = vpop.f32.mrb[78].mxu0  ;;  %v8973_v40 = vld [vmem:[%s11595_s1 + $0x430] sm:$0xff]  }
 0x194   : > { %v7277_v49 = vpop.f32.mrb[79].mxu1  ;;  %v7341_v45 = vpop.f32.mrb[79].mxu0  ;;  %7958 = vmatpush3.bf16.msra.mxu0 %v8925_v44 }
 0x195   : > { %v10231_v30 = vadd.f32 %v7275_v48, %v4373_v55  ;;  %v10234_v41 = vadd.f32 %v7339_v12, %v10038_v18  ;;  %v7278_v7 = vadd.f32 %v7277_v49, %v7276_v1  ;;  %v7342_v26 = vadd.f32 %v7341_v45, %v7340_v28  ;;  %7959 = vmatprep.subr.bf16.mxu0 %v8940_v42  ;;  %v8972_v18 = vld [vmem:[%s11595_s1 + $0x470] sm:$0xff]   ;;  %v8988_v1 = vld [vmem:[%s11595_s1 + $0x478] sm:$0xff]  }
 0x196   : > { %5136 = vmatmul.mubr.bf16.gmra.mrb[184].mxu1 %v8888_v0  ;;  %5233 = vmatmul.mubr.bf16.gmra.mrb[184].mxu0 %v8889_v39  ;;  %v8900_v0 = vld [vmem:[%s9406_s9 + $0x98c] ss:$100 sps:$4 sm:$0xff]   ;;  %v8902_v39 = vld [vmem:[%s9406_s9 + $0x354] ss:$100 sps:$4 sm:$0xff]  }
 0x197   : > { %v10239_v35 = vadd.f32 %v7278_v7, %v4376_v9  ;;  %v10242_v54 = vadd.f32 %v7342_v26, %v10042_v21  ;;  %5143 = vmatprep.mubr.bf16.mxu1 %v8894_v16  ;;  %5240 = vmatprep.mubr.bf16.mxu0 %v8896_v46  ;;  %v8989_v28 = vld [vmem:[%s11595_s1 + $0x438] sm:$0xff]   ;;  %v8904_v46 = vld [vmem:[%s9406_s9 + $0x988] ss:$100 sps:$4 sm:$0xff]   ;;  %v8905_v9 = vld [vmem:[%s9406_s9 + $0x350] ss:$100 sps:$4 sm:$0xff]  }
 0x198   : > { %7960 = vmatpush3.bf16.msra.mxu0 %v8941_v22 }
 0x199   : > { %v7343_v52 = vpop.f32.mrb[80].mxu0  ;;  %v7407_v53 = vpop.f32.mrb[80].mxu1  ;;  %7961 = vmatprep.subr.bf16.mxu0 %v8956_v14 }
 0x19a   : > { %v7344_v4 = vpop.f32.mrb[81].mxu0  ;;  %v7408_v8 = vpop.f32.mrb[81].mxu1 }
 0x19b   : > { %v7345_v3 = vadd.f32 %v7344_v4, %v7343_v52  ;;  %v7409_v44 = vadd.f32 %v7408_v8, %v7407_v53  ;;  %v7346_v21 = vpop.f32.mrb[82].mxu0  ;;  %v7410_v42 = vpop.f32.mrb[82].mxu1 }
 0x19c   : > { %v7347_v2 = vpop.f32.mrb[83].mxu0  ;;  %v7411_v38 = vpop.f32.mrb[83].mxu1  ;;  %7962 = vmatpush3.bf16.msra.mxu0 %v8957_v60  ;;  %v8910_v60 = vld [vmem:[%s9406_s9 + $0xa54] ss:$100 sps:$4 sm:$0xff]  }
 0x19d   : > { %v10255_v11 = vadd.f32 %v7345_v3, %v10061_v62  ;;  %v10258_v55 = vadd.f32 %v7409_v44, %v10064_v23  ;;  %v7348_v48 = vadd.f32 %v7347_v2, %v7346_v21  ;;  %v7412_v12 = vadd.f32 %v7411_v38, %v7410_v42  ;;  %7963 = vmatprep.subr.bf16.mxu0 %v8972_v18  ;;  %v9004_v23 = vld [vmem:[%s11595_s1 + $0x540] sm:$0xff]   ;;  %v8915_v21 = vld [vmem:[%s9406_s9 + $0x418] ss:$100 sps:$4 sm:$0xff]  }
 0x19e   : > { %5144 = vmatmul.mubr.bf16.gmra.mrb[188].mxu1 %v8898_v51  ;;  %5241 = vmatmul.mubr.bf16.gmra.mrb[188].mxu0 %v8899_v36  ;;  %v8912_v18 = vld [vmem:[%s9406_s9 + $0x41c] ss:$100 sps:$4 sm:$0xff]  }
 0x19f   : > { %v10267_v16 = vadd.f32 %v7348_v48, %v10072_v10  ;;  %v10270_v62 = vadd.f32 %v7412_v12, %v10075_v19  ;;  %5151 = vmatprep.mubr.bf16.mxu1 %v8900_v0  ;;  %5248 = vmatprep.mubr.bf16.mxu0 %v8902_v39  ;;  %v8916_v12 = vld [vmem:[%s9406_s9 + $0xb1c] ss:$100 sps:$4 sm:$0xff]  }
 0x1a0   : > { %7964 = vmatpush3.bf16.msra.mxu0 %v8973_v40 }
 0x1a1   : > { %v7349_v49 = vpop.f32.mrb[84].mxu0  ;;  %v7413_v45 = vpop.f32.mrb[84].mxu1  ;;  %7965 = vmatprep.subr.bf16.mxu0 %v8988_v1  ;;  %v8918_v1 = vld [vmem:[%s9406_s9 + $0x4e4] ss:$100 sps:$4 sm:$0xff]  }
 0x1a2   : > { %v7350_v22 = vpop.f32.mrb[85].mxu0  ;;  %v7414_v10 = vpop.f32.mrb[85].mxu1 }
 0x1a3   : > { %v7351_v14 = vadd.f32 %v7350_v22, %v7349_v49  ;;  %v7415_v7 = vadd.f32 %v7414_v10, %v7413_v45  ;;  %v7352_v19 = vpop.f32.mrb[86].mxu0  ;;  %v7416_v26 = vpop.f32.mrb[86].mxu1 }
 0x1a4   : > { %v7353_v51 = vpop.f32.mrb[87].mxu0  ;;  %v7417_v36 = vpop.f32.mrb[87].mxu1  ;;  %7966 = vmatpush3.bf16.msra.mxu0 %v8989_v28 }
 0x1a5   : > { %v10280_v52 = vadd.f32 %v7351_v14, %v10088_v43  ;;  %v10283_v53 = vadd.f32 %v7415_v7, %v10091_v50  ;;  %v7354_v4 = vadd.f32 %v7353_v51, %v7352_v19  ;;  %v7418_v8 = vadd.f32 %v7417_v36, %v7416_v26  ;;  %8175 = vmatprep.subr.bf16.mxu0 %v9004_v23  ;;  %v8914_v43 = vld [vmem:[%s9406_s9 + $0xa50] ss:$100 sps:$4 sm:$0xff]   ;;  %v8921_v7 = vld [vmem:[%s9406_s9 + $0x4e0] ss:$100 sps:$4 sm:$0xff]  }
 0x1a6   : > { %5152 = vmatmul.mubr.bf16.gmra.mrb[192].mxu1 %v8904_v46  ;;  %5249 = vmatmul.mubr.bf16.gmra.mrb[192].mxu0 %v8905_v9  ;;  %v8926_v51 = vld [vmem:[%s9406_s9 + $0xbe4] ss:$100 sps:$4 sm:$0xff]   ;;  %v8928_v36 = vld [vmem:[%s9406_s9 + $0x5ac] ss:$100 sps:$4 sm:$0xff]  }
 0x1a7   : > { %v10286_v3 = vadd.f32 %v7354_v4, %v10093_v47  ;;  %v10289_v44 = vadd.f32 %v7418_v8, %v10096_v5  ;;  %5159 = vmatprep.mubr.bf16.mxu1 %v8910_v60  ;;  %5256 = vmatprep.mubr.bf16.mxu0 %v8912_v18 }
 0x1a9   : > { %v7355_v42 = vpop.f32.mrb[88].mxu0  ;;  %v7419_v50 = vpop.f32.mrb[88].mxu1 }
 0x1aa   : > { %v7356_v0 = vpop.f32.mrb[89].mxu0  ;;  %v7420_v39 = vpop.f32.mrb[89].mxu1 }
 0x1ab   : > { %v7357_v2 = vadd.f32 %v7356_v0, %v7355_v42  ;;  %v7421_v38 = vadd.f32 %v7420_v39, %v7419_v50  ;;  %v7358_v40 = vpop.f32.mrb[90].mxu0  ;;  %v7422_v48 = vpop.f32.mrb[90].mxu1 }
 0x1ac   : > { %v7359_v28 = vpop.f32.mrb[91].mxu0  ;;  %v7423_v47 = vpop.f32.mrb[91].mxu1 }
 0x1ad   : > { %v10296_v5 = vadd.f32 %v7357_v2, %v10106_v61  ;;  %v10299_v23 = vadd.f32 %v7421_v38, %v10109_v15  ;;  %v7360_v46 = vadd.f32 %v7359_v28, %v7358_v40  ;;  %v7424_v9 = vadd.f32 %v7423_v47, %v7422_v48  ;;  %v8920_v15 = vld [vmem:[%s9406_s9 + $0xb18] ss:$100 sps:$4 sm:$0xff]   ;;  %v8931_v38 = vld [vmem:[%s9406_s9 + $0x5a8] ss:$100 sps:$4 sm:$0xff]  }
 0x1ae   : > { %5160 = vmatmul.mubr.bf16.gmra.mrb[196].mxu1 %v8914_v43  ;;  %5257 = vmatmul.mubr.bf16.gmra.mrb[196].mxu0 %v8915_v21  ;;  %v8932_v28 = vld [vmem:[%s9406_s9 + $0x674] ss:$100 sps:$4 sm:$0xff]   ;;  %v8936_v47 = vld [vmem:[%s9406_s9 + $0x3c] ss:$100 sps:$4 sm:$0xff]  }
 0x1af   : > { %v10302_v49 = vadd.f32 %v7360_v46, %v10111_v59  ;;  %v10305_v45 = vadd.f32 %v7424_v9, %v10114_v25  ;;  %5167 = vmatprep.mubr.bf16.mxu1 %v8916_v12  ;;  %5264 = vmatprep.mubr.bf16.mxu0 %v8918_v1 }
 0x1b1   : > { %v7361_v22 = vpop.f32.mrb[92].mxu0  ;;  %v7425_v61 = vpop.f32.mrb[92].mxu1 }
 0x1b2   : > { %v7362_v10 = vpop.f32.mrb[93].mxu0  ;;  %v7426_v14 = vpop.f32.mrb[93].mxu1 }
 0x1b3   : > { %v7363_v19 = vadd.f32 %v7362_v10, %v7361_v22  ;;  %v7427_v26 = vadd.f32 %v7426_v14, %v7425_v61  ;;  %v7364_v60 = vpop.f32.mrb[94].mxu0  ;;  %v7428_v18 = vpop.f32.mrb[94].mxu1 }
 0x1b4   : > { %v7365_v4 = vpop.f32.mrb[95].mxu0  ;;  %v7429_v59 = vpop.f32.mrb[95].mxu1 }
 0x1b5   : > { %v10312_v25 = vadd.f32 %v7363_v19, %v10129_v17  ;;  %v10315_v8 = vadd.f32 %v7427_v26, %v10132_v32  ;;  %v7366_v43 = vadd.f32 %v7365_v4, %v7364_v60  ;;  %v7430_v21 = vadd.f32 %v7429_v59, %v7428_v18  ;;  %v8930_v32 = vld [vmem:[%s9406_s9 + $0xbe0] ss:$100 sps:$4 sm:$0xff]   ;;  %v8937_v26 = vld [vmem:[%s9406_s9 + $0x670] ss:$100 sps:$4 sm:$0xff]  }
 0x1b6   : > { %5168 = vmatmul.mubr.bf16.gmra.mrb[200].mxu1 %v8920_v15  ;;  %5265 = vmatmul.mubr.bf16.gmra.mrb[200].mxu0 %v8921_v7  ;;  %v8942_v4 = vld [vmem:[%s9406_s9 + $0x73c] ss:$100 sps:$4 sm:$0xff]  }
 0x1b7   : > { %v10318_v42 = vadd.f32 %v7366_v43, %v10134_v31  ;;  %v10321_v50 = vadd.f32 %v7430_v21, %v10137_v63  ;;  %5175 = vmatprep.mubr.bf16.mxu1 %v8926_v51  ;;  %5272 = vmatprep.mubr.bf16.mxu0 %v8928_v36  ;;  %v8944_v43 = vld [vmem:[%s9406_s9 + $0x104] ss:$100 sps:$4 sm:$0xff]  }
 0x1b8   : > { %v8954_v21 = vld [vmem:[%s11595_s1 + $0x4c8] sm:$0xff]  }
 0x1b9   : > { %v7367_v0 = vpop.f32.mrb[96].mxu0  ;;  %v7431_v17 = vpop.f32.mrb[96].mxu1 }
 0x1ba   : > { %v7368_v39 = vpop.f32.mrb[97].mxu0  ;;  %v7432_v2 = vpop.f32.mrb[97].mxu1 }
 0x1bb   : > { %v7369_v40 = vadd.f32 %v7368_v39, %v7367_v0  ;;  %v7433_v48 = vadd.f32 %v7432_v2, %v7431_v17  ;;  %v7370_v12 = vpop.f32.mrb[98].mxu0  ;;  %v7434_v1 = vpop.f32.mrb[98].mxu1 }
 0x1bc   : > { %v7371_v46 = vpop.f32.mrb[99].mxu0  ;;  %v7435_v31 = vpop.f32.mrb[99].mxu1 }
 0x1bd   : > { %v10328_v63 = vadd.f32 %v7369_v40, %v10147_v29  ;;  %v10331_v9 = vadd.f32 %v7433_v48, %v10150_v33  ;;  %v7372_v22 = vadd.f32 %v7371_v46, %v7370_v12  ;;  %v7436_v61 = vadd.f32 %v7435_v31, %v7434_v1  ;;  %v8934_v33 = vld [vmem:[%s9406_s9 + $0x38] ss:$100 sps:$4 sm:$0xff]   ;;  %v8947_v1 = vld [vmem:[%s9406_s9 + $0x100] ss:$100 sps:$4 sm:$0xff]  }
 0x1be   : > { %5176 = vmatmul.mubr.bf16.gmra.mrb[204].mxu1 %v8930_v32  ;;  %5273 = vmatmul.mubr.bf16.gmra.mrb[204].mxu0 %v8931_v38 }
 0x1bf   : > { %v10334_v10 = vadd.f32 %v7372_v22, %v10152_v34  ;;  %v10337_v14 = vadd.f32 %v7436_v61, %v10155_v37  ;;  %5280 = vmatprep.mubr.bf16.mxu0 %v8932_v28  ;;  %5377 = vmatprep.mubr.bf16.mxu1 %v8936_v47  ;;  %v8939_v34 = vld [vmem:[%s11595_s1 + $0x480] sm:$0xff]   ;;  %v8950_v61 = vld [vmem:[%s9406_s9 + $0x1cc] ss:$100 sps:$4 sm:$0xff]  }
 0x1c0   : > { %v8948_v22 = vld [vmem:[%s9406_s9 + $0x804] ss:$100 sps:$4 sm:$0xff]  }
 0x1c1   : > { %v7373_v15 = vpop.f32.mrb[100].mxu0  ;;  %v7437_v29 = vpop.f32.mrb[100].mxu1 }
 0x1c2   : > { %v7374_v7 = vpop.f32.mrb[101].mxu0  ;;  %v7438_v19 = vpop.f32.mrb[101].mxu1 }
 0x1c3   : > { %v7375_v60 = vadd.f32 %v7374_v7, %v7373_v15  ;;  %v7439_v18 = vadd.f32 %v7438_v19, %v7437_v29  ;;  %v7376_v51 = vpop.f32.mrb[102].mxu0  ;;  %v7440_v36 = vpop.f32.mrb[102].mxu1  ;;  %v8971_v7 = vld [vmem:[%s11595_s1 + $0x490] sm:$0xff]  }
 0x1c4   : > { %v7377_v37 = vpop.f32.mrb[103].mxu0  ;;  %v7441_v59 = vpop.f32.mrb[103].mxu1 }
 0x1c5   : > { %v10350_v0 = vadd.f32 %v7375_v60, %v10171_v24  ;;  %v10353_v17 = vadd.f32 %v7439_v18, %v10174_v6  ;;  %v7378_v39 = vadd.f32 %v7377_v37, %v7376_v51  ;;  %v7442_v2 = vadd.f32 %v7441_v59, %v7440_v36  ;;  %v8955_v24 = vld [vmem:[%s11595_s1 + $0x488] sm:$0xff]   ;;  %v8970_v6 = vld [vmem:[%s11595_s1 + $0x4d0] sm:$0xff]   ;;  %v8986_v18 = vld [vmem:[%s11595_s1 + $0x4d8] sm:$0xff]  }
 0x1c6   : > { %5281 = vmatmul.mubr.bf16.gmra.mrb[208].mxu0 %v8937_v26  ;;  %5378 = vmatmul.mubr.bf16.vlgmr.msra.gmra.mrb[208].mxu1 %v8934_v33  ;;  %v8953_v59 = vld [vmem:[%s9406_s9 + $0x1c8] ss:$100 sps:$4 sm:$0xff]  }
 0x1c7   : > { %v10356_v32 = vadd.f32 %v7378_v39, %v10182_v13  ;;  %v10359_v38 = vadd.f32 %v7442_v2, %v10185_v27  ;;  %8064 = vmatpush3.bf16.msra.mxu1 %v8939_v34  ;;  %5288 = vmatprep.mubr.bf16.mxu0 %v8942_v4  ;;  %v8946_v27 = vld [vmem:[%s9406_s9 + $0x738] ss:$100 sps:$4 sm:$0xff]  }
 0x1c8   : > { %5385 = vmatprep.mubr.bf16.mxu1 %v8944_v43  ;;  %8065 = vmatprep.subr.bf16.mxu1 %v8954_v21 }
 0x1c9   : > { %v7379_v40 = vpop.f32.mrb[104].mxu0  ;;  %v7443_v13 = vpop.f32.mrb[104].mxu1 }
 0x1ca   : > { %v7380_v48 = vpop.f32.mrb[105].mxu0  ;;  %v7444_v12 = vpop.f32.mrb[105].mxu1 }
 0x1cb   : > { %v7381_v28 = vadd.f32 %v7380_v48, %v7379_v40  ;;  %v7445_v47 = vadd.f32 %v7444_v12, %v7443_v13  ;;  %v7382_v46 = vpop.f32.mrb[106].mxu0  ;;  %v7446_v31 = vpop.f32.mrb[106].mxu1  ;;  %8066 = vmatpush3.bf16.msra.mxu1 %v8955_v24  ;;  %v8958_v24 = vld [vmem:[%s9406_s9 + $0x8cc] ss:$100 sps:$4 sm:$0xff]   ;;  %v9003_v48 = vld [vmem:[%s11595_s1 + $0x4a0] sm:$0xff]  }
 0x1cc   : > { %v7383_v15 = vpop.f32.mrb[107].mxu0  ;;  %v7447_v29 = vpop.f32.mrb[107].mxu1  ;;  %8067 = vmatprep.subr.bf16.mxu1 %v8970_v6  ;;  %v8960_v6 = vld [vmem:[%s9406_s9 + $0x294] ss:$100 sps:$4 sm:$0xff]  }
 0x1cd   : > { %v10375_v19 = vadd.f32 %v7381_v28, %v10198_v58  ;;  %v10378_v33 = vadd.f32 %v7445_v47, %v10201_v56  ;;  %v7384_v26 = vadd.f32 %v7383_v15, %v7382_v46  ;;  %v7448_v60 = vadd.f32 %v7447_v29, %v7446_v31  ;;  %v8987_v58 = vld [vmem:[%s11595_s1 + $0x498] sm:$0xff]   ;;  %v9018_v47 = vld [vmem:[%s11595_s1 + $0x4e8] sm:$0xff]   ;;  %v8963_v29 = vld [vmem:[%s9406_s9 + $0x290] ss:$100 sps:$4 sm:$0xff]  }
 0x1ce   : > { %5289 = vmatmul.mubr.bf16.gmra.mrb[212].mxu0 %v8946_v27  ;;  %5386 = vmatmul.mubr.bf16.gmra.mrb[212].mxu1 %v8947_v1 }
 0x1cf   : > { %v10384_v51 = vadd.f32 %v7384_v26, %v10209_v57  ;;  %v10387_v36 = vadd.f32 %v7448_v60, %v10212_v20  ;;  %5296 = vmatprep.mubr.bf16.mxu0 %v8948_v22  ;;  %5393 = vmatprep.mubr.bf16.mxu1 %v8950_v61  ;;  %v9002_v57 = vld [vmem:[%s11595_s1 + $0x4e0] sm:$0xff]  }
 0x1d0   : > { %8068 = vmatpush3.bf16.msra.mxu1 %v8971_v7  ;;  %v8952_v20 = vld [vmem:[%s9406_s9 + $0x800] ss:$100 sps:$4 sm:$0xff]  }
 0x1d1   : > { %v7385_v56 = vpop.f32.mrb[108].mxu0  ;;  %v7449_v34 = vpop.f32.mrb[108].mxu1  ;;  %8069 = vmatprep.subr.bf16.mxu1 %v8986_v18 }
 0x1d2   : > { %v7386_v4 = vpop.f32.mrb[109].mxu0  ;;  %v7450_v37 = vpop.f32.mrb[109].mxu1 }
 0x1d3   : > { %v7387_v43 = vadd.f32 %v7386_v4, %v7385_v56  ;;  %v7451_v21 = vadd.f32 %v7450_v37, %v7449_v34  ;;  %v7388_v39 = vpop.f32.mrb[110].mxu0  ;;  %v7452_v2 = vpop.f32.mrb[110].mxu1  ;;  %v8966_v56 = vld [vmem:[%s9406_s9 + $0x35c] ss:$100 sps:$4 sm:$0xff]   ;;  %v9035_v4 = vld [vmem:[%s11595_s1 + $0x4b0] sm:$0xff]  }
 0x1d4   : > { %v7389_v40 = vpop.f32.mrb[111].mxu0  ;;  %v7453_v13 = vpop.f32.mrb[111].mxu1  ;;  %8070 = vmatpush3.bf16.msra.mxu1 %v8987_v58  ;;  %v8964_v58 = vld [vmem:[%s9406_s9 + $0x994] ss:$100 sps:$4 sm:$0xff]  }
 0x1d5   : > { %v10403_v12 = vadd.f32 %v7387_v43, %v10231_v30  ;;  %v10406_v27 = vadd.f32 %v7451_v21, %v10234_v41  ;;  %v7390_v1 = vadd.f32 %v7389_v40, %v7388_v39  ;;  %v7454_v28 = vadd.f32 %v7453_v13, %v7452_v2  ;;  %8071 = vmatprep.subr.bf16.mxu1 %v9002_v57  ;;  %v9019_v41 = vld [vmem:[%s11595_s1 + $0x4a8] sm:$0xff]   ;;  %v9050_v21 = vld [vmem:[%s11595_s1 + $0x4f8] sm:$0xff]   ;;  %v8968_v13 = vld [vmem:[%s9406_s9 + $0x990] ss:$100 sps:$4 sm:$0xff]  }
 0x1d6   : > { %5297 = vmatmul.mubr.bf16.gmra.mrb[216].mxu0 %v8952_v20  ;;  %5394 = vmatmul.mubr.bf16.gmra.mrb[216].mxu1 %v8953_v59 }
 0x1d7   : > { %v10412_v46 = vadd.f32 %v7390_v1, %v10239_v35  ;;  %v10415_v30 = vadd.f32 %v7454_v28, %v10242_v54  ;;  %5304 = vmatprep.mubr.bf16.mxu0 %v8958_v24  ;;  %5401 = vmatprep.mubr.bf16.mxu1 %v8960_v6  ;;  %v9034_v35 = vld [vmem:[%s11595_s1 + $0x4f0] sm:$0xff]   ;;  %v8962_v54 = vld [vmem:[%s9406_s9 + $0x8c8] ss:$100 sps:$4 sm:$0xff]   ;;  %v9066_v6 = vld [vmem:[%s11595_s1 + $0x5c0] sm:$0xff]  }
 0x1d8   : > { %8072 = vmatpush3.bf16.msra.mxu1 %v9003_v48  ;;  %v8969_v48 = vld [vmem:[%s9406_s9 + $0x358] ss:$100 sps:$4 sm:$0xff]  }
 0x1d9   : > { %v7455_v31 = vpop.f32.mrb[112].mxu1  ;;  %v7519_v22 = vpop.f32.mrb[112].mxu0  ;;  %8073 = vmatprep.subr.bf16.mxu1 %v9018_v47 }
 0x1da   : > { %v7456_v61 = vpop.f32.mrb[113].mxu1  ;;  %v7520_v15 = vpop.f32.mrb[113].mxu0 }
 0x1db   : > { %v7457_v7 = vadd.f32 %v7456_v61, %v7455_v31  ;;  %v7521_v26 = vadd.f32 %v7520_v15, %v7519_v22  ;;  %v7458_v60 = vpop.f32.mrb[114].mxu1  ;;  %v7522_v18 = vpop.f32.mrb[114].mxu0  ;;  %v8976_v31 = vld [vmem:[%s9406_s9 + $0x424] ss:$100 sps:$4 sm:$0xff]  }
 0x1dc   : > { %v7459_v34 = vpop.f32.mrb[115].mxu1  ;;  %v7523_v57 = vpop.f32.mrb[115].mxu0  ;;  %8074 = vmatpush3.bf16.msra.mxu1 %v9019_v41  ;;  %v8974_v41 = vld [vmem:[%s9406_s9 + $0xa5c] ss:$100 sps:$4 sm:$0xff]  }
 0x1dd   : > { %v7460_v37 = vadd.f32 %v7459_v34, %v7458_v60  ;;  %v7524_v20 = vadd.f32 %v7523_v57, %v7522_v18  ;;  %v10431_v59 = vadd.f32 %v7457_v7, %v10255_v11  ;;  %v10434_v43 = vadd.f32 %v7521_v26, %v10258_v55  ;;  %8075 = vmatprep.subr.bf16.mxu1 %v9034_v35  ;;  %v9051_v55 = vld [vmem:[%s11595_s1 + $0x4b8] sm:$0xff]  }
 0x1de   : > { %5305 = vmatmul.mubr.bf16.gmra.mrb[220].mxu0 %v8962_v54  ;;  %5402 = vmatmul.mubr.bf16.gmra.mrb[220].mxu1 %v8963_v29 }
 0x1df   : > { %5312 = vmatprep.mubr.bf16.mxu0 %v8964_v58  ;;  %5409 = vmatprep.mubr.bf16.mxu1 %v8966_v56  ;;  %v10440_v39 = vadd.f32 %v7460_v37, %v10267_v16  ;;  %v10443_v11 = vadd.f32 %v7524_v20, %v10270_v62  ;;  %v8978_v56 = vld [vmem:[%s9406_s9 + $0xa58] ss:$100 sps:$4 sm:$0xff]   ;;  %v8980_v20 = vld [vmem:[%s9406_s9 + $0xb24] ss:$100 sps:$4 sm:$0xff]  }
 0x1e0   : > { %8076 = vmatpush3.bf16.msra.mxu1 %v9035_v4 }
 0x1e1   : > { %v7461_v2 = vpop.f32.mrb[116].mxu1  ;;  %v7525_v24 = vpop.f32.mrb[116].mxu0  ;;  %8077 = vmatprep.subr.bf16.mxu1 %v9050_v21  ;;  %v8982_v21 = vld [vmem:[%s9406_s9 + $0x4ec] ss:$100 sps:$4 sm:$0xff]  }
 0x1e2   : > { %v7462_v40 = vpop.f32.mrb[117].mxu1  ;;  %v7526_v16 = vpop.f32.mrb[117].mxu0 }
 0x1e3   : > { %v7463_v1 = vadd.f32 %v7462_v40, %v7461_v2  ;;  %v7527_v62 = vadd.f32 %v7526_v16, %v7525_v24  ;;  %v7464_v28 = vpop.f32.mrb[118].mxu1  ;;  %v7528_v47 = vpop.f32.mrb[118].mxu0 }
 0x1e4   : > { %v7465_v22 = vpop.f32.mrb[119].mxu1  ;;  %v7529_v35 = vpop.f32.mrb[119].mxu0  ;;  %8078 = vmatpush3.bf16.msra.mxu1 %v9051_v55 }
 0x1e5   : > { %v7466_v61 = vadd.f32 %v7465_v22, %v7464_v28  ;;  %v7530_v15 = vadd.f32 %v7529_v35, %v7528_v47  ;;  %v10456_v54 = vadd.f32 %v7463_v1, %v10280_v52  ;;  %v10459_v29 = vadd.f32 %v7527_v62, %v10283_v53  ;;  %8287 = vmatprep.subr.bf16.mxu1 %v9066_v6  ;;  %v8979_v53 = vld [vmem:[%s9406_s9 + $0x420] ss:$100 sps:$4 sm:$0xff]   ;;  %v8985_v28 = vld [vmem:[%s9406_s9 + $0x4e8] ss:$100 sps:$4 sm:$0xff]   ;;  %v8992_v35 = vld [vmem:[%s9406_s9 + $0x5b4] ss:$100 sps:$4 sm:$0xff]  }
 0x1e6   : > { %5313 = vmatmul.mubr.bf16.gmra.mrb[224].mxu0 %v8968_v13  ;;  %5410 = vmatmul.mubr.bf16.gmra.mrb[224].mxu1 %v8969_v48  ;;  %v8984_v62 = vld [vmem:[%s9406_s9 + $0xb20] ss:$100 sps:$4 sm:$0xff]   ;;  %v8990_v22 = vld [vmem:[%s9406_s9 + $0xbec] ss:$100 sps:$4 sm:$0xff]  }
 0x1e7   : > { %5320 = vmatprep.mubr.bf16.mxu0 %v8974_v41  ;;  %5417 = vmatprep.mubr.bf16.mxu1 %v8976_v31  ;;  %v10462_v7 = vadd.f32 %v7466_v61, %v10286_v3  ;;  %v10465_v26 = vadd.f32 %v7530_v15, %v10289_v44 }
 0x1e9   : > { %v7467_v60 = vpop.f32.mrb[120].mxu1  ;;  %v7531_v18 = vpop.f32.mrb[120].mxu0 }
 0x1ea   : > { %v7468_v52 = vpop.f32.mrb[121].mxu1  ;;  %v7532_v58 = vpop.f32.mrb[121].mxu0 }
 0x1eb   : > { %v7469_v34 = vadd.f32 %v7468_v52, %v7467_v60  ;;  %v7533_v57 = vadd.f32 %v7532_v58, %v7531_v18  ;;  %v7470_v4 = vpop.f32.mrb[122].mxu1  ;;  %v7534_v37 = vpop.f32.mrb[122].mxu0 }
 0x1ec   : > { %v7471_v55 = vpop.f32.mrb[123].mxu1  ;;  %v7535_v2 = vpop.f32.mrb[123].mxu0 }
 0x1ed   : > { %v7472_v3 = vadd.f32 %v7471_v55, %v7470_v4  ;;  %v7536_v24 = vadd.f32 %v7535_v2, %v7534_v37  ;;  %v10472_v44 = vadd.f32 %v7469_v34, %v10296_v5  ;;  %v10475_v6 = vadd.f32 %v7533_v57, %v10299_v23  ;;  %v8994_v57 = vld [vmem:[%s9406_s9 + $0xbe8] ss:$100 sps:$4 sm:$0xff]   ;;  %v8995_v4 = vld [vmem:[%s9406_s9 + $0x5b0] ss:$100 sps:$4 sm:$0xff]   ;;  %v8996_v55 = vld [vmem:[%s9406_s9 + $0x67c] ss:$100 sps:$4 sm:$0xff]  }
 0x1ee   : > { %5321 = vmatmul.mubr.bf16.gmra.mrb[228].mxu0 %v8978_v56  ;;  %5418 = vmatmul.mubr.bf16.gmra.mrb[228].mxu1 %v8979_v53  ;;  %v9000_v2 = vld [vmem:[%s9406_s9 + $0x44] ss:$100 sps:$4 sm:$0xff]  }
 0x1ef   : > { %5328 = vmatprep.mubr.bf16.mxu0 %v8980_v20  ;;  %5425 = vmatprep.mubr.bf16.mxu1 %v8982_v21  ;;  %v10478_v40 = vadd.f32 %v7472_v3, %v10302_v49  ;;  %v10481_v16 = vadd.f32 %v7536_v24, %v10305_v45 }
 0x1f1   : > { %v7473_v13 = vpop.f32.mrb[124].mxu1  ;;  %v7537_v48 = vpop.f32.mrb[124].mxu0 }
 0x1f2   : > { %v7474_v1 = vpop.f32.mrb[125].mxu1  ;;  %v7538_v5 = vpop.f32.mrb[125].mxu0 }
 0x1f3   : > { %v7475_v23 = vadd.f32 %v7474_v1, %v7473_v13  ;;  %v7539_v47 = vadd.f32 %v7538_v5, %v7537_v48  ;;  %v7476_v41 = vpop.f32.mrb[126].mxu1  ;;  %v7540_v31 = vpop.f32.mrb[126].mxu0 }
 0x1f4   : > { %v7477_v61 = vpop.f32.mrb[127].mxu1  ;;  %v7541_v15 = vpop.f32.mrb[127].mxu0 }
 0x1f5   : > { %v7478_v49 = vadd.f32 %v7477_v61, %v7476_v41  ;;  %v7542_v60 = vadd.f32 %v7541_v15, %v7540_v31  ;;  %v10488_v45 = vadd.f32 %v7475_v23, %v10312_v25  ;;  %v10491_v18 = vadd.f32 %v7539_v47, %v10315_v8  ;;  %v8998_v47 = vld [vmem:[%s9406_s9 + $0x40] ss:$100 sps:$4 sm:$0xff]   ;;  %v9001_v41 = vld [vmem:[%s9406_s9 + $0x678] ss:$100 sps:$4 sm:$0xff]  }
 0x1f6   : > { %5329 = vmatmul.mubr.bf16.gmra.mrb[232].mxu0 %v8984_v62  ;;  %5426 = vmatmul.mubr.bf16.gmra.mrb[232].mxu1 %v8985_v28  ;;  %v9005_v61 = vld [vmem:[%s11595_s1 + $0x500] sm:$0xff]  }
 0x1f7   : > { %5336 = vmatprep.mubr.bf16.mxu0 %v8990_v22  ;;  %5433 = vmatprep.mubr.bf16.mxu1 %v8992_v35  ;;  %v10494_v52 = vadd.f32 %v7478_v49, %v10318_v42  ;;  %v10497_v58 = vadd.f32 %v7542_v60, %v10321_v50  ;;  %v9008_v60 = vld [vmem:[%s9406_s9 + $0x10c] ss:$100 sps:$4 sm:$0xff]  }
 0x1f9   : > { %v7479_v56 = vpop.f32.mrb[128].mxu1  ;;  %v7543_v53 = vpop.f32.mrb[128].mxu0 }
 0x1fa   : > { %v7480_v34 = vpop.f32.mrb[129].mxu1  ;;  %v7544_v25 = vpop.f32.mrb[129].mxu0 }
 0x1fb   : > { %v7481_v8 = vadd.f32 %v7480_v34, %v7479_v56  ;;  %v7545_v37 = vadd.f32 %v7544_v25, %v7543_v53  ;;  %v7482_v20 = vpop.f32.mrb[130].mxu1  ;;  %v7546_v21 = vpop.f32.mrb[130].mxu0 }
 0x1fc   : > { %v7483_v3 = vpop.f32.mrb[131].mxu1  ;;  %v7547_v24 = vpop.f32.mrb[131].mxu0 }
 0x1fd   : > { %v7484_v42 = vadd.f32 %v7483_v3, %v7482_v20  ;;  %v7548_v13 = vadd.f32 %v7547_v24, %v7546_v21  ;;  %v10504_v50 = vadd.f32 %v7481_v8, %v10328_v63  ;;  %v10507_v48 = vadd.f32 %v7545_v37, %v10331_v9 }
 0x1fe   : > { %5337 = vmatmul.mubr.bf16.gmra.mrb[236].mxu0 %v8994_v57  ;;  %5434 = vmatmul.mubr.bf16.gmra.mrb[236].mxu1 %v8995_v4  ;;  %v9021_v57 = vld [vmem:[%s11595_s1 + $0x508] sm:$0xff]  }
 0x1ff   : > { %5441 = vmatprep.mubr.bf16.mxu1 %v8996_v55  ;;  %5538 = vmatprep.mubr.bf16.mxu0 %v9000_v2  ;;  %v10510_v1 = vadd.f32 %v7484_v42, %v10334_v10  ;;  %v10513_v5 = vadd.f32 %v7548_v13, %v10337_v14  ;;  %v9006_v10 = vld [vmem:[%s9406_s9 + $0x744] ss:$100 sps:$4 sm:$0xff]   ;;  %v9012_v13 = vld [vmem:[%s9406_s9 + $0x80c] ss:$100 sps:$4 sm:$0xff]  }
 0x200   : > { %v9020_v14 = vld [vmem:[%s11595_s1 + $0x548] sm:$0xff]   ;;  %v9010_v55 = vld [vmem:[%s9406_s9 + $0x740] ss:$100 sps:$4 sm:$0xff]  }
 0x201   : > { %v7485_v62 = vpop.f32.mrb[132].mxu1  ;;  %v7549_v28 = vpop.f32.mrb[132].mxu0  ;;  %v9011_v2 = vld [vmem:[%s9406_s9 + $0x108] ss:$100 sps:$4 sm:$0xff]  }
 0x202   : > { %v7486_v23 = vpop.f32.mrb[133].mxu1  ;;  %v7550_v63 = vpop.f32.mrb[133].mxu0 }
 0x203   : > { %v7487_v9 = vadd.f32 %v7486_v23, %v7485_v62  ;;  %v7551_v31 = vadd.f32 %v7550_v63, %v7549_v28  ;;  %v7488_v22 = vpop.f32.mrb[134].mxu1  ;;  %v7552_v35 = vpop.f32.mrb[134].mxu0  ;;  %v9014_v62 = vld [vmem:[%s9406_s9 + $0x1d4] ss:$100 sps:$4 sm:$0xff]  }
 0x204   : > { %v7489_v15 = vpop.f32.mrb[135].mxu1  ;;  %v7553_v49 = vpop.f32.mrb[135].mxu0  ;;  %v9037_v23 = vld [vmem:[%s11595_s1 + $0x510] sm:$0xff]  }
 0x205   : > { %v7490_v56 = vadd.f32 %v7489_v15, %v7488_v22  ;;  %v7554_v53 = vadd.f32 %v7553_v49, %v7552_v35  ;;  %v10526_v34 = vadd.f32 %v7487_v9, %v10350_v0  ;;  %v10529_v25 = vadd.f32 %v7551_v31, %v10353_v17  ;;  %v9036_v17 = vld [vmem:[%s11595_s1 + $0x550] sm:$0xff]   ;;  %v9016_v49 = vld [vmem:[%s9406_s9 + $0x808] ss:$100 sps:$4 sm:$0xff]  }
 0x206   : > { %5442 = vmatmul.mubr.bf16.gmra.mrb[240].mxu1 %v9001_v41  ;;  %5539 = vmatmul.mubr.bf16.vlgmr.msra.gmra.mrb[240].mxu0 %v8998_v47  ;;  %v9052_v41 = vld [vmem:[%s11595_s1 + $0x558] sm:$0xff]  }
 0x207   : > { %8176 = vmatpush3.bf16.msra.mxu0 %v9005_v61  ;;  %5449 = vmatprep.mubr.bf16.mxu1 %v9006_v10  ;;  %v10535_v4 = vadd.f32 %v7490_v56, %v10356_v32  ;;  %v10538_v0 = vadd.f32 %v7554_v53, %v10359_v38  ;;  %v9068_v10 = vld [vmem:[%s11595_s1 + $0x560] sm:$0xff]  }
 0x208   : > { %5546 = vmatprep.mubr.bf16.mxu0 %v9008_v60  ;;  %8177 = vmatprep.subr.bf16.mxu0 %v9020_v14  ;;  %v9017_v60 = vld [vmem:[%s9406_s9 + $0x1d0] ss:$100 sps:$4 sm:$0xff]  }
 0x209   : > { %v7491_v8 = vpop.f32.mrb[136].mxu1  ;;  %v7555_v37 = vpop.f32.mrb[136].mxu0 }
 0x20a   : > { %v7492_v20 = vpop.f32.mrb[137].mxu1  ;;  %v7556_v21 = vpop.f32.mrb[137].mxu0 }
 0x20b   : > { %v7493_v3 = vadd.f32 %v7492_v20, %v7491_v8  ;;  %v7557_v24 = vadd.f32 %v7556_v21, %v7555_v37  ;;  %v7494_v32 = vpop.f32.mrb[138].mxu1  ;;  %v7558_v42 = vpop.f32.mrb[138].mxu0  ;;  %8178 = vmatpush3.bf16.msra.mxu0 %v9021_v57  ;;  %v9022_v57 = vld [vmem:[%s9406_s9 + $0x8d4] ss:$100 sps:$4 sm:$0xff]   ;;  %v9069_v20 = vld [vmem:[%s11595_s1 + $0x520] sm:$0xff]  }
 0x20c   : > { %v7495_v38 = vpop.f32.mrb[139].mxu1  ;;  %v7559_v28 = vpop.f32.mrb[139].mxu0  ;;  %8179 = vmatprep.subr.bf16.mxu0 %v9036_v17  ;;  %v9024_v17 = vld [vmem:[%s9406_s9 + $0x29c] ss:$100 sps:$4 sm:$0xff]  }
 0x20d   : > { %v7496_v63 = vadd.f32 %v7495_v38, %v7494_v32  ;;  %v7560_v47 = vadd.f32 %v7559_v28, %v7558_v42  ;;  %v10554_v9 = vadd.f32 %v7493_v3, %v10375_v19  ;;  %v10557_v31 = vadd.f32 %v7557_v24, %v10378_v33  ;;  %v9053_v19 = vld [vmem:[%s11595_s1 + $0x518] sm:$0xff]   ;;  %v9084_v24 = vld [vmem:[%s11595_s1 + $0x568] sm:$0xff]   ;;  %v9026_v28 = vld [vmem:[%s9406_s9 + $0x8d0] ss:$100 sps:$4 sm:$0xff]  }
 0x20e   : > { %5450 = vmatmul.mubr.bf16.gmra.mrb[244].mxu1 %v9010_v55  ;;  %5547 = vmatmul.mubr.bf16.gmra.mrb[244].mxu0 %v9011_v2 }
 0x20f   : > { %5457 = vmatprep.mubr.bf16.mxu1 %v9012_v13  ;;  %5554 = vmatprep.mubr.bf16.mxu0 %v9014_v62  ;;  %v10560_v22 = vadd.f32 %v7496_v63, %v10384_v51  ;;  %v10563_v35 = vadd.f32 %v7560_v47, %v10387_v36  ;;  %v9100_v62 = vld [vmem:[%s11595_s1 + $0x570] sm:$0xff]  }
 0x210   : > { %8180 = vmatpush3.bf16.msra.mxu0 %v9037_v23  ;;  %v9027_v23 = vld [vmem:[%s9406_s9 + $0x298] ss:$100 sps:$4 sm:$0xff]  }
 0x211   : > { %v7497_v33 = vpop.f32.mrb[140].mxu1  ;;  %v7561_v61 = vpop.f32.mrb[140].mxu0  ;;  %8181 = vmatprep.subr.bf16.mxu0 %v9052_v41 }
 0x212   : > { %v7498_v15 = vpop.f32.mrb[141].mxu1  ;;  %v7562_v51 = vpop.f32.mrb[141].mxu0 }
 0x213   : > { %v7499_v14 = vadd.f32 %v7498_v15, %v7497_v33  ;;  %v7563_v36 = vadd.f32 %v7562_v51, %v7561_v61  ;;  %v7500_v56 = vpop.f32.mrb[142].mxu1  ;;  %v7564_v53 = vpop.f32.mrb[142].mxu0  ;;  %v9033_v33 = vld [vmem:[%s9406_s9 + $0x364] ss:$100 sps:$4 sm:$0xff]   ;;  %v9101_v15 = vld [vmem:[%s11595_s1 + $0x530] sm:$0xff]  }
 0x214   : > { %v7501_v8 = vpop.f32.mrb[143].mxu1  ;;  %v7565_v37 = vpop.f32.mrb[143].mxu0  ;;  %8182 = vmatpush3.bf16.msra.mxu0 %v9053_v19  ;;  %v9030_v19 = vld [vmem:[%s9406_s9 + $0x99c] ss:$100 sps:$4 sm:$0xff]  }
 0x215   : > { %v7502_v21 = vadd.f32 %v7501_v8, %v7500_v56  ;;  %v7566_v55 = vadd.f32 %v7565_v37, %v7564_v53  ;;  %8183 = vmatprep.subr.bf16.mxu0 %v9068_v10  ;;  %v10579_v2 = vadd.f32 %v7499_v14, %v10403_v12  ;;  %v10582_v3 = vadd.f32 %v7563_v36, %v10406_v27  ;;  %v9085_v27 = vld [vmem:[%s11595_s1 + $0x528] sm:$0xff]   ;;  %v9116_v36 = vld [vmem:[%s11595_s1 + $0x578] sm:$0xff]   ;;  %v9031_v37 = vld [vmem:[%s9406_s9 + $0x360] ss:$100 sps:$4 sm:$0xff]  }
 0x216   : > { %5458 = vmatmul.mubr.bf16.gmra.mrb[248].mxu1 %v9016_v49  ;;  %5555 = vmatmul.mubr.bf16.gmra.mrb[248].mxu0 %v9017_v60  ;;  %v9028_v8 = vld [vmem:[%s9406_s9 + $0x998] ss:$100 sps:$4 sm:$0xff]  }
 0x217   : > { %5465 = vmatprep.mubr.bf16.mxu1 %v9022_v57  ;;  %5562 = vmatprep.mubr.bf16.mxu0 %v9024_v17  ;;  %v10588_v32 = vadd.f32 %v7502_v21, %v10412_v46  ;;  %v10591_v12 = vadd.f32 %v7566_v55, %v10415_v30 }
 0x218   : > { %8184 = vmatpush3.bf16.msra.mxu0 %v9069_v20 }
 0x219   : > { %v7567_v42 = vpop.f32.mrb[144].mxu0  ;;  %v7631_v13 = vpop.f32.mrb[144].mxu1  ;;  %8185 = vmatprep.subr.bf16.mxu0 %v9084_v24 }
 0x21a   : > { %v7568_v38 = vpop.f32.mrb[145].mxu0  ;;  %v7632_v46 = vpop.f32.mrb[145].mxu1 }
 0x21b   : > { %v7569_v63 = vadd.f32 %v7568_v38, %v7567_v42  ;;  %v7633_v30 = vadd.f32 %v7632_v46, %v7631_v13  ;;  %v7570_v47 = vpop.f32.mrb[146].mxu0  ;;  %v7634_v41 = vpop.f32.mrb[146].mxu1  ;;  %v9043_v42 = vld [vmem:[%s9406_s9 + $0x42c] ss:$100 sps:$4 sm:$0xff]  }
 0x21c   : > { %v7571_v61 = vpop.f32.mrb[147].mxu0  ;;  %v7635_v10 = vpop.f32.mrb[147].mxu1  ;;  %8186 = vmatpush3.bf16.msra.mxu0 %v9085_v27  ;;  %v9040_v27 = vld [vmem:[%s9406_s9 + $0xa64] ss:$100 sps:$4 sm:$0xff]  }
 0x21d   : > { %v10607_v51 = vadd.f32 %v7569_v63, %v10431_v59  ;;  %v10610_v49 = vadd.f32 %v7633_v30, %v10434_v43  ;;  %v7572_v60 = vadd.f32 %v7571_v61, %v7570_v47  ;;  %v7636_v14 = vadd.f32 %v7635_v10, %v7634_v41  ;;  %8187 = vmatprep.subr.bf16.mxu0 %v9100_v62  ;;  %v9117_v43 = vld [vmem:[%s11595_s1 + $0x538] sm:$0xff]  }
 0x21e   : > { %5466 = vmatmul.mubr.bf16.gmra.mrb[252].mxu1 %v9026_v28  ;;  %5563 = vmatmul.mubr.bf16.gmra.mrb[252].mxu0 %v9027_v23 }
 0x21f   : > { %v10616_v56 = vadd.f32 %v7572_v60, %v10440_v39  ;;  %v10619_v59 = vadd.f32 %v7636_v14, %v10443_v11  ;;  %5473 = vmatprep.mubr.bf16.mxu1 %v9030_v19  ;;  %5570 = vmatprep.mubr.bf16.mxu0 %v9033_v33  ;;  %v10627_v39 = vld [vmem:[%s11595_s1 + $0x600] sm:$0xff]   ;;  %v9041_v33 = vld [vmem:[%s9406_s9 + $0x428] ss:$100 sps:$4 sm:$0xff]  }
 0x220   : > { %8188 = vmatpush3.bf16.msra.mxu0 %v9101_v15  ;;  %v9038_v19 = vld [vmem:[%s9406_s9 + $0xa60] ss:$100 sps:$4 sm:$0xff]   ;;  %v9046_v14 = vld [vmem:[%s9406_s9 + $0xb2c] ss:$100 sps:$4 sm:$0xff]  }
 0x221   : > { %v7573_v53 = vpop.f32.mrb[148].mxu0  ;;  %v7637_v57 = vpop.f32.mrb[148].mxu1  ;;  %8189 = vmatprep.subr.bf16.mxu0 %v9116_v36  ;;  %v9049_v36 = vld [vmem:[%s9406_s9 + $0x4f4] ss:$100 sps:$4 sm:$0xff]  }
 0x222   : > { %v7574_v17 = vpop.f32.mrb[149].mxu0  ;;  %v7638_v11 = vpop.f32.mrb[149].mxu1 }
 0x223   : > { %v7575_v20 = vadd.f32 %v7574_v17, %v7573_v53  ;;  %v7639_v21 = vadd.f32 %v7638_v11, %v7637_v57  ;;  %v7576_v55 = vpop.f32.mrb[150].mxu0  ;;  %v7640_v24 = vpop.f32.mrb[150].mxu1 }
 0x224   : > { %v7577_v13 = vpop.f32.mrb[151].mxu0  ;;  %v7641_v62 = vpop.f32.mrb[151].mxu1  ;;  %8190 = vmatpush3.bf16.msra.mxu0 %v9117_v43 }
 0x225   : > { %v10634_v38 = vadd.f32 %v7575_v20, %v10456_v54  ;;  %v10637_v46 = vadd.f32 %v7639_v21, %v10459_v29  ;;  %v7578_v28 = vadd.f32 %v7577_v13, %v7576_v55  ;;  %v7642_v23 = vadd.f32 %v7641_v62, %v7640_v24  ;;  %8419 = vmatprep.subr.bf16.mxu0 %v10627_v39  ;;  %v9047_v55 = vld [vmem:[%s9406_s9 + $0x4f0] ss:$100 sps:$4 sm:$0xff]  }
 0x226   : > { %5474 = vmatmul.mubr.bf16.gmra.mrb[0].mxu1 %v9028_v8  ;;  %5571 = vmatmul.mubr.bf16.gmra.mrb[0].mxu0 %v9031_v37  ;;  %v9056_v62 = vld [vmem:[%s9406_s9 + $0xbf4] ss:$100 sps:$4 sm:$0xff]  }
 0x227   : > { %v10641_v63 = vadd.f32 %v7578_v28, %v10462_v7  ;;  %v10644_v30 = vadd.f32 %v7642_v23, %v10465_v26  ;;  %5481 = vmatprep.mubr.bf16.mxu1 %v9040_v27  ;;  %5578 = vmatprep.mubr.bf16.mxu0 %v9043_v42  ;;  %v9059_v28 = vld [vmem:[%s9406_s9 + $0x5bc] ss:$100 sps:$4 sm:$0xff]  }
 0x229   : > { %v7579_v54 = vpop.f32.mrb[152].mxu0  ;;  %v7643_v47 = vpop.f32.mrb[152].mxu1 }
 0x22a   : > { %v7580_v29 = vpop.f32.mrb[153].mxu0  ;;  %v7644_v41 = vpop.f32.mrb[153].mxu1 }
 0x22b   : > { %v7581_v61 = vadd.f32 %v7580_v29, %v7579_v54  ;;  %v7645_v10 = vadd.f32 %v7644_v41, %v7643_v47  ;;  %v7582_v15 = vpop.f32.mrb[154].mxu0  ;;  %v7646_v60 = vpop.f32.mrb[154].mxu1 }
 0x22c   : > { %v7583_v43 = vpop.f32.mrb[155].mxu0  ;;  %v7647_v7 = vpop.f32.mrb[155].mxu1 }
 0x22d   : > { %v10651_v26 = vadd.f32 %v7581_v61, %v10472_v44  ;;  %v10654_v53 = vadd.f32 %v7645_v10, %v10475_v6  ;;  %v7584_v57 = vadd.f32 %v7583_v43, %v7582_v15  ;;  %v7648_v17 = vadd.f32 %v7647_v7, %v7646_v60  ;;  %v9044_v6 = vld [vmem:[%s9406_s9 + $0xb28] ss:$100 sps:$4 sm:$0xff]   ;;  %v9057_v15 = vld [vmem:[%s9406_s9 + $0x5b8] ss:$100 sps:$4 sm:$0xff]  }
 0x22e   : > { %5482 = vmatmul.mubr.bf16.gmra.mrb[4].mxu1 %v9038_v19  ;;  %5579 = vmatmul.mubr.bf16.gmra.mrb[4].mxu0 %v9041_v33  ;;  %v9062_v7 = vld [vmem:[%s9406_s9 + $0x684] ss:$100 sps:$4 sm:$0xff]  }
 0x22f   : > { %v10657_v11 = vadd.f32 %v7584_v57, %v10478_v40  ;;  %v10660_v8 = vadd.f32 %v7648_v17, %v10481_v16  ;;  %5489 = vmatprep.mubr.bf16.mxu1 %v9046_v14  ;;  %5586 = vmatprep.mubr.bf16.mxu0 %v9049_v36  ;;  %v9065_v57 = vld [vmem:[%s9406_s9 + $0x4c] ss:$100 sps:$4 sm:$0xff]  }
 0x231   : > { %v7585_v37 = vpop.f32.mrb[156].mxu0  ;;  %v7649_v44 = vpop.f32.mrb[156].mxu1 }
 0x232   : > { %v7586_v20 = vpop.f32.mrb[157].mxu0  ;;  %v7650_v21 = vpop.f32.mrb[157].mxu1 }
 0x233   : > { %v7587_v24 = vadd.f32 %v7586_v20, %v7585_v37  ;;  %v7651_v27 = vadd.f32 %v7650_v21, %v7649_v44  ;;  %v7588_v42 = vpop.f32.mrb[158].mxu0  ;;  %v7652_v13 = vpop.f32.mrb[158].mxu1 }
 0x234   : > { %v7589_v23 = vpop.f32.mrb[159].mxu0  ;;  %v7653_v40 = vpop.f32.mrb[159].mxu1 }
 0x235   : > { %v10667_v16 = vadd.f32 %v7587_v24, %v10488_v45  ;;  %v10670_v54 = vadd.f32 %v7651_v27, %v10491_v18  ;;  %v7590_v47 = vadd.f32 %v7589_v23, %v7588_v42  ;;  %v7654_v29 = vadd.f32 %v7653_v40, %v7652_v13  ;;  %v9054_v18 = vld [vmem:[%s9406_s9 + $0xbf0] ss:$100 sps:$4 sm:$0xff]   ;;  %v9063_v42 = vld [vmem:[%s9406_s9 + $0x48] ss:$100 sps:$4 sm:$0xff]  }
 0x236   : > { %5490 = vmatmul.mubr.bf16.gmra.mrb[8].mxu1 %v9044_v6  ;;  %5587 = vmatmul.mubr.bf16.gmra.mrb[8].mxu0 %v9047_v55  ;;  %v9072_v40 = vld [vmem:[%s9406_s9 + $0x74c] ss:$100 sps:$4 sm:$0xff]  }
 0x237   : > { %v10673_v41 = vadd.f32 %v7590_v47, %v10494_v52  ;;  %v10676_v19 = vadd.f32 %v7654_v29, %v10497_v58  ;;  %5497 = vmatprep.mubr.bf16.mxu1 %v9056_v62  ;;  %5594 = vmatprep.mubr.bf16.mxu0 %v9059_v28  ;;  %v9075_v29 = vld [vmem:[%s9406_s9 + $0x114] ss:$100 sps:$4 sm:$0xff]  }
 0x239   : > { %v7591_v33 = vpop.f32.mrb[160].mxu0  ;;  %v7655_v45 = vpop.f32.mrb[160].mxu1 }
 0x23a   : > { %v7592_v61 = vpop.f32.mrb[161].mxu0  ;;  %v7656_v10 = vpop.f32.mrb[161].mxu1 }
 0x23b   : > { %v7593_v60 = vadd.f32 %v7592_v61, %v7591_v33  ;;  %v7657_v14 = vadd.f32 %v7656_v10, %v7655_v45  ;;  %v7594_v36 = vpop.f32.mrb[162].mxu0  ;;  %v7658_v43 = vpop.f32.mrb[162].mxu1  ;;  %v9082_v33 = vld [vmem:[%s11595_s1 + $0x5c8] sm:$0xff]  }
 0x23c   : > { %v7595_v17 = vpop.f32.mrb[163].mxu0  ;;  %v7659_v52 = vpop.f32.mrb[163].mxu1 }
 0x23d   : > { %v10683_v58 = vadd.f32 %v7593_v60, %v10504_v50  ;;  %v10686_v37 = vadd.f32 %v7657_v14, %v10507_v48  ;;  %v7596_v44 = vadd.f32 %v7595_v17, %v7594_v36  ;;  %v7660_v20 = vadd.f32 %v7659_v52, %v7658_v43  ;;  %v9060_v48 = vld [vmem:[%s9406_s9 + $0x680] ss:$100 sps:$4 sm:$0xff]  }
 0x23e   : > { %5498 = vmatmul.mubr.bf16.gmra.mrb[12].mxu1 %v9054_v18  ;;  %5595 = vmatmul.mubr.bf16.gmra.mrb[12].mxu0 %v9057_v15 }
 0x23f   : > { %v10689_v21 = vadd.f32 %v7596_v44, %v10510_v1  ;;  %v10692_v6 = vadd.f32 %v7660_v20, %v10513_v5  ;;  %5602 = vmatprep.mubr.bf16.mxu0 %v9062_v7  ;;  %5699 = vmatprep.mubr.bf16.mxu1 %v9065_v57  ;;  %v9067_v1 = vld [vmem:[%s11595_s1 + $0x580] sm:$0xff]   ;;  %v9073_v7 = vld [vmem:[%s9406_s9 + $0x110] ss:$100 sps:$4 sm:$0xff]  }
 0x240   : > { %v9078_v20 = vld [vmem:[%s9406_s9 + $0x814] ss:$100 sps:$4 sm:$0xff]  }
 0x241   : > { %v7597_v55 = vpop.f32.mrb[164].mxu0  ;;  %v7661_v50 = vpop.f32.mrb[164].mxu1 }
 0x242   : > { %v7598_v24 = vpop.f32.mrb[165].mxu0  ;;  %v7662_v27 = vpop.f32.mrb[165].mxu1 }
 0x243   : > { %v7599_v13 = vadd.f32 %v7598_v24, %v7597_v55  ;;  %v7663_v62 = vadd.f32 %v7662_v27, %v7661_v50  ;;  %v7600_v28 = vpop.f32.mrb[166].mxu0  ;;  %v7664_v23 = vpop.f32.mrb[166].mxu1  ;;  %v9081_v55 = vld [vmem:[%s9406_s9 + $0x1dc] ss:$100 sps:$4 sm:$0xff]   ;;  %v9099_v27 = vld [vmem:[%s11595_s1 + $0x590] sm:$0xff]  }
 0x244   : > { %v7601_v5 = vpop.f32.mrb[167].mxu0  ;;  %v7665_v47 = vpop.f32.mrb[167].mxu1 }
 0x245   : > { %v10705_v45 = vadd.f32 %v7599_v13, %v10526_v34  ;;  %v10708_v61 = vadd.f32 %v7663_v62, %v10529_v25  ;;  %v7602_v10 = vadd.f32 %v7601_v5, %v7600_v28  ;;  %v7666_v18 = vadd.f32 %v7665_v47, %v7664_v23  ;;  %v9083_v34 = vld [vmem:[%s11595_s1 + $0x588] sm:$0xff]   ;;  %v9098_v25 = vld [vmem:[%s11595_s1 + $0x5d0] sm:$0xff]   ;;  %v9114_v28 = vld [vmem:[%s11595_s1 + $0x5d8] sm:$0xff]  }
 0x246   : > { %5603 = vmatmul.mubr.bf16.gmra.mrb[16].mxu0 %v9060_v48  ;;  %5700 = vmatmul.mubr.bf16.vlgmr.msra.gmra.mrb[16].mxu1 %v9063_v42 }
 0x247   : > { %v10711_v15 = vadd.f32 %v7602_v10, %v10535_v4  ;;  %v10714_v60 = vadd.f32 %v7666_v18, %v10538_v0  ;;  %8288 = vmatpush3.bf16.msra.mxu1 %v9067_v1  ;;  %5610 = vmatprep.mubr.bf16.mxu0 %v9072_v40  ;;  %v9070_v0 = vld [vmem:[%s9406_s9 + $0x748] ss:$100 sps:$4 sm:$0xff]  }
 0x248   : > { %5707 = vmatprep.mubr.bf16.mxu1 %v9075_v29  ;;  %8289 = vmatprep.subr.bf16.mxu1 %v9082_v33  ;;  %v9079_v29 = vld [vmem:[%s9406_s9 + $0x1d8] ss:$100 sps:$4 sm:$0xff]  }
 0x249   : > { %v7603_v14 = vpop.f32.mrb[168].mxu0  ;;  %v7667_v4 = vpop.f32.mrb[168].mxu1 }
 0x24a   : > { %v7604_v36 = vpop.f32.mrb[169].mxu0  ;;  %v7668_v43 = vpop.f32.mrb[169].mxu1 }
 0x24b   : > { %v7605_v57 = vadd.f32 %v7604_v36, %v7603_v14  ;;  %v7669_v17 = vadd.f32 %v7668_v43, %v7667_v4  ;;  %v7606_v52 = vpop.f32.mrb[170].mxu0  ;;  %v7670_v44 = vpop.f32.mrb[170].mxu1  ;;  %8290 = vmatpush3.bf16.msra.mxu1 %v9083_v34  ;;  %v9091_v14 = vld [vmem:[%s9406_s9 + $0x2a4] ss:$100 sps:$4 sm:$0xff]  }
 0x24c   : > { %v7607_v50 = vpop.f32.mrb[171].mxu0  ;;  %v7671_v24 = vpop.f32.mrb[171].mxu1  ;;  %8291 = vmatprep.subr.bf16.mxu1 %v9098_v25  ;;  %v9088_v25 = vld [vmem:[%s9406_s9 + $0x8dc] ss:$100 sps:$4 sm:$0xff]  }
 0x24d   : > { %v10730_v48 = vadd.f32 %v7605_v57, %v10554_v9  ;;  %v10733_v42 = vadd.f32 %v7669_v17, %v10557_v31  ;;  %v7608_v13 = vadd.f32 %v7607_v50, %v7606_v52  ;;  %v7672_v62 = vadd.f32 %v7671_v24, %v7670_v44  ;;  %v9115_v9 = vld [vmem:[%s11595_s1 + $0x598] sm:$0xff]   ;;  %v9131_v43 = vld [vmem:[%s11595_s1 + $0x5a0] sm:$0xff]   ;;  %v9145_v52 = vld [vmem:[%s11595_s1 + $0x5e8] sm:$0xff]  }
 0x24e   : > { %5611 = vmatmul.mubr.bf16.gmra.mrb[20].mxu0 %v9070_v0  ;;  %5708 = vmatmul.mubr.bf16.gmra.mrb[20].mxu1 %v9073_v7 }
 0x24f   : > { %v10739_v23 = vadd.f32 %v7608_v13, %v10560_v22  ;;  %v10742_v1 = vadd.f32 %v7672_v62, %v10563_v35  ;;  %5618 = vmatprep.mubr.bf16.mxu0 %v9078_v20  ;;  %5715 = vmatprep.mubr.bf16.mxu1 %v9081_v55  ;;  %v9130_v22 = vld [vmem:[%s11595_s1 + $0x5e0] sm:$0xff]   ;;  %v9076_v35 = vld [vmem:[%s9406_s9 + $0x810] ss:$100 sps:$4 sm:$0xff]  }
 0x250   : > { %8292 = vmatpush3.bf16.msra.mxu1 %v9099_v27  ;;  %v9089_v27 = vld [vmem:[%s9406_s9 + $0x2a0] ss:$100 sps:$4 sm:$0xff]  }
 0x251   : > { %v7609_v31 = vpop.f32.mrb[172].mxu0  ;;  %v7673_v40 = vpop.f32.mrb[172].mxu1  ;;  %8293 = vmatprep.subr.bf16.mxu1 %v9114_v28 }
 0x252   : > { %v7610_v5 = vpop.f32.mrb[173].mxu0  ;;  %v7674_v47 = vpop.f32.mrb[173].mxu1 }
 0x253   : > { %v7611_v33 = vadd.f32 %v7610_v5, %v7609_v31  ;;  %v7675_v10 = vadd.f32 %v7674_v47, %v7673_v40  ;;  %v7612_v18 = vpop.f32.mrb[174].mxu0  ;;  %v7676_v34 = vpop.f32.mrb[174].mxu1  ;;  %v9094_v31 = vld [vmem:[%s9406_s9 + $0x9a4] ss:$100 sps:$4 sm:$0xff]   ;;  %v9097_v40 = vld [vmem:[%s9406_s9 + $0x36c] ss:$100 sps:$4 sm:$0xff]  }
 0x254   : > { %v7613_v4 = vpop.f32.mrb[175].mxu0  ;;  %v7677_v36 = vpop.f32.mrb[175].mxu1  ;;  %8294 = vmatpush3.bf16.msra.mxu1 %v9115_v9  ;;  %v9160_v47 = vld [vmem:[%s11595_s1 + $0x5b0] sm:$0xff]  }
 0x255   : > { %v10758_v0 = vadd.f32 %v7611_v33, %v10579_v2  ;;  %v10761_v7 = vadd.f32 %v7675_v10, %v10582_v3  ;;  %v7614_v57 = vadd.f32 %v7613_v4, %v7612_v18  ;;  %v7678_v17 = vadd.f32 %v7677_v36, %v7676_v34  ;;  %8295 = vmatprep.subr.bf16.mxu1 %v9130_v22  ;;  %v9146_v3 = vld [vmem:[%s11595_s1 + $0x5a8] sm:$0xff]   ;;  %v9174_v18 = vld [vmem:[%s11595_s1 + $0x5f8] sm:$0xff]  }
 0x256   : > { %5619 = vmatmul.mubr.bf16.gmra.mrb[24].mxu0 %v9076_v35  ;;  %5716 = vmatmul.mubr.bf16.gmra.mrb[24].mxu1 %v9079_v29 }
 0x257   : > { %v10767_v44 = vadd.f32 %v7614_v57, %v10588_v32  ;;  %v10770_v2 = vadd.f32 %v7678_v17, %v10591_v12  ;;  %5626 = vmatprep.mubr.bf16.mxu0 %v9088_v25  ;;  %5723 = vmatprep.mubr.bf16.mxu1 %v9091_v14  ;;  %v9159_v32 = vld [vmem:[%s11595_s1 + $0x5f0] sm:$0xff]   ;;  %v9086_v12 = vld [vmem:[%s9406_s9 + $0x8d8] ss:$100 sps:$4 sm:$0xff]  }
 0x258   : > { %8296 = vmatpush3.bf16.msra.mxu1 %v9131_v43  ;;  %v9092_v43 = vld [vmem:[%s9406_s9 + $0x9a0] ss:$100 sps:$4 sm:$0xff]  }
 0x259   : > { %v7679_v20 = vpop.f32.mrb[176].mxu1  ;;  %v7743_v55 = vpop.f32.mrb[176].mxu0  ;;  %8297 = vmatprep.subr.bf16.mxu1 %v9145_v52 }
 0x25a   : > { %v7680_v50 = vpop.f32.mrb[177].mxu1  ;;  %v7744_v24 = vpop.f32.mrb[177].mxu0 }
 0x25b   : > { %v7681_v13 = vadd.f32 %v7680_v50, %v7679_v20  ;;  %v7745_v62 = vadd.f32 %v7744_v24, %v7743_v55  ;;  %v7682_v28 = vpop.f32.mrb[178].mxu1  ;;  %v7746_v9 = vpop.f32.mrb[178].mxu0  ;;  %v9107_v20 = vld [vmem:[%s9406_s9 + $0x434] ss:$100 sps:$4 sm:$0xff]  }
 0x25c   : > { %v7683_v22 = vpop.f32.mrb[179].mxu1  ;;  %v7747_v5 = vpop.f32.mrb[179].mxu0  ;;  %8298 = vmatpush3.bf16.msra.mxu1 %v9146_v3  ;;  %v9104_v3 = vld [vmem:[%s9406_s9 + $0xa6c] ss:$100 sps:$4 sm:$0xff]  }
 0x25d   : > { %v10786_v35 = vadd.f32 %v7681_v13, %v10607_v51  ;;  %v10789_v29 = vadd.f32 %v7745_v62, %v10610_v49  ;;  %v7684_v33 = vadd.f32 %v7683_v22, %v7682_v28  ;;  %v7748_v10 = vadd.f32 %v7747_v5, %v7746_v9  ;;  %8299 = vmatprep.subr.bf16.mxu1 %v9159_v32  ;;  %v9175_v49 = vld [vmem:[%s11595_s1 + $0x5b8] sm:$0xff]  }
 0x25e   : > { %5627 = vmatmul.mubr.bf16.gmra.mrb[28].mxu0 %v9086_v12  ;;  %5724 = vmatmul.mubr.bf16.gmra.mrb[28].mxu1 %v9089_v27 }
 0x25f   : > { %v10795_v34 = vadd.f32 %v7684_v33, %v10616_v56  ;;  %v10798_v51 = vadd.f32 %v7748_v10, %v10619_v59  ;;  %5634 = vmatprep.mubr.bf16.mxu0 %v9094_v31  ;;  %5731 = vmatprep.mubr.bf16.mxu1 %v9097_v40  ;;  %v9095_v56 = vld [vmem:[%s9406_s9 + $0x368] ss:$100 sps:$4 sm:$0xff]   ;;  %v9105_v40 = vld [vmem:[%s9406_s9 + $0x430] ss:$100 sps:$4 sm:$0xff]  }
 0x260   : > { %8300 = vmatpush3.bf16.msra.mxu1 %v9160_v47  ;;  %v9110_v10 = vld [vmem:[%s9406_s9 + $0xb34] ss:$100 sps:$4 sm:$0xff]  }
 0x261   : > { %v7685_v25 = vpop.f32.mrb[180].mxu1  ;;  %v7749_v14 = vpop.f32.mrb[180].mxu0  ;;  %8301 = vmatprep.subr.bf16.mxu1 %v9174_v18  ;;  %v9113_v18 = vld [vmem:[%s9406_s9 + $0x4fc] ss:$100 sps:$4 sm:$0xff]  }
 0x262   : > { %v7686_v4 = vpop.f32.mrb[181].mxu1  ;;  %v7750_v36 = vpop.f32.mrb[181].mxu0 }
 0x263   : > { %v7687_v57 = vadd.f32 %v7686_v4, %v7685_v25  ;;  %v7751_v17 = vadd.f32 %v7750_v36, %v7749_v14  ;;  %v7688_v59 = vpop.f32.mrb[182].mxu1  ;;  %v7752_v52 = vpop.f32.mrb[182].mxu0 }
 0x264   : > { %v7689_v55 = vpop.f32.mrb[183].mxu1  ;;  %v7753_v32 = vpop.f32.mrb[183].mxu0  ;;  %8302 = vmatpush3.bf16.msra.mxu1 %v9175_v49 }
 0x265   : > { %v10808_v50 = vadd.f32 %v7687_v57, %v10634_v38  ;;  %v10811_v24 = vadd.f32 %v7751_v17, %v10637_v46  ;;  %v7690_v12 = vadd.f32 %v7689_v55, %v7688_v59  ;;  %v7754_v27 = vadd.f32 %v7753_v32, %v7752_v52  ;;  %v9102_v46 = vld [vmem:[%s9406_s9 + $0xa68] ss:$100 sps:$4 sm:$0xff]   ;;  %v9111_v59 = vld [vmem:[%s9406_s9 + $0x4f8] ss:$100 sps:$4 sm:$0xff]  }
 0x266   : > { %5635 = vmatmul.mubr.bf16.gmra.mrb[32].mxu0 %v9092_v43  ;;  %5732 = vmatmul.mubr.bf16.gmra.mrb[32].mxu1 %v9095_v56  ;;  %v9120_v32 = vld [vmem:[%s9406_s9 + $0xbfc] ss:$100 sps:$4 sm:$0xff]  }
 0x267   : > { %v10814_v13 = vadd.f32 %v7690_v12, %v10641_v63  ;;  %v10817_v62 = vadd.f32 %v7754_v27, %v10644_v30  ;;  %5642 = vmatprep.mubr.bf16.mxu0 %v9104_v3  ;;  %5739 = vmatprep.mubr.bf16.mxu1 %v9107_v20  ;;  %v9123_v12 = vld [vmem:[%s9406_s9 + $0x5c4] ss:$100 sps:$4 sm:$0xff]  }
 0x269   : > { %v7691_v28 = vpop.f32.mrb[184].mxu1  ;;  %v7755_v38 = vpop.f32.mrb[184].mxu0 }
 0x26a   : > { %v7692_v9 = vpop.f32.mrb[185].mxu1  ;;  %v7756_v31 = vpop.f32.mrb[185].mxu0 }
 0x26b   : > { %v7693_v22 = vadd.f32 %v7692_v9, %v7691_v28  ;;  %v7757_v5 = vadd.f32 %v7756_v31, %v7755_v38  ;;  %v7694_v47 = vpop.f32.mrb[186].mxu1  ;;  %v7758_v33 = vpop.f32.mrb[186].mxu0 }
 0x26c   : > { %v7695_v49 = vpop.f32.mrb[187].mxu1  ;;  %v7759_v63 = vpop.f32.mrb[187].mxu0 }
 0x26d   : > { %v10824_v30 = vadd.f32 %v7693_v22, %v10651_v26  ;;  %v10827_v25 = vadd.f32 %v7757_v5, %v10654_v53  ;;  %v7696_v14 = vadd.f32 %v7695_v49, %v7694_v47  ;;  %v7760_v4 = vadd.f32 %v7759_v63, %v7758_v33  ;;  %v9108_v53 = vld [vmem:[%s9406_s9 + $0xb30] ss:$100 sps:$4 sm:$0xff]   ;;  %v9121_v47 = vld [vmem:[%s9406_s9 + $0x5c0] ss:$100 sps:$4 sm:$0xff]  }
 0x26e   : > { %5643 = vmatmul.mubr.bf16.gmra.mrb[36].mxu0 %v9102_v46  ;;  %5740 = vmatmul.mubr.bf16.gmra.mrb[36].mxu1 %v9105_v40  ;;  %v9126_v63 = vld [vmem:[%s9406_s9 + $0x68c] ss:$100 sps:$4 sm:$0xff]  }
 0x26f   : > { %v10830_v36 = vadd.f32 %v7696_v14, %v10657_v11  ;;  %v10833_v43 = vadd.f32 %v7760_v4, %v10660_v8  ;;  %5650 = vmatprep.mubr.bf16.mxu0 %v9110_v10  ;;  %5747 = vmatprep.mubr.bf16.mxu1 %v9113_v18  ;;  %v9129_v14 = vld [vmem:[%s9406_s9 + $0x54] ss:$100 sps:$4 sm:$0xff]  }
 0x271   : > { %v7697_v56 = vpop.f32.mrb[188].mxu1  ;;  %v7761_v26 = vpop.f32.mrb[188].mxu0 }
 0x272   : > { %v7698_v57 = vpop.f32.mrb[189].mxu1  ;;  %v7762_v17 = vpop.f32.mrb[189].mxu0 }
 0x273   : > { %v7699_v52 = vadd.f32 %v7698_v57, %v7697_v56  ;;  %v7763_v3 = vadd.f32 %v7762_v17, %v7761_v26  ;;  %v7700_v20 = vpop.f32.mrb[190].mxu1  ;;  %v7764_v55 = vpop.f32.mrb[190].mxu0 }
 0x274   : > { %v7701_v27 = vpop.f32.mrb[191].mxu1  ;;  %v7765_v11 = vpop.f32.mrb[191].mxu0 }
 0x275   : > { %v10840_v8 = vadd.f32 %v7699_v52, %v10667_v16  ;;  %v10843_v28 = vadd.f32 %v7763_v3, %v10670_v54  ;;  %v7702_v38 = vadd.f32 %v7701_v27, %v7700_v20  ;;  %v7766_v9 = vadd.f32 %v7765_v11, %v7764_v55  ;;  %v9118_v54 = vld [vmem:[%s9406_s9 + $0xbf8] ss:$100 sps:$4 sm:$0xff]   ;;  %v9127_v20 = vld [vmem:[%s9406_s9 + $0x50] ss:$100 sps:$4 sm:$0xff]  }
 0x276   : > { %5651 = vmatmul.mubr.bf16.gmra.mrb[40].mxu0 %v9108_v53  ;;  %5748 = vmatmul.mubr.bf16.gmra.mrb[40].mxu1 %v9111_v59  ;;  %v9135_v11 = vld [vmem:[%s9406_s9 + $0x754] ss:$100 sps:$4 sm:$0xff]  }
 0x277   : > { %v10846_v31 = vadd.f32 %v7702_v38, %v10673_v41  ;;  %v10849_v46 = vadd.f32 %v7766_v9, %v10676_v19  ;;  %5658 = vmatprep.mubr.bf16.mxu0 %v9120_v32  ;;  %5755 = vmatprep.mubr.bf16.mxu1 %v9123_v12  ;;  %v9138_v9 = vld [vmem:[%s9406_s9 + $0x11c] ss:$100 sps:$4 sm:$0xff]  }
 0x279   : > { %v7703_v40 = vpop.f32.mrb[192].mxu1  ;;  %v7767_v16 = vpop.f32.mrb[192].mxu0 }
 0x27a   : > { %v7704_v22 = vpop.f32.mrb[193].mxu1  ;;  %v7768_v5 = vpop.f32.mrb[193].mxu0 }
 0x27b   : > { %v7705_v33 = vadd.f32 %v7704_v22, %v7703_v40  ;;  %v7769_v10 = vadd.f32 %v7768_v5, %v7767_v16  ;;  %v7706_v18 = vpop.f32.mrb[194].mxu1  ;;  %v7770_v49 = vpop.f32.mrb[194].mxu0 }
 0x27c   : > { %v7707_v4 = vpop.f32.mrb[195].mxu1  ;;  %v7771_v41 = vpop.f32.mrb[195].mxu0 }
 0x27d   : > { %v10856_v19 = vadd.f32 %v7705_v33, %v10683_v58  ;;  %v10859_v56 = vadd.f32 %v7769_v10, %v10686_v37  ;;  %v7708_v26 = vadd.f32 %v7707_v4, %v7706_v18  ;;  %v7772_v57 = vadd.f32 %v7771_v41, %v7770_v49  ;;  %v9124_v37 = vld [vmem:[%s9406_s9 + $0x688] ss:$100 sps:$4 sm:$0xff]   ;;  %v9136_v49 = vld [vmem:[%s9406_s9 + $0x118] ss:$100 sps:$4 sm:$0xff]  }
 0x27e   : > { %5659 = vmatmul.mubr.bf16.gmra.mrb[44].mxu0 %v9118_v54  ;;  %5756 = vmatmul.mubr.bf16.gmra.mrb[44].mxu1 %v9121_v47  ;;  %v9141_v41 = vld [vmem:[%s9406_s9 + $0x81c] ss:$100 sps:$4 sm:$0xff]  }
 0x27f   : > { %v10862_v17 = vadd.f32 %v7708_v26, %v10689_v21  ;;  %v10865_v53 = vadd.f32 %v7772_v57, %v10692_v6  ;;  %5763 = vmatprep.mubr.bf16.mxu1 %v9126_v63  ;;  %5860 = vmatprep.mubr.bf16.mxu0 %v9129_v14  ;;  %v9161_v6 = vld [vmem:[%s11595_s1 + $0x608] sm:$0xff]  }
 0x281   : > { %v7709_v59 = vpop.f32.mrb[196].mxu1  ;;  %v7773_v58 = vpop.f32.mrb[196].mxu0 }
 0x282   : > { %v7710_v52 = vpop.f32.mrb[197].mxu1  ;;  %v7774_v3 = vpop.f32.mrb[197].mxu0 }
 0x283   : > { %v7711_v55 = vadd.f32 %v7710_v52, %v7709_v59  ;;  %v7775_v32 = vadd.f32 %v7774_v3, %v7773_v58  ;;  %v7712_v12 = vpop.f32.mrb[198].mxu1  ;;  %v7776_v27 = vpop.f32.mrb[198].mxu0 }
 0x284   : > { %v7713_v38 = vpop.f32.mrb[199].mxu1  ;;  %v7777_v21 = vpop.f32.mrb[199].mxu0 }
 0x285   : > { %v10875_v40 = vadd.f32 %v7711_v55, %v10705_v45  ;;  %v10878_v16 = vadd.f32 %v7775_v32, %v10708_v61  ;;  %v7714_v22 = vadd.f32 %v7713_v38, %v7712_v12  ;;  %v7778_v5 = vadd.f32 %v7777_v21, %v7776_v27  ;;  %v9188_v45 = vld [vmem:[%s11595_s1 + $0x610] sm:$0xff]   ;;  %v9139_v27 = vld [vmem:[%s9406_s9 + $0x818] ss:$100 sps:$4 sm:$0xff]  }
 0x286   : > { %5764 = vmatmul.mubr.bf16.gmra.mrb[48].mxu1 %v9124_v37  ;;  %5861 = vmatmul.mubr.bf16.vlgmr.msra.gmra.mrb[48].mxu0 %v9127_v20  ;;  %v9213_v37 = vld [vmem:[%s11595_s1 + $0x618] sm:$0xff]  }
 0x287   : > { %v10881_v54 = vadd.f32 %v7714_v22, %v10711_v15  ;;  %v10884_v47 = vadd.f32 %v7778_v5, %v10714_v60  ;;  %8420 = vmatpush3.bf16.msra.mxu0 %v10627_v39  ;;  %5771 = vmatprep.mubr.bf16.mxu1 %v9135_v11  ;;  %v9133_v15 = vld [vmem:[%s9406_s9 + $0x750] ss:$100 sps:$4 sm:$0xff]   ;;  %v9144_v39 = vld [vmem:[%s9406_s9 + $0x1e4] ss:$100 sps:$4 sm:$0xff]  }
 0x288   : > { %5868 = vmatprep.mubr.bf16.mxu0 %v9138_v9  ;;  %8421 = vmatprep.subr.bf16.mxu0 %v9161_v6  ;;  %v9142_v11 = vld [vmem:[%s9406_s9 + $0x1e0] ss:$100 sps:$4 sm:$0xff]   ;;  %v9152_v22 = vld [vmem:[%s9406_s9 + $0x2ac] ss:$100 sps:$4 sm:$0xff]  }
 0x289   : > { %v7715_v61 = vpop.f32.mrb[200].mxu1  ;;  %v7779_v33 = vpop.f32.mrb[200].mxu0 }
 0x28a   : > { %v7716_v10 = vpop.f32.mrb[201].mxu1  ;;  %v7780_v18 = vpop.f32.mrb[201].mxu0 }
 0x28b   : > { %v7717_v63 = vadd.f32 %v7716_v10, %v7715_v61  ;;  %v7781_v60 = vadd.f32 %v7780_v18, %v7779_v33  ;;  %v7718_v14 = vpop.f32.mrb[202].mxu1  ;;  %v7782_v4 = vpop.f32.mrb[202].mxu0  ;;  %8422 = vmatpush3.bf16.msra.mxu0 %v9161_v6  ;;  %v9149_v6 = vld [vmem:[%s9406_s9 + $0x8e4] ss:$100 sps:$4 sm:$0xff]  }
 0x28c   : > { %v7719_v26 = vpop.f32.mrb[203].mxu1  ;;  %v7783_v57 = vpop.f32.mrb[203].mxu0  ;;  %8423 = vmatprep.subr.bf16.mxu0 %v9188_v45 }
 0x28d   : > { %v10895_v59 = vadd.f32 %v7717_v63, %v10730_v48  ;;  %v10898_v58 = vadd.f32 %v7781_v60, %v10733_v42  ;;  %v7720_v52 = vadd.f32 %v7719_v26, %v7718_v14  ;;  %v7784_v3 = vadd.f32 %v7783_v57, %v7782_v4  ;;  %v9150_v14 = vld [vmem:[%s9406_s9 + $0x2a8] ss:$100 sps:$4 sm:$0xff]  }
 0x28e   : > { %5772 = vmatmul.mubr.bf16.gmra.mrb[52].mxu1 %v9133_v15  ;;  %5869 = vmatmul.mubr.bf16.gmra.mrb[52].mxu0 %v9136_v49  ;;  %v9155_v57 = vld [vmem:[%s9406_s9 + $0x9ac] ss:$100 sps:$4 sm:$0xff]  }
 0x28f   : > { %v10904_v20 = vadd.f32 %v7720_v52, %v10739_v23  ;;  %v10907_v48 = vadd.f32 %v7784_v3, %v10742_v1  ;;  %5779 = vmatprep.mubr.bf16.mxu1 %v9141_v41  ;;  %5876 = vmatprep.mubr.bf16.mxu0 %v9144_v39  ;;  %v9158_v52 = vld [vmem:[%s9406_s9 + $0x374] ss:$100 sps:$4 sm:$0xff]  }
 0x290   : > { %8424 = vmatpush3.bf16.msra.mxu0 %v9188_v45 }
 0x291   : > { %v7721_v42 = vpop.f32.mrb[204].mxu1  ;;  %v7785_v55 = vpop.f32.mrb[204].mxu0  ;;  %8425 = vmatprep.subr.bf16.mxu0 %v9213_v37 }
 0x292   : > { %v7722_v32 = vpop.f32.mrb[205].mxu1  ;;  %v7786_v12 = vpop.f32.mrb[205].mxu0 }
 0x293   : > { %v7723_v38 = vadd.f32 %v7722_v32, %v7721_v42  ;;  %v7787_v21 = vadd.f32 %v7786_v12, %v7785_v55  ;;  %v7724_v9 = vpop.f32.mrb[206].mxu1  ;;  %v7788_v23 = vpop.f32.mrb[206].mxu0 }
 0x294   : > { %v7725_v5 = vpop.f32.mrb[207].mxu1  ;;  %v7789_v1 = vpop.f32.mrb[207].mxu0  ;;  %8426 = vmatpush3.bf16.msra.mxu0 %v9213_v37 }
 0x295   : > { %v10914_v45 = vadd.f32 %v7723_v38, %v10758_v0  ;;  %v10917_v61 = vadd.f32 %v7787_v21, %v10761_v7  ;;  %v7726_v33 = vadd.f32 %v7725_v5, %v7724_v9  ;;  %v7790_v10 = vadd.f32 %v7789_v1, %v7788_v23  ;;  %v9147_v7 = vld [vmem:[%s9406_s9 + $0x8e0] ss:$100 sps:$4 sm:$0xff]   ;;  %v9156_v21 = vld [vmem:[%s9406_s9 + $0x370] ss:$100 sps:$4 sm:$0xff]  }
 0x296   : > { %5780 = vmatmul.mubr.bf16.gmra.mrb[56].mxu1 %v9139_v27  ;;  %5877 = vmatmul.mubr.bf16.gmra.mrb[56].mxu0 %v9142_v11  ;;  %v9164_v5 = vld [vmem:[%s9406_s9 + $0xa74] ss:$100 sps:$4 sm:$0xff]   ;;  %v9167_v1 = vld [vmem:[%s9406_s9 + $0x43c] ss:$100 sps:$4 sm:$0xff]  }
 0x297   : > { %v10920_v18 = vadd.f32 %v7726_v33, %v10767_v44  ;;  %v10923_v15 = vadd.f32 %v7790_v10, %v10770_v2  ;;  %5787 = vmatprep.mubr.bf16.mxu1 %v9149_v6  ;;  %5884 = vmatprep.mubr.bf16.mxu0 %v9152_v22 }
 0x299   : > { %v7791_v49 = vpop.f32.mrb[208].mxu0  ;;  %v7855_v0 = vpop.f32.mrb[208].mxu1 }
 0x29a   : > { %v7792_v63 = vpop.f32.mrb[209].mxu0  ;;  %v7856_v60 = vpop.f32.mrb[209].mxu1 }
 0x29b   : > { %v7793_v4 = vadd.f32 %v7792_v63, %v7791_v49  ;;  %v7857_v41 = vadd.f32 %v7856_v60, %v7855_v0  ;;  %v7794_v39 = vpop.f32.mrb[210].mxu0  ;;  %v7858_v26 = vpop.f32.mrb[210].mxu1 }
 0x29c   : > { %v7795_v3 = vpop.f32.mrb[211].mxu0  ;;  %v7859_v44 = vpop.f32.mrb[211].mxu1 }
 0x29d   : > { %v10930_v2 = vadd.f32 %v7793_v4, %v10786_v35  ;;  %v10933_v37 = vadd.f32 %v7857_v41, %v10789_v29  ;;  %v7796_v42 = vadd.f32 %v7795_v3, %v7794_v39  ;;  %v7860_v55 = vadd.f32 %v7859_v44, %v7858_v26  ;;  %v9153_v29 = vld [vmem:[%s9406_s9 + $0x9a8] ss:$100 sps:$4 sm:$0xff]   ;;  %v9165_v41 = vld [vmem:[%s9406_s9 + $0x438] ss:$100 sps:$4 sm:$0xff]  }
 0x29e   : > { %5788 = vmatmul.mubr.bf16.gmra.mrb[60].mxu1 %v9147_v7  ;;  %5885 = vmatmul.mubr.bf16.gmra.mrb[60].mxu0 %v9150_v14  ;;  %v9170_v3 = vld [vmem:[%s9406_s9 + $0xb3c] ss:$100 sps:$4 sm:$0xff]   ;;  %v9173_v44 = vld [vmem:[%s9406_s9 + $0x504] ss:$100 sps:$4 sm:$0xff]  }
 0x29f   : > { %v10936_v32 = vadd.f32 %v7796_v42, %v10795_v34  ;;  %v10939_v12 = vadd.f32 %v7860_v55, %v10798_v51  ;;  %5795 = vmatprep.mubr.bf16.mxu1 %v9155_v57  ;;  %5892 = vmatprep.mubr.bf16.mxu0 %v9158_v52 }
 0x2a1   : > { %v7797_v27 = vpop.f32.mrb[212].mxu0  ;;  %v7861_v35 = vpop.f32.mrb[212].mxu1 }
 0x2a2   : > { %v7798_v11 = vpop.f32.mrb[213].mxu0  ;;  %v7862_v38 = vpop.f32.mrb[213].mxu1 }
 0x2a3   : > { %v7799_v9 = vadd.f32 %v7798_v11, %v7797_v27  ;;  %v7863_v23 = vadd.f32 %v7862_v38, %v7861_v35  ;;  %v7800_v6 = vpop.f32.mrb[214].mxu0  ;;  %v7864_v22 = vpop.f32.mrb[214].mxu1 }
 0x2a4   : > { %v7801_v33 = vpop.f32.mrb[215].mxu0  ;;  %v7865_v34 = vpop.f32.mrb[215].mxu1 }
 0x2a5   : > { %v10946_v51 = vadd.f32 %v7799_v9, %v10808_v50  ;;  %v10949_v10 = vadd.f32 %v7863_v23, %v10811_v24  ;;  %v7802_v49 = vadd.f32 %v7801_v33, %v7800_v6  ;;  %v7866_v0 = vadd.f32 %v7865_v34, %v7864_v22  ;;  %v9162_v24 = vld [vmem:[%s9406_s9 + $0xa70] ss:$100 sps:$4 sm:$0xff]   ;;  %v9171_v23 = vld [vmem:[%s9406_s9 + $0x500] ss:$100 sps:$4 sm:$0xff]  }
 0x2a6   : > { %5796 = vmatmul.mubr.bf16.gmra.mrb[64].mxu1 %v9153_v29  ;;  %5893 = vmatmul.mubr.bf16.gmra.mrb[64].mxu0 %v9156_v21  ;;  %v9178_v33 = vld [vmem:[%s9406_s9 + $0xc04] ss:$100 sps:$4 sm:$0xff]   ;;  %v9181_v34 = vld [vmem:[%s9406_s9 + $0x5cc] ss:$100 sps:$4 sm:$0xff]  }
 0x2a7   : > { %v10952_v63 = vadd.f32 %v7802_v49, %v10814_v13  ;;  %v10955_v60 = vadd.f32 %v7866_v0, %v10817_v62  ;;  %5803 = vmatprep.mubr.bf16.mxu1 %v9164_v5  ;;  %5900 = vmatprep.mubr.bf16.mxu0 %v9167_v1 }
 0x2a9   : > { %v7803_v7 = vpop.f32.mrb[216].mxu0  ;;  %v7867_v50 = vpop.f32.mrb[216].mxu1 }
 0x2aa   : > { %v7804_v14 = vpop.f32.mrb[217].mxu0  ;;  %v7868_v4 = vpop.f32.mrb[217].mxu1 }
 0x2ab   : > { %v7805_v39 = vadd.f32 %v7804_v14, %v7803_v7  ;;  %v7869_v26 = vadd.f32 %v7868_v4, %v7867_v50  ;;  %v7806_v57 = vpop.f32.mrb[218].mxu0  ;;  %v7870_v52 = vpop.f32.mrb[218].mxu1 }
 0x2ac   : > { %v7807_v42 = vpop.f32.mrb[219].mxu0  ;;  %v7871_v13 = vpop.f32.mrb[219].mxu1 }
 0x2ad   : > { %v10962_v62 = vadd.f32 %v7805_v39, %v10824_v30  ;;  %v10965_v55 = vadd.f32 %v7869_v26, %v10827_v25  ;;  %v7808_v27 = vadd.f32 %v7807_v42, %v7806_v57  ;;  %v7872_v35 = vadd.f32 %v7871_v13, %v7870_v52  ;;  %v9168_v25 = vld [vmem:[%s9406_s9 + $0xb38] ss:$100 sps:$4 sm:$0xff]   ;;  %v9179_v26 = vld [vmem:[%s9406_s9 + $0x5c8] ss:$100 sps:$4 sm:$0xff]  }
 0x2ae   : > { %5804 = vmatmul.mubr.bf16.gmra.mrb[68].mxu1 %v9162_v24  ;;  %5901 = vmatmul.mubr.bf16.gmra.mrb[68].mxu0 %v9165_v41  ;;  %v9184_v42 = vld [vmem:[%s9406_s9 + $0x694] ss:$100 sps:$4 sm:$0xff]   ;;  %v9187_v13 = vld [vmem:[%s9406_s9 + $0x5c] ss:$100 sps:$4 sm:$0xff]  }
 0x2af   : > { %v10968_v11 = vadd.f32 %v7808_v27, %v10830_v36  ;;  %v10971_v38 = vadd.f32 %v7872_v35, %v10833_v43  ;;  %5811 = vmatprep.mubr.bf16.mxu1 %v9170_v3  ;;  %5908 = vmatprep.mubr.bf16.mxu0 %v9173_v44 }
 0x2b1   : > { %v7809_v29 = vpop.f32.mrb[220].mxu0  ;;  %v7873_v30 = vpop.f32.mrb[220].mxu1 }
 0x2b2   : > { %v7810_v21 = vpop.f32.mrb[221].mxu0  ;;  %v7874_v9 = vpop.f32.mrb[221].mxu1 }
 0x2b3   : > { %v7811_v6 = vadd.f32 %v7810_v21, %v7809_v29  ;;  %v7875_v22 = vadd.f32 %v7874_v9, %v7873_v30  ;;  %v7812_v5 = vpop.f32.mrb[222].mxu0  ;;  %v7876_v1 = vpop.f32.mrb[222].mxu1 }
 0x2b4   : > { %v7813_v49 = vpop.f32.mrb[223].mxu0  ;;  %v7877_v36 = vpop.f32.mrb[223].mxu1 }
 0x2b5   : > { %v10978_v43 = vadd.f32 %v7811_v6, %v10840_v8  ;;  %v10981_v0 = vadd.f32 %v7875_v22, %v10843_v28  ;;  %v7814_v7 = vadd.f32 %v7813_v49, %v7812_v5  ;;  %v7878_v50 = vadd.f32 %v7877_v36, %v7876_v1  ;;  %v9176_v28 = vld [vmem:[%s9406_s9 + $0xc00] ss:$100 sps:$4 sm:$0xff]   ;;  %v9185_v22 = vld [vmem:[%s9406_s9 + $0x58] ss:$100 sps:$4 sm:$0xff]  }
 0x2b6   : > { %5812 = vmatmul.mubr.bf16.gmra.mrb[72].mxu1 %v9168_v25  ;;  %5909 = vmatmul.mubr.bf16.gmra.mrb[72].mxu0 %v9171_v23  ;;  %v9191_v49 = vld [vmem:[%s9406_s9 + $0x75c] ss:$100 sps:$4 sm:$0xff]   ;;  %v9194_v36 = vld [vmem:[%s9406_s9 + $0x124] ss:$100 sps:$4 sm:$0xff]  }
 0x2b7   : > { %v10984_v14 = vadd.f32 %v7814_v7, %v10846_v31  ;;  %v10987_v4 = vadd.f32 %v7878_v50, %v10849_v46  ;;  %5819 = vmatprep.mubr.bf16.mxu1 %v9178_v33  ;;  %5916 = vmatprep.mubr.bf16.mxu0 %v9181_v34 }
 0x2b9   : > { %v7815_v24 = vpop.f32.mrb[224].mxu0  ;;  %v7879_v8 = vpop.f32.mrb[224].mxu1 }
 0x2ba   : > { %v7816_v41 = vpop.f32.mrb[225].mxu0  ;;  %v7880_v39 = vpop.f32.mrb[225].mxu1 }
 0x2bb   : > { %v7817_v57 = vadd.f32 %v7816_v41, %v7815_v24  ;;  %v7881_v52 = vadd.f32 %v7880_v39, %v7879_v8  ;;  %v7818_v3 = vpop.f32.mrb[226].mxu0  ;;  %v7882_v44 = vpop.f32.mrb[226].mxu1 }
 0x2bc   : > { %v7819_v27 = vpop.f32.mrb[227].mxu0  ;;  %v7883_v31 = vpop.f32.mrb[227].mxu1 }
 0x2bd   : > { %v10994_v46 = vadd.f32 %v7817_v57, %v10856_v19  ;;  %v10997_v35 = vadd.f32 %v7881_v52, %v10859_v56  ;;  %v7820_v29 = vadd.f32 %v7819_v27, %v7818_v3  ;;  %v7884_v30 = vadd.f32 %v7883_v31, %v7882_v44  ;;  %v9182_v56 = vld [vmem:[%s9406_s9 + $0x690] ss:$100 sps:$4 sm:$0xff]   ;;  %v9192_v52 = vld [vmem:[%s9406_s9 + $0x120] ss:$100 sps:$4 sm:$0xff]  }
 0x2be   : > { %5820 = vmatmul.mubr.bf16.gmra.mrb[76].mxu1 %v9176_v28  ;;  %5917 = vmatmul.mubr.bf16.gmra.mrb[76].mxu0 %v9179_v26  ;;  %v9197_v27 = vld [vmem:[%s9406_s9 + $0x824] ss:$100 sps:$4 sm:$0xff]   ;;  %v9200_v31 = vld [vmem:[%s9406_s9 + $0x1ec] ss:$100 sps:$4 sm:$0xff]  }
 0x2bf   : > { %v11000_v21 = vadd.f32 %v7820_v29, %v10862_v17  ;;  %v11003_v9 = vadd.f32 %v7884_v30, %v10865_v53  ;;  %5924 = vmatprep.mubr.bf16.mxu0 %v9184_v42  ;;  %6021 = vmatprep.mubr.bf16.mxu1 %v9187_v13 }
 0x2c1   : > { %v7821_v25 = vpop.f32.mrb[228].mxu0  ;;  %v7885_v19 = vpop.f32.mrb[228].mxu1 }
 0x2c2   : > { %v7822_v23 = vpop.f32.mrb[229].mxu0  ;;  %v7886_v6 = vpop.f32.mrb[229].mxu1 }
 0x2c3   : > { %v7823_v5 = vadd.f32 %v7822_v23, %v7821_v25  ;;  %v7887_v1 = vadd.f32 %v7886_v6, %v7885_v19  ;;  %v7824_v33 = vpop.f32.mrb[230].mxu0  ;;  %v7888_v34 = vpop.f32.mrb[230].mxu1 }
 0x2c4   : > { %v7825_v7 = vpop.f32.mrb[231].mxu0  ;;  %v7889_v17 = vpop.f32.mrb[231].mxu1 }
 0x2c5   : > { %v11010_v53 = vadd.f32 %v7823_v5, %v10875_v40  ;;  %v11013_v50 = vadd.f32 %v7887_v1, %v10878_v16  ;;  %v7826_v24 = vadd.f32 %v7825_v7, %v7824_v33  ;;  %v7890_v8 = vadd.f32 %v7889_v17, %v7888_v34  ;;  %v9189_v16 = vld [vmem:[%s9406_s9 + $0x758] ss:$100 sps:$4 sm:$0xff]   ;;  %v9198_v1 = vld [vmem:[%s9406_s9 + $0x1e8] ss:$100 sps:$4 sm:$0xff]  }
 0x2c6   : > { %5925 = vmatmul.mubr.bf16.gmra.mrb[80].mxu0 %v9182_v56  ;;  %6022 = vmatmul.mubr.bf16.vlgmr.msra.gmra.mrb[80].mxu1 %v9185_v22  ;;  %v9203_v7 = vld [vmem:[%s9406_s9 + $0x8ec] ss:$100 sps:$4 sm:$0xff]   ;;  %v9206_v17 = vld [vmem:[%s9406_s9 + $0x2b4] ss:$100 sps:$4 sm:$0xff]  }
 0x2c7   : > { %v11016_v41 = vadd.f32 %v7826_v24, %v10881_v54  ;;  %v11019_v39 = vadd.f32 %v7890_v8, %v10884_v47  ;;  %5932 = vmatprep.mubr.bf16.mxu0 %v9191_v49  ;;  %6029 = vmatprep.mubr.bf16.mxu1 %v9194_v36 }
 0x2c9   : > { %v7827_v28 = vpop.f32.mrb[232].mxu0  ;;  %v7891_v40 = vpop.f32.mrb[232].mxu1 }
 0x2ca   : > { %v7828_v26 = vpop.f32.mrb[233].mxu0  ;;  %v7892_v57 = vpop.f32.mrb[233].mxu1 }
 0x2cb   : > { %v7829_v3 = vadd.f32 %v7828_v26, %v7827_v28  ;;  %v7893_v44 = vadd.f32 %v7892_v57, %v7891_v40  ;;  %v7830_v42 = vpop.f32.mrb[234].mxu0  ;;  %v7894_v13 = vpop.f32.mrb[234].mxu1 }
 0x2cc   : > { %v7831_v29 = vpop.f32.mrb[235].mxu0  ;;  %v7895_v54 = vpop.f32.mrb[235].mxu1 }
 0x2cd   : > { %v11026_v47 = vadd.f32 %v7829_v3, %v10895_v59  ;;  %v11029_v30 = vadd.f32 %v7893_v44, %v10898_v58  ;;  %v7832_v25 = vadd.f32 %v7831_v29, %v7830_v42  ;;  %v7896_v19 = vadd.f32 %v7895_v54, %v7894_v13  ;;  %v9195_v58 = vld [vmem:[%s9406_s9 + $0x820] ss:$100 sps:$4 sm:$0xff]   ;;  %v9204_v44 = vld [vmem:[%s9406_s9 + $0x2b0] ss:$100 sps:$4 sm:$0xff]  }
 0x2ce   : > { %5933 = vmatmul.mubr.bf16.gmra.mrb[84].mxu0 %v9189_v16  ;;  %6030 = vmatmul.mubr.bf16.gmra.mrb[84].mxu1 %v9192_v52  ;;  %v9209_v29 = vld [vmem:[%s9406_s9 + $0x9b4] ss:$100 sps:$4 sm:$0xff]   ;;  %v9212_v54 = vld [vmem:[%s9406_s9 + $0x37c] ss:$100 sps:$4 sm:$0xff]  }
 0x2cf   : > { %v11032_v23 = vadd.f32 %v7832_v25, %v10904_v20  ;;  %v11035_v6 = vadd.f32 %v7896_v19, %v10907_v48  ;;  %5940 = vmatprep.mubr.bf16.mxu0 %v9197_v27  ;;  %6037 = vmatprep.mubr.bf16.mxu1 %v9200_v31 }
 0x2d1   : > { %v7833_v56 = vpop.f32.mrb[236].mxu0  ;;  %v7897_v59 = vpop.f32.mrb[236].mxu1 }
 0x2d2   : > { %v7834_v22 = vpop.f32.mrb[237].mxu0  ;;  %v7898_v5 = vpop.f32.mrb[237].mxu1 }
 0x2d3   : > { %v7835_v33 = vadd.f32 %v7834_v22, %v7833_v56  ;;  %v7899_v34 = vadd.f32 %v7898_v5, %v7897_v59  ;;  %v7836_v49 = vpop.f32.mrb[238].mxu0  ;;  %v7900_v36 = vpop.f32.mrb[238].mxu1 }
 0x2d4   : > { %v7837_v24 = vpop.f32.mrb[239].mxu0  ;;  %v7901_v20 = vpop.f32.mrb[239].mxu1 }
 0x2d5   : > { %v11042_v48 = vadd.f32 %v7835_v33, %v10914_v45  ;;  %v11045_v8 = vadd.f32 %v7899_v34, %v10917_v61  ;;  %v7838_v28 = vadd.f32 %v7837_v24, %v7836_v49  ;;  %v7902_v40 = vadd.f32 %v7901_v20, %v7900_v36  ;;  %v9201_v61 = vld [vmem:[%s9406_s9 + $0x8e8] ss:$100 sps:$4 sm:$0xff]   ;;  %v9210_v34 = vld [vmem:[%s9406_s9 + $0x378] ss:$100 sps:$4 sm:$0xff]  }
 0x2d6   : > { %5941 = vmatmul.mubr.bf16.gmra.mrb[88].mxu0 %v9195_v58  ;;  %6038 = vmatmul.mubr.bf16.gmra.mrb[88].mxu1 %v9198_v1  ;;  %v9216_v24 = vld [vmem:[%s9406_s9 + $0xa7c] ss:$100 sps:$4 sm:$0xff]   ;;  %v9219_v20 = vld [vmem:[%s9406_s9 + $0x444] ss:$100 sps:$4 sm:$0xff]  }
 0x2d7   : > { %v11048_v26 = vadd.f32 %v7838_v28, %v10920_v18  ;;  %v11051_v57 = vadd.f32 %v7902_v40, %v10923_v15  ;;  %5948 = vmatprep.mubr.bf16.mxu0 %v9203_v7  ;;  %6045 = vmatprep.mubr.bf16.mxu1 %v9206_v17 }
 0x2d9   : > { %v7903_v16 = vpop.f32.mrb[240].mxu1  ;;  %v7967_v45 = vpop.f32.mrb[240].mxu0 }
 0x2da   : > { %v7904_v52 = vpop.f32.mrb[241].mxu1  ;;  %v7968_v3 = vpop.f32.mrb[241].mxu0 }
 0x2db   : > { %v7905_v42 = vadd.f32 %v7904_v52, %v7903_v16  ;;  %v7969_v13 = vadd.f32 %v7968_v3, %v7967_v45  ;;  %v7906_v27 = vpop.f32.mrb[242].mxu1  ;;  %v7970_v31 = vpop.f32.mrb[242].mxu0 }
 0x2dc   : > { %v7907_v25 = vpop.f32.mrb[243].mxu1  ;;  %v7971_v18 = vpop.f32.mrb[243].mxu0 }
 0x2dd   : > { %v11058_v15 = vadd.f32 %v7905_v42, %v10930_v2  ;;  %v11061_v19 = vadd.f32 %v7969_v13, %v10933_v37  ;;  %v7908_v56 = vadd.f32 %v7907_v25, %v7906_v27  ;;  %v7972_v59 = vadd.f32 %v7971_v18, %v7970_v31  ;;  %v9207_v37 = vld [vmem:[%s9406_s9 + $0x9b0] ss:$100 sps:$4 sm:$0xff]   ;;  %v9217_v13 = vld [vmem:[%s9406_s9 + $0x440] ss:$100 sps:$4 sm:$0xff]  }
 0x2de   : > { %5949 = vmatmul.mubr.bf16.gmra.mrb[92].mxu0 %v9201_v61  ;;  %6046 = vmatmul.mubr.bf16.gmra.mrb[92].mxu1 %v9204_v44  ;;  %v9222_v25 = vld [vmem:[%s9406_s9 + $0xb44] ss:$100 sps:$4 sm:$0xff]   ;;  %v9225_v18 = vld [vmem:[%s9406_s9 + $0x50c] ss:$100 sps:$4 sm:$0xff]  }
 0x2df   : > { %v11064_v22 = vadd.f32 %v7908_v56, %v10936_v32  ;;  %v11067_v5 = vadd.f32 %v7972_v59, %v10939_v12  ;;  %5956 = vmatprep.mubr.bf16.mxu0 %v9209_v29  ;;  %6053 = vmatprep.mubr.bf16.mxu1 %v9212_v54 }
 0x2e1   : > { %v7909_v58 = vpop.f32.mrb[244].mxu1  ;;  %v7973_v2 = vpop.f32.mrb[244].mxu0 }
 0x2e2   : > { %v7910_v1 = vpop.f32.mrb[245].mxu1  ;;  %v7974_v33 = vpop.f32.mrb[245].mxu0 }
 0x2e3   : > { %v7911_v49 = vadd.f32 %v7910_v1, %v7909_v58  ;;  %v7975_v36 = vadd.f32 %v7974_v33, %v7973_v2  ;;  %v7912_v7 = vpop.f32.mrb[246].mxu1  ;;  %v7976_v17 = vpop.f32.mrb[246].mxu0 }
 0x2e4   : > { %v7913_v28 = vpop.f32.mrb[247].mxu1  ;;  %v7977_v32 = vpop.f32.mrb[247].mxu0 }
 0x2e5   : > { %v11074_v12 = vadd.f32 %v7911_v49, %v10946_v51  ;;  %v11077_v40 = vadd.f32 %v7975_v36, %v10949_v10  ;;  %v7914_v16 = vadd.f32 %v7913_v28, %v7912_v7  ;;  %v7978_v45 = vadd.f32 %v7977_v32, %v7976_v17  ;;  %v9214_v10 = vld [vmem:[%s9406_s9 + $0xa78] ss:$100 sps:$4 sm:$0xff]   ;;  %v9223_v36 = vld [vmem:[%s9406_s9 + $0x508] ss:$100 sps:$4 sm:$0xff]  }
 0x2e6   : > { %5957 = vmatmul.mubr.bf16.gmra.mrb[96].mxu0 %v9207_v37  ;;  %6054 = vmatmul.mubr.bf16.gmra.mrb[96].mxu1 %v9210_v34  ;;  %v9228_v28 = vld [vmem:[%s9406_s9 + $0xc0c] ss:$100 sps:$4 sm:$0xff]   ;;  %v9231_v32 = vld [vmem:[%s9406_s9 + $0x5d4] ss:$100 sps:$4 sm:$0xff]  }
 0x2e7   : > { %v11080_v52 = vadd.f32 %v7914_v16, %v10952_v63  ;;  %v11083_v3 = vadd.f32 %v7978_v45, %v10955_v60  ;;  %5964 = vmatprep.mubr.bf16.mxu0 %v9216_v24  ;;  %6061 = vmatprep.mubr.bf16.mxu1 %v9219_v20 }
 0x2e9   : > { %v7915_v61 = vpop.f32.mrb[248].mxu1  ;;  %v7979_v51 = vpop.f32.mrb[248].mxu0 }
 0x2ea   : > { %v7916_v44 = vpop.f32.mrb[249].mxu1  ;;  %v7980_v42 = vpop.f32.mrb[249].mxu0 }
 0x2eb   : > { %v7917_v27 = vadd.f32 %v7916_v44, %v7915_v61  ;;  %v7981_v31 = vadd.f32 %v7980_v42, %v7979_v51  ;;  %v7918_v29 = vpop.f32.mrb[250].mxu1  ;;  %v7982_v54 = vpop.f32.mrb[250].mxu0 }
 0x2ec   : > { %v7919_v56 = vpop.f32.mrb[251].mxu1  ;;  %v7983_v63 = vpop.f32.mrb[251].mxu0 }
 0x2ed   : > { %v11090_v60 = vadd.f32 %v7917_v27, %v10962_v62  ;;  %v11093_v59 = vadd.f32 %v7981_v31, %v10965_v55  ;;  %v7920_v58 = vadd.f32 %v7919_v56, %v7918_v29  ;;  %v7984_v2 = vadd.f32 %v7983_v63, %v7982_v54  ;;  %v9220_v55 = vld [vmem:[%s9406_s9 + $0xb40] ss:$100 sps:$4 sm:$0xff]   ;;  %v9229_v31 = vld [vmem:[%s9406_s9 + $0x5d0] ss:$100 sps:$4 sm:$0xff]  }
 0x2ee   : > { %5965 = vmatmul.mubr.bf16.gmra.mrb[100].mxu0 %v9214_v10  ;;  %6062 = vmatmul.mubr.bf16.gmra.mrb[100].mxu1 %v9217_v13  ;;  %v9234_v56 = vld [vmem:[%s9406_s9 + $0x69c] ss:$100 sps:$4 sm:$0xff]  }
 0x2ef   : > { %v11096_v1 = vadd.f32 %v7920_v58, %v10968_v11  ;;  %v11099_v33 = vadd.f32 %v7984_v2, %v10971_v38  ;;  %5972 = vmatprep.mubr.bf16.mxu0 %v9222_v25  ;;  %6069 = vmatprep.mubr.bf16.mxu1 %v9225_v18  ;;  %v9235_v63 = vld [vmem:[%s9406_s9 + $0x60] ss:$100 sps:$4 sm:$0xff]  }
 0x2f1   : > { %v7921_v37 = vpop.f32.mrb[252].mxu1  ;;  %v7985_v62 = vpop.f32.mrb[252].mxu0 }
 0x2f2   : > { %v7922_v34 = vpop.f32.mrb[253].mxu1  ;;  %v7986_v49 = vpop.f32.mrb[253].mxu0 }
 0x2f3   : > { %v7923_v7 = vadd.f32 %v7922_v34, %v7921_v37  ;;  %v7987_v17 = vadd.f32 %v7986_v49, %v7985_v62  ;;  %v7924_v24 = vpop.f32.mrb[254].mxu1  ;;  %v7988_v20 = vpop.f32.mrb[254].mxu0 }
 0x2f4   : > { %v7925_v16 = vpop.f32.mrb[255].mxu1  ;;  %v7989_v11 = vpop.f32.mrb[255].mxu0 }
 0x2f5   : > { %v11106_v38 = vadd.f32 %v7923_v7, %v10978_v43  ;;  %v11109_v45 = vadd.f32 %v7987_v17, %v10981_v0  ;;  %v7926_v61 = vadd.f32 %v7925_v16, %v7924_v24  ;;  %v7990_v51 = vadd.f32 %v7989_v11, %v7988_v20  ;;  %v9226_v0 = vld [vmem:[%s9406_s9 + $0xc08] ss:$100 sps:$4 sm:$0xff]   ;;  %v9232_v7 = vld [vmem:[%s9406_s9 + $0x698] ss:$100 sps:$4 sm:$0xff]   ;;  %v9240_v11 = vld [vmem:[%s9406_s9 + $0x1f0] ss:$100 sps:$4 sm:$0xff]  }
 0x2f6   : > { %5973 = vmatmul.mubr.bf16.gmra.mrb[104].mxu0 %v9220_v55  ;;  %6070 = vmatmul.mubr.bf16.gmra.mrb[104].mxu1 %v9223_v36  ;;  %v9236_v17 = vld [vmem:[%s9406_s9 + $0x128] ss:$100 sps:$4 sm:$0xff]  }
 0x2f7   : > { %v11112_v44 = vadd.f32 %v7926_v61, %v10984_v14  ;;  %v11115_v42 = vadd.f32 %v7990_v51, %v10987_v4  ;;  %5980 = vmatprep.mubr.bf16.mxu0 %v9228_v28  ;;  %6077 = vmatprep.mubr.bf16.mxu1 %v9231_v32  ;;  %v9239_v16 = vld [vmem:[%s9406_s9 + $0x764] ss:$100 sps:$4 sm:$0xff]  }
 0x2f9   : > { %v7927_v10 = vpop.f32.mrb[0].mxu1  ;;  %v7991_v43 = vpop.f32.mrb[0].mxu0 }
 0x2fa   : > { %v7928_v13 = vpop.f32.mrb[1].mxu1  ;;  %v7992_v27 = vpop.f32.mrb[1].mxu0 }
 0x2fb   : > { %v7929_v29 = vadd.f32 %v7928_v13, %v7927_v10  ;;  %v7993_v54 = vadd.f32 %v7992_v27, %v7991_v43  ;;  %v7930_v25 = vpop.f32.mrb[2].mxu1  ;;  %v7994_v18 = vpop.f32.mrb[2].mxu0 }
 0x2fc   : > { %v7931_v58 = vpop.f32.mrb[3].mxu1  ;;  %v7995_v14 = vpop.f32.mrb[3].mxu0 }
 0x2fd   : > { %v11122_v4 = vadd.f32 %v7929_v29, %v10994_v46  ;;  %v11125_v2 = vadd.f32 %v7993_v54, %v10997_v35  ;;  %v7932_v37 = vadd.f32 %v7931_v58, %v7930_v25  ;;  %v7996_v62 = vadd.f32 %v7995_v14, %v7994_v18  ;;  %v9237_v29 = vld [vmem:[%s9406_s9 + $0x760] ss:$100 sps:$4 sm:$0xff]   ;;  %v9241_v54 = vld [vmem:[%s9406_s9 + $0x2b8] ss:$100 sps:$4 sm:$0xff]   ;;  %v9244_v58 = vld [vmem:[%s9406_s9 + $0x82c] ss:$100 sps:$4 sm:$0xff]  }
 0x2fe   : > { %5981 = vmatmul.mubr.bf16.gmra.mrb[108].mxu0 %v9226_v0  ;;  %6078 = vmatmul.mubr.bf16.gmra.mrb[108].mxu1 %v9229_v31  ;;  %v9245_v14 = vld [vmem:[%s9406_s9 + $0x380] ss:$100 sps:$4 sm:$0xff]  }
 0x2ff   : > { %v11128_v34 = vadd.f32 %v7932_v37, %v11000_v21  ;;  %v11131_v49 = vadd.f32 %v7996_v62, %v11003_v9  ;;  %6085 = vmatprep.mubr.bf16.mxu1 %v9234_v56  ;;  %8427 = vmatprep.mubr.msk.bf16.mxu0 %vm4169_vm0, %v9235_v63 }
 0x301   : > { %v7933_v46 = vpop.f32.mrb[4].mxu1  ;;  %v7997_v55 = vpop.f32.mrb[4].mxu0 }
 0x302   : > { %v7934_v36 = vpop.f32.mrb[5].mxu1  ;;  %v7998_v35 = vpop.f32.mrb[5].mxu0 }
 0x303   : > { %v7935_v24 = vadd.f32 %v7934_v36, %v7933_v46  ;;  %v7999_v20 = vadd.f32 %v7998_v35, %v7997_v55  ;;  %v7936_v28 = vpop.f32.mrb[6].mxu1  ;;  %v8000_v32 = vpop.f32.mrb[6].mxu0 }
 0x304   : > { %v7937_v21 = vpop.f32.mrb[7].mxu1  ;;  %v8001_v61 = vpop.f32.mrb[7].mxu0 }
 0x305   : > { %v11139_v9 = vadd.f32 %v7935_v24, %v11010_v53  ;;  %v11142_v51 = vadd.f32 %v7999_v20, %v11013_v50  ;;  %v7938_v10 = vadd.f32 %v7937_v21, %v7936_v28  ;;  %v8002_v43 = vadd.f32 %v8001_v61, %v8000_v32  ;;  %v9242_v24 = vld [vmem:[%s9406_s9 + $0x828] ss:$100 sps:$4 sm:$0xff]   ;;  %v9249_v21 = vld [vmem:[%s9406_s9 + $0x8f4] ss:$100 sps:$4 sm:$0xff]  }
 0x306   : > { %6086 = vmatmul.mubr.bf16.gmra.mrb[112].mxu1 %v9232_v7  ;;  %8428 = vmatmul.mubr.msk.bf16.vlgmr.msra.gmra.mrb[112].mxu0 %vm4169_vm0, %v9236_v17  ;;  %v9246_v20 = vld [vmem:[%s9406_s9 + $0x448] ss:$100 sps:$4 sm:$0xff]   ;;  %v9250_v61 = vld [vmem:[%s9406_s9 + $0x510] ss:$100 sps:$4 sm:$0xff]  }
 0x307   : > { %v11146_v13 = vadd.f32 %v7938_v10, %v11016_v41  ;;  %v11149_v27 = vadd.f32 %v8002_v43, %v11019_v39  ;;  %6093 = vmatprep.mubr.bf16.mxu1 %v9239_v16  ;;  %8431 = vmatprep.mubr.msk.bf16.mxu0 %vm4169_vm0, %v9240_v11 }
 0x309   : > { %v7939_v53 = vpop.f32.mrb[8].mxu1  ;;  %v8003_v0 = vpop.f32.mrb[8].mxu0 }
 0x30a   : > { %v7940_v50 = vpop.f32.mrb[9].mxu1  ;;  %v8004_v31 = vpop.f32.mrb[9].mxu0 }
 0x30b   : > { %v7941_v25 = vadd.f32 %v7940_v50, %v7939_v53  ;;  %v8005_v18 = vadd.f32 %v8004_v31, %v8003_v0  ;;  %v7942_v56 = vpop.f32.mrb[10].mxu1  ;;  %v8006_v63 = vpop.f32.mrb[10].mxu0 }
 0x30c   : > { %v7943_v41 = vpop.f32.mrb[11].mxu1  ;;  %v8007_v37 = vpop.f32.mrb[11].mxu0 }
 0x30d   : > { %v11157_v39 = vadd.f32 %v7941_v25, %v11026_v47  ;;  %v11160_v62 = vadd.f32 %v8005_v18, %v11029_v30  ;;  %v7944_v46 = vadd.f32 %v7943_v41, %v7942_v56  ;;  %v8008_v55 = vadd.f32 %v8007_v37, %v8006_v63  ;;  %v9247_v25 = vld [vmem:[%s9406_s9 + $0x8f0] ss:$100 sps:$4 sm:$0xff]   ;;  %v9251_v18 = vld [vmem:[%s9406_s9 + $0x5d8] ss:$100 sps:$4 sm:$0xff]   ;;  %v9255_v37 = vld [vmem:[%s9406_s9 + $0x6a0] ss:$100 sps:$4 sm:$0xff]  }
 0x30e   : > { %6094 = vmatmul.mubr.bf16.gmra.mrb[116].mxu1 %v9237_v29  ;;  %8432 = vmatmul.mubr.msk.bf16.gmra.mrb[116].mxu0 %vm4169_vm0, %v9241_v54  ;;  %v9254_v41 = vld [vmem:[%s9406_s9 + $0x9bc] ss:$100 sps:$4 sm:$0xff]  }
 0x30f   : > { %v11164_v36 = vadd.f32 %v7944_v46, %v11032_v23  ;;  %v11167_v35 = vadd.f32 %v8008_v55, %v11035_v6  ;;  %6101 = vmatprep.mubr.bf16.mxu1 %v9244_v58  ;;  %8435 = vmatprep.mubr.msk.bf16.mxu0 %vm4169_vm0, %v9245_v14 }
 0x311   : > { %v7945_v47 = vpop.f32.mrb[12].mxu1  ;;  %v8009_v7 = vpop.f32.mrb[12].mxu0 }
 0x312   : > { %v7946_v30 = vpop.f32.mrb[13].mxu1  ;;  %v8010_v17 = vpop.f32.mrb[13].mxu0 }
 0x313   : > { %v7947_v28 = vadd.f32 %v7946_v30, %v7945_v47  ;;  %v8011_v32 = vadd.f32 %v8010_v17, %v8009_v7  ;;  %v7948_v16 = vpop.f32.mrb[14].mxu1  ;;  %v8012_v11 = vpop.f32.mrb[14].mxu0 }
 0x314   : > { %v7949_v23 = vpop.f32.mrb[15].mxu1  ;;  %v8013_v10 = vpop.f32.mrb[15].mxu0 }
 0x315   : > { %v11175_v6 = vadd.f32 %v7947_v28, %v11042_v48  ;;  %v11178_v43 = vadd.f32 %v8011_v32, %v11045_v8  ;;  %v7950_v53 = vadd.f32 %v7949_v23, %v7948_v16  ;;  %v8014_v0 = vadd.f32 %v8013_v10, %v8012_v11  ;;  %v9252_v28 = vld [vmem:[%s9406_s9 + $0x9b8] ss:$100 sps:$4 sm:$0xff]   ;;  %v9256_v32 = vld [vmem:[%s9406_s9 + $0x768] ss:$100 sps:$4 sm:$0xff]   ;;  %v9260_v10 = vld [vmem:[%s9406_s9 + $0x830] ss:$100 sps:$4 sm:$0xff]  }
 0x316   : > { %6102 = vmatmul.mubr.bf16.gmra.mrb[120].mxu1 %v9242_v24  ;;  %8436 = vmatmul.mubr.msk.bf16.gmra.mrb[120].mxu0 %vm4169_vm0, %v9246_v20  ;;  %v9259_v23 = vld [vmem:[%s9406_s9 + $0xa84] ss:$100 sps:$4 sm:$0xff]  }
 0x317   : > { %v11182_v50 = vadd.f32 %v7950_v53, %v11048_v26  ;;  %v11185_v31 = vadd.f32 %v8014_v0, %v11051_v57  ;;  %6109 = vmatprep.mubr.bf16.mxu1 %v9249_v21  ;;  %8439 = vmatprep.mubr.msk.bf16.mxu0 %vm4169_vm0, %v9250_v61 }
 0x319   : > { %v8015_v48 = vpop.f32.mrb[16].mxu0  ;;  %v8079_v29 = vpop.f32.mrb[16].mxu1 }
 0x31a   : > { %v8016_v8 = vpop.f32.mrb[17].mxu0  ;;  %v8080_v54 = vpop.f32.mrb[17].mxu1 }
 0x31b   : > { %v8017_v56 = vadd.f32 %v8016_v8, %v8015_v48  ;;  %v8081_v63 = vadd.f32 %v8080_v54, %v8079_v29  ;;  %v8018_v58 = vpop.f32.mrb[18].mxu0  ;;  %v8082_v14 = vpop.f32.mrb[18].mxu1 }
 0x31c   : > { %v8019_v26 = vpop.f32.mrb[19].mxu0  ;;  %v8083_v46 = vpop.f32.mrb[19].mxu1 }
 0x31d   : > { %v11193_v57 = vadd.f32 %v8017_v56, %v11058_v15  ;;  %v11196_v55 = vadd.f32 %v8081_v63, %v11061_v19  ;;  %v8020_v47 = vadd.f32 %v8019_v26, %v8018_v58  ;;  %v8084_v7 = vadd.f32 %v8083_v46, %v8082_v14  ;;  %v9257_v56 = vld [vmem:[%s9406_s9 + $0xa80] ss:$100 sps:$4 sm:$0xff]   ;;  %v9261_v63 = vld [vmem:[%s9406_s9 + $0x8f8] ss:$100 sps:$4 sm:$0xff]   ;;  %v9264_v26 = vld [vmem:[%s9406_s9 + $0xb4c] ss:$100 sps:$4 sm:$0xff]  }
 0x31e   : > { %6110 = vmatmul.mubr.bf16.gmra.mrb[124].mxu1 %v9247_v25  ;;  %8440 = vmatmul.mubr.msk.bf16.gmra.mrb[124].mxu0 %vm4169_vm0, %v9251_v18  ;;  %v9265_v46 = vld [vmem:[%s9406_s9 + $0x9c0] ss:$100 sps:$4 sm:$0xff]  }
 0x31f   : > { %v11200_v30 = vadd.f32 %v8020_v47, %v11064_v22  ;;  %v11203_v17 = vadd.f32 %v8084_v7, %v11067_v5  ;;  %6117 = vmatprep.mubr.bf16.mxu1 %v9254_v41  ;;  %8443 = vmatprep.mubr.msk.bf16.mxu0 %vm4169_vm0, %v9255_v37 }
 0x321   : > { %v8021_v15 = vpop.f32.mrb[20].mxu0  ;;  %v8085_v24 = vpop.f32.mrb[20].mxu1 }
 0x322   : > { %v8022_v19 = vpop.f32.mrb[21].mxu0  ;;  %v8086_v20 = vpop.f32.mrb[21].mxu1 }
 0x323   : > { %v8023_v16 = vadd.f32 %v8022_v19, %v8021_v15  ;;  %v8087_v11 = vadd.f32 %v8086_v20, %v8085_v24  ;;  %v8024_v21 = vpop.f32.mrb[22].mxu0  ;;  %v8088_v61 = vpop.f32.mrb[22].mxu1 }
 0x324   : > { %v8025_v22 = vpop.f32.mrb[23].mxu0  ;;  %v8089_v53 = vpop.f32.mrb[23].mxu1 }
 0x325   : > { %v11211_v5 = vadd.f32 %v8023_v16, %v11074_v12  ;;  %v11214_v0 = vadd.f32 %v8087_v11, %v11077_v40  ;;  %v8026_v48 = vadd.f32 %v8025_v22, %v8024_v21  ;;  %v8090_v29 = vadd.f32 %v8089_v53, %v8088_v61  ;;  %v9262_v16 = vld [vmem:[%s9406_s9 + $0xb48] ss:$100 sps:$4 sm:$0xff]   ;;  %v9269_v22 = vld [vmem:[%s9406_s9 + $0xc14] ss:$100 sps:$4 sm:$0xff]  }
 0x326   : > { %6118 = vmatmul.mubr.bf16.gmra.mrb[128].mxu1 %v9252_v28  ;;  %8444 = vmatmul.mubr.msk.bf16.gmra.mrb[128].mxu0 %vm4169_vm0, %v9256_v32  ;;  %v9266_v11 = vld [vmem:[%s9406_s9 + $0xa88] ss:$100 sps:$4 sm:$0xff]   ;;  %v9270_v53 = vld [vmem:[%s9406_s9 + $0xb50] ss:$100 sps:$4 sm:$0xff]  }
 0x327   : > { %v11218_v8 = vadd.f32 %v8026_v48, %v11080_v52  ;;  %v11221_v54 = vadd.f32 %v8090_v29, %v11083_v3  ;;  %6125 = vmatprep.mubr.bf16.mxu1 %v9259_v23  ;;  %8447 = vmatprep.mubr.msk.bf16.mxu0 %vm4169_vm0, %v9260_v10 }
 0x329   : > { %v8027_v12 = vpop.f32.mrb[24].mxu0  ;;  %v8091_v25 = vpop.f32.mrb[24].mxu1 }
 0x32a   : > { %v8028_v40 = vpop.f32.mrb[25].mxu0  ;;  %v8092_v18 = vpop.f32.mrb[25].mxu1 }
 0x32b   : > { %v8029_v58 = vadd.f32 %v8028_v40, %v8027_v12  ;;  %v8093_v14 = vadd.f32 %v8092_v18, %v8091_v25  ;;  %v8030_v41 = vpop.f32.mrb[26].mxu0  ;;  %v8094_v37 = vpop.f32.mrb[26].mxu1 }
 0x32c   : > { %v8031_v52 = vpop.f32.mrb[27].mxu0  ;;  %v8095_v47 = vpop.f32.mrb[27].mxu1 }
 0x32d   : > { %v11229_v3 = vadd.f32 %v8029_v58, %v11090_v60  ;;  %v11232_v7 = vadd.f32 %v8093_v14, %v11093_v59  ;;  %v8032_v15 = vadd.f32 %v8031_v52, %v8030_v41  ;;  %v8096_v24 = vadd.f32 %v8095_v47, %v8094_v37  ;;  %v9271_v14 = vld [vmem:[%s9406_s9 + $0xc18] ss:$100 sps:$4 sm:$0xff]  }
 0x32e   : > { %6126 = vmatmul.mubr.bf16.gmra.mrb[132].mxu1 %v9257_v56  ;;  %8448 = vmatmul.mubr.msk.bf16.gmra.mrb[132].mxu0 %vm4169_vm0, %v9261_v63 }
 0x32f   : > { %v11236_v19 = vadd.f32 %v8032_v15, %v11096_v1  ;;  %v11239_v20 = vadd.f32 %v8096_v24, %v11099_v33  ;;  %6133 = vmatprep.mubr.bf16.mxu1 %v9264_v26  ;;  %8451 = vmatprep.mubr.msk.bf16.mxu0 %vm4169_vm0, %v9265_v46 }
 0x331   : > { %v8033_v60 = vpop.f32.mrb[28].mxu0  ;;  %v8097_v28 = vpop.f32.mrb[28].mxu1 }
 0x332   : > { %v8034_v59 = vpop.f32.mrb[29].mxu0  ;;  %v8098_v32 = vpop.f32.mrb[29].mxu1 }
 0x333   : > { %v8035_v21 = vadd.f32 %v8034_v59, %v8033_v60  ;;  %v8099_v61 = vadd.f32 %v8098_v32, %v8097_v28  ;;  %v8036_v23 = vpop.f32.mrb[30].mxu0  ;;  %v8100_v10 = vpop.f32.mrb[30].mxu1 }
 0x334   : > { %v8037_v1 = vpop.f32.mrb[31].mxu0  ;;  %v8101_v48 = vpop.f32.mrb[31].mxu1 }
 0x335   : > { %v11247_v33 = vadd.f32 %v8035_v21, %v11106_v38  ;;  %v11250_v29 = vadd.f32 %v8099_v61, %v11109_v45  ;;  %v8038_v12 = vadd.f32 %v8037_v1, %v8036_v23  ;;  %v8102_v25 = vadd.f32 %v8101_v48, %v8100_v10  ;;  %v9267_v45 = vld [vmem:[%s9406_s9 + $0xc10] ss:$100 sps:$4 sm:$0xff]   ;;  %s6439_s9 = sshll.u32 %s11599_s16, 3 }
 0x336   : > { %6134 = vmatmul.mubr.bf16.gmra.mrb[136].mxu1 %v9262_v16  ;;  %8452 = vmatmul.mubr.msk.bf16.gmra.mrb[136].mxu0 %vm4169_vm0, %v9266_v11  ;;  %s11519_s5 = scalar_lea.vmem %s11597_s3, %s6439_s9 }
 0x337   : > { %v11254_v40 = vadd.f32 %v8038_v12, %v11112_v44  ;;  %v11257_v18 = vadd.f32 %v8102_v25, %v11115_v42  ;;  %6141 = vmatprep.mubr.bf16.mxu1 %v9269_v22  ;;  %8455 = vmatprep.mubr.msk.bf16.mxu0 %vm4169_vm0, %v9270_v53 }
 0x339   : > { %v8039_v56 = vpop.f32.mrb[32].mxu0  ;;  %v8103_v38 = vpop.f32.mrb[32].mxu1 }
 0x33a   : > { %v8040_v63 = vpop.f32.mrb[33].mxu0  ;;  %v8104_v58 = vpop.f32.mrb[33].mxu1 }
 0x33b   : > { %v8041_v41 = vadd.f32 %v8040_v63, %v8039_v56  ;;  %v8105_v37 = vadd.f32 %v8104_v58, %v8103_v38  ;;  %v8042_v26 = vpop.f32.mrb[34].mxu0  ;;  %v8106_v46 = vpop.f32.mrb[34].mxu1 }
 0x33c   : > { %v8043_v52 = vpop.f32.mrb[35].mxu0  ;;  %v8107_v47 = vpop.f32.mrb[35].mxu1 }
 0x33d   : > { %v11263_v44 = vadd.f32 %v8041_v41, %v11122_v4  ;;  %v11266_v42 = vadd.f32 %v8105_v37, %v11125_v2  ;;  %v8044_v15 = vadd.f32 %v8043_v52, %v8042_v26  ;;  %v8108_v24 = vadd.f32 %v8107_v47, %v8106_v46 }
 0x33e   : > { %6142 = vmatmul.mubr.bf16.gmra.mrb[140].mxu1 %v9267_v45  ;;  %8456 = vmatmul.mubr.msk.bf16.gmra.mrb[140].mxu0 %vm4169_vm0, %v9271_v14 }
 0x33f   : > { %v11270_v60 = vadd.f32 %v8044_v15, %v11128_v34  ;;  %v11273_v28 = vadd.f32 %v8108_v24, %v11131_v49 }
 0x341   : > { %v8045_v59 = vpop.f32.mrb[36].mxu0  ;;  %v8109_v32 = vpop.f32.mrb[36].mxu1 }
 0x342   : > { %v8046_v16 = vpop.f32.mrb[37].mxu0  ;;  %v8110_v11 = vpop.f32.mrb[37].mxu1 }
 0x343   : > { %v8047_v4 = vadd.f32 %v8046_v16, %v8045_v59  ;;  %v8111_v21 = vadd.f32 %v8110_v11, %v8109_v32  ;;  %v8048_v61 = vpop.f32.mrb[38].mxu0  ;;  %v8112_v2 = vpop.f32.mrb[38].mxu1 }
 0x344   : > { %v8049_v23 = vpop.f32.mrb[39].mxu0  ;;  %v8113_v10 = vpop.f32.mrb[39].mxu1 }
 0x345   : > { %v11276_v22 = vadd.f32 %v8047_v4, %v11139_v9  ;;  %v11279_v53 = vadd.f32 %v8111_v21, %v11142_v51  ;;  %v8050_v34 = vadd.f32 %v8049_v23, %v8048_v61  ;;  %v8114_v1 = vadd.f32 %v8113_v10, %v8112_v2 }
 0x347   : > { %v11282_v49 = vadd.f32 %v8050_v34, %v11146_v13  ;;  %v11285_v48 = vadd.f32 %v8114_v1, %v11149_v27 }
 0x349   : > { %v8051_v12 = vpop.f32.mrb[40].mxu0  ;;  %v8115_v25 = vpop.f32.mrb[40].mxu1 }
 0x34a   : > { %v8052_v56 = vpop.f32.mrb[41].mxu0  ;;  %v8116_v38 = vpop.f32.mrb[41].mxu1 }
 0x34b   : > { %v8053_v63 = vadd.f32 %v8052_v56, %v8051_v12  ;;  %v8117_v58 = vadd.f32 %v8116_v38, %v8115_v25  ;;  %v8054_v45 = vpop.f32.mrb[42].mxu0  ;;  %v8118_v9 = vpop.f32.mrb[42].mxu1 }
 0x34c   : > { %v8055_v14 = vpop.f32.mrb[43].mxu0  ;;  %v8119_v41 = vpop.f32.mrb[43].mxu1 }
 0x34d   : > { %v11288_v51 = vadd.f32 %v8053_v63, %v11157_v39  ;;  %v11291_v37 = vadd.f32 %v8117_v58, %v11160_v62  ;;  %v8056_v13 = vadd.f32 %v8055_v14, %v8054_v45  ;;  %v8120_v26 = vadd.f32 %v8119_v41, %v8118_v9 }
 0x34f   : > { %v11294_v27 = vadd.f32 %v8056_v13, %v11164_v36  ;;  %v11297_v46 = vadd.f32 %v8120_v26, %v11167_v35 }
 0x351   : > { %v8057_v52 = vpop.f32.mrb[44].mxu0  ;;  %v8121_v47 = vpop.f32.mrb[44].mxu1 }
 0x352   : > { %v8058_v15 = vpop.f32.mrb[45].mxu0  ;;  %v8122_v24 = vpop.f32.mrb[45].mxu1 }
 0x353   : > { %v8059_v59 = vadd.f32 %v8058_v15, %v8057_v52  ;;  %v8123_v32 = vadd.f32 %v8122_v24, %v8121_v47  ;;  %v8060_v16 = vpop.f32.mrb[46].mxu0  ;;  %v8124_v39 = vpop.f32.mrb[46].mxu1 }
 0x354   : > { %v8061_v11 = vpop.f32.mrb[47].mxu0  ;;  %v8125_v4 = vpop.f32.mrb[47].mxu1 }
 0x355   : > { %v11300_v62 = vadd.f32 %v8059_v59, %v11175_v6  ;;  %v11303_v21 = vadd.f32 %v8123_v32, %v11178_v43  ;;  %v8062_v36 = vadd.f32 %v8061_v11, %v8060_v16  ;;  %v8126_v61 = vadd.f32 %v8125_v4, %v8124_v39 }
 0x357   : > { %v11306_v35 = vadd.f32 %v8062_v36, %v11182_v50  ;;  %v11309_v2 = vadd.f32 %v8126_v61, %v11185_v31 }
 0x359   : > { %v8127_v23 = vpop.f32.mrb[48].mxu1  ;;  %v8191_v10 = vpop.f32.mrb[48].mxu0 }
 0x35a   : > { %v8128_v34 = vpop.f32.mrb[49].mxu1  ;;  %v8192_v1 = vpop.f32.mrb[49].mxu0 }
 0x35b   : > { %v8129_v12 = vadd.f32 %v8128_v34, %v8127_v23  ;;  %v8193_v25 = vadd.f32 %v8192_v1, %v8191_v10  ;;  %v8130_v56 = vpop.f32.mrb[50].mxu1  ;;  %v8194_v6 = vpop.f32.mrb[50].mxu0 }
 0x35c   : > { %v8131_v38 = vpop.f32.mrb[51].mxu1  ;;  %v8195_v63 = vpop.f32.mrb[51].mxu0 }
 0x35d   : > { %v11312_v43 = vadd.f32 %v8129_v12, %v11193_v57  ;;  %v11315_v58 = vadd.f32 %v8193_v25, %v11196_v55  ;;  %v8132_v50 = vadd.f32 %v8131_v38, %v8130_v56  ;;  %v8196_v45 = vadd.f32 %v8195_v63, %v8194_v6 }
 0x35f   : > { %v11318_v31 = vadd.f32 %v8132_v50, %v11200_v30  ;;  %v11321_v9 = vadd.f32 %v8196_v45, %v11203_v17 }
 0x361   : > { %v8133_v14 = vpop.f32.mrb[52].mxu1  ;;  %v8197_v41 = vpop.f32.mrb[52].mxu0 }
 0x362   : > { %v8134_v13 = vpop.f32.mrb[53].mxu1  ;;  %v8198_v26 = vpop.f32.mrb[53].mxu0 }
 0x363   : > { %v8135_v52 = vadd.f32 %v8134_v13, %v8133_v14  ;;  %v8199_v47 = vadd.f32 %v8198_v26, %v8197_v41  ;;  %v8136_v15 = vpop.f32.mrb[54].mxu1  ;;  %v8200_v57 = vpop.f32.mrb[54].mxu0 }
 0x364   : > { %v8137_v24 = vpop.f32.mrb[55].mxu1  ;;  %v8201_v59 = vpop.f32.mrb[55].mxu0 }
 0x365   : > { %v11324_v55 = vadd.f32 %v8135_v52, %v11211_v5  ;;  %v11327_v32 = vadd.f32 %v8199_v47, %v11214_v0  ;;  %v8138_v30 = vadd.f32 %v8137_v24, %v8136_v15  ;;  %v8202_v16 = vadd.f32 %v8201_v59, %v8200_v57 }
 0x367   : > { %v11330_v17 = vadd.f32 %v8138_v30, %v11218_v8  ;;  %v11333_v39 = vadd.f32 %v8202_v16, %v11221_v54 }
 0x369   : > { %v8139_v11 = vpop.f32.mrb[56].mxu1  ;;  %v8203_v4 = vpop.f32.mrb[56].mxu0 }
 0x36a   : > { %v8140_v36 = vpop.f32.mrb[57].mxu1  ;;  %v8204_v61 = vpop.f32.mrb[57].mxu0 }
 0x36b   : > { %v8141_v23 = vadd.f32 %v8140_v36, %v8139_v11  ;;  %v8205_v10 = vadd.f32 %v8204_v61, %v8203_v4  ;;  %v8142_v34 = vpop.f32.mrb[58].mxu1  ;;  %v8206_v5 = vpop.f32.mrb[58].mxu0 }
 0x36c   : > { %v8143_v1 = vpop.f32.mrb[59].mxu1  ;;  %v8207_v12 = vpop.f32.mrb[59].mxu0 }
 0x36d   : > { %v11336_v0 = vadd.f32 %v8141_v23, %v11229_v3  ;;  %v11339_v25 = vadd.f32 %v8205_v10, %v11232_v7  ;;  %v8144_v8 = vadd.f32 %v8143_v1, %v8142_v34  ;;  %v8208_v56 = vadd.f32 %v8207_v12, %v8206_v5 }
 0x36f   : > { %v11342_v54 = vadd.f32 %v8144_v8, %v11236_v19  ;;  %v11345_v6 = vadd.f32 %v8208_v56, %v11239_v20 }
 0x371   : > { %v8145_v38 = vpop.f32.mrb[60].mxu1  ;;  %v8209_v63 = vpop.f32.mrb[60].mxu0 }
 0x372   : > { %v8146_v50 = vpop.f32.mrb[61].mxu1  ;;  %v8210_v45 = vpop.f32.mrb[61].mxu0 }
 0x373   : > { %v8147_v14 = vadd.f32 %v8146_v50, %v8145_v38  ;;  %v8211_v41 = vadd.f32 %v8210_v45, %v8209_v63  ;;  %v8148_v13 = vpop.f32.mrb[62].mxu1  ;;  %v8212_v3 = vpop.f32.mrb[62].mxu0 }
 0x374   : > { %v8149_v26 = vpop.f32.mrb[63].mxu1  ;;  %v8213_v52 = vpop.f32.mrb[63].mxu0 }
 0x375   : > { %v11348_v7 = vadd.f32 %v8147_v14, %v11247_v33  ;;  %v11351_v47 = vadd.f32 %v8211_v41, %v11250_v29  ;;  %v8150_v19 = vadd.f32 %v8149_v26, %v8148_v13  ;;  %v8214_v15 = vadd.f32 %v8213_v52, %v8212_v3 }
 0x377   : > { %v11354_v20 = vadd.f32 %v8150_v19, %v11254_v40  ;;  %v11357_v57 = vadd.f32 %v8214_v15, %v11257_v18 }
 0x379   : > { %v8151_v24 = vpop.f32.mrb[64].mxu1  ;;  %v8215_v59 = vpop.f32.mrb[64].mxu0 }
 0x37a   : > { %v8152_v30 = vpop.f32.mrb[65].mxu1  ;;  %v8216_v16 = vpop.f32.mrb[65].mxu0 }
 0x37b   : > { %v8153_v11 = vadd.f32 %v8152_v30, %v8151_v24  ;;  %v8217_v4 = vadd.f32 %v8216_v16, %v8215_v59  ;;  %v8154_v36 = vpop.f32.mrb[66].mxu1  ;;  %v8218_v33 = vpop.f32.mrb[66].mxu0 }
 0x37c   : > { %v8155_v61 = vpop.f32.mrb[67].mxu1  ;;  %v8219_v23 = vpop.f32.mrb[67].mxu0 }
 0x37d   : > { %v11360_v29 = vadd.f32 %v8153_v11, %v11263_v44  ;;  %v11363_v10 = vadd.f32 %v8217_v4, %v11266_v42  ;;  %v8156_v40 = vadd.f32 %v8155_v61, %v8154_v36  ;;  %v8220_v34 = vadd.f32 %v8219_v23, %v8218_v33 }
 0x37f   : > { %v11366_v18 = vadd.f32 %v8156_v40, %v11270_v60  ;;  %v11369_v5 = vadd.f32 %v8220_v34, %v11273_v28 }
 0x381   : > { %v8157_v1 = vpop.f32.mrb[68].mxu1  ;;  %v8221_v12 = vpop.f32.mrb[68].mxu0 }
 0x382   : > { %v8158_v8 = vpop.f32.mrb[69].mxu1  ;;  %v8222_v56 = vpop.f32.mrb[69].mxu0 }
 0x383   : > { %v8159_v38 = vadd.f32 %v8158_v8, %v8157_v1  ;;  %v8223_v63 = vadd.f32 %v8222_v56, %v8221_v12  ;;  %v8160_v50 = vpop.f32.mrb[70].mxu1  ;;  %v8224_v44 = vpop.f32.mrb[70].mxu0 }
 0x384   : > { %v8161_v45 = vpop.f32.mrb[71].mxu1  ;;  %v8225_v14 = vpop.f32.mrb[71].mxu0 }
 0x385   : > { %v11372_v42 = vadd.f32 %v8159_v38, %v11276_v22  ;;  %v11375_v41 = vadd.f32 %v8223_v63, %v11279_v53  ;;  %v8162_v60 = vadd.f32 %v8161_v45, %v8160_v50  ;;  %v8226_v13 = vadd.f32 %v8225_v14, %v8224_v44 }
 0x387   : > { %v11378_v28 = vadd.f32 %v8162_v60, %v11282_v49  ;;  %v11381_v3 = vadd.f32 %v8226_v13, %v11285_v48 }
 0x389   : > { %v8163_v26 = vpop.f32.mrb[72].mxu1  ;;  %v8227_v52 = vpop.f32.mrb[72].mxu0 }
 0x38a   : > { %v8164_v19 = vpop.f32.mrb[73].mxu1  ;;  %v8228_v15 = vpop.f32.mrb[73].mxu0 }
 0x38b   : > { %v8165_v24 = vadd.f32 %v8164_v19, %v8163_v26  ;;  %v8229_v59 = vadd.f32 %v8228_v15, %v8227_v52  ;;  %v8166_v30 = vpop.f32.mrb[74].mxu1  ;;  %v8230_v22 = vpop.f32.mrb[74].mxu0 }
 0x38c   : > { %v8167_v16 = vpop.f32.mrb[75].mxu1  ;;  %v8231_v11 = vpop.f32.mrb[75].mxu0 }
 0x38d   : > { %v11384_v53 = vadd.f32 %v8165_v24, %v11288_v51  ;;  %v11387_v4 = vadd.f32 %v8229_v59, %v11291_v37  ;;  %v8168_v49 = vadd.f32 %v8167_v16, %v8166_v30  ;;  %v8232_v36 = vadd.f32 %v8231_v11, %v8230_v22 }
 0x38f   : > { %v11390_v48 = vadd.f32 %v8168_v49, %v11294_v27  ;;  %v11393_v33 = vadd.f32 %v8232_v36, %v11297_v46 }
 0x391   : > { %v8169_v61 = vpop.f32.mrb[76].mxu1  ;;  %v8233_v23 = vpop.f32.mrb[76].mxu0 }
 0x392   : > { %v8170_v40 = vpop.f32.mrb[77].mxu1  ;;  %v8234_v34 = vpop.f32.mrb[77].mxu0 }
 0x393   : > { %v8171_v1 = vadd.f32 %v8170_v40, %v8169_v61  ;;  %v8235_v12 = vadd.f32 %v8234_v34, %v8233_v23  ;;  %v8172_v8 = vpop.f32.mrb[78].mxu1  ;;  %v8236_v51 = vpop.f32.mrb[78].mxu0 }
 0x394   : > { %v8173_v56 = vpop.f32.mrb[79].mxu1  ;;  %v8237_v38 = vpop.f32.mrb[79].mxu0 }
 0x395   : > { %v11396_v37 = vadd.f32 %v8171_v1, %v11300_v62  ;;  %v11399_v63 = vadd.f32 %v8235_v12, %v11303_v21  ;;  %v8174_v27 = vadd.f32 %v8173_v56, %v8172_v8  ;;  %v8238_v50 = vadd.f32 %v8237_v38, %v8236_v51 }
 0x397   : > { %v11402_v46 = vadd.f32 %v8174_v27, %v11306_v35  ;;  %v11405_v44 = vadd.f32 %v8238_v50, %v11309_v2 }
 0x399   : > { %v8239_v45 = vpop.f32.mrb[80].mxu0  ;;  %v8303_v14 = vpop.f32.mrb[80].mxu1 }
 0x39a   : > { %v8240_v60 = vpop.f32.mrb[81].mxu0  ;;  %v8304_v13 = vpop.f32.mrb[81].mxu1 }
 0x39b   : > { %v8241_v26 = vadd.f32 %v8240_v60, %v8239_v45  ;;  %v8305_v52 = vadd.f32 %v8304_v13, %v8303_v14  ;;  %v8242_v19 = vpop.f32.mrb[82].mxu0  ;;  %v8306_v62 = vpop.f32.mrb[82].mxu1 }
 0x39c   : > { %v8243_v15 = vpop.f32.mrb[83].mxu0  ;;  %v8307_v24 = vpop.f32.mrb[83].mxu1 }
 0x39d   : > { %v11408_v21 = vadd.f32 %v8241_v26, %v11312_v43  ;;  %v8244_v59 = vadd.f32 %v8243_v15, %v8242_v19  ;;  %v8308_v30 = vadd.f32 %v8307_v24, %v8306_v62  ;;  %v11411_v35 = vadd.f32 %v8305_v52, %v11315_v58 }
 0x39f   : > { %v11414_v2 = vadd.f32 %v8244_v59, %v11318_v31  ;;  %v11417_v22 = vadd.f32 %v8308_v30, %v11321_v9 }
 0x3a1   : > { %v8245_v16 = vpop.f32.mrb[84].mxu0  ;;  %v8309_v11 = vpop.f32.mrb[84].mxu1 }
 0x3a2   : > { %v8246_v49 = vpop.f32.mrb[85].mxu0  ;;  %v8310_v36 = vpop.f32.mrb[85].mxu1 }
 0x3a3   : > { %v8247_v61 = vadd.f32 %v8246_v49, %v8245_v16  ;;  %v8311_v23 = vadd.f32 %v8310_v36, %v8309_v11  ;;  %v8248_v40 = vpop.f32.mrb[86].mxu0  ;;  %v8312_v43 = vpop.f32.mrb[86].mxu1 }
 0x3a4   : > { %v8249_v34 = vpop.f32.mrb[87].mxu0  ;;  %v8313_v1 = vpop.f32.mrb[87].mxu1 }
 0x3a5   : > { %v11420_v12 = vadd.f32 %v8247_v61, %v11324_v55  ;;  %v8250_v58 = vadd.f32 %v8249_v34, %v8248_v40  ;;  %v8314_v8 = vadd.f32 %v8313_v1, %v8312_v43  ;;  %v11423_v31 = vadd.f32 %v8311_v23, %v11327_v32 }
 0x3a7   : > { %v11426_v9 = vadd.f32 %v8250_v58, %v11330_v17  ;;  %v11429_v51 = vadd.f32 %v8314_v8, %v11333_v39 }
 0x3a9   : > { %v8251_v56 = vpop.f32.mrb[88].mxu0  ;;  %v8315_v38 = vpop.f32.mrb[88].mxu1 }
 0x3aa   : > { %v8252_v27 = vpop.f32.mrb[89].mxu0  ;;  %v8316_v50 = vpop.f32.mrb[89].mxu1 }
 0x3ab   : > { %v8253_v45 = vadd.f32 %v8252_v27, %v8251_v56  ;;  %v8317_v14 = vadd.f32 %v8316_v50, %v8315_v38  ;;  %v8254_v60 = vpop.f32.mrb[90].mxu0  ;;  %v8318_v55 = vpop.f32.mrb[90].mxu1 }
 0x3ac   : > { %v8255_v13 = vpop.f32.mrb[91].mxu0  ;;  %v8319_v26 = vpop.f32.mrb[91].mxu1 }
 0x3ad   : > { %v11432_v52 = vadd.f32 %v8253_v45, %v11336_v0  ;;  %v8256_v32 = vadd.f32 %v8255_v13, %v8254_v60  ;;  %v8320_v19 = vadd.f32 %v8319_v26, %v8318_v55  ;;  %v11435_v17 = vadd.f32 %v8317_v14, %v11339_v25 }
 0x3af   : > { %v11438_v39 = vadd.f32 %v8256_v32, %v11342_v54  ;;  %v11441_v62 = vadd.f32 %v8320_v19, %v11345_v6 }
 0x3b1   : > { %v8257_v15 = vpop.f32.mrb[92].mxu0  ;;  %v8321_v24 = vpop.f32.mrb[92].mxu1 }
 0x3b2   : > { %v8258_v59 = vpop.f32.mrb[93].mxu0  ;;  %v8322_v30 = vpop.f32.mrb[93].mxu1 }
 0x3b3   : > { %v8259_v16 = vadd.f32 %v8258_v59, %v8257_v15  ;;  %v8323_v11 = vadd.f32 %v8322_v30, %v8321_v24  ;;  %v8260_v49 = vpop.f32.mrb[94].mxu0  ;;  %v8324_v0 = vpop.f32.mrb[94].mxu1 }
 0x3b4   : > { %v8261_v36 = vpop.f32.mrb[95].mxu0  ;;  %v8325_v61 = vpop.f32.mrb[95].mxu1 }
 0x3b5   : > { %v11444_v23 = vadd.f32 %v8259_v16, %v11348_v7  ;;  %v8262_v25 = vadd.f32 %v8261_v36, %v8260_v49  ;;  %v8326_v40 = vadd.f32 %v8325_v61, %v8324_v0  ;;  %v11447_v54 = vadd.f32 %v8323_v11, %v11351_v47 }
 0x3b7   : > { %v11450_v6 = vadd.f32 %v8262_v25, %v11354_v20  ;;  %v11453_v43 = vadd.f32 %v8326_v40, %v11357_v57 }
 0x3b9   : > { %v8263_v34 = vpop.f32.mrb[96].mxu0  ;;  %v8327_v1 = vpop.f32.mrb[96].mxu1 }
 0x3ba   : > { %v8264_v58 = vpop.f32.mrb[97].mxu0  ;;  %v8328_v8 = vpop.f32.mrb[97].mxu1 }
 0x3bb   : > { %v8265_v56 = vadd.f32 %v8264_v58, %v8263_v34  ;;  %v8329_v38 = vadd.f32 %v8328_v8, %v8327_v1  ;;  %v8266_v27 = vpop.f32.mrb[98].mxu0  ;;  %v8330_v7 = vpop.f32.mrb[98].mxu1 }
 0x3bc   : > { %v8267_v50 = vpop.f32.mrb[99].mxu0  ;;  %v8331_v45 = vpop.f32.mrb[99].mxu1 }
 0x3bd   : > { %v11456_v14 = vadd.f32 %v8265_v56, %v11360_v29  ;;  %v8268_v47 = vadd.f32 %v8267_v50, %v8266_v27  ;;  %v8332_v60 = vadd.f32 %v8331_v45, %v8330_v7  ;;  %v11459_v20 = vadd.f32 %v8329_v38, %v11363_v10 }
 0x3bf   : > { %v11462_v57 = vadd.f32 %v8268_v47, %v11366_v18  ;;  %v11465_v55 = vadd.f32 %v8332_v60, %v11369_v5 }
 0x3c1   : > { %v8269_v13 = vpop.f32.mrb[100].mxu0  ;;  %v8333_v26 = vpop.f32.mrb[100].mxu1 }
 0x3c2   : > { %v8270_v32 = vpop.f32.mrb[101].mxu0  ;;  %v8334_v19 = vpop.f32.mrb[101].mxu1 }
 0x3c3   : > { %v8271_v15 = vadd.f32 %v8270_v32, %v8269_v13  ;;  %v8335_v24 = vadd.f32 %v8334_v19, %v8333_v26  ;;  %v8272_v59 = vpop.f32.mrb[102].mxu0  ;;  %v8336_v29 = vpop.f32.mrb[102].mxu1 }
 0x3c4   : > { %v8273_v30 = vpop.f32.mrb[103].mxu0  ;;  %v8337_v16 = vpop.f32.mrb[103].mxu1 }
 0x3c5   : > { %v11468_v11 = vadd.f32 %v8271_v15, %v11372_v42  ;;  %v8274_v10 = vadd.f32 %v8273_v30, %v8272_v59  ;;  %v8338_v49 = vadd.f32 %v8337_v16, %v8336_v29  ;;  %v11471_v18 = vadd.f32 %v8335_v24, %v11375_v41 }
 0x3c7   : > { %v11474_v5 = vadd.f32 %v8274_v10, %v11378_v28  ;;  %v11477_v0 = vadd.f32 %v8338_v49, %v11381_v3 }
 0x3c9   : > { %v8275_v36 = vpop.f32.mrb[104].mxu0  ;;  %v8339_v61 = vpop.f32.mrb[104].mxu1 }
 0x3ca   : > { %v8276_v25 = vpop.f32.mrb[105].mxu0  ;;  %v8340_v40 = vpop.f32.mrb[105].mxu1 }
 0x3cb   : > { %v8277_v34 = vadd.f32 %v8276_v25, %v8275_v36  ;;  %v8341_v1 = vadd.f32 %v8340_v40, %v8339_v61  ;;  %v8278_v58 = vpop.f32.mrb[106].mxu0  ;;  %v8342_v42 = vpop.f32.mrb[106].mxu1 }
 0x3cc   : > { %v8279_v8 = vpop.f32.mrb[107].mxu0  ;;  %v8343_v56 = vpop.f32.mrb[107].mxu1 }
 0x3cd   : > { %v11480_v38 = vadd.f32 %v8277_v34, %v11384_v53  ;;  %v8280_v41 = vadd.f32 %v8279_v8, %v8278_v58  ;;  %v8344_v27 = vadd.f32 %v8343_v56, %v8342_v42  ;;  %v11483_v28 = vadd.f32 %v8341_v1, %v11387_v4 }
 0x3cf   : > { %v11486_v3 = vadd.f32 %v8280_v41, %v11390_v48  ;;  %v11489_v7 = vadd.f32 %v8344_v27, %v11393_v33 }
 0x3d1   : > { %v8281_v50 = vpop.f32.mrb[108].mxu0  ;;  %v8345_v45 = vpop.f32.mrb[108].mxu1 }
 0x3d2   : > { %v8282_v47 = vpop.f32.mrb[109].mxu0  ;;  %v8346_v60 = vpop.f32.mrb[109].mxu1 }
 0x3d3   : > { %v8283_v13 = vadd.f32 %v8282_v47, %v8281_v50  ;;  %v8347_v26 = vadd.f32 %v8346_v60, %v8345_v45  ;;  %v8284_v32 = vpop.f32.mrb[110].mxu0  ;;  %v8348_v53 = vpop.f32.mrb[110].mxu1 }
 0x3d4   : > { %v8285_v19 = vpop.f32.mrb[111].mxu0  ;;  %v8349_v15 = vpop.f32.mrb[111].mxu1 }
 0x3d5   : > { %v11492_v24 = vadd.f32 %v8283_v13, %v11396_v37  ;;  %v8286_v4 = vadd.f32 %v8285_v19, %v8284_v32  ;;  %v8350_v59 = vadd.f32 %v8349_v15, %v8348_v53  ;;  %v11495_v48 = vadd.f32 %v8347_v26, %v11399_v63 }
 0x3d7   : > { %v11498_v33 = vadd.f32 %v8286_v4, %v11402_v46  ;;  %v11501_v29 = vadd.f32 %v8350_v59, %v11405_v44 }
 0x3d9   : > { %v8351_v30 = vpop.f32.mrb[112].mxu1  ;;  %v8429_v16 = vpop.f32.mrb[112].mxu0 }
 0x3da   : > { %v6193_v10 = vadd.f32 %v8429_v16, %v11423_v31  ;;  %v8352_v49 = vpop.f32.mrb[113].mxu1  ;;  %v6184_v36 = vpop.f32.mrb[113].mxu0 }
 0x3db   : > { %v8353_v37 = vadd.f32 %v8352_v49, %v8351_v30  ;;  %v6185_v61 = vadd.f32 %v6184_v36, %v11411_v35  ;;  %v8354_v25 = vpop.f32.mrb[114].mxu1  ;;  %v8430_v40 = vpop.f32.mrb[114].mxu0 }
 0x3dc   : > { %9272 = vtanh.f32 %v6193_v10  ;;  %v6196_v63 = vadd.f32 %v8430_v40, %v11429_v51  ;;  %v8355_v46 = vpop.f32.mrb[115].mxu1  ;;  %v6187_v34 = vpop.f32.mrb[115].mxu0 }
 0x3dd   : > { %9274 = vtanh.f32 %v6185_v61  ;;  %v8356_v44 = vadd.f32 %v8355_v46, %v8354_v25  ;;  %v6188_v1 = vadd.f32 %v6187_v34, %v11417_v22  ;;  %v11508_v58 = vadd.f32 %v8353_v37, %v11408_v21 }
 0x3de   : > { %9276 = vtanh.f32 %v6196_v63 }
 0x3df   : > { %9278 = vtanh.f32 %v6188_v1  ;;  %v11511_v31 = vadd.f32 %v8356_v44, %v11414_v2 }
 0x3e1   : > { %v8357_v35 = vpop.f32.mrb[116].mxu1  ;;  %v8433_v42 = vpop.f32.mrb[116].mxu0 }
 0x3e2   : > { %v6209_v8 = vadd.f32 %v8433_v42, %v11447_v54  ;;  %v8358_v51 = vpop.f32.mrb[117].mxu1  ;;  %v6200_v56 = vpop.f32.mrb[117].mxu0 }
 0x3e3   : > { %v8359_v41 = vadd.f32 %v8358_v51, %v8357_v35  ;;  %v6201_v27 = vadd.f32 %v6200_v56, %v11435_v17  ;;  %v8360_v50 = vpop.f32.mrb[118].mxu1  ;;  %v8434_v22 = vpop.f32.mrb[118].mxu0 }
 0x3e4   : > { %9280 = vtanh.f32 %v6209_v8  ;;  %v6212_v21 = vadd.f32 %v8434_v22, %v11453_v43  ;;  %v8361_v2 = vpop.f32.mrb[119].mxu1  ;;  %v6203_v54 = vpop.f32.mrb[119].mxu0 }
 0x3e5   : > { %9282 = vtanh.f32 %v6201_v27  ;;  %v8362_v45 = vadd.f32 %v8361_v2, %v8360_v50  ;;  %v6204_v17 = vadd.f32 %v6203_v54, %v11441_v62  ;;  %v11524_v47 = vadd.f32 %v8359_v41, %v11420_v12 }
 0x3e6   : > { %v9273_v60 = vpop.eup %9272  ;;  %9284 = vtanh.f32 %v6212_v21 }
 0x3e7   : > { %v9275_v13 = vpop.eup %9274  ;;  %6345 = vst [vmem:[%s11519_s5 + $0x10] sm:$0xff] %v9273_v60  ;;  %9286 = vtanh.f32 %v6204_v17  ;;  %v11528_v26 = vadd.f32 %v8362_v45, %v11426_v9 }
 0x3e8   : > { %v9277_v43 = vpop.eup %9276  ;;  %6343 = vst [vmem:[%s11519_s5] sm:$0xff] %v9275_v13 }
 0x3e9   : > { %v9279_v32 = vpop.eup %9278  ;;  %6346 = vst [vmem:[%s11519_s5 + $0x18] sm:$0xff] %v9277_v43  ;;  %v8363_v53 = vpop.f32.mrb[120].mxu1 }
 0x3ea   : > { %v8437_v19 = vpop.f32.mrb[120].mxu0  ;;  %6344 = vst [vmem:[%s11519_s5 + $0x8] sm:$0xff] %v9279_v32  ;;  %v8364_v15 = vpop.f32.mrb[121].mxu1 }
 0x3eb   : > { %v6225_v62 = vadd.f32 %v8437_v19, %v11471_v18  ;;  %v6216_v12 = vpop.f32.mrb[121].mxu0  ;;  %v8365_v4 = vadd.f32 %v8364_v15, %v8363_v53  ;;  %v8366_v30 = vpop.f32.mrb[122].mxu1 }
 0x3ec   : > { %v6217_v59 = vadd.f32 %v6216_v12, %v11459_v20  ;;  %v8438_v16 = vpop.f32.mrb[122].mxu0  ;;  %v8367_v10 = vpop.f32.mrb[123].mxu1 }
 0x3ed   : > { %9288 = vtanh.f32 %v6225_v62  ;;  %v6228_v9 = vadd.f32 %v8438_v16, %v11477_v0  ;;  %v6219_v49 = vpop.f32.mrb[123].mxu0  ;;  %v8368_v36 = vadd.f32 %v8367_v10, %v8366_v30  ;;  %v11538_v37 = vadd.f32 %v8365_v4, %v11432_v52 }
 0x3ee   : > { %9290 = vtanh.f32 %v6217_v59  ;;  %v6220_v18 = vadd.f32 %v6219_v49, %v11465_v55  ;;  %v9281_v61 = vpop.eup %9280 }
 0x3ef   : > { %9292 = vtanh.f32 %v6228_v9  ;;  %v9283_v20 = vpop.eup %9282  ;;  %6349 = vst [vmem:[%s11519_s5 + $0x30] sm:$0xff] %v9281_v61  ;;  %v11542_v25 = vadd.f32 %v8368_v36, %v11438_v39 }
 0x3f0   : > { %9294 = vtanh.f32 %v6220_v18  ;;  %v9285_v0 = vpop.eup %9284  ;;  %6347 = vst [vmem:[%s11519_s5 + $0x20] sm:$0xff] %v9283_v20 }
 0x3f1   : > { %v9287_v40 = vpop.eup %9286  ;;  %6350 = vst [vmem:[%s11519_s5 + $0x38] sm:$0xff] %v9285_v0  ;;  %v8369_v63 = vpop.f32.mrb[124].mxu1 }
 0x3f2   : > { %v8441_v46 = vpop.f32.mrb[124].mxu0  ;;  %6348 = vst [vmem:[%s11519_s5 + $0x28] sm:$0xff] %v9287_v40  ;;  %v8370_v34 = vpop.f32.mrb[125].mxu1 }
 0x3f3   : > { %v6241_v55 = vadd.f32 %v8441_v46, %v11495_v48  ;;  %v6232_v52 = vpop.f32.mrb[125].mxu0  ;;  %v8371_v44 = vadd.f32 %v8370_v34, %v8369_v63  ;;  %v8372_v35 = vpop.f32.mrb[126].mxu1 }
 0x3f4   : > { %v6233_v1 = vadd.f32 %v6232_v52, %v11483_v28  ;;  %v8442_v42 = vpop.f32.mrb[126].mxu0  ;;  %v8373_v8 = vpop.f32.mrb[127].mxu1 }
 0x3f5   : > { %9296 = vtanh.f32 %v6241_v55  ;;  %v6244_v39 = vadd.f32 %v8442_v42, %v11501_v29  ;;  %v6235_v51 = vpop.f32.mrb[127].mxu0  ;;  %v8374_v56 = vadd.f32 %v8373_v8, %v8372_v35  ;;  %v6112_v41 = vadd.f32 %v8371_v44, %v11444_v23 }
 0x3f6   : > { %9298 = vtanh.f32 %v6233_v1  ;;  %v6236_v48 = vadd.f32 %v6235_v51, %v11489_v7 }
 0x3f7   : > { %v9289_v27 = vpop.eup %9288  ;;  %9300 = vtanh.f32 %v6244_v39  ;;  %v6115_v28 = vadd.f32 %v8374_v56, %v11450_v6 }
 0x3f8   : > { %v9291_v50 = vpop.eup %9290  ;;  %6353 = vst [vmem:[%s11519_s5 + $0x50] sm:$0xff] %v9289_v27  ;;  %9302 = vtanh.f32 %v6236_v48 }
 0x3f9   : > { %v9293_v22 = vpop.eup %9292  ;;  %6351 = vst [vmem:[%s11519_s5 + $0x40] sm:$0xff] %v9291_v50  ;;  %v8375_v21 = vpop.f32.mrb[128].mxu1 }
 0x3fa   : > { %v9295_v29 = vpop.eup %9294  ;;  %6354 = vst [vmem:[%s11519_s5 + $0x58] sm:$0xff] %v9293_v22  ;;  %v8445_v2 = vpop.f32.mrb[128].mxu0 }
 0x3fb   : > { %6352 = vst [vmem:[%s11519_s5 + $0x48] sm:$0xff] %v9295_v29  ;;  %v6257_v54 = vadd.f32 %v8445_v2, %v11524_v47  ;;  %v8376_v45 = vpop.f32.mrb[129].mxu1  ;;  %v6248_v7 = vpop.f32.mrb[129].mxu0 }
 0x3fc   : > { %v8377_v23 = vadd.f32 %v8376_v45, %v8375_v21  ;;  %v6249_v17 = vadd.f32 %v6248_v7, %v11508_v58  ;;  %v8378_v60 = vpop.f32.mrb[130].mxu1  ;;  %v8446_v13 = vpop.f32.mrb[130].mxu0 }
 0x3fd   : > { %9304 = vtanh.f32 %v6257_v54  ;;  %v6260_v6 = vadd.f32 %v8446_v13, %v11528_v26  ;;  %v8379_v43 = vpop.f32.mrb[131].mxu1  ;;  %v6251_v32 = vpop.f32.mrb[131].mxu0 }
 0x3fe   : > { %9306 = vtanh.f32 %v6249_v17  ;;  %v8380_v53 = vadd.f32 %v8379_v43, %v8378_v60  ;;  %v6252_v47 = vadd.f32 %v6251_v32, %v11511_v31  ;;  %v6120_v19 = vadd.f32 %v8377_v23, %v11456_v14 }
 0x3ff   : > { %v9297_v62 = vpop.eup %9296  ;;  %9308 = vtanh.f32 %v6260_v6 }
 0x400   : > { %v9299_v15 = vpop.eup %9298  ;;  %6357 = vst [vmem:[%s11519_s5 + $0x70] sm:$0xff] %v9297_v62  ;;  %9310 = vtanh.f32 %v6252_v47  ;;  %v6123_v58 = vadd.f32 %v8380_v53, %v11462_v57 }
 0x401   : > { %v9301_v12 = vpop.eup %9300  ;;  %6355 = vst [vmem:[%s11519_s5 + $0x60] sm:$0xff] %v9299_v15  ;;  %v8381_v4 = vpop.f32.mrb[132].mxu1 }
 0x402   : > { %v9303_v26 = vpop.eup %9302  ;;  %6358 = vst [vmem:[%s11519_s5 + $0x78] sm:$0xff] %v9301_v12  ;;  %v8449_v59 = vpop.f32.mrb[132].mxu0 }
 0x403   : > { %6356 = vst [vmem:[%s11519_s5 + $0x68] sm:$0xff] %v9303_v26  ;;  %v6273_v30 = vadd.f32 %v8449_v59, %v6112_v41  ;;  %v8382_v16 = vpop.f32.mrb[133].mxu1  ;;  %v6264_v9 = vpop.f32.mrb[133].mxu0 }
 0x404   : > { %v8383_v31 = vadd.f32 %v8382_v16, %v8381_v4  ;;  %v6265_v14 = vadd.f32 %v6264_v9, %v11538_v37  ;;  %v8384_v10 = vpop.f32.mrb[134].mxu1  ;;  %v8450_v49 = vpop.f32.mrb[134].mxu0 }
 0x405   : > { %9312 = vtanh.f32 %v6273_v30  ;;  %v6276_v36 = vadd.f32 %v8450_v49, %v6115_v28  ;;  %v8385_v57 = vpop.f32.mrb[135].mxu1  ;;  %v6267_v18 = vpop.f32.mrb[135].mxu0 }
 0x406   : > { %9314 = vtanh.f32 %v6265_v14  ;;  %v8386_v61 = vadd.f32 %v8385_v57, %v8384_v10  ;;  %v6268_v20 = vadd.f32 %v6267_v18, %v11542_v25  ;;  %v6128_v0 = vadd.f32 %v8383_v31, %v11468_v11 }
 0x407   : > { %v9305_v40 = vpop.eup %9304  ;;  %9316 = vtanh.f32 %v6276_v36 }
 0x408   : > { %v9307_v63 = vpop.eup %9306  ;;  %6361 = vst [vmem:[%s11519_s5 + $0x90] sm:$0xff] %v9305_v40  ;;  %9318 = vtanh.f32 %v6268_v20  ;;  %v6131_v37 = vadd.f32 %v8386_v61, %v11474_v5 }
 0x409   : > { %v9309_v46 = vpop.eup %9308  ;;  %6359 = vst [vmem:[%s11519_s5 + $0x80] sm:$0xff] %v9307_v63  ;;  %v8387_v34 = vpop.f32.mrb[136].mxu1 }
 0x40a   : > { %v9311_v55 = vpop.eup %9310  ;;  %6362 = vst [vmem:[%s11519_s5 + $0x98] sm:$0xff] %v9309_v46  ;;  %v8453_v52 = vpop.f32.mrb[136].mxu0 }
 0x40b   : > { %6360 = vst [vmem:[%s11519_s5 + $0x88] sm:$0xff] %v9311_v55  ;;  %v6289_v44 = vadd.f32 %v8453_v52, %v6128_v0  ;;  %v8388_v1 = vpop.f32.mrb[137].mxu1  ;;  %v6280_v35 = vpop.f32.mrb[137].mxu0 }
 0x40c   : > { %v8389_v25 = vadd.f32 %v8388_v1, %v8387_v34  ;;  %v6281_v11 = vadd.f32 %v6280_v35, %v6120_v19  ;;  %v8390_v42 = vpop.f32.mrb[138].mxu1  ;;  %v8454_v39 = vpop.f32.mrb[138].mxu0 }
 0x40d   : > { %9320 = vtanh.f32 %v6289_v44  ;;  %v6292_v8 = vadd.f32 %v8454_v39, %v6131_v37  ;;  %v8391_v5 = vpop.f32.mrb[139].mxu1  ;;  %v6283_v51 = vpop.f32.mrb[139].mxu0 }
 0x40e   : > { %9322 = vtanh.f32 %v6281_v11  ;;  %v8392_v56 = vadd.f32 %v8391_v5, %v8390_v42  ;;  %v6284_v48 = vadd.f32 %v6283_v51, %v6123_v58  ;;  %v6136_v41 = vadd.f32 %v8389_v25, %v11480_v38 }
 0x40f   : > { %v9313_v27 = vpop.eup %9312  ;;  %9324 = vtanh.f32 %v6292_v8 }
 0x410   : > { %v9315_v50 = vpop.eup %9314  ;;  %6365 = vst [vmem:[%s11519_s5 + $0xb0] sm:$0xff] %v9313_v27  ;;  %9326 = vtanh.f32 %v6284_v48  ;;  %v6139_v28 = vadd.f32 %v8392_v56, %v11486_v3 }
 0x411   : > { %v9317_v22 = vpop.eup %9316  ;;  %6363 = vst [vmem:[%s11519_s5 + $0xa0] sm:$0xff] %v9315_v50  ;;  %v8393_v21 = vpop.f32.mrb[140].mxu1 }
 0x412   : > { %v9319_v29 = vpop.eup %9318  ;;  %6366 = vst [vmem:[%s11519_s5 + $0xb8] sm:$0xff] %v9317_v22  ;;  %v8457_v2 = vpop.f32.mrb[140].mxu0 }
 0x413   : > { %6364 = vst [vmem:[%s11519_s5 + $0xa8] sm:$0xff] %v9319_v29  ;;  %v8394_v54 = vpop.f32.mrb[141].mxu1  ;;  %v6296_v45 = vpop.f32.mrb[141].mxu0 }
 0x414   : > { %v8395_v7 = vadd.f32 %v8394_v54, %v8393_v21  ;;  %v6297_v23 = vadd.f32 %v6296_v45, %v6136_v41  ;;  %v8396_v38 = vpop.f32.mrb[142].mxu1  ;;  %v8458_v17 = vpop.f32.mrb[142].mxu0 }
 0x415   : > { %v8397_v60 = vpop.f32.mrb[143].mxu1  ;;  %v6299_v13 = vpop.f32.mrb[143].mxu0 }
 0x416   : > { %v6144_v3 = vadd.f32 %v8395_v7, %v11492_v24  ;;  %9328 = vtanh.f32 %v6297_v23  ;;  %v8398_v6 = vadd.f32 %v8397_v60, %v8396_v38  ;;  %v6300_v43 = vadd.f32 %v6299_v13, %v6139_v28 }
 0x417   : > { %v9321_v32 = vpop.eup %9320 }
 0x418   : > { %v9323_v53 = vpop.eup %9322  ;;  %6369 = vst [vmem:[%s11519_s5 + $0xd0] sm:$0xff] %v9321_v32  ;;  %v6305_v47 = vadd.f32 %v8457_v2, %v6144_v3  ;;  %v6147_v19 = vadd.f32 %v8398_v6, %v11498_v33  ;;  %9330 = vtanh.f32 %v6300_v43 }
 0x419   : > { %v9325_v62 = vpop.eup %9324  ;;  %6367 = vst [vmem:[%s11519_s5 + $0xc0] sm:$0xff] %v9323_v53 }
 0x41a   : > { %v9327_v15 = vpop.eup %9326  ;;  %6370 = vst [vmem:[%s11519_s5 + $0xd8] sm:$0xff] %v9325_v62  ;;  %9332 = vtanh.f32 %v6305_v47  ;;  %v6308_v24 = vadd.f32 %v8458_v17, %v6147_v19 }
 0x41b   : > { %6368 = vst [vmem:[%s11519_s5 + $0xc8] sm:$0xff] %v9327_v15 }
 0x41c   : > { %9334 = vtanh.f32 %v6308_v24 }
 0x420   : > { %v9329_v58 = vpop.eup %9328 }
 0x421   : > { %6371 = vst [vmem:[%s11519_s5 + $0xe0] sm:$0xff] %v9329_v58 }
 0x422   : > { %v9331_v12 = vpop.eup %9330 }
 0x423   : > { %6372 = vst [vmem:[%s11519_s5 + $0xe8] sm:$0xff] %v9331_v12 }
 0x424   : > { %v9333_v26 = vpop.eup %9332 }
 0x425   : > { %6373 = vst [vmem:[%s11519_s5 + $0xf0] sm:$0xff] %v9333_v26 }
 0x426   : > { %v9335_v4 = vpop.eup %9334 }
 0x427   : > { %6374 = vst [vmem:[%s11519_s5 + $0xf8] sm:$0xff] %v9335_v4 }
 0x428 PF: > { %s13_s12 = sadd.s32 1, %s9343_s12  }
 0x429   : > { %p10_p4 = scmp.ge.s32.totalorder %s13_s12, 4  }
 0x42b   :  { %12 = sbr.rel (!%p10_p4) target bundleno = 1 (0x1), region = 62 }

</bundles_post_ra>
